<compile_context>
chip_gen: v5e
topology: v5e:2x2
jax: 0.10.0
libtpu: 0.0.40
codegen_flags: <defaults>
</compile_context>

<pallas_src>
import numpy as np
import jax
import jax.numpy as jnp
from jax.experimental import pallas as pl
from jax.experimental.pallas import tpu as pltpu

EPS = 1e-5
MAX_ROW_TILE = 1024          # capped so the largest (704-in/512-out) kernel
                             # stays well under v7x's 64 MiB VMEM
VMEM_LIMIT = 48 * 1024 * 1024


def _row_tile(n):
    return n if n <= MAX_ROW_TILE else MAX_ROW_TILE


# ---------------------------------------------------------------------------
# Pointwise conv (1x1x1) with split-cin segments + folded BN + ReLU
# ---------------------------------------------------------------------------

def pointwise_conv_bn_relu(xs, ws, scale, shift, *, out_dtype=jnp.bfloat16):
    # xs: list of (N, Ci) bf16, ws: list of (Ci, Cout) bf16, scale/shift (1, Cout) f32
    N = xs[0].shape[0]
    cout = ws[0].shape[1]
    nseg = len(xs)
    tn = _row_tile(N)
    grid = (pl.cdiv(N, tn),)

    def kernel(*refs):
        x_refs = refs[:nseg]
        w_refs = refs[nseg:2 * nseg]
        scale_ref = refs[2 * nseg]
        shift_ref = refs[2 * nseg + 1]
        o_ref = refs[2 * nseg + 2]
        y = jnp.dot(x_refs[0][...], w_refs[0][...],
                    preferred_element_type=jnp.float32)
        for i in range(1, nseg):
            y = y + jnp.dot(x_refs[i][...], w_refs[i][...],
                            preferred_element_type=jnp.float32)
        y = y * scale_ref[...] + shift_ref[...]
        o_ref[...] = jnp.maximum(y, 0.0).astype(o_ref.dtype)

    in_specs = [pl.BlockSpec((tn, x.shape[1]), lambda i: (i, 0)) for x in xs]
    in_specs += [pl.BlockSpec(w.shape, lambda i: (0, 0)) for w in ws]
    in_specs += [pl.BlockSpec((1, cout), lambda i: (0, 0)),
                 pl.BlockSpec((1, cout), lambda i: (0, 0))]

    return pl.pallas_call(
        kernel,
        out_shape=jax.ShapeDtypeStruct((N, cout), out_dtype),
        grid_spec=pltpu.PrefetchScalarGridSpec(
            num_scalar_prefetch=0,
            grid=grid,
            in_specs=in_specs,
            out_specs=pl.BlockSpec((tn, cout), lambda i: (i, 0)),
        ),
        compiler_params=pltpu.CompilerParams(
            dimension_semantics=("parallel",),
            vmem_limit_bytes=VMEM_LIMIT),
    )(*xs, *ws, scale, shift)


# ---------------------------------------------------------------------------
# Temporal conv (3,1,1) with dilation d, "same" padding, via shifted index maps
# ---------------------------------------------------------------------------

def temporal_conv_bn_relu(x, w_list, scale, shift, dilation, *,
                          out_dtype=jnp.bfloat16):
    # x: (B, T, S, Cin) bf16; w_list: [w_m, w_0, w_p] each (Cin, Cout) bf16
    B, T, S, cin = x.shape
    cout = w_list[0].shape[1]
    d = dilation

    def im_c(b, t):
        return (b, t, 0, 0)

    def im_m(b, t):
        return (b, jnp.maximum(t - d, 0), 0, 0)

    def im_p(b, t):
        return (b, jnp.minimum(t + d, T - 1), 0, 0)

    def kernel(xm_ref, x0_ref, xp_ref, wm_ref, w0_ref, wp_ref,
               scale_ref, shift_ref, o_ref):
        t = pl.program_id(1)
        y = jnp.dot(x0_ref[...], w0_ref[...], preferred_element_type=jnp.float32)
        ym = jnp.dot(xm_ref[...], wm_ref[...], preferred_element_type=jnp.float32)
        yp = jnp.dot(xp_ref[...], wp_ref[...], preferred_element_type=jnp.float32)
        # zero the boundary taps (index_maps clamp into range; mask makes them 0)
        mm = jnp.where(t >= d, 1.0, 0.0)
        mp = jnp.where(t + d <= T - 1, 1.0, 0.0)
        y = y + mm * ym + mp * yp
        y = y * scale_ref[...] + shift_ref[...]
        o_ref[...] = jnp.maximum(y, 0.0).astype(o_ref.dtype)

    blk = (None, None, S, cin)
    return pl.pallas_call(
        kernel,
        out_shape=jax.ShapeDtypeStruct((B, T, S, cout), out_dtype),
        grid_spec=pltpu.PrefetchScalarGridSpec(
            num_scalar_prefetch=0,
            grid=(B, T),
            in_specs=[
                pl.BlockSpec(blk, im_m),
                pl.BlockSpec(blk, im_c),
                pl.BlockSpec(blk, im_p),
                pl.BlockSpec((cin, cout), lambda b, t: (0, 0)),
                pl.BlockSpec((cin, cout), lambda b, t: (0, 0)),
                pl.BlockSpec((cin, cout), lambda b, t: (0, 0)),
                pl.BlockSpec((1, cout), lambda b, t: (0, 0)),
                pl.BlockSpec((1, cout), lambda b, t: (0, 0)),
            ],
            out_specs=pl.BlockSpec((None, None, S, cout),
                                   lambda b, t: (b, t, 0, 0)),
        ),
        compiler_params=pltpu.CompilerParams(
            dimension_semantics=("parallel", "parallel"),
            vmem_limit_bytes=VMEM_LIMIT),
    )(x, x, x, w_list[0], w_list[1], w_list[2], scale, shift)


# ---------------------------------------------------------------------------
# conv4_1 (704->512 pointwise, split segments) fused with the global-avg-pool
# partial sums of the attention block
# ---------------------------------------------------------------------------

def conv4_pool(segs, ws, scale, shift, *, out_dtype=jnp.bfloat16):
    # segs: list of (B, TS, Ci) bf16; ws: list of (Ci, 512) bf16
    B, TS, _ = segs[0].shape
    cout = ws[0].shape[1]
    nseg = len(segs)
    tr = _row_tile(TS)
    R = pl.cdiv(TS, tr)

    def kernel(*refs):
        x_refs = refs[:nseg]
        w_refs = refs[nseg:2 * nseg]
        scale_ref = refs[2 * nseg]
        shift_ref = refs[2 * nseg + 1]
        z_ref = refs[2 * nseg + 2]
        pool_ref = refs[2 * nseg + 3]
        r = pl.program_id(1)

        y = jnp.dot(x_refs[0][...], w_refs[0][...],
                    preferred_element_type=jnp.float32)
        for i in range(1, nseg):
            y = y + jnp.dot(x_refs[i][...], w_refs[i][...],
                            preferred_element_type=jnp.float32)
        y = jnp.maximum(y * scale_ref[...] + shift_ref[...], 0.0)   # (tr, 512) f32
        z_ref[...] = y.astype(z_ref.dtype)

        # Partial sum for the global average pool; mask rows past TS (tail tile).
        row = r * tr + jax.lax.broadcasted_iota(jnp.int32, (tr, 1), 0)
        partial = jnp.sum(jnp.where(row < TS, y, 0.0), axis=0, keepdims=True)

        @pl.when(r == 0)
        def _():
            pool_ref[...] = jnp.zeros_like(pool_ref)

        pool_ref[...] += partial

    in_specs = [pl.BlockSpec((None, tr, s.shape[2]), lambda b, r: (b, r, 0))
                for s in segs]
    in_specs += [pl.BlockSpec(w.shape, lambda b, r: (0, 0)) for w in ws]
    in_specs += [pl.BlockSpec((1, cout), lambda b, r: (0, 0)),
                 pl.BlockSpec((1, cout), lambda b, r: (0, 0))]

    z4, pooled = pl.pallas_call(
        kernel,
        out_shape=(jax.ShapeDtypeStruct((B, TS, cout), out_dtype),
                   jax.ShapeDtypeStruct((B, 1, cout), jnp.float32)),
        grid_spec=pltpu.PrefetchScalarGridSpec(
            num_scalar_prefetch=0,
            grid=(B, R),
            in_specs=in_specs,
            out_specs=[pl.BlockSpec((None, tr, cout), lambda b, r: (b, r, 0)),
                       pl.BlockSpec((None, 1, cout), lambda b, r: (b, 0, 0))],
        ),
        compiler_params=pltpu.CompilerParams(
            dimension_semantics=("parallel", "arbitrary"),
            vmem_limit_bytes=VMEM_LIMIT),
    )(*segs, *ws, scale, shift)
    return z4, pooled


# ---------------------------------------------------------------------------
# Attention finalize (FC->ReLU->FC->Sigmoid) fused with the channel scaling
# ---------------------------------------------------------------------------

def attention_scale(z4, pooled, w1, b1, w2, b2, *, out_dtype=jnp.float32):
    # z4: (B, TS, 512) bf16; pooled: (B, 1, 512) f32 (sums, not yet divided)
    B, TS, C = z4.shape
    hid = w1.shape[1]
    tr = _row_tile(TS)
    R = pl.cdiv(TS, tr)
    inv_ts = 1.0 / float(TS)

    def kernel(pool_ref, w1_ref, b1_ref, w2_ref, b2_ref, z_ref, o_ref, a_ref):
        r = pl.program_id(1)

        @pl.when(r == 0)
        def _():
            p = pool_ref[...] * inv_ts                                   # (1, C)
            h = jnp.dot(p, w1_ref[...], preferred_element_type=jnp.float32)
            h = jnp.maximum(h + b1_ref[...], 0.0)
            g = jnp.dot(h, w2_ref[...], preferred_element_type=jnp.float32)
            g = g + b2_ref[...]
            a_ref[...] = 1.0 / (1.0 + jnp.exp(-g))                       # sigmoid

        o_ref[...] = (z_ref[...].astype(jnp.float32) * a_ref[...]).astype(o_ref.dtype)

    return pl.pallas_call(
        kernel,
        out_shape=jax.ShapeDtypeStruct((B, TS, C), out_dtype),
        grid_spec=pltpu.PrefetchScalarGridSpec(
            num_scalar_prefetch=0,
            grid=(B, R),
            in_specs=[
                pl.BlockSpec((None, 1, C), lambda b, r: (b, 0, 0)),
                pl.BlockSpec((C, hid), lambda b, r: (0, 0)),
                pl.BlockSpec((1, hid), lambda b, r: (0, 0)),
                pl.BlockSpec((hid, C), lambda b, r: (0, 0)),
                pl.BlockSpec((1, C), lambda b, r: (0, 0)),
                pl.BlockSpec((None, tr, C), lambda b, r: (b, r, 0)),
            ],
            out_specs=pl.BlockSpec((None, tr, C), lambda b, r: (b, r, 0)),
            scratch_shapes=[pltpu.VMEM((1, C), jnp.float32)],
        ),
        compiler_params=pltpu.CompilerParams(
            dimension_semantics=("parallel", "arbitrary"),
            vmem_limit_bytes=VMEM_LIMIT),
    )(pooled, w1, b1, w2, b2, z4)


# ---------------------------------------------------------------------------
# Parameters (deterministic, synthetic)
# ---------------------------------------------------------------------------

def init_params(key):
    keys = iter(jax.random.split(key, 64))

    def bn_fold(bias):
        gamma = jnp.ones_like(bias)
        beta = jnp.zeros_like(bias)
        mean = jnp.zeros_like(bias)
        var = jnp.ones_like(bias)
        scale = gamma / jnp.sqrt(var + EPS)
        shift = beta + (bias - mean) * scale
        return scale[None, :], shift[None, :]

    def pw_params(cins, cout):
        ws = [(jax.random.normal(next(keys), (ci, cout), jnp.float32) * 0.02
               ).astype(jnp.bfloat16) for ci in cins]
        bias = jax.random.normal(next(keys), (cout,), jnp.float32) * 0.01
        scale, shift = bn_fold(bias)
        return {"w": ws, "scale": scale, "shift": shift}

    def tc_params(cin, cout):
        w = (jax.random.normal(next(keys), (3, cin, cout), jnp.float32) * 0.02
             ).astype(jnp.bfloat16)
        bias = jax.random.normal(next(keys), (cout,), jnp.float32) * 0.01
        scale, shift = bn_fold(bias)
        return {"w": [w[0], w[1], w[2]], "scale": scale, "shift": shift}

    p = {
        "conv1_1": pw_params([512], 256),
        "conv1_2": tc_params(256, 64),
        "conv2_1": pw_params([512, 64], 256),
        "conv2_2": tc_params(256, 64),
        "conv3_1": pw_params([512, 64, 64], 256),
        "conv3_2": tc_params(256, 64),
        "conv4_1": pw_params([512, 64, 64, 64], 512),
    }
    # TemporalChannelAwareBlock FC: normal(std=0.001) weights, zero bias
    p["att_w1"] = jax.random.normal(next(keys), (512, 128), jnp.float32) * 0.001
    p["att_b1"] = jnp.zeros((1, 128), jnp.float32)
    p["att_w2"] = jax.random.normal(next(keys), (128, 512), jnp.float32) * 0.001
    p["att_b2"] = jnp.zeros((1, 512), jnp.float32)
    return p


# ---------------------------------------------------------------------------
# DenseTemporalBlock forward
# ---------------------------------------------------------------------------

def dense_temporal_block(x_ncthw, params):
    B, C, T, H, W = x_ncthw.shape
    S = H * W
    N = B * T * S
    xl = jnp.transpose(x_ncthw.astype(jnp.bfloat16),
                       (0, 2, 3, 4, 1)).reshape(B, T, S, C)

    def pw(name, segs):
        p = params[name]
        flat = [s.reshape(N, s.shape[-1]) for s in segs]
        out = pointwise_conv_bn_relu(flat, p["w"], p["scale"], p["shift"])
        return out.reshape(B, T, S, -1)

    def tc(name, inp, d):
        p = params[name]
        return temporal_conv_bn_relu(inp, p["w"], p["scale"], p["shift"], d)

    z1 = tc("conv1_2", pw("conv1_1", [xl]), 1)                 # dilation 1
    z2 = tc("conv2_2", pw("conv2_1", [xl, z1]), 2)             # dilation 2
    z3 = tc("conv3_2", pw("conv3_1", [xl, z1, z2]), 3)         # dilation 3

    TS = T * S
    segs4 = [a.reshape(B, TS, a.shape[-1]) for a in (xl, z1, z2, z3)]
    p4 = params["conv4_1"]
    z4, pooled = conv4_pool(segs4, p4["w"], p4["scale"], p4["shift"])

    out = attention_scale(z4, pooled, params["att_w1"], params["att_b1"],
                          params["att_w2"], params["att_b2"])  # (B, TS, 512) f32
    return out.reshape(B, T, H, W, 512).transpose(0, 4, 1, 2, 3)   # NCTHW


# ---------------------------------------------------------------------------
# Pure-JAX reference (same math & dtype policy, no Pallas) for validation
# ---------------------------------------------------------------------------

def reference(x_ncthw, params):
    B, C, T, H, W = x_ncthw.shape
    S = H * W
    xl = jnp.transpose(x_ncthw.astype(jnp.bfloat16),
                       (0, 2, 3, 4, 1)).reshape(B, T, S, C)

    def mm(a, w):
        return jnp.einsum('...k,kn->...n', a, w,
                          preferred_element_type=jnp.float32)

    def pw_f32(name, segs):
        p = params[name]
        y = mm(segs[0], p["w"][0])
        for s, w in zip(segs[1:], p["w"][1:]):
            y = y + mm(s, w)
        return jnp.maximum(y * p["scale"] + p["shift"], 0.0)

    def pw(name, segs):
        return pw_f32(name, segs).astype(jnp.bfloat16)

    def tc(name, inp, d):
        p = params[name]
        xm = jnp.pad(inp, ((0, 0), (d, 0), (0, 0), (0, 0)))[:, :T]
        xp = jnp.pad(inp, ((0, 0), (0, d), (0, 0), (0, 0)))[:, d:]
        y = mm(inp, p["w"][1]) + mm(xm, p["w"][0]) + mm(xp, p["w"][2])
        return jnp.maximum(y * p["scale"] + p["shift"], 0.0).astype(jnp.bfloat16)

    z1 = tc("conv1_2", pw("conv1_1", [xl]), 1)
    z2 = tc("conv2_2", pw("conv2_1", [xl, z1]), 2)
    z3 = tc("conv3_2", pw("conv3_1", [xl, z1, z2]), 3)

    z4 = pw_f32("conv4_1", [xl, z1, z2, z3]).reshape(B, T * S, 512)   # f32

    pooled = z4.mean(axis=1)                                          # (B, 512)
    h = jnp.maximum(pooled @ params["att_w1"] + params["att_b1"], 0.0)
    a = jax.nn.sigmoid(h @ params["att_w2"] + params["att_b2"])
    out = z4.astype(jnp.bfloat16).astype(jnp.float32) * a[:, None, :]
    return out.reshape(B, T, H, W, 512).transpose(0, 4, 1, 2, 3)


if __name__ == "__main__":
    key = jax.random.PRNGKey(0)
    kx, kp = jax.random.split(key)
    # Channel count 512 is fixed by the module; small T/H/W for the test.
    B, C, T, H, W = 2, 512, 4, 4, 4
    x = jax.random.normal(kx, (B, C, T, H, W), jnp.float32)
    params = init_params(kp)

    out = jax.block_until_ready(jax.jit(dense_temporal_block)(x, params))
    ref = jax.block_until_ready(jax.jit(reference)(x, params))

    assert out.shape == (B, 512, T, H, W), out.shape
    np.testing.assert_allclose(np.asarray(out), np.asarray(ref),
                               rtol=1e-2, atol=1e-2)
    print("KERNEL_OK")
</pallas_src>

<mosaic_0001>
module attributes {stable_mosaic.version = 11 : i64} {
  func.func @kernel(%arg0: i32, %arg1: memref<128x512xbf16, #tpu.memory_space<vmem>>, %arg2: memref<512x256xbf16, #tpu.memory_space<vmem>>, %arg3: memref<1x256xf32, #tpu.memory_space<vmem>>, %arg4: memref<1x256xf32, #tpu.memory_space<vmem>>, %arg5: memref<128x256xbf16, #tpu.memory_space<vmem>>) attributes {dimension_semantics = [#tpu.dimension_semantics<parallel>], iteration_bounds = array<i64: 1>, scalar_prefetch = 0 : i64, scratch_operands = 0 : i64, tpu.core_type = #tpu.core_type<tc>, window_params = [{transform_indices = @transform_0, window_bounds = array<i64: 128, 512>}, {pipeline_mode = #tpu.pipeline_mode<synchronous>, transform_indices = @transform_1, window_bounds = array<i64: 512, 256>}, {pipeline_mode = #tpu.pipeline_mode<synchronous>, transform_indices = @transform_2, window_bounds = array<i64: 1, 256>}, {pipeline_mode = #tpu.pipeline_mode<synchronous>, transform_indices = @transform_3, window_bounds = array<i64: 1, 256>}, {transform_indices = @transform_4, window_bounds = array<i64: 128, 256>}]} {
    %c0 = arith.constant 0 : index
    %c0_0 = arith.constant 0 : index
    %0 = vector.load %arg1[%c0, %c0_0] : memref<128x512xbf16, #tpu.memory_space<vmem>>, vector<128x512xbf16>
    %c0_1 = arith.constant 0 : index
    %c0_2 = arith.constant 0 : index
    %1 = vector.load %arg2[%c0_1, %c0_2] : memref<512x256xbf16, #tpu.memory_space<vmem>>, vector<512x256xbf16>
    %cst = arith.constant dense<0.000000e+00> : vector<128x256xf32>
    %2 = tpu.matmul %0, %1, %cst {dimension_numbers = #tpu.dot_dimension_numbers<[1], [0], [0], [1], [0, 0, 1, 1], [], []>} : vector<128x512xbf16>, vector<512x256xbf16>, vector<128x256xf32> -> vector<128x256xf32>
    %c0_3 = arith.constant 0 : index
    %c0_4 = arith.constant 0 : index
    %3 = vector.load %arg3[%c0_3, %c0_4] : memref<1x256xf32, #tpu.memory_space<vmem>>, vector<1x256xf32>
    %4 = vector.broadcast %3 : vector<1x256xf32> to vector<128x256xf32>
    %5 = arith.mulf %2, %4 : vector<128x256xf32>
    %c0_5 = arith.constant 0 : index
    %c0_6 = arith.constant 0 : index
    %6 = vector.load %arg4[%c0_5, %c0_6] : memref<1x256xf32, #tpu.memory_space<vmem>>, vector<1x256xf32>
    %7 = vector.broadcast %6 : vector<1x256xf32> to vector<128x256xf32>
    %8 = arith.addf %5, %7 : vector<128x256xf32>
    %cst_7 = arith.constant 0.000000e+00 : f32
    %9 = vector.broadcast %cst_7 : f32 to vector<128x256xf32>
    %10 = arith.maximumf %8, %9 : vector<128x256xf32>
    %11 = arith.truncf %10 : vector<128x256xf32> to vector<128x256xbf16>
    %c0_8 = arith.constant 0 : index
    %c0_9 = arith.constant 0 : index
    %12 = vector.load %arg5[%c0_8, %c0_9] : memref<128x256xbf16, #tpu.memory_space<vmem>>, vector<128x256xbf16>
    tpu.vector_store %arg5[%c0_8, %c0_9], %11 {strides = array<i32>} : memref<128x256xbf16, #tpu.memory_space<vmem>>, vector<128x256xbf16>,
    return
  }
  func.func @transform_0(%arg0: i32) -> (i32, i32) {
    %c0_i32 = arith.constant 0 : i32
    %c0_i32_0 = arith.constant 0 : i32
    return %arg0, %c0_i32 : i32, i32
  }
  func.func @transform_1(%arg0: i32) -> (i32, i32) {
    %c0_i32 = arith.constant 0 : i32
    %c0_i32_0 = arith.constant 0 : i32
    %c0_i32_1 = arith.constant 0 : i32
    return %c0_i32, %c0_i32_0 : i32, i32
  }
  func.func @transform_2(%arg0: i32) -> (i32, i32) {
    %c0_i32 = arith.constant 0 : i32
    %c0_i32_0 = arith.constant 0 : i32
    %c0_i32_1 = arith.constant 0 : i32
    return %c0_i32, %c0_i32_0 : i32, i32
  }
  func.func @transform_3(%arg0: i32) -> (i32, i32) {
    %c0_i32 = arith.constant 0 : i32
    %c0_i32_0 = arith.constant 0 : i32
    %c0_i32_1 = arith.constant 0 : i32
    return %c0_i32, %c0_i32_0 : i32, i32
  }
  func.func @transform_4(%arg0: i32) -> (i32, i32) {
    %c0_i32 = arith.constant 0 : i32
    %c0_i32_0 = arith.constant 0 : i32
    return %arg0, %c0_i32 : i32, i32
  }
}

module attributes {stable_mosaic.version = 11 : i64} {
  func.func @kernel(%arg0: i32, %arg1: i32, %arg2: memref<1x1x16x256xbf16, #tpu.memory_space<vmem>>, %arg3: memref<1x1x16x256xbf16, #tpu.memory_space<vmem>>, %arg4: memref<1x1x16x256xbf16, #tpu.memory_space<vmem>>, %arg5: memref<256x64xbf16, #tpu.memory_space<vmem>>, %arg6: memref<256x64xbf16, #tpu.memory_space<vmem>>, %arg7: memref<256x64xbf16, #tpu.memory_space<vmem>>, %arg8: memref<1x64xf32, #tpu.memory_space<vmem>>, %arg9: memref<1x64xf32, #tpu.memory_space<vmem>>, %arg10: memref<1x1x16x64xbf16, #tpu.memory_space<vmem>>) attributes {dimension_semantics = [#tpu.dimension_semantics<parallel>, #tpu.dimension_semantics<parallel>], iteration_bounds = array<i64: 2, 4>, scalar_prefetch = 0 : i64, scratch_operands = 0 : i64, tpu.core_type = #tpu.core_type<tc>, window_params = [{transform_indices = @transform_0, window_bounds = array<i64: 1, 1, 16, 256>}, {transform_indices = @transform_1, window_bounds = array<i64: 1, 1, 16, 256>}, {transform_indices = @transform_2, window_bounds = array<i64: 1, 1, 16, 256>}, {pipeline_mode = #tpu.pipeline_mode<synchronous>, transform_indices = @transform_3, window_bounds = array<i64: 256, 64>}, {pipeline_mode = #tpu.pipeline_mode<synchronous>, transform_indices = @transform_4, window_bounds = array<i64: 256, 64>}, {pipeline_mode = #tpu.pipeline_mode<synchronous>, transform_indices = @transform_5, window_bounds = array<i64: 256, 64>}, {pipeline_mode = #tpu.pipeline_mode<synchronous>, transform_indices = @transform_6, window_bounds = array<i64: 1, 64>}, {pipeline_mode = #tpu.pipeline_mode<synchronous>, transform_indices = @transform_7, window_bounds = array<i64: 1, 64>}, {transform_indices = @transform_8, window_bounds = array<i64: 1, 1, 16, 64>}]} {
    %c0 = arith.constant 0 : index
    %c0_0 = arith.constant 0 : index
    %c0_1 = arith.constant 0 : index
    %c0_2 = arith.constant 0 : index
    %0 = vector.load %arg3[%c0, %c0_0, %c0_1, %c0_2] : memref<1x1x16x256xbf16, #tpu.memory_space<vmem>>, vector<1x1x16x256xbf16>
    %1 = vector.shape_cast %0 : vector<1x1x16x256xbf16> to vector<16x256xbf16>
    %c0_3 = arith.constant 0 : index
    %c0_4 = arith.constant 0 : index
    %2 = vector.load %arg6[%c0_3, %c0_4] : memref<256x64xbf16, #tpu.memory_space<vmem>>, vector<256x64xbf16>
    %cst = arith.constant dense<0.000000e+00> : vector<16x64xf32>
    %3 = tpu.matmul %1, %2, %cst {dimension_numbers = #tpu.dot_dimension_numbers<[1], [0], [0], [1], [0, 0, 1, 1], [], []>} : vector<16x256xbf16>, vector<256x64xbf16>, vector<16x64xf32> -> vector<16x64xf32>
    %c0_5 = arith.constant 0 : index
    %c0_6 = arith.constant 0 : index
    %c0_7 = arith.constant 0 : index
    %c0_8 = arith.constant 0 : index
    %4 = vector.load %arg2[%c0_5, %c0_6, %c0_7, %c0_8] : memref<1x1x16x256xbf16, #tpu.memory_space<vmem>>, vector<1x1x16x256xbf16>
    %5 = vector.shape_cast %4 : vector<1x1x16x256xbf16> to vector<16x256xbf16>
    %c0_9 = arith.constant 0 : index
    %c0_10 = arith.constant 0 : index
    %6 = vector.load %arg5[%c0_9, %c0_10] : memref<256x64xbf16, #tpu.memory_space<vmem>>, vector<256x64xbf16>
    %cst_11 = arith.constant dense<0.000000e+00> : vector<16x64xf32>
    %7 = tpu.matmul %5, %6, %cst_11 {dimension_numbers = #tpu.dot_dimension_numbers<[1], [0], [0], [1], [0, 0, 1, 1], [], []>} : vector<16x256xbf16>, vector<256x64xbf16>, vector<16x64xf32> -> vector<16x64xf32>
    %c0_12 = arith.constant 0 : index
    %c0_13 = arith.constant 0 : index
    %c0_14 = arith.constant 0 : index
    %c0_15 = arith.constant 0 : index
    %8 = vector.load %arg4[%c0_12, %c0_13, %c0_14, %c0_15] : memref<1x1x16x256xbf16, #tpu.memory_space<vmem>>, vector<1x1x16x256xbf16>
    %9 = vector.shape_cast %8 : vector<1x1x16x256xbf16> to vector<16x256xbf16>
    %c0_16 = arith.constant 0 : index
    %c0_17 = arith.constant 0 : index
    %10 = vector.load %arg7[%c0_16, %c0_17] : memref<256x64xbf16, #tpu.memory_space<vmem>>, vector<256x64xbf16>
    %cst_18 = arith.constant dense<0.000000e+00> : vector<16x64xf32>
    %11 = tpu.matmul %9, %10, %cst_18 {dimension_numbers = #tpu.dot_dimension_numbers<[1], [0], [0], [1], [0, 0, 1, 1], [], []>} : vector<16x256xbf16>, vector<256x64xbf16>, vector<16x64xf32> -> vector<16x64xf32>
    %c1_i32 = arith.constant 1 : i32
    %12 = arith.cmpi sge, %arg1, %c1_i32 : i32
    %cst_19 = arith.constant 1.000000e+00 : f32
    %cst_20 = arith.constant 0.000000e+00 : f32
    %13 = arith.select %12, %cst_19, %cst_20 : f32
    %c1_i32_21 = arith.constant 1 : i32
    %14 = arith.addi %arg1, %c1_i32_21 : i32
    %c3_i32 = arith.constant 3 : i32
    %15 = arith.cmpi sle, %14, %c3_i32 : i32
    %cst_22 = arith.constant 1.000000e+00 : f32
    %cst_23 = arith.constant 0.000000e+00 : f32
    %16 = arith.select %15, %cst_22, %cst_23 : f32
    %17 = vector.broadcast %13 : f32 to vector<16x64xf32>
    %18 = arith.mulf %17, %7 : vector<16x64xf32>
    %19 = arith.addf %3, %18 : vector<16x64xf32>
    %20 = vector.broadcast %16 : f32 to vector<16x64xf32>
    %21 = arith.mulf %20, %11 : vector<16x64xf32>
    %22 = arith.addf %19, %21 : vector<16x64xf32>
    %c0_24 = arith.constant 0 : index
    %c0_25 = arith.constant 0 : index
    %23 = vector.load %arg8[%c0_24, %c0_25] : memref<1x64xf32, #tpu.memory_space<vmem>>, vector<1x64xf32>
    %24 = vector.broadcast %23 : vector<1x64xf32> to vector<16x64xf32>
    %25 = arith.mulf %22, %24 : vector<16x64xf32>
    %c0_26 = arith.constant 0 : index
    %c0_27 = arith.constant 0 : index
    %26 = vector.load %arg9[%c0_26, %c0_27] : memref<1x64xf32, #tpu.memory_space<vmem>>, vector<1x64xf32>
    %27 = vector.broadcast %26 : vector<1x64xf32> to vector<16x64xf32>
    %28 = arith.addf %25, %27 : vector<16x64xf32>
    %cst_28 = arith.constant 0.000000e+00 : f32
    %29 = vector.broadcast %cst_28 : f32 to vector<16x64xf32>
    %30 = arith.maximumf %28, %29 : vector<16x64xf32>
    %31 = arith.truncf %30 : vector<16x64xf32> to vector<16x64xbf16>
    %c0_29 = arith.constant 0 : index
    %c0_30 = arith.constant 0 : index
    %c0_31 = arith.constant 0 : index
    %c0_32 = arith.constant 0 : index
    %32 = vector.load %arg10[%c0_29, %c0_30, %c0_31, %c0_32] : memref<1x1x16x64xbf16, #tpu.memory_space<vmem>>, vector<1x1x16x64xbf16>
    %33 = vector.shape_cast %32 : vector<1x1x16x64xbf16> to vector<16x64xbf16>
    %34 = vector.shape_cast %31 : vector<16x64xbf16> to vector<1x1x16x64xbf16>
    tpu.vector_store %arg10[%c0_29, %c0_30, %c0_31, %c0_32], %34 {strides = array<i32>} : memref<1x1x16x64xbf16, #tpu.memory_space<vmem>>, vector<1x1x16x64xbf16>,
    return
  }
  func.func @transform_0(%arg0: i32, %arg1: i32) -> (i32, i32, i32, i32) {
    %c1_i32 = arith.constant 1 : i32
    %0 = arith.subi %arg1, %c1_i32 : i32
    %c0_i32 = arith.constant 0 : i32
    %1 = arith.maxsi %0, %c0_i32 : i32
    %c0_i32_0 = arith.constant 0 : i32
    %c0_i32_1 = arith.constant 0 : i32
    %c0_i32_2 = arith.constant 0 : i32
    return %arg0, %1, %c0_i32_0, %c0_i32_1 : i32, i32, i32, i32
  }
  func.func @transform_1(%arg0: i32, %arg1: i32) -> (i32, i32, i32, i32) {
    %c0_i32 = arith.constant 0 : i32
    %c0_i32_0 = arith.constant 0 : i32
    %c0_i32_1 = arith.constant 0 : i32
    return %arg0, %arg1, %c0_i32, %c0_i32_0 : i32, i32, i32, i32
  }
  func.func @transform_2(%arg0: i32, %arg1: i32) -> (i32, i32, i32, i32) {
    %c1_i32 = arith.constant 1 : i32
    %0 = arith.addi %arg1, %c1_i32 : i32
    %c3_i32 = arith.constant 3 : i32
    %1 = arith.minsi %0, %c3_i32 : i32
    %c0_i32 = arith.constant 0 : i32
    %c0_i32_0 = arith.constant 0 : i32
    %c0_i32_1 = arith.constant 0 : i32
    return %arg0, %1, %c0_i32, %c0_i32_0 : i32, i32, i32, i32
  }
  func.func @transform_3(%arg0: i32, %arg1: i32) -> (i32, i32) {
    %c0_i32 = arith.constant 0 : i32
    %c0_i32_0 = arith.constant 0 : i32
    %c0_i32_1 = arith.constant 0 : i32
    return %c0_i32, %c0_i32_0 : i32, i32
  }
  func.func @transform_4(%arg0: i32, %arg1: i32) -> (i32, i32) {
    %c0_i32 = arith.constant 0 : i32
    %c0_i32_0 = arith.constant 0 : i32
    %c0_i32_1 = arith.constant 0 : i32
    return %c0_i32, %c0_i32_0 : i32, i32
  }
  func.func @transform_5(%arg0: i32, %arg1: i32) -> (i32, i32) {
    %c0_i32 = arith.constant 0 : i32
    %c0_i32_0 = arith.constant 0 : i32
    %c0_i32_1 = arith.constant 0 : i32
    return %c0_i32, %c0_i32_0 : i32, i32
  }
  func.func @transform_6(%arg0: i32, %arg1: i32) -> (i32, i32) {
    %c0_i32 = arith.constant 0 : i32
    %c0_i32_0 = arith.constant 0 : i32
    %c0_i32_1 = arith.constant 0 : i32
    return %c0_i32, %c0_i32_0 : i32, i32
  }
  func.func @transform_7(%arg0: i32, %arg1: i32) -> (i32, i32) {
    %c0_i32 = arith.constant 0 : i32
    %c0_i32_0 = arith.constant 0 : i32
    %c0_i32_1 = arith.constant 0 : i32
    return %c0_i32, %c0_i32_0 : i32, i32
  }
  func.func @transform_8(%arg0: i32, %arg1: i32) -> (i32, i32, i32, i32) {
    %c0_i32 = arith.constant 0 : i32
    %c0_i32_0 = arith.constant 0 : i32
    %c0_i32_1 = arith.constant 0 : i32
    return %arg0, %arg1, %c0_i32, %c0_i32_0 : i32, i32, i32, i32
  }
}

module attributes {stable_mosaic.version = 11 : i64} {
  func.func @kernel(%arg0: i32, %arg1: memref<128x512xbf16, #tpu.memory_space<vmem>>, %arg2: memref<128x64xbf16, #tpu.memory_space<vmem>>, %arg3: memref<512x256xbf16, #tpu.memory_space<vmem>>, %arg4: memref<64x256xbf16, #tpu.memory_space<vmem>>, %arg5: memref<1x256xf32, #tpu.memory_space<vmem>>, %arg6: memref<1x256xf32, #tpu.memory_space<vmem>>, %arg7: memref<128x256xbf16, #tpu.memory_space<vmem>>) attributes {dimension_semantics = [#tpu.dimension_semantics<parallel>], iteration_bounds = array<i64: 1>, scalar_prefetch = 0 : i64, scratch_operands = 0 : i64, tpu.core_type = #tpu.core_type<tc>, window_params = [{transform_indices = @transform_0, window_bounds = array<i64: 128, 512>}, {transform_indices = @transform_1, window_bounds = array<i64: 128, 64>}, {pipeline_mode = #tpu.pipeline_mode<synchronous>, transform_indices = @transform_2, window_bounds = array<i64: 512, 256>}, {pipeline_mode = #tpu.pipeline_mode<synchronous>, transform_indices = @transform_3, window_bounds = array<i64: 64, 256>}, {pipeline_mode = #tpu.pipeline_mode<synchronous>, transform_indices = @transform_4, window_bounds = array<i64: 1, 256>}, {pipeline_mode = #tpu.pipeline_mode<synchronous>, transform_indices = @transform_5, window_bounds = array<i64: 1, 256>}, {transform_indices = @transform_6, window_bounds = array<i64: 128, 256>}]} {
    %c0 = arith.constant 0 : index
    %c0_0 = arith.constant 0 : index
    %0 = vector.load %arg1[%c0, %c0_0] : memref<128x512xbf16, #tpu.memory_space<vmem>>, vector<128x512xbf16>
    %c0_1 = arith.constant 0 : index
    %c0_2 = arith.constant 0 : index
    %1 = vector.load %arg3[%c0_1, %c0_2] : memref<512x256xbf16, #tpu.memory_space<vmem>>, vector<512x256xbf16>
    %cst = arith.constant dense<0.000000e+00> : vector<128x256xf32>
    %2 = tpu.matmul %0, %1, %cst {dimension_numbers = #tpu.dot_dimension_numbers<[1], [0], [0], [1], [0, 0, 1, 1], [], []>} : vector<128x512xbf16>, vector<512x256xbf16>, vector<128x256xf32> -> vector<128x256xf32>
    %c0_3 = arith.constant 0 : index
    %c0_4 = arith.constant 0 : index
    %3 = vector.load %arg2[%c0_3, %c0_4] : memref<128x64xbf16, #tpu.memory_space<vmem>>, vector<128x64xbf16>
    %c0_5 = arith.constant 0 : index
    %c0_6 = arith.constant 0 : index
    %4 = vector.load %arg4[%c0_5, %c0_6] : memref<64x256xbf16, #tpu.memory_space<vmem>>, vector<64x256xbf16>
    %cst_7 = arith.constant dense<0.000000e+00> : vector<128x256xf32>
    %5 = tpu.matmul %3, %4, %cst_7 {dimension_numbers = #tpu.dot_dimension_numbers<[1], [0], [0], [1], [0, 0, 1, 1], [], []>} : vector<128x64xbf16>, vector<64x256xbf16>, vector<128x256xf32> -> vector<128x256xf32>
    %6 = arith.addf %2, %5 : vector<128x256xf32>
    %c0_8 = arith.constant 0 : index
    %c0_9 = arith.constant 0 : index
    %7 = vector.load %arg5[%c0_8, %c0_9] : memref<1x256xf32, #tpu.memory_space<vmem>>, vector<1x256xf32>
    %8 = vector.broadcast %7 : vector<1x256xf32> to vector<128x256xf32>
    %9 = arith.mulf %6, %8 : vector<128x256xf32>
    %c0_10 = arith.constant 0 : index
    %c0_11 = arith.constant 0 : index
    %10 = vector.load %arg6[%c0_10, %c0_11] : memref<1x256xf32, #tpu.memory_space<vmem>>, vector<1x256xf32>
    %11 = vector.broadcast %10 : vector<1x256xf32> to vector<128x256xf32>
    %12 = arith.addf %9, %11 : vector<128x256xf32>
    %cst_12 = arith.constant 0.000000e+00 : f32
    %13 = vector.broadcast %cst_12 : f32 to vector<128x256xf32>
    %14 = arith.maximumf %12, %13 : vector<128x256xf32>
    %15 = arith.truncf %14 : vector<128x256xf32> to vector<128x256xbf16>
    %c0_13 = arith.constant 0 : index
    %c0_14 = arith.constant 0 : index
    %16 = vector.load %arg7[%c0_13, %c0_14] : memref<128x256xbf16, #tpu.memory_space<vmem>>, vector<128x256xbf16>
    tpu.vector_store %arg7[%c0_13, %c0_14], %15 {strides = array<i32>} : memref<128x256xbf16, #tpu.memory_space<vmem>>, vector<128x256xbf16>,
    return
  }
  func.func @transform_0(%arg0: i32) -> (i32, i32) {
    %c0_i32 = arith.constant 0 : i32
    %c0_i32_0 = arith.constant 0 : i32
    return %arg0, %c0_i32 : i32, i32
  }
  func.func @transform_1(%arg0: i32) -> (i32, i32) {
    %c0_i32 = arith.constant 0 : i32
    %c0_i32_0 = arith.constant 0 : i32
    return %arg0, %c0_i32 : i32, i32
  }
  func.func @transform_2(%arg0: i32) -> (i32, i32) {
    %c0_i32 = arith.constant 0 : i32
    %c0_i32_0 = arith.constant 0 : i32
    %c0_i32_1 = arith.constant 0 : i32
    return %c0_i32, %c0_i32_0 : i32, i32
  }
  func.func @transform_3(%arg0: i32) -> (i32, i32) {
    %c0_i32 = arith.constant 0 : i32
    %c0_i32_0 = arith.constant 0 : i32
    %c0_i32_1 = arith.constant 0 : i32
    return %c0_i32, %c0_i32_0 : i32, i32
  }
  func.func @transform_4(%arg0: i32) -> (i32, i32) {
    %c0_i32 = arith.constant 0 : i32
    %c0_i32_0 = arith.constant 0 : i32
    %c0_i32_1 = arith.constant 0 : i32
    return %c0_i32, %c0_i32_0 : i32, i32
  }
  func.func @transform_5(%arg0: i32) -> (i32, i32) {
    %c0_i32 = arith.constant 0 : i32
    %c0_i32_0 = arith.constant 0 : i32
    %c0_i32_1 = arith.constant 0 : i32
    return %c0_i32, %c0_i32_0 : i32, i32
  }
  func.func @transform_6(%arg0: i32) -> (i32, i32) {
    %c0_i32 = arith.constant 0 : i32
    %c0_i32_0 = arith.constant 0 : i32
    return %arg0, %c0_i32 : i32, i32
  }
}

module attributes {stable_mosaic.version = 11 : i64} {
  func.func @kernel(%arg0: i32, %arg1: i32, %arg2: memref<1x1x16x256xbf16, #tpu.memory_space<vmem>>, %arg3: memref<1x1x16x256xbf16, #tpu.memory_space<vmem>>, %arg4: memref<1x1x16x256xbf16, #tpu.memory_space<vmem>>, %arg5: memref<256x64xbf16, #tpu.memory_space<vmem>>, %arg6: memref<256x64xbf16, #tpu.memory_space<vmem>>, %arg7: memref<256x64xbf16, #tpu.memory_space<vmem>>, %arg8: memref<1x64xf32, #tpu.memory_space<vmem>>, %arg9: memref<1x64xf32, #tpu.memory_space<vmem>>, %arg10: memref<1x1x16x64xbf16, #tpu.memory_space<vmem>>) attributes {dimension_semantics = [#tpu.dimension_semantics<parallel>, #tpu.dimension_semantics<parallel>], iteration_bounds = array<i64: 2, 4>, scalar_prefetch = 0 : i64, scratch_operands = 0 : i64, tpu.core_type = #tpu.core_type<tc>, window_params = [{transform_indices = @transform_0, window_bounds = array<i64: 1, 1, 16, 256>}, {transform_indices = @transform_1, window_bounds = array<i64: 1, 1, 16, 256>}, {transform_indices = @transform_2, window_bounds = array<i64: 1, 1, 16, 256>}, {pipeline_mode = #tpu.pipeline_mode<synchronous>, transform_indices = @transform_3, window_bounds = array<i64: 256, 64>}, {pipeline_mode = #tpu.pipeline_mode<synchronous>, transform_indices = @transform_4, window_bounds = array<i64: 256, 64>}, {pipeline_mode = #tpu.pipeline_mode<synchronous>, transform_indices = @transform_5, window_bounds = array<i64: 256, 64>}, {pipeline_mode = #tpu.pipeline_mode<synchronous>, transform_indices = @transform_6, window_bounds = array<i64: 1, 64>}, {pipeline_mode = #tpu.pipeline_mode<synchronous>, transform_indices = @transform_7, window_bounds = array<i64: 1, 64>}, {transform_indices = @transform_8, window_bounds = array<i64: 1, 1, 16, 64>}]} {
    %c0 = arith.constant 0 : index
    %c0_0 = arith.constant 0 : index
    %c0_1 = arith.constant 0 : index
    %c0_2 = arith.constant 0 : index
    %0 = vector.load %arg3[%c0, %c0_0, %c0_1, %c0_2] : memref<1x1x16x256xbf16, #tpu.memory_space<vmem>>, vector<1x1x16x256xbf16>
    %1 = vector.shape_cast %0 : vector<1x1x16x256xbf16> to vector<16x256xbf16>
    %c0_3 = arith.constant 0 : index
    %c0_4 = arith.constant 0 : index
    %2 = vector.load %arg6[%c0_3, %c0_4] : memref<256x64xbf16, #tpu.memory_space<vmem>>, vector<256x64xbf16>
    %cst = arith.constant dense<0.000000e+00> : vector<16x64xf32>
    %3 = tpu.matmul %1, %2, %cst {dimension_numbers = #tpu.dot_dimension_numbers<[1], [0], [0], [1], [0, 0, 1, 1], [], []>} : vector<16x256xbf16>, vector<256x64xbf16>, vector<16x64xf32> -> vector<16x64xf32>
    %c0_5 = arith.constant 0 : index
    %c0_6 = arith.constant 0 : index
    %c0_7 = arith.constant 0 : index
    %c0_8 = arith.constant 0 : index
    %4 = vector.load %arg2[%c0_5, %c0_6, %c0_7, %c0_8] : memref<1x1x16x256xbf16, #tpu.memory_space<vmem>>, vector<1x1x16x256xbf16>
    %5 = vector.shape_cast %4 : vector<1x1x16x256xbf16> to vector<16x256xbf16>
    %c0_9 = arith.constant 0 : index
    %c0_10 = arith.constant 0 : index
    %6 = vector.load %arg5[%c0_9, %c0_10] : memref<256x64xbf16, #tpu.memory_space<vmem>>, vector<256x64xbf16>
    %cst_11 = arith.constant dense<0.000000e+00> : vector<16x64xf32>
    %7 = tpu.matmul %5, %6, %cst_11 {dimension_numbers = #tpu.dot_dimension_numbers<[1], [0], [0], [1], [0, 0, 1, 1], [], []>} : vector<16x256xbf16>, vector<256x64xbf16>, vector<16x64xf32> -> vector<16x64xf32>
    %c0_12 = arith.constant 0 : index
    %c0_13 = arith.constant 0 : index
    %c0_14 = arith.constant 0 : index
    %c0_15 = arith.constant 0 : index
    %8 = vector.load %arg4[%c0_12, %c0_13, %c0_14, %c0_15] : memref<1x1x16x256xbf16, #tpu.memory_space<vmem>>, vector<1x1x16x256xbf16>
    %9 = vector.shape_cast %8 : vector<1x1x16x256xbf16> to vector<16x256xbf16>
    %c0_16 = arith.constant 0 : index
    %c0_17 = arith.constant 0 : index
    %10 = vector.load %arg7[%c0_16, %c0_17] : memref<256x64xbf16, #tpu.memory_space<vmem>>, vector<256x64xbf16>
    %cst_18 = arith.constant dense<0.000000e+00> : vector<16x64xf32>
    %11 = tpu.matmul %9, %10, %cst_18 {dimension_numbers = #tpu.dot_dimension_numbers<[1], [0], [0], [1], [0, 0, 1, 1], [], []>} : vector<16x256xbf16>, vector<256x64xbf16>, vector<16x64xf32> -> vector<16x64xf32>
    %c2_i32 = arith.constant 2 : i32
    %12 = arith.cmpi sge, %arg1, %c2_i32 : i32
    %cst_19 = arith.constant 1.000000e+00 : f32
    %cst_20 = arith.constant 0.000000e+00 : f32
    %13 = arith.select %12, %cst_19, %cst_20 : f32
    %c2_i32_21 = arith.constant 2 : i32
    %14 = arith.addi %arg1, %c2_i32_21 : i32
    %c3_i32 = arith.constant 3 : i32
    %15 = arith.cmpi sle, %14, %c3_i32 : i32
    %cst_22 = arith.constant 1.000000e+00 : f32
    %cst_23 = arith.constant 0.000000e+00 : f32
    %16 = arith.select %15, %cst_22, %cst_23 : f32
    %17 = vector.broadcast %13 : f32 to vector<16x64xf32>
    %18 = arith.mulf %17, %7 : vector<16x64xf32>
    %19 = arith.addf %3, %18 : vector<16x64xf32>
    %20 = vector.broadcast %16 : f32 to vector<16x64xf32>
    %21 = arith.mulf %20, %11 : vector<16x64xf32>
    %22 = arith.addf %19, %21 : vector<16x64xf32>
    %c0_24 = arith.constant 0 : index
    %c0_25 = arith.constant 0 : index
    %23 = vector.load %arg8[%c0_24, %c0_25] : memref<1x64xf32, #tpu.memory_space<vmem>>, vector<1x64xf32>
    %24 = vector.broadcast %23 : vector<1x64xf32> to vector<16x64xf32>
    %25 = arith.mulf %22, %24 : vector<16x64xf32>
    %c0_26 = arith.constant 0 : index
    %c0_27 = arith.constant 0 : index
    %26 = vector.load %arg9[%c0_26, %c0_27] : memref<1x64xf32, #tpu.memory_space<vmem>>, vector<1x64xf32>
    %27 = vector.broadcast %26 : vector<1x64xf32> to vector<16x64xf32>
    %28 = arith.addf %25, %27 : vector<16x64xf32>
    %cst_28 = arith.constant 0.000000e+00 : f32
    %29 = vector.broadcast %cst_28 : f32 to vector<16x64xf32>
    %30 = arith.maximumf %28, %29 : vector<16x64xf32>
    %31 = arith.truncf %30 : vector<16x64xf32> to vector<16x64xbf16>
    %c0_29 = arith.constant 0 : index
    %c0_30 = arith.constant 0 : index
    %c0_31 = arith.constant 0 : index
    %c0_32 = arith.constant 0 : index
    %32 = vector.load %arg10[%c0_29, %c0_30, %c0_31, %c0_32] : memref<1x1x16x64xbf16, #tpu.memory_space<vmem>>, vector<1x1x16x64xbf16>
    %33 = vector.shape_cast %32 : vector<1x1x16x64xbf16> to vector<16x64xbf16>
    %34 = vector.shape_cast %31 : vector<16x64xbf16> to vector<1x1x16x64xbf16>
    tpu.vector_store %arg10[%c0_29, %c0_30, %c0_31, %c0_32], %34 {strides = array<i32>} : memref<1x1x16x64xbf16, #tpu.memory_space<vmem>>, vector<1x1x16x64xbf16>,
    return
  }
  func.func @transform_0(%arg0: i32, %arg1: i32) -> (i32, i32, i32, i32) {
    %c2_i32 = arith.constant 2 : i32
    %0 = arith.subi %arg1, %c2_i32 : i32
    %c0_i32 = arith.constant 0 : i32
    %1 = arith.maxsi %0, %c0_i32 : i32
    %c0_i32_0 = arith.constant 0 : i32
    %c0_i32_1 = arith.constant 0 : i32
    %c0_i32_2 = arith.constant 0 : i32
    return %arg0, %1, %c0_i32_0, %c0_i32_1 : i32, i32, i32, i32
  }
  func.func @transform_1(%arg0: i32, %arg1: i32) -> (i32, i32, i32, i32) {
    %c0_i32 = arith.constant 0 : i32
    %c0_i32_0 = arith.constant 0 : i32
    %c0_i32_1 = arith.constant 0 : i32
    return %arg0, %arg1, %c0_i32, %c0_i32_0 : i32, i32, i32, i32
  }
  func.func @transform_2(%arg0: i32, %arg1: i32) -> (i32, i32, i32, i32) {
    %c2_i32 = arith.constant 2 : i32
    %0 = arith.addi %arg1, %c2_i32 : i32
    %c3_i32 = arith.constant 3 : i32
    %1 = arith.minsi %0, %c3_i32 : i32
    %c0_i32 = arith.constant 0 : i32
    %c0_i32_0 = arith.constant 0 : i32
    %c0_i32_1 = arith.constant 0 : i32
    return %arg0, %1, %c0_i32, %c0_i32_0 : i32, i32, i32, i32
  }
  func.func @transform_3(%arg0: i32, %arg1: i32) -> (i32, i32) {
    %c0_i32 = arith.constant 0 : i32
    %c0_i32_0 = arith.constant 0 : i32
    %c0_i32_1 = arith.constant 0 : i32
    return %c0_i32, %c0_i32_0 : i32, i32
  }
  func.func @transform_4(%arg0: i32, %arg1: i32) -> (i32, i32) {
    %c0_i32 = arith.constant 0 : i32
    %c0_i32_0 = arith.constant 0 : i32
    %c0_i32_1 = arith.constant 0 : i32
    return %c0_i32, %c0_i32_0 : i32, i32
  }
  func.func @transform_5(%arg0: i32, %arg1: i32) -> (i32, i32) {
    %c0_i32 = arith.constant 0 : i32
    %c0_i32_0 = arith.constant 0 : i32
    %c0_i32_1 = arith.constant 0 : i32
    return %c0_i32, %c0_i32_0 : i32, i32
  }
  func.func @transform_6(%arg0: i32, %arg1: i32) -> (i32, i32) {
    %c0_i32 = arith.constant 0 : i32
    %c0_i32_0 = arith.constant 0 : i32
    %c0_i32_1 = arith.constant 0 : i32
    return %c0_i32, %c0_i32_0 : i32, i32
  }
  func.func @transform_7(%arg0: i32, %arg1: i32) -> (i32, i32) {
    %c0_i32 = arith.constant 0 : i32
    %c0_i32_0 = arith.constant 0 : i32
    %c0_i32_1 = arith.constant 0 : i32
    return %c0_i32, %c0_i32_0 : i32, i32
  }
  func.func @transform_8(%arg0: i32, %arg1: i32) -> (i32, i32, i32, i32) {
    %c0_i32 = arith.constant 0 : i32
    %c0_i32_0 = arith.constant 0 : i32
    %c0_i32_1 = arith.constant 0 : i32
    return %arg0, %arg1, %c0_i32, %c0_i32_0 : i32, i32, i32, i32
  }
}

module attributes {stable_mosaic.version = 11 : i64} {
  func.func @kernel(%arg0: i32, %arg1: i32, %arg2: memref<1x1x16x256xbf16, #tpu.memory_space<vmem>>, %arg3: memref<1x1x16x256xbf16, #tpu.memory_space<vmem>>, %arg4: memref<1x1x16x256xbf16, #tpu.memory_space<vmem>>, %arg5: memref<256x64xbf16, #tpu.memory_space<vmem>>, %arg6: memref<256x64xbf16, #tpu.memory_space<vmem>>, %arg7: memref<256x64xbf16, #tpu.memory_space<vmem>>, %arg8: memref<1x64xf32, #tpu.memory_space<vmem>>, %arg9: memref<1x64xf32, #tpu.memory_space<vmem>>, %arg10: memref<1x1x16x64xbf16, #tpu.memory_space<vmem>>) attributes {dimension_semantics = [#tpu.dimension_semantics<parallel>, #tpu.dimension_semantics<parallel>], iteration_bounds = array<i64: 2, 4>, scalar_prefetch = 0 : i64, scratch_operands = 0 : i64, tpu.core_type = #tpu.core_type<tc>, window_params = [{transform_indices = @transform_0, window_bounds = array<i64: 1, 1, 16, 256>}, {transform_indices = @transform_1, window_bounds = array<i64: 1, 1, 16, 256>}, {transform_indices = @transform_2, window_bounds = array<i64: 1, 1, 16, 256>}, {pipeline_mode = #tpu.pipeline_mode<synchronous>, transform_indices = @transform_3, window_bounds = array<i64: 256, 64>}, {pipeline_mode = #tpu.pipeline_mode<synchronous>, transform_indices = @transform_4, window_bounds = array<i64: 256, 64>}, {pipeline_mode = #tpu.pipeline_mode<synchronous>, transform_indices = @transform_5, window_bounds = array<i64: 256, 64>}, {pipeline_mode = #tpu.pipeline_mode<synchronous>, transform_indices = @transform_6, window_bounds = array<i64: 1, 64>}, {pipeline_mode = #tpu.pipeline_mode<synchronous>, transform_indices = @transform_7, window_bounds = array<i64: 1, 64>}, {transform_indices = @transform_8, window_bounds = array<i64: 1, 1, 16, 64>}]} {
    %c0 = arith.constant 0 : index
    %c0_0 = arith.constant 0 : index
    %c0_1 = arith.constant 0 : index
    %c0_2 = arith.constant 0 : index
    %0 = vector.load %arg3[%c0, %c0_0, %c0_1, %c0_2] : memref<1x1x16x256xbf16, #tpu.memory_space<vmem>>, vector<1x1x16x256xbf16>
    %1 = vector.shape_cast %0 : vector<1x1x16x256xbf16> to vector<16x256xbf16>
    %c0_3 = arith.constant 0 : index
    %c0_4 = arith.constant 0 : index
    %2 = vector.load %arg6[%c0_3, %c0_4] : memref<256x64xbf16, #tpu.memory_space<vmem>>, vector<256x64xbf16>
    %cst = arith.constant dense<0.000000e+00> : vector<16x64xf32>
    %3 = tpu.matmul %1, %2, %cst {dimension_numbers = #tpu.dot_dimension_numbers<[1], [0], [0], [1], [0, 0, 1, 1], [], []>} : vector<16x256xbf16>, vector<256x64xbf16>, vector<16x64xf32> -> vector<16x64xf32>
    %c0_5 = arith.constant 0 : index
    %c0_6 = arith.constant 0 : index
    %c0_7 = arith.constant 0 : index
    %c0_8 = arith.constant 0 : index
    %4 = vector.load %arg2[%c0_5, %c0_6, %c0_7, %c0_8] : memref<1x1x16x256xbf16, #tpu.memory_space<vmem>>, vector<1x1x16x256xbf16>
    %5 = vector.shape_cast %4 : vector<1x1x16x256xbf16> to vector<16x256xbf16>
    %c0_9 = arith.constant 0 : index
    %c0_10 = arith.constant 0 : index
    %6 = vector.load %arg5[%c0_9, %c0_10] : memref<256x64xbf16, #tpu.memory_space<vmem>>, vector<256x64xbf16>
    %cst_11 = arith.constant dense<0.000000e+00> : vector<16x64xf32>
    %7 = tpu.matmul %5, %6, %cst_11 {dimension_numbers = #tpu.dot_dimension_numbers<[1], [0], [0], [1], [0, 0, 1, 1], [], []>} : vector<16x256xbf16>, vector<256x64xbf16>, vector<16x64xf32> -> vector<16x64xf32>
    %c0_12 = arith.constant 0 : index
    %c0_13 = arith.constant 0 : index
    %c0_14 = arith.constant 0 : index
    %c0_15 = arith.constant 0 : index
    %8 = vector.load %arg4[%c0_12, %c0_13, %c0_14, %c0_15] : memref<1x1x16x256xbf16, #tpu.memory_space<vmem>>, vector<1x1x16x256xbf16>
    %9 = vector.shape_cast %8 : vector<1x1x16x256xbf16> to vector<16x256xbf16>
    %c0_16 = arith.constant 0 : index
    %c0_17 = arith.constant 0 : index
    %10 = vector.load %arg7[%c0_16, %c0_17] : memref<256x64xbf16, #tpu.memory_space<vmem>>, vector<256x64xbf16>
    %cst_18 = arith.constant dense<0.000000e+00> : vector<16x64xf32>
    %11 = tpu.matmul %9, %10, %cst_18 {dimension_numbers = #tpu.dot_dimension_numbers<[1], [0], [0], [1], [0, 0, 1, 1], [], []>} : vector<16x256xbf16>, vector<256x64xbf16>, vector<16x64xf32> -> vector<16x64xf32>
    %c3_i32 = arith.constant 3 : i32
    %12 = arith.cmpi sge, %arg1, %c3_i32 : i32
    %cst_19 = arith.constant 1.000000e+00 : f32
    %cst_20 = arith.constant 0.000000e+00 : f32
    %13 = arith.select %12, %cst_19, %cst_20 : f32
    %c3_i32_21 = arith.constant 3 : i32
    %14 = arith.addi %arg1, %c3_i32_21 : i32
    %c3_i32_22 = arith.constant 3 : i32
    %15 = arith.cmpi sle, %14, %c3_i32_22 : i32
    %cst_23 = arith.constant 1.000000e+00 : f32
    %cst_24 = arith.constant 0.000000e+00 : f32
    %16 = arith.select %15, %cst_23, %cst_24 : f32
    %17 = vector.broadcast %13 : f32 to vector<16x64xf32>
    %18 = arith.mulf %17, %7 : vector<16x64xf32>
    %19 = arith.addf %3, %18 : vector<16x64xf32>
    %20 = vector.broadcast %16 : f32 to vector<16x64xf32>
    %21 = arith.mulf %20, %11 : vector<16x64xf32>
    %22 = arith.addf %19, %21 : vector<16x64xf32>
    %c0_25 = arith.constant 0 : index
    %c0_26 = arith.constant 0 : index
    %23 = vector.load %arg8[%c0_25, %c0_26] : memref<1x64xf32, #tpu.memory_space<vmem>>, vector<1x64xf32>
    %24 = vector.broadcast %23 : vector<1x64xf32> to vector<16x64xf32>
    %25 = arith.mulf %22, %24 : vector<16x64xf32>
    %c0_27 = arith.constant 0 : index
    %c0_28 = arith.constant 0 : index
    %26 = vector.load %arg9[%c0_27, %c0_28] : memref<1x64xf32, #tpu.memory_space<vmem>>, vector<1x64xf32>
    %27 = vector.broadcast %26 : vector<1x64xf32> to vector<16x64xf32>
    %28 = arith.addf %25, %27 : vector<16x64xf32>
    %cst_29 = arith.constant 0.000000e+00 : f32
    %29 = vector.broadcast %cst_29 : f32 to vector<16x64xf32>
    %30 = arith.maximumf %28, %29 : vector<16x64xf32>
    %31 = arith.truncf %30 : vector<16x64xf32> to vector<16x64xbf16>
    %c0_30 = arith.constant 0 : index
    %c0_31 = arith.constant 0 : index
    %c0_32 = arith.constant 0 : index
    %c0_33 = arith.constant 0 : index
    %32 = vector.load %arg10[%c0_30, %c0_31, %c0_32, %c0_33] : memref<1x1x16x64xbf16, #tpu.memory_space<vmem>>, vector<1x1x16x64xbf16>
    %33 = vector.shape_cast %32 : vector<1x1x16x64xbf16> to vector<16x64xbf16>
    %34 = vector.shape_cast %31 : vector<16x64xbf16> to vector<1x1x16x64xbf16>
    tpu.vector_store %arg10[%c0_30, %c0_31, %c0_32, %c0_33], %34 {strides = array<i32>} : memref<1x1x16x64xbf16, #tpu.memory_space<vmem>>, vector<1x1x16x64xbf16>,
    return
  }
  func.func @transform_0(%arg0: i32, %arg1: i32) -> (i32, i32, i32, i32) {
    %c3_i32 = arith.constant 3 : i32
    %0 = arith.subi %arg1, %c3_i32 : i32
    %c0_i32 = arith.constant 0 : i32
    %1 = arith.maxsi %0, %c0_i32 : i32
    %c0_i32_0 = arith.constant 0 : i32
    %c0_i32_1 = arith.constant 0 : i32
    %c0_i32_2 = arith.constant 0 : i32
    return %arg0, %1, %c0_i32_0, %c0_i32_1 : i32, i32, i32, i32
  }
  func.func @transform_1(%arg0: i32, %arg1: i32) -> (i32, i32, i32, i32) {
    %c0_i32 = arith.constant 0 : i32
    %c0_i32_0 = arith.constant 0 : i32
    %c0_i32_1 = arith.constant 0 : i32
    return %arg0, %arg1, %c0_i32, %c0_i32_0 : i32, i32, i32, i32
  }
  func.func @transform_2(%arg0: i32, %arg1: i32) -> (i32, i32, i32, i32) {
    %c3_i32 = arith.constant 3 : i32
    %0 = arith.addi %arg1, %c3_i32 : i32
    %c3_i32_0 = arith.constant 3 : i32
    %1 = arith.minsi %0, %c3_i32_0 : i32
    %c0_i32 = arith.constant 0 : i32
    %c0_i32_1 = arith.constant 0 : i32
    %c0_i32_2 = arith.constant 0 : i32
    return %arg0, %1, %c0_i32, %c0_i32_1 : i32, i32, i32, i32
  }
  func.func @transform_3(%arg0: i32, %arg1: i32) -> (i32, i32) {
    %c0_i32 = arith.constant 0 : i32
    %c0_i32_0 = arith.constant 0 : i32
    %c0_i32_1 = arith.constant 0 : i32
    return %c0_i32, %c0_i32_0 : i32, i32
  }
  func.func @transform_4(%arg0: i32, %arg1: i32) -> (i32, i32) {
    %c0_i32 = arith.constant 0 : i32
    %c0_i32_0 = arith.constant 0 : i32
    %c0_i32_1 = arith.constant 0 : i32
    return %c0_i32, %c0_i32_0 : i32, i32
  }
  func.func @transform_5(%arg0: i32, %arg1: i32) -> (i32, i32) {
    %c0_i32 = arith.constant 0 : i32
    %c0_i32_0 = arith.constant 0 : i32
    %c0_i32_1 = arith.constant 0 : i32
    return %c0_i32, %c0_i32_0 : i32, i32
  }
  func.func @transform_6(%arg0: i32, %arg1: i32) -> (i32, i32) {
    %c0_i32 = arith.constant 0 : i32
    %c0_i32_0 = arith.constant 0 : i32
    %c0_i32_1 = arith.constant 0 : i32
    return %c0_i32, %c0_i32_0 : i32, i32
  }
  func.func @transform_7(%arg0: i32, %arg1: i32) -> (i32, i32) {
    %c0_i32 = arith.constant 0 : i32
    %c0_i32_0 = arith.constant 0 : i32
    %c0_i32_1 = arith.constant 0 : i32
    return %c0_i32, %c0_i32_0 : i32, i32
  }
  func.func @transform_8(%arg0: i32, %arg1: i32) -> (i32, i32, i32, i32) {
    %c0_i32 = arith.constant 0 : i32
    %c0_i32_0 = arith.constant 0 : i32
    %c0_i32_1 = arith.constant 0 : i32
    return %arg0, %arg1, %c0_i32, %c0_i32_0 : i32, i32, i32, i32
  }
}

module attributes {stable_mosaic.version = 11 : i64} {
  func.func @kernel(%arg0: i32, %arg1: memref<128x512xbf16, #tpu.memory_space<vmem>>, %arg2: memref<128x64xbf16, #tpu.memory_space<vmem>>, %arg3: memref<128x64xbf16, #tpu.memory_space<vmem>>, %arg4: memref<512x256xbf16, #tpu.memory_space<vmem>>, %arg5: memref<64x256xbf16, #tpu.memory_space<vmem>>, %arg6: memref<64x256xbf16, #tpu.memory_space<vmem>>, %arg7: memref<1x256xf32, #tpu.memory_space<vmem>>, %arg8: memref<1x256xf32, #tpu.memory_space<vmem>>, %arg9: memref<128x256xbf16, #tpu.memory_space<vmem>>) attributes {dimension_semantics = [#tpu.dimension_semantics<parallel>], iteration_bounds = array<i64: 1>, scalar_prefetch = 0 : i64, scratch_operands = 0 : i64, tpu.core_type = #tpu.core_type<tc>, window_params = [{transform_indices = @transform_0, window_bounds = array<i64: 128, 512>}, {transform_indices = @transform_1, window_bounds = array<i64: 128, 64>}, {transform_indices = @transform_2, window_bounds = array<i64: 128, 64>}, {pipeline_mode = #tpu.pipeline_mode<synchronous>, transform_indices = @transform_3, window_bounds = array<i64: 512, 256>}, {pipeline_mode = #tpu.pipeline_mode<synchronous>, transform_indices = @transform_4, window_bounds = array<i64: 64, 256>}, {pipeline_mode = #tpu.pipeline_mode<synchronous>, transform_indices = @transform_5, window_bounds = array<i64: 64, 256>}, {pipeline_mode = #tpu.pipeline_mode<synchronous>, transform_indices = @transform_6, window_bounds = array<i64: 1, 256>}, {pipeline_mode = #tpu.pipeline_mode<synchronous>, transform_indices = @transform_7, window_bounds = array<i64: 1, 256>}, {transform_indices = @transform_8, window_bounds = array<i64: 128, 256>}]} {
    %c0 = arith.constant 0 : index
    %c0_0 = arith.constant 0 : index
    %0 = vector.load %arg1[%c0, %c0_0] : memref<128x512xbf16, #tpu.memory_space<vmem>>, vector<128x512xbf16>
    %c0_1 = arith.constant 0 : index
    %c0_2 = arith.constant 0 : index
    %1 = vector.load %arg4[%c0_1, %c0_2] : memref<512x256xbf16, #tpu.memory_space<vmem>>, vector<512x256xbf16>
    %cst = arith.constant dense<0.000000e+00> : vector<128x256xf32>
    %2 = tpu.matmul %0, %1, %cst {dimension_numbers = #tpu.dot_dimension_numbers<[1], [0], [0], [1], [0, 0, 1, 1], [], []>} : vector<128x512xbf16>, vector<512x256xbf16>, vector<128x256xf32> -> vector<128x256xf32>
    %c0_3 = arith.constant 0 : index
    %c0_4 = arith.constant 0 : index
    %3 = vector.load %arg2[%c0_3, %c0_4] : memref<128x64xbf16, #tpu.memory_space<vmem>>, vector<128x64xbf16>
    %c0_5 = arith.constant 0 : index
    %c0_6 = arith.constant 0 : index
    %4 = vector.load %arg5[%c0_5, %c0_6] : memref<64x256xbf16, #tpu.memory_space<vmem>>, vector<64x256xbf16>
    %cst_7 = arith.constant dense<0.000000e+00> : vector<128x256xf32>
    %5 = tpu.matmul %3, %4, %cst_7 {dimension_numbers = #tpu.dot_dimension_numbers<[1], [0], [0], [1], [0, 0, 1, 1], [], []>} : vector<128x64xbf16>, vector<64x256xbf16>, vector<128x256xf32> -> vector<128x256xf32>
    %6 = arith.addf %2, %5 : vector<128x256xf32>
    %c0_8 = arith.constant 0 : index
    %c0_9 = arith.constant 0 : index
    %7 = vector.load %arg3[%c0_8, %c0_9] : memref<128x64xbf16, #tpu.memory_space<vmem>>, vector<128x64xbf16>
    %c0_10 = arith.constant 0 : index
    %c0_11 = arith.constant 0 : index
    %8 = vector.load %arg6[%c0_10, %c0_11] : memref<64x256xbf16, #tpu.memory_space<vmem>>, vector<64x256xbf16>
    %cst_12 = arith.constant dense<0.000000e+00> : vector<128x256xf32>
    %9 = tpu.matmul %7, %8, %cst_12 {dimension_numbers = #tpu.dot_dimension_numbers<[1], [0], [0], [1], [0, 0, 1, 1], [], []>} : vector<128x64xbf16>, vector<64x256xbf16>, vector<128x256xf32> -> vector<128x256xf32>
    %10 = arith.addf %6, %9 : vector<128x256xf32>
    %c0_13 = arith.constant 0 : index
    %c0_14 = arith.constant 0 : index
    %11 = vector.load %arg7[%c0_13, %c0_14] : memref<1x256xf32, #tpu.memory_space<vmem>>, vector<1x256xf32>
    %12 = vector.broadcast %11 : vector<1x256xf32> to vector<128x256xf32>
    %13 = arith.mulf %10, %12 : vector<128x256xf32>
    %c0_15 = arith.constant 0 : index
    %c0_16 = arith.constant 0 : index
    %14 = vector.load %arg8[%c0_15, %c0_16] : memref<1x256xf32, #tpu.memory_space<vmem>>, vector<1x256xf32>
    %15 = vector.broadcast %14 : vector<1x256xf32> to vector<128x256xf32>
    %16 = arith.addf %13, %15 : vector<128x256xf32>
    %cst_17 = arith.constant 0.000000e+00 : f32
    %17 = vector.broadcast %cst_17 : f32 to vector<128x256xf32>
    %18 = arith.maximumf %16, %17 : vector<128x256xf32>
    %19 = arith.truncf %18 : vector<128x256xf32> to vector<128x256xbf16>
    %c0_18 = arith.constant 0 : index
    %c0_19 = arith.constant 0 : index
    %20 = vector.load %arg9[%c0_18, %c0_19] : memref<128x256xbf16, #tpu.memory_space<vmem>>, vector<128x256xbf16>
    tpu.vector_store %arg9[%c0_18, %c0_19], %19 {strides = array<i32>} : memref<128x256xbf16, #tpu.memory_space<vmem>>, vector<128x256xbf16>,
    return
  }
  func.func @transform_0(%arg0: i32) -> (i32, i32) {
    %c0_i32 = arith.constant 0 : i32
    %c0_i32_0 = arith.constant 0 : i32
    return %arg0, %c0_i32 : i32, i32
  }
  func.func @transform_1(%arg0: i32) -> (i32, i32) {
    %c0_i32 = arith.constant 0 : i32
    %c0_i32_0 = arith.constant 0 : i32
    return %arg0, %c0_i32 : i32, i32
  }
  func.func @transform_2(%arg0: i32) -> (i32, i32) {
    %c0_i32 = arith.constant 0 : i32
    %c0_i32_0 = arith.constant 0 : i32
    return %arg0, %c0_i32 : i32, i32
  }
  func.func @transform_3(%arg0: i32) -> (i32, i32) {
    %c0_i32 = arith.constant 0 : i32
    %c0_i32_0 = arith.constant 0 : i32
    %c0_i32_1 = arith.constant 0 : i32
    return %c0_i32, %c0_i32_0 : i32, i32
  }
  func.func @transform_4(%arg0: i32) -> (i32, i32) {
    %c0_i32 = arith.constant 0 : i32
    %c0_i32_0 = arith.constant 0 : i32
    %c0_i32_1 = arith.constant 0 : i32
    return %c0_i32, %c0_i32_0 : i32, i32
  }
  func.func @transform_5(%arg0: i32) -> (i32, i32) {
    %c0_i32 = arith.constant 0 : i32
    %c0_i32_0 = arith.constant 0 : i32
    %c0_i32_1 = arith.constant 0 : i32
    return %c0_i32, %c0_i32_0 : i32, i32
  }
  func.func @transform_6(%arg0: i32) -> (i32, i32) {
    %c0_i32 = arith.constant 0 : i32
    %c0_i32_0 = arith.constant 0 : i32
    %c0_i32_1 = arith.constant 0 : i32
    return %c0_i32, %c0_i32_0 : i32, i32
  }
  func.func @transform_7(%arg0: i32) -> (i32, i32) {
    %c0_i32 = arith.constant 0 : i32
    %c0_i32_0 = arith.constant 0 : i32
    %c0_i32_1 = arith.constant 0 : i32
    return %c0_i32, %c0_i32_0 : i32, i32
  }
  func.func @transform_8(%arg0: i32) -> (i32, i32) {
    %c0_i32 = arith.constant 0 : i32
    %c0_i32_0 = arith.constant 0 : i32
    return %arg0, %c0_i32 : i32, i32
  }
}

module attributes {stable_mosaic.version = 11 : i64} {
  func.func @kernel(%arg0: i32, %arg1: i32, %arg2: memref<1x64x512xbf16, #tpu.memory_space<vmem>>, %arg3: memref<1x64x64xbf16, #tpu.memory_space<vmem>>, %arg4: memref<1x64x64xbf16, #tpu.memory_space<vmem>>, %arg5: memref<1x64x64xbf16, #tpu.memory_space<vmem>>, %arg6: memref<512x512xbf16, #tpu.memory_space<vmem>>, %arg7: memref<64x512xbf16, #tpu.memory_space<vmem>>, %arg8: memref<64x512xbf16, #tpu.memory_space<vmem>>, %arg9: memref<64x512xbf16, #tpu.memory_space<vmem>>, %arg10: memref<1x512xf32, #tpu.memory_space<vmem>>, %arg11: memref<1x512xf32, #tpu.memory_space<vmem>>, %arg12: memref<1x64x512xbf16, #tpu.memory_space<vmem>>, %arg13: memref<1x1x512xf32, #tpu.memory_space<vmem>>) attributes {dimension_semantics = [#tpu.dimension_semantics<parallel>, #tpu.dimension_semantics<arbitrary>], iteration_bounds = array<i64: 2, 1>, scalar_prefetch = 0 : i64, scratch_operands = 0 : i64, tpu.core_type = #tpu.core_type<tc>, window_params = [{transform_indices = @transform_0, window_bounds = array<i64: 1, 64, 512>}, {transform_indices = @transform_1, window_bounds = array<i64: 1, 64, 64>}, {transform_indices = @transform_2, window_bounds = array<i64: 1, 64, 64>}, {transform_indices = @transform_3, window_bounds = array<i64: 1, 64, 64>}, {pipeline_mode = #tpu.pipeline_mode<synchronous>, transform_indices = @transform_4, window_bounds = array<i64: 512, 512>}, {pipeline_mode = #tpu.pipeline_mode<synchronous>, transform_indices = @transform_5, window_bounds = array<i64: 64, 512>}, {pipeline_mode = #tpu.pipeline_mode<synchronous>, transform_indices = @transform_6, window_bounds = array<i64: 64, 512>}, {pipeline_mode = #tpu.pipeline_mode<synchronous>, transform_indices = @transform_7, window_bounds = array<i64: 64, 512>}, {pipeline_mode = #tpu.pipeline_mode<synchronous>, transform_indices = @transform_8, window_bounds = array<i64: 1, 512>}, {pipeline_mode = #tpu.pipeline_mode<synchronous>, transform_indices = @transform_9, window_bounds = array<i64: 1, 512>}, {transform_indices = @transform_10, window_bounds = array<i64: 1, 64, 512>}, {transform_indices = @transform_11, window_bounds = array<i64: 1, 1, 512>}]} {
    %c0 = arith.constant 0 : index
    %c0_0 = arith.constant 0 : index
    %c0_1 = arith.constant 0 : index
    %0 = vector.load %arg2[%c0, %c0_0, %c0_1] : memref<1x64x512xbf16, #tpu.memory_space<vmem>>, vector<1x64x512xbf16>
    %1 = vector.shape_cast %0 : vector<1x64x512xbf16> to vector<64x512xbf16>
    %c0_2 = arith.constant 0 : index
    %c0_3 = arith.constant 0 : index
    %2 = vector.load %arg6[%c0_2, %c0_3] : memref<512x512xbf16, #tpu.memory_space<vmem>>, vector<512x512xbf16>
    %cst = arith.constant dense<0.000000e+00> : vector<64x512xf32>
    %3 = tpu.matmul %1, %2, %cst {dimension_numbers = #tpu.dot_dimension_numbers<[1], [0], [0], [1], [0, 0, 1, 1], [], []>} : vector<64x512xbf16>, vector<512x512xbf16>, vector<64x512xf32> -> vector<64x512xf32>
    %c0_4 = arith.constant 0 : index
    %c0_5 = arith.constant 0 : index
    %c0_6 = arith.constant 0 : index
    %4 = vector.load %arg3[%c0_4, %c0_5, %c0_6] : memref<1x64x64xbf16, #tpu.memory_space<vmem>>, vector<1x64x64xbf16>
    %5 = vector.shape_cast %4 : vector<1x64x64xbf16> to vector<64x64xbf16>
    %c0_7 = arith.constant 0 : index
    %c0_8 = arith.constant 0 : index
    %6 = vector.load %arg7[%c0_7, %c0_8] : memref<64x512xbf16, #tpu.memory_space<vmem>>, vector<64x512xbf16>
    %cst_9 = arith.constant dense<0.000000e+00> : vector<64x512xf32>
    %7 = tpu.matmul %5, %6, %cst_9 {dimension_numbers = #tpu.dot_dimension_numbers<[1], [0], [0], [1], [0, 0, 1, 1], [], []>} : vector<64x64xbf16>, vector<64x512xbf16>, vector<64x512xf32> -> vector<64x512xf32>
    %8 = arith.addf %3, %7 : vector<64x512xf32>
    %c0_10 = arith.constant 0 : index
    %c0_11 = arith.constant 0 : index
    %c0_12 = arith.constant 0 : index
    %9 = vector.load %arg4[%c0_10, %c0_11, %c0_12] : memref<1x64x64xbf16, #tpu.memory_space<vmem>>, vector<1x64x64xbf16>
    %10 = vector.shape_cast %9 : vector<1x64x64xbf16> to vector<64x64xbf16>
    %c0_13 = arith.constant 0 : index
    %c0_14 = arith.constant 0 : index
    %11 = vector.load %arg8[%c0_13, %c0_14] : memref<64x512xbf16, #tpu.memory_space<vmem>>, vector<64x512xbf16>
    %cst_15 = arith.constant dense<0.000000e+00> : vector<64x512xf32>
    %12 = tpu.matmul %10, %11, %cst_15 {dimension_numbers = #tpu.dot_dimension_numbers<[1], [0], [0], [1], [0, 0, 1, 1], [], []>} : vector<64x64xbf16>, vector<64x512xbf16>, vector<64x512xf32> -> vector<64x512xf32>
    %13 = arith.addf %8, %12 : vector<64x512xf32>
    %c0_16 = arith.constant 0 : index
    %c0_17 = arith.constant 0 : index
    %c0_18 = arith.constant 0 : index
    %14 = vector.load %arg5[%c0_16, %c0_17, %c0_18] : memref<1x64x64xbf16, #tpu.memory_space<vmem>>, vector<1x64x64xbf16>
    %15 = vector.shape_cast %14 : vector<1x64x64xbf16> to vector<64x64xbf16>
    %c0_19 = arith.constant 0 : index
    %c0_20 = arith.constant 0 : index
    %16 = vector.load %arg9[%c0_19, %c0_20] : memref<64x512xbf16, #tpu.memory_space<vmem>>, vector<64x512xbf16>
    %cst_21 = arith.constant dense<0.000000e+00> : vector<64x512xf32>
    %17 = tpu.matmul %15, %16, %cst_21 {dimension_numbers = #tpu.dot_dimension_numbers<[1], [0], [0], [1], [0, 0, 1, 1], [], []>} : vector<64x64xbf16>, vector<64x512xbf16>, vector<64x512xf32> -> vector<64x512xf32>
    %18 = arith.addf %13, %17 : vector<64x512xf32>
    %c0_22 = arith.constant 0 : index
    %c0_23 = arith.constant 0 : index
    %19 = vector.load %arg10[%c0_22, %c0_23] : memref<1x512xf32, #tpu.memory_space<vmem>>, vector<1x512xf32>
    %20 = vector.broadcast %19 : vector<1x512xf32> to vector<64x512xf32>
    %21 = arith.mulf %18, %20 : vector<64x512xf32>
    %c0_24 = arith.constant 0 : index
    %c0_25 = arith.constant 0 : index
    %22 = vector.load %arg11[%c0_24, %c0_25] : memref<1x512xf32, #tpu.memory_space<vmem>>, vector<1x512xf32>
    %23 = vector.broadcast %22 : vector<1x512xf32> to vector<64x512xf32>
    %24 = arith.addf %21, %23 : vector<64x512xf32>
    %cst_26 = arith.constant 0.000000e+00 : f32
    %25 = vector.broadcast %cst_26 : f32 to vector<64x512xf32>
    %26 = arith.maximumf %24, %25 : vector<64x512xf32>
    %27 = arith.truncf %26 : vector<64x512xf32> to vector<64x512xbf16>
    %c0_27 = arith.constant 0 : index
    %c0_28 = arith.constant 0 : index
    %c0_29 = arith.constant 0 : index
    %28 = vector.load %arg12[%c0_27, %c0_28, %c0_29] : memref<1x64x512xbf16, #tpu.memory_space<vmem>>, vector<1x64x512xbf16>
    %29 = vector.shape_cast %28 : vector<1x64x512xbf16> to vector<64x512xbf16>
    %30 = vector.shape_cast %27 : vector<64x512xbf16> to vector<1x64x512xbf16>
    tpu.vector_store %arg12[%c0_27, %c0_28, %c0_29], %30 {strides = array<i32>} : memref<1x64x512xbf16, #tpu.memory_space<vmem>>, vector<1x64x512xbf16>,
    %c64_i32 = arith.constant 64 : i32
    %31 = arith.muli %arg1, %c64_i32 : i32
    %32 = tpu.iota {dimensions = array<i32: 0>} : vector<64x1xi32>
    %33 = vector.broadcast %31 : i32 to vector<64x1xi32>
    %34 = arith.addi %33, %32 : vector<64x1xi32>
    %c64_i32_30 = arith.constant 64 : i32
    %35 = vector.broadcast %c64_i32_30 : i32 to vector<64x1xi32>
    %36 = arith.cmpi slt, %34, %35 : vector<64x1xi32>
    %cst_31 = arith.constant 0.000000e+00 : f32
    %37 = vector.shape_cast %36 : vector<64x1xi1> to vector<64x1xi1>
    %38 = vector.broadcast %37 : vector<64x1xi1> to vector<64x512xi1>
    %39 = vector.broadcast %cst_31 : f32 to vector<64x512xf32>
    %40 = arith.select %38, %26, %39 : vector<64x512xi1>, vector<64x512xf32>
    %cst_32 = arith.constant dense<0.000000e+00> : vector<512xf32>
    %41 = vector.multi_reduction <add>, %40, %cst_32 [0] : vector<64x512xf32> to vector<512xf32>
    %42 = vector.shape_cast %41 : vector<512xf32> to vector<1x512xf32>
    %c0_i32 = arith.constant 0 : i32
    %43 = arith.cmpi eq, %arg1, %c0_i32 : i32
    %44 = arith.extui %43 : i1 to i32
    %c0_i32_33 = arith.constant 0 : i32
    %45 = arith.cmpi ne, %44, %c0_i32_33 : i32
    scf.if %45 {
      %cst_40 = arith.constant 0.000000e+00 : f32
      %52 = vector.broadcast %cst_40 : f32 to vector<1x512xf32>
      %c0_41 = arith.constant 0 : index
      %c0_42 = arith.constant 0 : index
      %c0_43 = arith.constant 0 : index
      %53 = vector.load %arg13[%c0_41, %c0_42, %c0_43] : memref<1x1x512xf32, #tpu.memory_space<vmem>>, vector<1x1x512xf32>
      %54 = vector.shape_cast %53 : vector<1x1x512xf32> to vector<1x512xf32>
      %55 = vector.shape_cast %52 : vector<1x512xf32> to vector<1x1x512xf32>
      tpu.vector_store %arg13[%c0_41, %c0_42, %c0_43], %55 {strides = array<i32>} : memref<1x1x512xf32, #tpu.memory_space<vmem>>, vector<1x1x512xf32>,
    } else {
    }
    %c0_34 = arith.constant 0 : index
    %c0_35 = arith.constant 0 : index
    %c0_36 = arith.constant 0 : index
    %46 = vector.load %arg13[%c0_34, %c0_35, %c0_36] : memref<1x1x512xf32, #tpu.memory_space<vmem>>, vector<1x1x512xf32>
    %47 = vector.shape_cast %46 : vector<1x1x512xf32> to vector<1x512xf32>
    %48 = arith.addf %47, %42 : vector<1x512xf32>
    %c0_37 = arith.constant 0 : index
    %c0_38 = arith.constant 0 : index
    %c0_39 = arith.constant 0 : index
    %49 = vector.load %arg13[%c0_37, %c0_38, %c0_39] : memref<1x1x512xf32, #tpu.memory_space<vmem>>, vector<1x1x512xf32>
    %50 = vector.shape_cast %49 : vector<1x1x512xf32> to vector<1x512xf32>
    %51 = vector.shape_cast %48 : vector<1x512xf32> to vector<1x1x512xf32>
    tpu.vector_store %arg13[%c0_37, %c0_38, %c0_39], %51 {strides = array<i32>} : memref<1x1x512xf32, #tpu.memory_space<vmem>>, vector<1x1x512xf32>,
    return
  }
  func.func @transform_0(%arg0: i32, %arg1: i32) -> (i32, i32, i32) {
    %c0_i32 = arith.constant 0 : i32
    %c0_i32_0 = arith.constant 0 : i32
    return %arg0, %arg1, %c0_i32 : i32, i32, i32
  }
  func.func @transform_1(%arg0: i32, %arg1: i32) -> (i32, i32, i32) {
    %c0_i32 = arith.constant 0 : i32
    %c0_i32_0 = arith.constant 0 : i32
    return %arg0, %arg1, %c0_i32 : i32, i32, i32
  }
  func.func @transform_2(%arg0: i32, %arg1: i32) -> (i32, i32, i32) {
    %c0_i32 = arith.constant 0 : i32
    %c0_i32_0 = arith.constant 0 : i32
    return %arg0, %arg1, %c0_i32 : i32, i32, i32
  }
  func.func @transform_3(%arg0: i32, %arg1: i32) -> (i32, i32, i32) {
    %c0_i32 = arith.constant 0 : i32
    %c0_i32_0 = arith.constant 0 : i32
    return %arg0, %arg1, %c0_i32 : i32, i32, i32
  }
  func.func @transform_4(%arg0: i32, %arg1: i32) -> (i32, i32) {
    %c0_i32 = arith.constant 0 : i32
    %c0_i32_0 = arith.constant 0 : i32
    %c0_i32_1 = arith.constant 0 : i32
    return %c0_i32, %c0_i32_0 : i32, i32
  }
  func.func @transform_5(%arg0: i32, %arg1: i32) -> (i32, i32) {
    %c0_i32 = arith.constant 0 : i32
    %c0_i32_0 = arith.constant 0 : i32
    %c0_i32_1 = arith.constant 0 : i32
    return %c0_i32, %c0_i32_0 : i32, i32
  }
  func.func @transform_6(%arg0: i32, %arg1: i32) -> (i32, i32) {
    %c0_i32 = arith.constant 0 : i32
    %c0_i32_0 = arith.constant 0 : i32
    %c0_i32_1 = arith.constant 0 : i32
    return %c0_i32, %c0_i32_0 : i32, i32
  }
  func.func @transform_7(%arg0: i32, %arg1: i32) -> (i32, i32) {
    %c0_i32 = arith.constant 0 : i32
    %c0_i32_0 = arith.constant 0 : i32
    %c0_i32_1 = arith.constant 0 : i32
    return %c0_i32, %c0_i32_0 : i32, i32
  }
  func.func @transform_8(%arg0: i32, %arg1: i32) -> (i32, i32) {
    %c0_i32 = arith.constant 0 : i32
    %c0_i32_0 = arith.constant 0 : i32
    %c0_i32_1 = arith.constant 0 : i32
    return %c0_i32, %c0_i32_0 : i32, i32
  }
  func.func @transform_9(%arg0: i32, %arg1: i32) -> (i32, i32) {
    %c0_i32 = arith.constant 0 : i32
    %c0_i32_0 = arith.constant 0 : i32
    %c0_i32_1 = arith.constant 0 : i32
    return %c0_i32, %c0_i32_0 : i32, i32
  }
  func.func @transform_10(%arg0: i32, %arg1: i32) -> (i32, i32, i32) {
    %c0_i32 = arith.constant 0 : i32
    %c0_i32_0 = arith.constant 0 : i32
    return %arg0, %arg1, %c0_i32 : i32, i32, i32
  }
  func.func @transform_11(%arg0: i32, %arg1: i32) -> (i32, i32, i32) {
    %c0_i32 = arith.constant 0 : i32
    %c0_i32_0 = arith.constant 0 : i32
    %c0_i32_1 = arith.constant 0 : i32
    return %arg0, %c0_i32, %c0_i32_0 : i32, i32, i32
  }
}

module attributes {stable_mosaic.version = 11 : i64} {
  func.func @kernel(%arg0: i32, %arg1: i32, %arg2: memref<1x1x512xf32, #tpu.memory_space<vmem>>, %arg3: memref<512x128xf32, #tpu.memory_space<vmem>>, %arg4: memref<1x128xf32, #tpu.memory_space<vmem>>, %arg5: memref<128x512xf32, #tpu.memory_space<vmem>>, %arg6: memref<1x512xf32, #tpu.memory_space<vmem>>, %arg7: memref<1x64x512xbf16, #tpu.memory_space<vmem>>, %arg8: memref<1x64x512xf32, #tpu.memory_space<vmem>>, %arg9: memref<1x512xf32, #tpu.memory_space<vmem>>) attributes {dimension_semantics = [#tpu.dimension_semantics<parallel>, #tpu.dimension_semantics<arbitrary>], iteration_bounds = array<i64: 2, 1>, scalar_prefetch = 0 : i64, scratch_operands = 1 : i64, tpu.core_type = #tpu.core_type<tc>, window_params = [{transform_indices = @transform_0, window_bounds = array<i64: 1, 1, 512>}, {pipeline_mode = #tpu.pipeline_mode<synchronous>, transform_indices = @transform_1, window_bounds = array<i64: 512, 128>}, {pipeline_mode = #tpu.pipeline_mode<synchronous>, transform_indices = @transform_2, window_bounds = array<i64: 1, 128>}, {pipeline_mode = #tpu.pipeline_mode<synchronous>, transform_indices = @transform_3, window_bounds = array<i64: 128, 512>}, {pipeline_mode = #tpu.pipeline_mode<synchronous>, transform_indices = @transform_4, window_bounds = array<i64: 1, 512>}, {transform_indices = @transform_5, window_bounds = array<i64: 1, 64, 512>}, {transform_indices = @transform_6, window_bounds = array<i64: 1, 64, 512>}]} {
    %c0_i32 = arith.constant 0 : i32
    %0 = arith.cmpi eq, %arg1, %c0_i32 : i32
    %1 = arith.extui %0 : i1 to i32
    %c0_i32_0 = arith.constant 0 : i32
    %2 = arith.cmpi ne, %1, %c0_i32_0 : i32
    scf.if %2 {
      %c0_8 = arith.constant 0 : index
      %c0_9 = arith.constant 0 : index
      %c0_10 = arith.constant 0 : index
      %12 = vector.load %arg2[%c0_8, %c0_9, %c0_10] : memref<1x1x512xf32, #tpu.memory_space<vmem>>, vector<1x1x512xf32>
      %13 = vector.shape_cast %12 : vector<1x1x512xf32> to vector<1x512xf32>
      %cst = arith.constant 1.562500e-02 : f32
      %14 = vector.broadcast %cst : f32 to vector<1x512xf32>
      %15 = arith.mulf %13, %14 : vector<1x512xf32>
      %c0_11 = arith.constant 0 : index
      %c0_12 = arith.constant 0 : index
      %16 = vector.load %arg3[%c0_11, %c0_12] : memref<512x128xf32, #tpu.memory_space<vmem>>, vector<512x128xf32>
      %cst_13 = arith.constant dense<0.000000e+00> : vector<1x128xf32>
      %17 = tpu.matmul %15, %16, %cst_13 {dimension_numbers = #tpu.dot_dimension_numbers<[1], [0], [0], [1], [0, 0, 1, 1], [], []>} : vector<1x512xf32>, vector<512x128xf32>, vector<1x128xf32> -> vector<1x128xf32>
      %c0_14 = arith.constant 0 : index
      %c0_15 = arith.constant 0 : index
      %18 = vector.load %arg4[%c0_14, %c0_15] : memref<1x128xf32, #tpu.memory_space<vmem>>, vector<1x128xf32>
      %19 = arith.addf %17, %18 : vector<1x128xf32>
      %cst_16 = arith.constant 0.000000e+00 : f32
      %20 = vector.broadcast %cst_16 : f32 to vector<1x128xf32>
      %21 = arith.maximumf %19, %20 : vector<1x128xf32>
      %c0_17 = arith.constant 0 : index
      %c0_18 = arith.constant 0 : index
      %22 = vector.load %arg5[%c0_17, %c0_18] : memref<128x512xf32, #tpu.memory_space<vmem>>, vector<128x512xf32>
      %cst_19 = arith.constant dense<0.000000e+00> : vector<1x512xf32>
      %23 = tpu.matmul %21, %22, %cst_19 {dimension_numbers = #tpu.dot_dimension_numbers<[1], [0], [0], [1], [0, 0, 1, 1], [], []>} : vector<1x128xf32>, vector<128x512xf32>, vector<1x512xf32> -> vector<1x512xf32>
      %c0_20 = arith.constant 0 : index
      %c0_21 = arith.constant 0 : index
      %24 = vector.load %arg6[%c0_20, %c0_21] : memref<1x512xf32, #tpu.memory_space<vmem>>, vector<1x512xf32>
      %25 = arith.addf %23, %24 : vector<1x512xf32>
      %cst_22 = arith.constant 0.000000e+00 : f32
      %26 = vector.broadcast %cst_22 : f32 to vector<1x512xf32>
      %27 = arith.subf %26, %25 : vector<1x512xf32>
      %28 = math.exp %27 : vector<1x512xf32>
      %cst_23 = arith.constant 1.000000e+00 : f32
      %29 = vector.broadcast %cst_23 : f32 to vector<1x512xf32>
      %30 = arith.addf %29, %28 : vector<1x512xf32>
      %cst_24 = arith.constant 1.000000e+00 : f32
      %31 = vector.broadcast %cst_24 : f32 to vector<1x512xf32>
      %32 = arith.divf %31, %30 : vector<1x512xf32>
      %c0_25 = arith.constant 0 : index
      %c0_26 = arith.constant 0 : index
      %33 = vector.load %arg9[%c0_25, %c0_26] : memref<1x512xf32, #tpu.memory_space<vmem>>, vector<1x512xf32>
      tpu.vector_store %arg9[%c0_25, %c0_26], %32 {strides = array<i32>} : memref<1x512xf32, #tpu.memory_space<vmem>>, vector<1x512xf32>,
    } else {
    }
    %c0 = arith.constant 0 : index
    %c0_1 = arith.constant 0 : index
    %c0_2 = arith.constant 0 : index
    %3 = vector.load %arg7[%c0, %c0_1, %c0_2] : memref<1x64x512xbf16, #tpu.memory_space<vmem>>, vector<1x64x512xbf16>
    %4 = vector.shape_cast %3 : vector<1x64x512xbf16> to vector<64x512xbf16>
    %5 = arith.extf %4 : vector<64x512xbf16> to vector<64x512xf32>
    %c0_3 = arith.constant 0 : index
    %c0_4 = arith.constant 0 : index
    %6 = vector.load %arg9[%c0_3, %c0_4] : memref<1x512xf32, #tpu.memory_space<vmem>>, vector<1x512xf32>
    %7 = vector.broadcast %6 : vector<1x512xf32> to vector<64x512xf32>
    %8 = arith.mulf %5, %7 : vector<64x512xf32>
    %c0_5 = arith.constant 0 : index
    %c0_6 = arith.constant 0 : index
    %c0_7 = arith.constant 0 : index
    %9 = vector.load %arg8[%c0_5, %c0_6, %c0_7] : memref<1x64x512xf32, #tpu.memory_space<vmem>>, vector<1x64x512xf32>
    %10 = vector.shape_cast %9 : vector<1x64x512xf32> to vector<64x512xf32>
    %11 = vector.shape_cast %8 : vector<64x512xf32> to vector<1x64x512xf32>
    tpu.vector_store %arg8[%c0_5, %c0_6, %c0_7], %11 {strides = array<i32>} : memref<1x64x512xf32, #tpu.memory_space<vmem>>, vector<1x64x512xf32>,
    return
  }
  func.func @transform_0(%arg0: i32, %arg1: i32) -> (i32, i32, i32) {
    %c0_i32 = arith.constant 0 : i32
    %c0_i32_0 = arith.constant 0 : i32
    %c0_i32_1 = arith.constant 0 : i32
    return %arg0, %c0_i32, %c0_i32_0 : i32, i32, i32
  }
  func.func @transform_1(%arg0: i32, %arg1: i32) -> (i32, i32) {
    %c0_i32 = arith.constant 0 : i32
    %c0_i32_0 = arith.constant 0 : i32
    %c0_i32_1 = arith.constant 0 : i32
    return %c0_i32, %c0_i32_0 : i32, i32
  }
  func.func @transform_2(%arg0: i32, %arg1: i32) -> (i32, i32) {
    %c0_i32 = arith.constant 0 : i32
    %c0_i32_0 = arith.constant 0 : i32
    %c0_i32_1 = arith.constant 0 : i32
    return %c0_i32, %c0_i32_0 : i32, i32
  }
  func.func @transform_3(%arg0: i32, %arg1: i32) -> (i32, i32) {
    %c0_i32 = arith.constant 0 : i32
    %c0_i32_0 = arith.constant 0 : i32
    %c0_i32_1 = arith.constant 0 : i32
    return %c0_i32, %c0_i32_0 : i32, i32
  }
  func.func @transform_4(%arg0: i32, %arg1: i32) -> (i32, i32) {
    %c0_i32 = arith.constant 0 : i32
    %c0_i32_0 = arith.constant 0 : i32
    %c0_i32_1 = arith.constant 0 : i32
    return %c0_i32, %c0_i32_0 : i32, i32
  }
  func.func @transform_5(%arg0: i32, %arg1: i32) -> (i32, i32, i32) {
    %c0_i32 = arith.constant 0 : i32
    %c0_i32_0 = arith.constant 0 : i32
    return %arg0, %arg1, %c0_i32 : i32, i32, i32
  }
  func.func @transform_6(%arg0: i32, %arg1: i32) -> (i32, i32, i32) {
    %c0_i32 = arith.constant 0 : i32
    %c0_i32_0 = arith.constant 0 : i32
    return %arg0, %arg1, %c0_i32 : i32, i32, i32
  }
}

</mosaic_0001>

<bundles_post_ra>
// kernel: dense_temporal_block.8
= control target key start
LH: loop header
LB: loop body
LE: loop exit
PB: predicated region body
PF: predicated region fallthrough
CT: control target
= control target key end

     0   :  { %9 = vsyncpa [#allocation3], 0  ;;  %s1655_s18 = smov [#allocation2]   ;;  %s1656_s20 = smov 128   ;;  %s2180_s0 = inlined_call_operand.vmem [shape: bf16[128,512], index: 0, kind: input, shape index: {}]   ;;  %s2181_s1 = inlined_call_operand.hbm [shape: bf16[512,256], index: 1, kind: input, shape index: {}]   ;;  %s2182_s2 = inlined_call_operand.vmem [shape: f32[1,256], index: 2, kind: input, shape index: {}]   ;;  %s2183_s3 = inlined_call_operand.vmem [shape: f32[1,256], index: 3, kind: input, shape index: {}]   ;;  %s2184_s4 = inlined_call_operand.vmem [shape: bf16[128,256], index: 4, kind: output, shape index: {}]  }
   0x1   :  { %s16_s17 = sshll.u32 %s2181_s1, 4  ;;  %s18_s19 = sshll.u32 %s1655_s18, 4  ;;  %s17_s17 = int_to_ptr.hbm [resolvable:$true] %s16_s17  ;;  %s19_s19 = int_to_ptr.vmem [resolvable:$true] %s18_s19 }
   0x2   :  { %s1657_s21 = smov 8  }
   0x3   :  { %24 = dma.hbm_to_vmem [thread:$0]  %s17_s17, 8192, %s19_s19, [#allocation3], %s1656_s20, %s1656_s20, %s1657_s21  }
   0x4   :  { %1653 = dma.done.wait [#allocation3], 8192  }
   0x5   :  { %1654 = vsyncadd [#allocation3], 4294959104  ;;  %v1332_v0 = vld [vmem:[#allocation2 + $0x70] sm:$0xf]  ;;  %v1577_v1 = vld [vmem:[#allocation2 + $0x74] sm:$0xf0] }
   0x6   :  { %v1396_v2 = vld [vmem:[#allocation2 + $0xf0] sm:$0xf]  ;;  %v1333_v3 = vor.u32 %v1577_v1, %v1332_v0  ;;  %v1593_v4 = vld [vmem:[#allocation2 + $0xf4] sm:$0xf0]  ;;  %v1324_v11 = vld [vmem:[#allocation2 + $0x60] sm:$0xf] }
   0x7   :  { %v1460_v5 = vld [vmem:[#allocation2 + $0x170] sm:$0xf]  ;;  %v1609_v6 = vld [vmem:[#allocation2 + $0x174] sm:$0xf0]  ;;  %v1397_v7 = vor.u32 %v1593_v4, %v1396_v2  ;;  %v1575_v13 = vld [vmem:[#allocation2 + $0x64] sm:$0xf0] }
   0x8   :  { %v1461_v8 = vor.u32 %v1609_v6, %v1460_v5  ;;  %v1524_v9 = vld [vmem:[#allocation2 + $0x1f0] sm:$0xf]  ;;  %v1625_v10 = vld [vmem:[#allocation2 + $0x1f4] sm:$0xf0]  ;;  %609 = vmatpush.bf16.msra.mxu0 %v1333_v3  ;;  %v1388_v14 = vld [vmem:[#allocation2 + $0xe0] sm:$0xf]  ;;  %v1325_v16 = vor.u32 %v1575_v13, %v1324_v11 }
   0x9   :  { %v1525_v12 = vor.u32 %v1625_v10, %v1524_v9  ;;  %v1591_v15 = vld [vmem:[#allocation2 + $0xe4] sm:$0xf0]  ;;  %658 = vmatpush.bf16.msra.mxu1 %v1397_v7  ;;  %v1452_v18 = vld [vmem:[#allocation2 + $0x160] sm:$0xf]  ;;  %v1316_v23 = vld [vmem:[#allocation2 + $0x50] sm:$0xf] }
   0xa   :  { %707 = vmatpush.bf16.msra.mxu2 %v1461_v8  ;;  %v1389_v17 = vor.u32 %v1591_v15, %v1388_v14  ;;  %v1607_v19 = vld [vmem:[#allocation2 + $0x164] sm:$0xf0]  ;;  %v1516_v20 = vld [vmem:[#allocation2 + $0x1e0] sm:$0xf]  ;;  %v1573_v24 = vld [vmem:[#allocation2 + $0x54] sm:$0xf0] }
   0xb   :  { %756 = vmatpush.bf16.msra.mxu3 %v1525_v12  ;;  %v1453_v21 = vor.u32 %v1607_v19, %v1452_v18  ;;  %v1623_v22 = vld [vmem:[#allocation2 + $0x1e4] sm:$0xf0]  ;;  %v1380_v26 = vld [vmem:[#allocation2 + $0xd0] sm:$0xf]  ;;  %v1589_v27 = vld [vmem:[#allocation2 + $0xd4] sm:$0xf0]  ;;  %v1317_v29 = vor.u32 %v1573_v24, %v1316_v23 }
   0xc   :  { %v1517_v25 = vor.u32 %v1623_v22, %v1516_v20  ;;  %v1444_v28 = vld [vmem:[#allocation2 + $0x150] sm:$0xf]  ;;  %610 = vmatpush.bf16.msra.mxu0 %v1325_v16  ;;  %v1605_v30 = vld [vmem:[#allocation2 + $0x154] sm:$0xf0]  ;;  %v1381_v33 = vor.u32 %v1589_v27, %v1380_v26  ;;  %v1308_v35 = vld [vmem:[#allocation2 + $0x40] sm:$0xf] }
   0xd   :  { %v1508_v31 = vld [vmem:[#allocation2 + $0x1d0] sm:$0xf]  ;;  %v1621_v32 = vld [vmem:[#allocation2 + $0x1d4] sm:$0xf0]  ;;  %659 = vmatpush.bf16.msra.mxu1 %v1389_v17  ;;  %v1445_v34 = vor.u32 %v1605_v30, %v1444_v28  ;;  %v1571_v36 = vld [vmem:[#allocation2 + $0x44] sm:$0xf0] }
   0xe   :  { %708 = vmatpush.bf16.msra.mxu2 %v1453_v21  ;;  %v1372_v37 = vld [vmem:[#allocation2 + $0xc0] sm:$0xf]  ;;  %v1509_v38 = vor.u32 %v1621_v32, %v1508_v31  ;;  %v1587_v39 = vld [vmem:[#allocation2 + $0xc4] sm:$0xf0]  ;;  %v1309_v44 = vor.u32 %v1571_v36, %v1308_v35  ;;  %v1300_v47 = vld [vmem:[#allocation2 + $0x30] sm:$0xf] }
   0xf   :  { %757 = vmatpush.bf16.msra.mxu3 %v1517_v25  ;;  %v1436_v40 = vld [vmem:[#allocation2 + $0x140] sm:$0xf]  ;;  %v1603_v41 = vld [vmem:[#allocation2 + $0x144] sm:$0xf0]  ;;  %v1373_v45 = vor.u32 %v1587_v39, %v1372_v37  ;;  %v1569_v48 = vld [vmem:[#allocation2 + $0x34] sm:$0xf0] }
  0x10   :  { %v1500_v42 = vld [vmem:[#allocation2 + $0x1c0] sm:$0xf]  ;;  %v1619_v43 = vld [vmem:[#allocation2 + $0x1c4] sm:$0xf0]  ;;  %611 = vmatpush.bf16.msra.mxu0 %v1317_v29  ;;  %v1437_v46 = vor.u32 %v1603_v41, %v1436_v40  ;;  %v1364_v49 = vld [vmem:[#allocation2 + $0xb0] sm:$0xf]  ;;  %v1301_v56 = vor.u32 %v1569_v48, %v1300_v47 }
  0x11   :  { %660 = vmatpush.bf16.msra.mxu1 %v1381_v33  ;;  %v1501_v50 = vor.u32 %v1619_v43, %v1500_v42  ;;  %v1585_v51 = vld [vmem:[#allocation2 + $0xb4] sm:$0xf0]  ;;  %v1428_v52 = vld [vmem:[#allocation2 + $0x130] sm:$0xf]  ;;  %v1292_v59 = vld [vmem:[#allocation2 + $0x20] sm:$0xf] }
  0x12   :  { %709 = vmatpush.bf16.msra.mxu2 %v1445_v34  ;;  %v1601_v53 = vld [vmem:[#allocation2 + $0x134] sm:$0xf0]  ;;  %v1492_v54 = vld [vmem:[#allocation2 + $0x1b0] sm:$0xf]  ;;  %v1365_v57 = vor.u32 %v1585_v51, %v1364_v49  ;;  %v1567_v60 = vld [vmem:[#allocation2 + $0x24] sm:$0xf0] }
  0x13   :  { %758 = vmatpush.bf16.msra.mxu3 %v1509_v38  ;;  %v1617_v55 = vld [vmem:[#allocation2 + $0x1b4] sm:$0xf0]  ;;  %v1429_v58 = vor.u32 %v1601_v53, %v1428_v52  ;;  %v1356_v61 = vld [vmem:[#allocation2 + $0xa0] sm:$0xf]  ;;  %v1583_v63 = vld [vmem:[#allocation2 + $0xa4] sm:$0xf0]  ;;  %v1293_v4 = vor.u32 %v1567_v60, %v1292_v59 }
  0x14   :  { %612 = vmatpush.bf16.msra.mxu0 %v1309_v44  ;;  %v1493_v62 = vor.u32 %v1617_v55, %v1492_v54  ;;  %v1420_v0 = vld [vmem:[#allocation2 + $0x120] sm:$0xf]  ;;  %v1599_v1 = vld [vmem:[#allocation2 + $0x124] sm:$0xf0]  ;;  %v1357_v5 = vor.u32 %v1583_v63, %v1356_v61  ;;  %v1284_v7 = vld [vmem:[#allocation2 + $0x10] sm:$0xf] }
  0x15   :  { %661 = vmatpush.bf16.msra.mxu1 %v1373_v45  ;;  %v1484_v2 = vld [vmem:[#allocation2 + $0x1a0] sm:$0xf]  ;;  %v1615_v3 = vld [vmem:[#allocation2 + $0x1a4] sm:$0xf0]  ;;  %v1421_v6 = vor.u32 %v1599_v1, %v1420_v0  ;;  %v1565_v8 = vld [vmem:[#allocation2 + $0x14] sm:$0xf0] }
  0x16   :  { %710 = vmatpush.bf16.msra.mxu2 %v1437_v46  ;;  %v1348_v9 = vld [vmem:[#allocation2 + $0x90] sm:$0xf]  ;;  %v1485_v10 = vor.u32 %v1615_v3, %v1484_v2  ;;  %v1581_v11 = vld [vmem:[#allocation2 + $0x94] sm:$0xf0]  ;;  %v1276_v16 = vld [vmem:[#allocation2] sm:$0xf]  ;;  %v1285_v17 = vor.u32 %v1565_v8, %v1284_v7 }
  0x17   :  { %759 = vmatpush.bf16.msra.mxu3 %v1501_v50  ;;  %v1412_v12 = vld [vmem:[#allocation2 + $0x110] sm:$0xf]  ;;  %v1597_v13 = vld [vmem:[#allocation2 + $0x114] sm:$0xf0]  ;;  %v1563_v18 = vld [vmem:[#allocation2 + $0x4] sm:$0xf0]  ;;  %v1349_v21 = vor.u32 %v1581_v11, %v1348_v9 }
  0x18   :  { %613 = vmatpush.bf16.msra.mxu0 %v1301_v56  ;;  %v1476_v14 = vld [vmem:[#allocation2 + $0x190] sm:$0xf]  ;;  %v1613_v15 = vld [vmem:[#allocation2 + $0x194] sm:$0xf0]  ;;  %v1340_v19 = vld [vmem:[#allocation2 + $0x80] sm:$0xf]  ;;  %v1413_v22 = vor.u32 %v1597_v13, %v1412_v12  ;;  %v1277_v34 = vor.u32 %v1563_v18, %v1276_v16 }
  0x19   :  { %662 = vmatpush.bf16.msra.mxu1 %v1365_v57  ;;  %v1579_v20 = vld [vmem:[#allocation2 + $0x84] sm:$0xf0]  ;;  %v1404_v23 = vld [vmem:[#allocation2 + $0x100] sm:$0xf]  ;;  %v1477_v26 = vor.u32 %v1613_v15, %v1476_v14  ;;  %v1532_v29 = vld [vmem:[%s2180_s0 + $0xc] sm:$0xf0] }
  0x1a   :  { %711 = vmatpush.bf16.msra.mxu2 %v1429_v58  ;;  %v1595_v24 = vld [vmem:[#allocation2 + $0x104] sm:$0xf0]  ;;  %v1468_v25 = vld [vmem:[#allocation2 + $0x180] sm:$0xf]  ;;  %v1530_v30 = vld [vmem:[%s2180_s0 + $0x4] sm:$0xf]  ;;  %v1341_v38 = vor.u32 %v1579_v20, %v1340_v19 }
  0x1b   :  { %760 = vmatpush.bf16.msra.mxu3 %v1493_v62  ;;  %v1611_v27 = vld [vmem:[#allocation2 + $0x184] sm:$0xf0]  ;;  %v1148_v28 = vld [vmem:[%s2180_s0] sm:$0xf]  ;;  %v1150_v31 = vld [vmem:[%s2180_s0 + $0x10] sm:$0xf0]  ;;  %v1405_v39 = vor.u32 %v1595_v24, %v1404_v23 }
  0x1c   :  { %614 = vmatpush.bf16.msra.mxu0 %v1293_v4  ;;  %v1608_v32 = vld [vmem:[#allocation2 + $0x174] sm:$0xf]  ;;  %v1462_v33 = vld [vmem:[#allocation2 + $0x178] sm:$0xf0]  ;;  %v1156_v35 = vld [vmem:[%s2180_s0 + $0x8] sm:$0xf]  ;;  %v1469_v43 = vor.u32 %v1611_v27, %v1468_v25  ;;  %v1710_v48 = vor.u32 %v1532_v29, %v1148_v28  ;;  %v1712_v53 = vor.u32 %v1530_v30, %v1150_v31 }
  0x1d   :  { %663 = vmatpush.bf16.msra.mxu1 %v1357_v5  ;;  %v1624_v36 = vld [vmem:[#allocation2 + $0x1f4] sm:$0xf]  ;;  %v1526_v37 = vld [vmem:[#allocation2 + $0x1f8] sm:$0xf0]  ;;  %v1533_v40 = vld [vmem:[%s2180_s0 + $0x14] sm:$0xf0]  ;;  %v1465_v44 = vor.u32 %v1608_v32, %v1462_v33 }
  0x1e   :  { %712 = vmatpush.bf16.msra.mxu2 %v1421_v6  ;;  %v1531_v41 = vld [vmem:[%s2180_s0 + $0xc] sm:$0xf]  ;;  %v1158_v42 = vld [vmem:[%s2180_s0 + $0x18] sm:$0xf0]  ;;  %v1576_v45 = vld [vmem:[#allocation2 + $0x74] sm:$0xf]  ;;  %v1529_v49 = vor.u32 %v1624_v36, %v1526_v37  ;;  %v1714_v54 = vor.u32 %v1533_v40, %v1156_v35 }
  0x1f   :  { %761 = vmatpush.bf16.msra.mxu3 %v1485_v10  ;;  %v1334_v46 = vld [vmem:[#allocation2 + $0x78] sm:$0xf0]  ;;  %v1592_v47 = vld [vmem:[#allocation2 + $0xf4] sm:$0xf]  ;;  %v1606_v51 = vld [vmem:[#allocation2 + $0x164] sm:$0xf]  ;;  %v1716_v57 = vor.u32 %v1531_v41, %v1158_v42 }
  0x20   :  { %615 = vmatpush.bf16.msra.mxu0 %v1285_v17  ;;  %v1398_v50 = vld [vmem:[#allocation2 + $0xf8] sm:$0xf0]  ;;  %v1454_v52 = vld [vmem:[#allocation2 + $0x168] sm:$0xf0]  ;;  %v1622_v55 = vld [vmem:[#allocation2 + $0x1e4] sm:$0xf]  ;;  %v1337_v58 = vor.u32 %v1576_v45, %v1334_v46 }
  0x21   :  { %664 = vmatpush.bf16.msra.mxu1 %v1349_v21  ;;  %v1518_v56 = vld [vmem:[#allocation2 + $0x1e8] sm:$0xf0]  ;;  %v1401_v59 = vor.u32 %v1592_v47, %v1398_v50  ;;  %v1457_v60 = vor.u32 %v1606_v51, %v1454_v52  ;;  %v1574_v61 = vld [vmem:[#allocation2 + $0x64] sm:$0xf]  ;;  %v1604_v3 = vld [vmem:[#allocation2 + $0x154] sm:$0xf] }
  0x22   :  { %713 = vmatpush.bf16.msra.mxu2 %v1413_v22  ;;  %v1326_v62 = vld [vmem:[#allocation2 + $0x68] sm:$0xf0]  ;;  %v1521_v63 = vor.u32 %v1622_v55, %v1518_v56  ;;  %v1590_v0 = vld [vmem:[#allocation2 + $0xe4] sm:$0xf]  ;;  %v1446_v4 = vld [vmem:[#allocation2 + $0x158] sm:$0xf0] }
  0x23   :  { %762 = vmatpush.bf16.msra.mxu3 %v1477_v26  ;;  %v1390_v1 = vld [vmem:[#allocation2 + $0xe8] sm:$0xf0]  ;;  %v1329_v2 = vor.u32 %v1574_v61, %v1326_v62  ;;  %v1620_v5 = vld [vmem:[#allocation2 + $0x1d4] sm:$0xf]  ;;  %v1449_v7 = vor.u32 %v1604_v3, %v1446_v4  ;;  %v1510_v8 = vld [vmem:[#allocation2 + $0x1d8] sm:$0xf0] }
  0x24   :  { %616 = vmatpush.bf16.msra.mxu0 %v1277_v34  ;;  %v1393_v6 = vor.u32 %v1590_v0, %v1390_v1  ;;  %v1572_v9 = vld [vmem:[#allocation2 + $0x54] sm:$0xf]  ;;  %v1318_v10 = vld [vmem:[#allocation2 + $0x58] sm:$0xf0]  ;;  %v1513_v11 = vor.u32 %v1620_v5, %v1510_v8  ;;  %v1164_v16 = vld [vmem:[%s2180_s0 + $0x20] sm:$0xf] }
  0x25   :  { %665 = vmatpush.bf16.msra.mxu1 %v1341_v38  ;;  %v1588_v12 = vld [vmem:[#allocation2 + $0xd4] sm:$0xf]  ;;  %v1382_v13 = vld [vmem:[#allocation2 + $0xd8] sm:$0xf0]  ;;  %v1321_v14 = vor.u32 %v1572_v9, %v1318_v10  ;;  %v1536_v17 = vld [vmem:[%s2180_s0 + $0x2c] sm:$0xf0] }
  0x26   :  { %714 = vmatpush.bf16.msra.mxu2 %v1405_v39  ;;  %v1385_v15 = vor.u32 %v1588_v12, %v1382_v13  ;;  %v1534_v18 = vld [vmem:[%s2180_s0 + $0x24] sm:$0xf]  ;;  %v1166_v19 = vld [vmem:[%s2180_s0 + $0x30] sm:$0xf0]  ;;  %v1172_v20 = vld [vmem:[%s2180_s0 + $0x28] sm:$0xf]  ;;  %v1746_v24 = vor.u32 %v1536_v17, %v1164_v16 }
  0x27   :  { %763 = vmatpush.bf16.msra.mxu3 %v1469_v43  ;;  %617 = vmatmul.bf16.vlgmr.msra.gmra.mxu0 %v1710_v48  ;;  %v1537_v21 = vld [vmem:[%s2180_s0 + $0x34] sm:$0xf0]  ;;  %v1535_v22 = vld [vmem:[%s2180_s0 + $0x2c] sm:$0xf]  ;;  %v1174_v23 = vld [vmem:[%s2180_s0 + $0x38] sm:$0xf0]  ;;  %v1748_v25 = vor.u32 %v1534_v18, %v1166_v19 }
  0x28   :  { %666 = vmatmul.bf16.vlgmr.msra.gmra.mxu1 %v1712_v53  ;;  %805 = vmatpush.bf16.msrb.mxu0 %v1337_v58  ;;  %v1750_v26 = vor.u32 %v1537_v21, %v1172_v20  ;;  %v1752_v27 = vor.u32 %v1535_v22, %v1174_v23  ;;  %v1602_v28 = vld [vmem:[#allocation2 + $0x144] sm:$0xf]  ;;  %v1438_v29 = vld [vmem:[#allocation2 + $0x148] sm:$0xf0]  ;;  %v1180_v40 = vld [vmem:[%s2180_s0 + $0x40] sm:$0xf] }
  0x29   :  { %715 = vmatmul.bf16.vlgmr.msra.gmra.mxu2 %v1714_v54  ;;  %854 = vmatpush.bf16.msrb.mxu1 %v1401_v59  ;;  %v1618_v30 = vld [vmem:[#allocation2 + $0x1c4] sm:$0xf]  ;;  %v1441_v31 = vor.u32 %v1602_v28, %v1438_v29  ;;  %v1502_v32 = vld [vmem:[#allocation2 + $0x1c8] sm:$0xf0]  ;;  %v1540_v41 = vld [vmem:[%s2180_s0 + $0x4c] sm:$0xf0] }
  0x2a   :  { %903 = vmatpush.bf16.msrb.mxu2 %v1465_v44  ;;  %764 = vmatmul.bf16.vlgmr.msra.gmra.mxu3 %v1716_v57  ;;  %v1570_v33 = vld [vmem:[#allocation2 + $0x44] sm:$0xf]  ;;  %v1310_v34 = vld [vmem:[#allocation2 + $0x48] sm:$0xf0]  ;;  %v1505_v35 = vor.u32 %v1618_v30, %v1502_v32  ;;  %v1182_v43 = vld [vmem:[%s2180_s0 + $0x50] sm:$0xf0] }
  0x2b   :  { %952 = vmatpush.bf16.msrb.mxu3 %v1529_v49  ;;  %v1313_v36 = vor.u32 %v1570_v33, %v1310_v34  ;;  %v1586_v37 = vld [vmem:[#allocation2 + $0xc4] sm:$0xf]  ;;  %v1374_v38 = vld [vmem:[#allocation2 + $0xc8] sm:$0xf0]  ;;  %v1188_v44 = vld [vmem:[%s2180_s0 + $0x48] sm:$0xf]  ;;  %v1782_v49 = vor.u32 %v1540_v41, %v1180_v40 }
  0x2c   :  { %806 = vmatpush.bf16.msrb.mxu0 %v1329_v2  ;;  %v1377_v39 = vor.u32 %v1586_v37, %v1374_v38  ;;  %v1538_v42 = vld [vmem:[%s2180_s0 + $0x44] sm:$0xf]  ;;  %v1541_v45 = vld [vmem:[%s2180_s0 + $0x54] sm:$0xf0]  ;;  %v1539_v46 = vld [vmem:[%s2180_s0 + $0x4c] sm:$0xf] }
  0x2d   :  { %855 = vmatpush.bf16.msrb.mxu1 %v1393_v6  ;;  %v1190_v47 = vld [vmem:[%s2180_s0 + $0x58] sm:$0xf0]  ;;  %v1784_v50 = vor.u32 %v1538_v42, %v1182_v43  ;;  %v1786_v51 = vor.u32 %v1541_v45, %v1188_v44  ;;  %v1600_v55 = vld [vmem:[#allocation2 + $0x134] sm:$0xf]  ;;  %v1196_v4 = vld [vmem:[%s2180_s0 + $0x60] sm:$0xf] }
  0x2e   :  { %904 = vmatpush.bf16.msrb.mxu2 %v1457_v60  ;;  %v1788_v52 = vor.u32 %v1539_v46, %v1190_v47  ;;  %v1430_v56 = vld [vmem:[#allocation2 + $0x138] sm:$0xf0]  ;;  %v1616_v58 = vld [vmem:[#allocation2 + $0x1b4] sm:$0xf]  ;;  %v1544_v5 = vld [vmem:[%s2180_s0 + $0x6c] sm:$0xf0] }
  0x2f   :  { %953 = vmatpush.bf16.msrb.mxu3 %v1521_v63  ;;  %v1433_v59 = vor.u32 %v1600_v55, %v1430_v56  ;;  %v1494_v60 = vld [vmem:[#allocation2 + $0x1b8] sm:$0xf0]  ;;  %v1568_v61 = vld [vmem:[#allocation2 + $0x34] sm:$0xf]  ;;  %v1542_v6 = vld [vmem:[%s2180_s0 + $0x64] sm:$0xf]  ;;  %v1818_v12 = vor.u32 %v1544_v5, %v1196_v4 }
  0x30   :  { %807 = vmatpush.bf16.msrb.mxu0 %v1321_v14  ;;  %v1302_v62 = vld [vmem:[#allocation2 + $0x38] sm:$0xf0]  ;;  %v1497_v63 = vor.u32 %v1616_v58, %v1494_v60  ;;  %v1584_v1 = vld [vmem:[#allocation2 + $0xb4] sm:$0xf]  ;;  %v1204_v8 = vld [vmem:[%s2180_s0 + $0x68] sm:$0xf] }
  0x31   :  { %856 = vmatpush.bf16.msrb.mxu1 %v1385_v15  ;;  %v1305_v0 = vor.u32 %v1568_v61, %v1302_v62  ;;  %v1366_v2 = vld [vmem:[#allocation2 + $0xb8] sm:$0xf0]  ;;  %v1545_v9 = vld [vmem:[%s2180_s0 + $0x74] sm:$0xf0]  ;;  %v1543_v10 = vld [vmem:[%s2180_s0 + $0x6c] sm:$0xf] }
  0x32   :  { %905 = vmatpush.bf16.msrb.mxu2 %v1449_v7  ;;  %v1369_v3 = vor.u32 %v1584_v1, %v1366_v2  ;;  %v1198_v7 = vld [vmem:[%s2180_s0 + $0x70] sm:$0xf0]  ;;  %v1822_v14 = vor.u32 %v1545_v9, %v1204_v8  ;;  %v1598_v16 = vld [vmem:[#allocation2 + $0x124] sm:$0xf]  ;;  %v1422_v17 = vld [vmem:[#allocation2 + $0x128] sm:$0xf0] }
  0x33   :  { %954 = vmatpush.bf16.msrb.mxu3 %v1513_v11  ;;  %v1206_v11 = vld [vmem:[%s2180_s0 + $0x78] sm:$0xf0]  ;;  %v1820_v13 = vor.u32 %v1542_v6, %v1198_v7  ;;  %v1614_v18 = vld [vmem:[#allocation2 + $0x1a4] sm:$0xf]  ;;  %v1425_v19 = vor.u32 %v1598_v16, %v1422_v17  ;;  %v1486_v20 = vld [vmem:[#allocation2 + $0x1a8] sm:$0xf0] }
  0x34   :  { %808 = vmatpush.bf16.msrb.mxu0 %v1313_v36  ;;  %v1824_v15 = vor.u32 %v1543_v10, %v1206_v11  ;;  %v1566_v21 = vld [vmem:[#allocation2 + $0x24] sm:$0xf]  ;;  %v1294_v22 = vld [vmem:[#allocation2 + $0x28] sm:$0xf0]  ;;  %v1489_v23 = vor.u32 %v1614_v18, %v1486_v20  ;;  %v1212_v32 = vld [vmem:[%s2180_s0 + $0x80] sm:$0xf] }
  0x35   :  { %857 = vmatpush.bf16.msrb.mxu1 %v1377_v39  ;;  %v1297_v28 = vor.u32 %v1566_v21, %v1294_v22  ;;  %v1582_v29 = vld [vmem:[#allocation2 + $0xa4] sm:$0xf]  ;;  %v1358_v30 = vld [vmem:[#allocation2 + $0xa8] sm:$0xf0]  ;;  %v1548_v33 = vld [vmem:[%s2180_s0 + $0x8c] sm:$0xf0] }
  0x36   :  { %906 = vmatpush.bf16.msrb.mxu2 %v1441_v31  ;;  %v1361_v31 = vor.u32 %v1582_v29, %v1358_v30  ;;  %v1546_v34 = vld [vmem:[%s2180_s0 + $0x84] sm:$0xf]  ;;  %v1220_v36 = vld [vmem:[%s2180_s0 + $0x88] sm:$0xf]  ;;  %v1549_v37 = vld [vmem:[%s2180_s0 + $0x94] sm:$0xf0]  ;;  %v1854_v40 = vor.u32 %v1548_v33, %v1212_v32 }
  0x37   :  { %622 = vmatmul.bf16.gmra.mxu0 %v1746_v24  ;;  %955 = vmatpush.bf16.msrb.mxu3 %v1505_v35  ;;  %v1214_v35 = vld [vmem:[%s2180_s0 + $0x90] sm:$0xf0]  ;;  %v1547_v38 = vld [vmem:[%s2180_s0 + $0x8c] sm:$0xf]  ;;  %v1222_v39 = vld [vmem:[%s2180_s0 + $0x98] sm:$0xf0]  ;;  %v1858_v42 = vor.u32 %v1549_v37, %v1220_v36 }
  0x38   :  { %671 = vmatmul.bf16.gmra.mxu1 %v1748_v25  ;;  %809 = vmatpush.bf16.msrb.mxu0 %v1305_v0  ;;  %v1856_v41 = vor.u32 %v1546_v34, %v1214_v35  ;;  %v1860_v43 = vor.u32 %v1547_v38, %v1222_v39  ;;  %v1596_v44 = vld [vmem:[#allocation2 + $0x114] sm:$0xf]  ;;  %v1414_v45 = vld [vmem:[#allocation2 + $0x118] sm:$0xf0]  ;;  %v1228_v0 = vld [vmem:[%s2180_s0 + $0xa0] sm:$0xf] }
  0x39   :  { %720 = vmatmul.bf16.gmra.mxu2 %v1750_v26  ;;  %858 = vmatpush.bf16.msrb.mxu1 %v1369_v3  ;;  %v1612_v46 = vld [vmem:[#allocation2 + $0x194] sm:$0xf]  ;;  %v1417_v47 = vor.u32 %v1596_v44, %v1414_v45  ;;  %v1478_v55 = vld [vmem:[#allocation2 + $0x198] sm:$0xf0]  ;;  %v1552_v1 = vld [vmem:[%s2180_s0 + $0xac] sm:$0xf0] }
  0x3a   :  { %769 = vmatmul.bf16.gmra.mxu3 %v1752_v27  ;;  %907 = vmatpush.bf16.msrb.mxu2 %v1433_v59  ;;  %v1564_v56 = vld [vmem:[#allocation2 + $0x14] sm:$0xf]  ;;  %v1286_v58 = vld [vmem:[#allocation2 + $0x18] sm:$0xf0]  ;;  %v1481_v59 = vor.u32 %v1612_v46, %v1478_v55  ;;  %v1550_v2 = vld [vmem:[%s2180_s0 + $0xa4] sm:$0xf]  ;;  %v1890_v8 = vor.u32 %v1552_v1, %v1228_v0 }
  0x3b   :  { %956 = vmatpush.bf16.msrb.mxu3 %v1497_v63  ;;  %v1289_v60 = vor.u32 %v1564_v56, %v1286_v58  ;;  %v1580_v61 = vld [vmem:[#allocation2 + $0x94] sm:$0xf]  ;;  %v1350_v62 = vld [vmem:[#allocation2 + $0x98] sm:$0xf0]  ;;  %v1236_v4 = vld [vmem:[%s2180_s0 + $0xa8] sm:$0xf] }
  0x3c   :  { %810 = vmatpush.bf16.msrb.mxu0 %v1297_v28  ;;  %v1353_v63 = vor.u32 %v1580_v61, %v1350_v62  ;;  %v1230_v3 = vld [vmem:[%s2180_s0 + $0xb0] sm:$0xf0]  ;;  %v1553_v5 = vld [vmem:[%s2180_s0 + $0xb4] sm:$0xf0]  ;;  %v1551_v6 = vld [vmem:[%s2180_s0 + $0xac] sm:$0xf] }
  0x3d   :  { %859 = vmatpush.bf16.msrb.mxu1 %v1361_v31  ;;  %v1238_v7 = vld [vmem:[%s2180_s0 + $0xb8] sm:$0xf0]  ;;  %v1892_v9 = vor.u32 %v1550_v2, %v1230_v3  ;;  %v1894_v10 = vor.u32 %v1553_v5, %v1236_v4  ;;  %v1594_v16 = vld [vmem:[#allocation2 + $0x104] sm:$0xf]  ;;  %v1406_v17 = vld [vmem:[#allocation2 + $0x108] sm:$0xf0] }
  0x3e   :  { %908 = vmatpush.bf16.msrb.mxu2 %v1425_v19  ;;  %v1896_v11 = vor.u32 %v1551_v6, %v1238_v7  ;;  %v1610_v18 = vld [vmem:[#allocation2 + $0x184] sm:$0xf]  ;;  %v1409_v19 = vor.u32 %v1594_v16, %v1406_v17  ;;  %v1470_v20 = vld [vmem:[#allocation2 + $0x188] sm:$0xf0]  ;;  %v1244_v32 = vld [vmem:[%s2180_s0 + $0xc0] sm:$0xf] }
  0x3f   :  { %957 = vmatpush.bf16.msrb.mxu3 %v1489_v23  ;;  %v1562_v21 = vld [vmem:[#allocation2 + $0x4] sm:$0xf]  ;;  %v1278_v22 = vld [vmem:[#allocation2 + $0x8] sm:$0xf0]  ;;  %v1473_v23 = vor.u32 %v1610_v18, %v1470_v20  ;;  %v1556_v33 = vld [vmem:[%s2180_s0 + $0xcc] sm:$0xf0] }
  0x40   :  { %811 = vmatpush.bf16.msrb.mxu0 %v1289_v60  ;;  %v1281_v28 = vor.u32 %v1562_v21, %v1278_v22  ;;  %v1578_v29 = vld [vmem:[#allocation2 + $0x84] sm:$0xf]  ;;  %v1342_v30 = vld [vmem:[#allocation2 + $0x88] sm:$0xf0]  ;;  %v1246_v35 = vld [vmem:[%s2180_s0 + $0xd0] sm:$0xf0]  ;;  %v1926_v44 = vor.u32 %v1556_v33, %v1244_v32 }
  0x41   :  { %860 = vmatpush.bf16.msrb.mxu1 %v1353_v63  ;;  %v1345_v31 = vor.u32 %v1578_v29, %v1342_v30  ;;  %v1554_v34 = vld [vmem:[%s2180_s0 + $0xc4] sm:$0xf]  ;;  %v1252_v36 = vld [vmem:[%s2180_s0 + $0xc8] sm:$0xf]  ;;  %v1557_v37 = vld [vmem:[%s2180_s0 + $0xd4] sm:$0xf0] }
  0x42   :  { %909 = vmatpush.bf16.msrb.mxu2 %v1417_v47  ;;  %v1555_v38 = vld [vmem:[%s2180_s0 + $0xcc] sm:$0xf]  ;;  %v1254_v39 = vld [vmem:[%s2180_s0 + $0xd8] sm:$0xf0]  ;;  %v1928_v45 = vor.u32 %v1554_v34, %v1246_v35  ;;  %v1930_v46 = vor.u32 %v1557_v37, %v1252_v36  ;;  %v1260_v55 = vld [vmem:[%s2180_s0 + $0xe0] sm:$0xf] }
  0x43   :  { %958 = vmatpush.bf16.msrb.mxu3 %v1481_v59  ;;  %v1932_v47 = vor.u32 %v1555_v38, %v1254_v39  ;;  %v1560_v56 = vld [vmem:[%s2180_s0 + $0xec] sm:$0xf0]  ;;  %v1558_v58 = vld [vmem:[%s2180_s0 + $0xe4] sm:$0xf]  ;;  %v1262_v59 = vld [vmem:[%s2180_s0 + $0xf0] sm:$0xf0] }
  0x44   :  { %812 = vmatpush.bf16.msrb.mxu0 %v1281_v28  ;;  %v1268_v60 = vld [vmem:[%s2180_s0 + $0xe8] sm:$0xf]  ;;  %v1561_v61 = vld [vmem:[%s2180_s0 + $0xf4] sm:$0xf0]  ;;  %v1559_v62 = vld [vmem:[%s2180_s0 + $0xec] sm:$0xf]  ;;  %v1962_v0 = vor.u32 %v1560_v56, %v1260_v55  ;;  %v1964_v1 = vor.u32 %v1558_v58, %v1262_v59 }
  0x45   :  { %861 = vmatpush.bf16.msrb.mxu1 %v1345_v31  ;;  %v1270_v63 = vld [vmem:[%s2180_s0 + $0xf8] sm:$0xf0]  ;;  %v1966_v2 = vor.u32 %v1561_v61, %v1268_v60 }
  0x46   :  { %910 = vmatpush.bf16.msrb.mxu2 %v1409_v19  ;;  %v1968_v3 = vor.u32 %v1559_v62, %v1270_v63 }
  0x47   :  { %627 = vmatmul.bf16.gmra.mxu0 %v1782_v49  ;;  %959 = vmatpush.bf16.msrb.mxu3 %v1473_v23 }
  0x48   :  { %676 = vmatmul.bf16.gmra.mxu1 %v1784_v50 }
  0x49   :  { %725 = vmatmul.bf16.gmra.mxu2 %v1786_v51 }
  0x4a   :  { %774 = vmatmul.bf16.gmra.mxu3 %v1788_v52 }
  0x57   :  { %632 = vmatmul.bf16.gmra.mxu0 %v1818_v12 }
  0x58   :  { %681 = vmatmul.bf16.gmra.mxu1 %v1820_v13 }
  0x59   :  { %730 = vmatmul.bf16.gmra.mxu2 %v1822_v14 }
  0x5a   :  { %779 = vmatmul.bf16.gmra.mxu3 %v1824_v15 }
  0x67   :  { %637 = vmatmul.bf16.gmra.mxu0 %v1854_v40 }
  0x68   :  { %686 = vmatmul.bf16.gmra.mxu1 %v1856_v41 }
  0x69   :  { %735 = vmatmul.bf16.gmra.mxu2 %v1858_v42 }
  0x6a   :  { %784 = vmatmul.bf16.gmra.mxu3 %v1860_v43 }
  0x77   :  { %642 = vmatmul.bf16.gmra.mxu0 %v1890_v8 }
  0x78   :  { %691 = vmatmul.bf16.gmra.mxu1 %v1892_v9 }
  0x79   :  { %740 = vmatmul.bf16.gmra.mxu2 %v1894_v10 }
  0x7a   :  { %789 = vmatmul.bf16.gmra.mxu3 %v1896_v11 }
  0x87   :  { %647 = vmatmul.bf16.gmra.mxu0 %v1926_v44 }
  0x88   :  { %696 = vmatmul.bf16.gmra.mxu1 %v1928_v45 }
  0x89   :  { %745 = vmatmul.bf16.gmra.mxu2 %v1930_v46 }
  0x8a   :  { %794 = vmatmul.bf16.gmra.mxu3 %v1932_v47 }
  0x97   :  { %652 = vmatmul.bf16.gmra.mxu0 %v1962_v0 }
  0x98   :  { %701 = vmatmul.bf16.gmra.mxu1 %v1964_v1 }
  0x99   :  { %750 = vmatmul.bf16.gmra.mxu2 %v1966_v2 }
  0x9a   :  { %799 = vmatmul.bf16.gmra.mxu3 %v1968_v3 }
  0xa4   :  { %v618_v4 = vpop.f32.mrf.mxu0 }
  0xa5   :  { %v667_v5 = vpop.f32.mrf.mxu1 }
  0xa6   :  { %v668_v6 = vadd.f32 %v667_v5, %v618_v4 }
  0xa7   :  { %813 = vmatmul.bf16.vlgmr.msrb.gmra.mxu0 %v1710_v48 }
  0xa8   :  { %862 = vmatmul.bf16.vlgmr.msrb.gmra.mxu1 %v1712_v53 }
  0xa9   :  { %911 = vmatmul.bf16.vlgmr.msrb.gmra.mxu2 %v1714_v54 }
  0xaa   :  { %960 = vmatmul.bf16.vlgmr.msrb.gmra.mxu3 %v1716_v57 }
  0xac   :  { %v716_v7 = vpop.f32.mrf.mxu2  ;;  %v620_v18 = vpop.f32.mrf.mxu0 }
  0xad   :  { %v717_v16 = vadd.f32 %v716_v7, %v668_v6  ;;  %v765_v17 = vpop.f32.mrf.mxu3  ;;  %v669_v19 = vpop.f32.mrf.mxu1 }
  0xae   :  { %v670_v21 = vadd.f32 %v669_v19, %v620_v18 }
  0xaf   :  { %v1978_v20 = vadd.f32 %v765_v17, %v717_v16 }
  0xb4   :  { %v718_v22 = vpop.f32.mrf.mxu2  ;;  %v623_v29 = vpop.f32.mrf.mxu0 }
  0xb5   :  { %v719_v23 = vadd.f32 %v718_v22, %v670_v21  ;;  %v767_v28 = vpop.f32.mrf.mxu3  ;;  %v672_v30 = vpop.f32.mrf.mxu1 }
  0xb6   :  { %v673_v53 = vadd.f32 %v672_v30, %v623_v29 }
  0xb7   :  { %v1980_v48 = vadd.f32 %v767_v28, %v719_v23  ;;  %818 = vmatmul.bf16.gmra.mxu0 %v1746_v24 }
  0xb8   :  { %867 = vmatmul.bf16.gmra.mxu1 %v1748_v25 }
  0xb9   :  { %916 = vmatmul.bf16.gmra.mxu2 %v1750_v26 }
  0xba   :  { %965 = vmatmul.bf16.gmra.mxu3 %v1752_v27 }
  0xbc   :  { %v721_v54 = vpop.f32.mrf.mxu2  ;;  %v625_v32 = vpop.f32.mrf.mxu0 }
  0xbd   :  { %v722_v57 = vadd.f32 %v721_v54, %v673_v53  ;;  %v770_v31 = vpop.f32.mrf.mxu3  ;;  %v674_v33 = vpop.f32.mrf.mxu1 }
  0xbe   :  { %v675_v35 = vadd.f32 %v674_v33, %v625_v32 }
  0xbf   :  { %v1986_v34 = vadd.f32 %v770_v31, %v722_v57 }
  0xc4   :  { %v723_v36 = vpop.f32.mrf.mxu2  ;;  %v628_v39 = vpop.f32.mrf.mxu0 }
  0xc5   :  { %v724_v37 = vadd.f32 %v723_v36, %v675_v35  ;;  %v772_v38 = vpop.f32.mrf.mxu3  ;;  %v677_v55 = vpop.f32.mrf.mxu1 }
  0xc6   :  { %v678_v25 = vadd.f32 %v677_v55, %v628_v39 }
  0xc7   :  { %v1988_v24 = vadd.f32 %v772_v38, %v724_v37  ;;  %823 = vmatmul.bf16.gmra.mxu0 %v1782_v49 }
  0xc8   :  { %872 = vmatmul.bf16.gmra.mxu1 %v1784_v50 }
  0xc9   :  { %921 = vmatmul.bf16.gmra.mxu2 %v1786_v51 }
  0xca   :  { %970 = vmatmul.bf16.gmra.mxu3 %v1788_v52 }
  0xcc   :  { %v726_v26 = vpop.f32.mrf.mxu2  ;;  %v630_v58 = vpop.f32.mrf.mxu0 }
  0xcd   :  { %v727_v27 = vadd.f32 %v726_v26, %v678_v25  ;;  %v775_v56 = vpop.f32.mrf.mxu3  ;;  %v679_v59 = vpop.f32.mrf.mxu1 }
  0xce   :  { %v680_v61 = vadd.f32 %v679_v59, %v630_v58 }
  0xcf   :  { %v1994_v60 = vadd.f32 %v775_v56, %v727_v27 }
  0xd4   :  { %v728_v62 = vpop.f32.mrf.mxu2  ;;  %v633_v5 = vpop.f32.mrf.mxu0 }
  0xd5   :  { %v729_v63 = vadd.f32 %v728_v62, %v680_v61  ;;  %v777_v4 = vpop.f32.mrf.mxu3  ;;  %v682_v6 = vpop.f32.mrf.mxu1 }
  0xd6   :  { %v683_v50 = vadd.f32 %v682_v6, %v633_v5 }
  0xd7   :  { %v1996_v49 = vadd.f32 %v777_v4, %v729_v63  ;;  %828 = vmatmul.bf16.gmra.mxu0 %v1818_v12 }
  0xd8   :  { %877 = vmatmul.bf16.gmra.mxu1 %v1820_v13 }
  0xd9   :  { %926 = vmatmul.bf16.gmra.mxu2 %v1822_v14 }
  0xda   :  { %975 = vmatmul.bf16.gmra.mxu3 %v1824_v15 }
  0xdc   :  { %v731_v51 = vpop.f32.mrf.mxu2  ;;  %v635_v16 = vpop.f32.mrf.mxu0 }
  0xdd   :  { %v732_v52 = vadd.f32 %v731_v51, %v683_v50  ;;  %v780_v7 = vpop.f32.mrf.mxu3  ;;  %v684_v17 = vpop.f32.mrf.mxu1 }
  0xde   :  { %v685_v19 = vadd.f32 %v684_v17, %v635_v16 }
  0xdf   :  { %v2002_v18 = vadd.f32 %v780_v7, %v732_v52 }
  0xe4   :  { %v733_v21 = vpop.f32.mrf.mxu2  ;;  %v638_v28 = vpop.f32.mrf.mxu0 }
  0xe5   :  { %v734_v22 = vadd.f32 %v733_v21, %v685_v19  ;;  %v782_v23 = vpop.f32.mrf.mxu3  ;;  %v687_v29 = vpop.f32.mrf.mxu1 }
  0xe6   :  { %v688_v13 = vadd.f32 %v687_v29, %v638_v28 }
  0xe7   :  { %v2004_v12 = vadd.f32 %v782_v23, %v734_v22  ;;  %833 = vmatmul.bf16.gmra.mxu0 %v1854_v40 }
  0xe8   :  { %882 = vmatmul.bf16.gmra.mxu1 %v1856_v41 }
  0xe9   :  { %931 = vmatmul.bf16.gmra.mxu2 %v1858_v42 }
  0xea   :  { %980 = vmatmul.bf16.gmra.mxu3 %v1860_v43 }
  0xec   :  { %v736_v14 = vpop.f32.mrf.mxu2  ;;  %v640_v53 = vpop.f32.mrf.mxu0 }
  0xed   :  { %v737_v15 = vadd.f32 %v736_v14, %v688_v13  ;;  %v785_v30 = vpop.f32.mrf.mxu3  ;;  %v689_v54 = vpop.f32.mrf.mxu1 }
  0xee   :  { %v690_v31 = vadd.f32 %v689_v54, %v640_v53 }
  0xef   :  { %v2010_v57 = vadd.f32 %v785_v30, %v737_v15  ;;  %v1039_v30 = vld [vmem:[%s2183_s3] sm:$0x3] }
  0xf4   :  { %v738_v32 = vpop.f32.mrf.mxu2  ;;  %v643_v36 = vpop.f32.mrf.mxu0 }
  0xf5   :  { %v739_v33 = vadd.f32 %v738_v32, %v690_v31  ;;  %v787_v35 = vpop.f32.mrf.mxu3  ;;  %v692_v37 = vpop.f32.mrf.mxu1  ;;  %v2048_v31 = vperm.slane %v1039_v30, 0 }
  0xf6   :  { %v693_v41 = vadd.f32 %v692_v37, %v643_v36 }
  0xf7   :  { %v2012_v40 = vadd.f32 %v787_v35, %v739_v33  ;;  %838 = vmatmul.bf16.gmra.mxu0 %v1890_v8 }
  0xf8   :  { %887 = vmatmul.bf16.gmra.mxu1 %v1892_v9 }
  0xf9   :  { %936 = vmatmul.bf16.gmra.mxu2 %v1894_v10 }
  0xfa   :  { %985 = vmatmul.bf16.gmra.mxu3 %v1896_v11 }
  0xfc   :  { %v741_v42 = vpop.f32.mrf.mxu2  ;;  %v645_v39 = vpop.f32.mrf.mxu0 }
  0xfd   :  { %v742_v43 = vadd.f32 %v741_v42, %v693_v41  ;;  %v790_v38 = vpop.f32.mrf.mxu3  ;;  %v694_v55 = vpop.f32.mrf.mxu1  ;;  %v2052_v42 = vperm.slane %v1039_v30, 1 }
  0xfe   :  { %v695_v26 = vadd.f32 %v694_v55, %v645_v39 }
  0xff   :  { %v2018_v25 = vadd.f32 %v790_v38, %v742_v43 }
 0x104   :  { %v743_v27 = vpop.f32.mrf.mxu2  ;;  %v648_v59 = vpop.f32.mrf.mxu0 }
 0x105   :  { %v744_v56 = vadd.f32 %v743_v27, %v695_v26  ;;  %v792_v58 = vpop.f32.mrf.mxu3  ;;  %v697_v61 = vpop.f32.mrf.mxu1 }
 0x106   :  { %v698_v9 = vadd.f32 %v697_v61, %v648_v59 }
 0x107   :  { %v2020_v8 = vadd.f32 %v792_v58, %v744_v56  ;;  %843 = vmatmul.bf16.gmra.mxu0 %v1926_v44 }
 0x108   :  { %892 = vmatmul.bf16.gmra.mxu1 %v1928_v45 }
 0x109   :  { %941 = vmatmul.bf16.gmra.mxu2 %v1930_v46 }
 0x10a   :  { %990 = vmatmul.bf16.gmra.mxu3 %v1932_v47 }
 0x10c   :  { %v746_v10 = vpop.f32.mrf.mxu2  ;;  %v650_v63 = vpop.f32.mrf.mxu0 }
 0x10d   :  { %v747_v11 = vadd.f32 %v746_v10, %v698_v9  ;;  %v795_v62 = vpop.f32.mrf.mxu3  ;;  %v699_v4 = vpop.f32.mrf.mxu1 }
 0x10e   :  { %v700_v6 = vadd.f32 %v699_v4, %v650_v63 }
 0x10f   :  { %v2026_v5 = vadd.f32 %v795_v62, %v747_v11 }
 0x114   :  { %v748_v50 = vpop.f32.mrf.mxu2  ;;  %v653_v7 = vpop.f32.mrf.mxu0 }
 0x115   :  { %v749_v51 = vadd.f32 %v748_v50, %v700_v6  ;;  %v797_v52 = vpop.f32.mrf.mxu3  ;;  %v702_v16 = vpop.f32.mrf.mxu1 }
 0x116   :  { %v703_v45 = vadd.f32 %v702_v16, %v653_v7 }
 0x117   :  { %v2028_v44 = vadd.f32 %v797_v52, %v749_v51  ;;  %848 = vmatmul.bf16.gmra.mxu0 %v1962_v0  ;;  %v1001_v0 = vld [vmem:[%s2182_s2] sm:$0x3] }
 0x118   :  { %897 = vmatmul.bf16.gmra.mxu1 %v1964_v1  ;;  %v2050_v35 = vperm.slane %v1001_v0, 1 }
 0x119   :  { %946 = vmatmul.bf16.gmra.mxu2 %v1966_v2 }
 0x11a   :  { %995 = vmatmul.bf16.gmra.mxu3 %v1968_v3  ;;  %v2041_v3 = vperm.slane %v1001_v0, 0 }
 0x11c   :  { %v751_v46 = vpop.f32.mrf.mxu2  ;;  %v655_v19 = vpop.f32.mrf.mxu0  ;;  %v1007_v54 = vmul.f32 %v2041_v3, %v1978_v20  ;;  %v1009_v27 = vmul.f32 %v2041_v3, %v1980_v48  ;;  %v1011_v51 = vmul.f32 %v2041_v3, %v1986_v34 }
 0x11d   :  { %v752_v47 = vadd.f32 %v751_v46, %v703_v45  ;;  %v800_v17 = vpop.f32.mrf.mxu3  ;;  %v704_v21 = vpop.f32.mrf.mxu1 }
 0x11e   :  { %v705_v23 = vadd.f32 %v704_v21, %v655_v19  ;;  %v1045_v43 = vadd.f32 %v2048_v31, %v1007_v54  ;;  %v1047_v62 = vadd.f32 %v2048_v31, %v1009_v27  ;;  %v1049_v19 = vadd.f32 %v2048_v31, %v1011_v51 }
 0x11f   :  { %v2034_v22 = vadd.f32 %v800_v17, %v752_v47 }
 0x120   :  { %v1077_v20 = vmax.f32 %v1045_v43, 0.0  ;;  %v1079_v48 = vmax.f32 %v1047_v62, 0.0  ;;  %v1081_v34 = vmax.f32 %v1049_v19, 0.0  ;;  %v1015_v43 = vmul.f32 %v2041_v3, %v1994_v60 }
 0x124   :  { %v753_v28 = vpop.f32.mrf.mxu2  ;;  %v814_v14 = vpop.f32.mrf.mxu0 }
 0x125   :  { %v754_v29 = vadd.f32 %v753_v28, %v705_v23  ;;  %v802_v13 = vpop.f32.mrf.mxu3  ;;  %v863_v1 = vpop.f32.mrf.mxu1 }
 0x126   :  { %v864_v15 = vadd.f32 %v863_v1, %v814_v14 }
 0x127   :  { %v2039_v2 = vadd.f32 %v802_v13, %v754_v29  ;;  %v1013_v13 = vmul.f32 %v2041_v3, %v1988_v24 }
 0x12c   :  { %v912_v53 = vpop.f32.mrf.mxu2  ;;  %v816_v36 = vpop.f32.mrf.mxu0 }
 0x12d   :  { %v913_v32 = vadd.f32 %v912_v53, %v864_v15  ;;  %v961_v33 = vpop.f32.mrf.mxu3  ;;  %v865_v37 = vpop.f32.mrf.mxu1 }
 0x12e   :  { %v866_v55 = vadd.f32 %v865_v37, %v816_v36 }
 0x12f   :  { %v962_v41 = vadd.f32 %v961_v33, %v913_v32  ;;  %v1051_v32 = vadd.f32 %v2048_v31, %v1013_v13 }
 0x131   :  { %v1008_v38 = vmul.f32 %v2050_v35, %v962_v41  ;;  %v1083_v24 = vmax.f32 %v1051_v32, 0.0 }
 0x133   :  { %v1046_v39 = vadd.f32 %v2052_v42, %v1008_v38 }
 0x134   :  { %v914_v26 = vpop.f32.mrf.mxu2  ;;  %v819_v61 = vpop.f32.mrf.mxu0 }
 0x135   :  { %v1078_v56 = vmax.f32 %v1046_v39, 0.0  ;;  %v915_v58 = vadd.f32 %v914_v26, %v866_v55  ;;  %v963_v59 = vpop.f32.mrf.mxu3  ;;  %v868_v9 = vpop.f32.mrf.mxu1 }
 0x136   :  { %v869_v4 = vadd.f32 %v868_v9, %v819_v61 }
 0x137   :  { %v1109_v10 = vpack.c.bf16 %v1078_v56, %v1077_v20  ;;  %v964_v11 = vadd.f32 %v963_v59, %v915_v58  ;;  %v1053_v58 = vadd.f32 %v2048_v31, %v1015_v43 }
 0x139   :  { %1125 = vst [vmem:[%s2184_s4] sm:$0xff] %v1109_v10  ;;  %v1010_v63 = vmul.f32 %v2050_v35, %v964_v11  ;;  %v1085_v60 = vmax.f32 %v1053_v58, 0.0  ;;  %v1017_v11 = vmul.f32 %v2041_v3, %v1996_v49 }
 0x13b   :  { %v1048_v6 = vadd.f32 %v2052_v42, %v1010_v63 }
 0x13c   :  { %v917_v50 = vpop.f32.mrf.mxu2  ;;  %v821_v45 = vpop.f32.mrf.mxu0 }
 0x13d   :  { %v1080_v52 = vmax.f32 %v1048_v6, 0.0  ;;  %v918_v7 = vadd.f32 %v917_v50, %v869_v4  ;;  %v966_v16 = vpop.f32.mrf.mxu3  ;;  %v870_v46 = vpop.f32.mrf.mxu1 }
 0x13e   :  { %v871_v28 = vadd.f32 %v870_v46, %v821_v45 }
 0x13f   :  { %v1110_v47 = vpack.c.bf16 %v1080_v52, %v1079_v48  ;;  %v967_v17 = vadd.f32 %v966_v16, %v918_v7  ;;  %v1055_v52 = vadd.f32 %v2048_v31, %v1017_v11 }
 0x141   :  { %1126 = vst [vmem:[%s2184_s4 + $0x8] sm:$0xff] %v1110_v47  ;;  %v1012_v21 = vmul.f32 %v2050_v35, %v967_v17  ;;  %v1087_v49 = vmax.f32 %v1055_v52, 0.0  ;;  %v1019_v47 = vmul.f32 %v2041_v3, %v2002_v18 }
 0x143   :  { %v1050_v23 = vadd.f32 %v2052_v42, %v1012_v21  ;;  %v1057_v13 = vadd.f32 %v2048_v31, %v1019_v47 }
 0x144   :  { %v919_v29 = vpop.f32.mrf.mxu2  ;;  %v824_v15 = vpop.f32.mrf.mxu0 }
 0x145   :  { %v1082_v14 = vmax.f32 %v1050_v23, 0.0  ;;  %v920_v0 = vadd.f32 %v919_v29, %v871_v28  ;;  %v968_v1 = vpop.f32.mrf.mxu3  ;;  %v873_v30 = vpop.f32.mrf.mxu1  ;;  %v1089_v18 = vmax.f32 %v1057_v13, 0.0 }
 0x146   :  { %v874_v36 = vadd.f32 %v873_v30, %v824_v15  ;;  %v1021_v30 = vmul.f32 %v2041_v3, %v2004_v12 }
 0x147   :  { %v1111_v53 = vpack.c.bf16 %v1082_v14, %v1081_v34  ;;  %v969_v54 = vadd.f32 %v968_v1, %v920_v0 }
 0x149   :  { %1127 = vst [vmem:[%s2184_s4 + $0x10] sm:$0xff] %v1111_v53  ;;  %v1014_v33 = vmul.f32 %v2050_v35, %v969_v54 }
 0x14b   :  { %v1052_v37 = vadd.f32 %v2052_v42, %v1014_v33 }
 0x14c   :  { %v922_v41 = vpop.f32.mrf.mxu2  ;;  %v826_v26 = vpop.f32.mrf.mxu0 }
 0x14d   :  { %v1084_v38 = vmax.f32 %v1052_v37, 0.0  ;;  %v923_v39 = vadd.f32 %v922_v41, %v874_v36  ;;  %v971_v55 = vpop.f32.mrf.mxu3  ;;  %v875_v20 = vpop.f32.mrf.mxu1 }
 0x14e   :  { %v876_v9 = vadd.f32 %v875_v20, %v826_v26  ;;  %v1023_v26 = vmul.f32 %v2041_v3, %v2010_v57 }
 0x14f   :  { %v1112_v27 = vpack.c.bf16 %v1084_v38, %v1083_v24  ;;  %v972_v56 = vadd.f32 %v971_v55, %v923_v39  ;;  %v1059_v24 = vadd.f32 %v2048_v31, %v1021_v30 }
 0x151   :  { %1128 = vst [vmem:[%s2184_s4 + $0x18] sm:$0xff] %v1112_v27  ;;  %v1016_v59 = vmul.f32 %v2050_v35, %v972_v56  ;;  %v1091_v12 = vmax.f32 %v1059_v24, 0.0 }
 0x153   :  { %v1054_v61 = vadd.f32 %v2052_v42, %v1016_v59 }
 0x154   :  { %v924_v10 = vpop.f32.mrf.mxu2  ;;  %v829_v6 = vpop.f32.mrf.mxu0 }
 0x155   :  { %v1086_v62 = vmax.f32 %v1054_v61, 0.0  ;;  %v925_v63 = vadd.f32 %v924_v10, %v876_v9  ;;  %v973_v4 = vpop.f32.mrf.mxu3  ;;  %v878_v50 = vpop.f32.mrf.mxu1  ;;  %v1061_v10 = vadd.f32 %v2048_v31, %v1023_v26  ;;  %v1031_v26 = vmul.f32 %v2041_v3, %v2026_v5 }
 0x156   :  { %v879_v16 = vadd.f32 %v878_v50, %v829_v6 }
 0x157   :  { %v1113_v48 = vpack.c.bf16 %v1086_v62, %v1085_v60  ;;  %v974_v51 = vadd.f32 %v973_v4, %v925_v63  ;;  %v1093_v57 = vmax.f32 %v1061_v10, 0.0  ;;  %v1025_v4 = vmul.f32 %v2041_v3, %v2012_v40 }
 0x158   :  { %v1069_v10 = vadd.f32 %v2048_v31, %v1031_v26 }
 0x159   :  { %1129 = vst [vmem:[%s2184_s4 + $0x20] sm:$0xff] %v1113_v48  ;;  %v1018_v7 = vmul.f32 %v2050_v35, %v974_v51 }
 0x15a   :  { %v1101_v5 = vmax.f32 %v1069_v10, 0.0 }
 0x15b   :  { %v1056_v45 = vadd.f32 %v2052_v42, %v1018_v7 }
 0x15c   :  { %v927_v46 = vpop.f32.mrf.mxu2  ;;  %v831_v23 = vpop.f32.mrf.mxu0 }
 0x15d   :  { %v1088_v17 = vmax.f32 %v1056_v45, 0.0  ;;  %v928_v19 = vadd.f32 %v927_v46, %v879_v16  ;;  %v976_v21 = vpop.f32.mrf.mxu3  ;;  %v880_v28 = vpop.f32.mrf.mxu1  ;;  %v1063_v45 = vadd.f32 %v2048_v31, %v1025_v4 }
 0x15e   :  { %v881_v1 = vadd.f32 %v880_v28, %v831_v23 }
 0x15f   :  { %v1114_v29 = vpack.c.bf16 %v1088_v17, %v1087_v49  ;;  %v977_v34 = vadd.f32 %v976_v21, %v928_v19  ;;  %v1095_v40 = vmax.f32 %v1063_v45, 0.0  ;;  %v1027_v19 = vmul.f32 %v2041_v3, %v2018_v25 }
 0x161   :  { %1130 = vst [vmem:[%s2184_s4 + $0x28] sm:$0xff] %v1114_v29  ;;  %v1020_v14 = vmul.f32 %v2050_v35, %v977_v34 }
 0x163   :  { %v1058_v0 = vadd.f32 %v2052_v42, %v1020_v14 }
 0x164   :  { %v929_v15 = vpop.f32.mrf.mxu2  ;;  %v834_v33 = vpop.f32.mrf.mxu0 }
 0x165   :  { %v1090_v53 = vmax.f32 %v1058_v0, 0.0  ;;  %v930_v54 = vadd.f32 %v929_v15, %v881_v1  ;;  %v978_v32 = vpop.f32.mrf.mxu3  ;;  %v883_v36 = vpop.f32.mrf.mxu1  ;;  %v1065_v0 = vadd.f32 %v2048_v31, %v1027_v19 }
 0x166   :  { %v884_v38 = vadd.f32 %v883_v36, %v834_v33 }
 0x167   :  { %v1115_v37 = vpack.c.bf16 %v1090_v53, %v1089_v18  ;;  %v979_v41 = vadd.f32 %v978_v32, %v930_v54  ;;  %v1097_v25 = vmax.f32 %v1065_v0, 0.0  ;;  %v1029_v53 = vmul.f32 %v2041_v3, %v2020_v8 }
 0x169   :  { %1131 = vst [vmem:[%s2184_s4 + $0x30] sm:$0xff] %v1115_v37  ;;  %v1022_v43 = vmul.f32 %v2050_v35, %v979_v41 }
 0x16b   :  { %v1060_v39 = vadd.f32 %v2052_v42, %v1022_v43  ;;  %v1067_v43 = vadd.f32 %v2048_v31, %v1029_v53 }
 0x16c   :  { %v932_v55 = vpop.f32.mrf.mxu2  ;;  %v836_v58 = vpop.f32.mrf.mxu0 }
 0x16d   :  { %v1092_v20 = vmax.f32 %v1060_v39, 0.0  ;;  %v933_v27 = vadd.f32 %v932_v55, %v884_v38  ;;  %v981_v56 = vpop.f32.mrf.mxu3  ;;  %v885_v59 = vpop.f32.mrf.mxu1  ;;  %v1099_v8 = vmax.f32 %v1067_v43, 0.0 }
 0x16e   :  { %v886_v62 = vadd.f32 %v885_v59, %v836_v58 }
 0x16f   :  { %v1116_v61 = vpack.c.bf16 %v1092_v20, %v1091_v12  ;;  %v982_v9 = vadd.f32 %v981_v56, %v933_v27 }
 0x171   :  { %1132 = vst [vmem:[%s2184_s4 + $0x38] sm:$0xff] %v1116_v61  ;;  %v1024_v60 = vmul.f32 %v2050_v35, %v982_v9 }
 0x173   :  { %v1062_v11 = vadd.f32 %v2052_v42, %v1024_v60 }
 0x174   :  { %v934_v63 = vpop.f32.mrf.mxu2  ;;  %v839_v51 = vpop.f32.mrf.mxu0 }
 0x175   :  { %v1094_v6 = vmax.f32 %v1062_v11, 0.0  ;;  %v935_v50 = vadd.f32 %v934_v63, %v886_v62  ;;  %v983_v48 = vpop.f32.mrf.mxu3  ;;  %v888_v52 = vpop.f32.mrf.mxu1 }
 0x176   :  { %v889_v49 = vadd.f32 %v888_v52, %v839_v51 }
 0x177   :  { %v1117_v7 = vpack.c.bf16 %v1094_v6, %v1093_v57  ;;  %v984_v16 = vadd.f32 %v983_v48, %v935_v50  ;;  %v1033_v57 = vmul.f32 %v2041_v3, %v2028_v44 }
 0x179   :  { %1133 = vst [vmem:[%s2184_s4 + $0x40] sm:$0xff] %v1117_v7  ;;  %v1026_v46 = vmul.f32 %v2050_v35, %v984_v16  ;;  %v1071_v16 = vadd.f32 %v2048_v31, %v1033_v57 }
 0x17b   :  { %v1064_v47 = vadd.f32 %v2052_v42, %v1026_v46  ;;  %v1103_v44 = vmax.f32 %v1071_v16, 0.0 }
 0x17c   :  { %v937_v17 = vpop.f32.mrf.mxu2  ;;  %v841_v29 = vpop.f32.mrf.mxu0 }
 0x17d   :  { %v1096_v21 = vmax.f32 %v1064_v47, 0.0  ;;  %v938_v23 = vadd.f32 %v937_v17, %v889_v49  ;;  %v986_v28 = vpop.f32.mrf.mxu3  ;;  %v890_v34 = vpop.f32.mrf.mxu1  ;;  %v1035_v17 = vmul.f32 %v2041_v3, %v2034_v22 }
 0x17e   :  { %v891_v18 = vadd.f32 %v890_v34, %v841_v29 }
 0x17f   :  { %v1118_v13 = vpack.c.bf16 %v1096_v21, %v1095_v40  ;;  %v987_v14 = vadd.f32 %v986_v28, %v938_v23 }
 0x181   :  { %1134 = vst [vmem:[%s2184_s4 + $0x48] sm:$0xff] %v1118_v13  ;;  %v1028_v1 = vmul.f32 %v2050_v35, %v987_v14  ;;  %v1073_v13 = vadd.f32 %v2048_v31, %v1035_v17 }
 0x183   :  { %v1066_v15 = vadd.f32 %v2052_v42, %v1028_v1  ;;  %v1105_v22 = vmax.f32 %v1073_v13, 0.0 }
 0x184   :  { %v939_v30 = vpop.f32.mrf.mxu2  ;;  %v844_v36 = vpop.f32.mrf.mxu0 }
 0x185   :  { %v1098_v54 = vmax.f32 %v1066_v15, 0.0  ;;  %v940_v32 = vadd.f32 %v939_v30, %v891_v18  ;;  %v988_v33 = vpop.f32.mrf.mxu3  ;;  %v893_v37 = vpop.f32.mrf.mxu1  ;;  %v1037_v18 = vmul.f32 %v2041_v3, %v2039_v2 }
 0x186   :  { %v894_v39 = vadd.f32 %v893_v37, %v844_v36 }
 0x187   :  { %v1119_v41 = vpack.c.bf16 %v1098_v54, %v1097_v25  ;;  %v989_v24 = vadd.f32 %v988_v33, %v940_v32  ;;  %v1075_v33 = vadd.f32 %v2048_v31, %v1037_v18 }
 0x189   :  { %1135 = vst [vmem:[%s2184_s4 + $0x50] sm:$0xff] %v1119_v41  ;;  %v1030_v38 = vmul.f32 %v2050_v35, %v989_v24  ;;  %v1107_v41 = vmax.f32 %v1075_v33, 0.0 }
 0x18b   :  { %v1068_v55 = vadd.f32 %v2052_v42, %v1030_v38 }
 0x18c   :  { %v942_v12 = vpop.f32.mrf.mxu2  ;;  %v846_v58 = vpop.f32.mrf.mxu0 }
 0x18d   :  { %v1100_v20 = vmax.f32 %v1068_v55, 0.0  ;;  %v943_v27 = vadd.f32 %v942_v12, %v894_v39  ;;  %v991_v56 = vpop.f32.mrf.mxu3  ;;  %v895_v59 = vpop.f32.mrf.mxu1 }
 0x18e   :  { %v896_v62 = vadd.f32 %v895_v59, %v846_v58 }
 0x18f   :  { %v1120_v61 = vpack.c.bf16 %v1100_v20, %v1099_v8  ;;  %v992_v9 = vadd.f32 %v991_v56, %v943_v27 }
 0x191   :  { %1136 = vst [vmem:[%s2184_s4 + $0x58] sm:$0xff] %v1120_v61  ;;  %v1032_v60 = vmul.f32 %v2050_v35, %v992_v9 }
 0x193   :  { %v1070_v11 = vadd.f32 %v2052_v42, %v1032_v60 }
 0x194   :  { %v944_v63 = vpop.f32.mrf.mxu2  ;;  %v849_v48 = vpop.f32.mrf.mxu0 }
 0x195   :  { %v1102_v4 = vmax.f32 %v1070_v11, 0.0  ;;  %v945_v6 = vadd.f32 %v944_v63, %v896_v62  ;;  %v993_v50 = vpop.f32.mrf.mxu3  ;;  %v898_v51 = vpop.f32.mrf.mxu1 }
 0x196   :  { %v899_v46 = vadd.f32 %v898_v51, %v849_v48 }
 0x197   :  { %v1121_v52 = vpack.c.bf16 %v1102_v4, %v1101_v5  ;;  %v994_v7 = vadd.f32 %v993_v50, %v945_v6 }
 0x199   :  { %1137 = vst [vmem:[%s2184_s4 + $0x60] sm:$0xff] %v1121_v52  ;;  %v1034_v45 = vmul.f32 %v2050_v35, %v994_v7 }
 0x19b   :  { %v1072_v49 = vadd.f32 %v2052_v42, %v1034_v45 }
 0x19c   :  { %v947_v47 = vpop.f32.mrf.mxu2  ;;  %v851_v29 = vpop.f32.mrf.mxu0 }
 0x19d   :  { %v1104_v40 = vmax.f32 %v1072_v49, 0.0  ;;  %v948_v19 = vadd.f32 %v947_v47, %v899_v46  ;;  %v996_v21 = vpop.f32.mrf.mxu3  ;;  %v900_v34 = vpop.f32.mrf.mxu1 }
 0x19e   :  { %v901_v1 = vadd.f32 %v900_v34, %v851_v29 }
 0x19f   :  { %v1122_v23 = vpack.c.bf16 %v1104_v40, %v1103_v44  ;;  %v997_v28 = vadd.f32 %v996_v21, %v948_v19 }
 0x1a1   :  { %1138 = vst [vmem:[%s2184_s4 + $0x68] sm:$0xff] %v1122_v23  ;;  %v1036_v14 = vmul.f32 %v2050_v35, %v997_v28 }
 0x1a3   :  { %v1074_v0 = vadd.f32 %v2052_v42, %v1036_v14 }
 0x1a4   :  { %v949_v15 = vpop.f32.mrf.mxu2 }
 0x1a5   :  { %v1106_v30 = vmax.f32 %v1074_v0, 0.0  ;;  %v950_v25 = vadd.f32 %v949_v15, %v901_v1  ;;  %v998_v53 = vpop.f32.mrf.mxu3 }
 0x1a7   :  { %v1123_v54 = vpack.c.bf16 %v1106_v30, %v1105_v22  ;;  %v999_v32 = vadd.f32 %v998_v53, %v950_v25 }
 0x1a9   :  { %1139 = vst [vmem:[%s2184_s4 + $0x70] sm:$0xff] %v1123_v54  ;;  %v1038_v36 = vmul.f32 %v2050_v35, %v999_v32 }
 0x1ab   :  { %v1076_v37 = vadd.f32 %v2052_v42, %v1038_v36 }
 0x1ad   :  { %v1108_v24 = vmax.f32 %v1076_v37, 0.0 }
 0x1af   :  { %v1124_v43 = vpack.c.bf16 %v1108_v24, %v1107_v41 }
 0x1b1   :  { %1140 = vst [vmem:[%s2184_s4 + $0x78] sm:$0xff] %v1124_v43 }
 0x1b2   :  { %1145 = vsyncpa [#allocation3], 1 }

// kernel: dense_temporal_block.9
= control target key start
LH: loop header
LB: loop body
LE: loop exit
PB: predicated region body
PF: predicated region fallthrough
CT: control target
= control target key end

     0   :  { %s1554_s27 = smov 0   ;;  %s1556_s28 = smov 0   ;;  %s1798_s0 = inlined_call_operand.vmem [shape: bf16[2,4,16,256], index: 0, kind: input, shape index: {}, may-alias: {0,1,2}]   ;;  %s1799_s1 = inlined_call_operand.vmem [shape: bf16[2,4,16,256], index: 1, kind: input, shape index: {}, may-alias: {0,1,2}]   ;;  %s1800_s2 = inlined_call_operand.vmem [shape: bf16[2,4,16,256], index: 2, kind: input, shape index: {}, may-alias: {0,1,2}]   ;;  %s1801_s3 = inlined_call_operand.vmem [shape: bf16[256,64], index: 3, kind: input, shape index: {}]   ;;  %s1802_s4 = inlined_call_operand.vmem [shape: bf16[256,64], index: 4, kind: input, shape index: {}]   ;;  %s1803_s5 = inlined_call_operand.vmem [shape: bf16[256,64], index: 5, kind: input, shape index: {}]   ;;  %s1804_s6 = inlined_call_operand.vmem [shape: f32[1,64], index: 6, kind: input, shape index: {}]   ;;  %s1805_s7 = inlined_call_operand.vmem [shape: f32[1,64], index: 7, kind: input, shape index: {}]   ;;  %s1806_s8 = inlined_call_operand.vmem [shape: bf16[2,4,16,64], index: 8, kind: output, shape index: {}]  }
   0x1   :  { %s1558_s29 = smov 0   ;;  %s1560_s30 = smov 0  }
   0x2   :  { %s1562_s9 = smov 0  }
   0x3 LB: > { %s27_s10 = sadd.s32 1, %s1499_s29  ;;  %s30_s11 = sadd.s32 1, %s1503_s30  ;;  %s1507_s9 = sphi %s1562_s9, %s18_s9   ;;  %s1503_s30 = sphi %s1560_s30, %s1812_s30   ;;  %s1499_s29 = sphi %s1558_s29, %s1811_s29   ;;  %s1495_s28 = sphi %s1556_s28, %s1810_s28   ;;  %s1491_s27 = sphi %s1554_s27, %s1809_s27  }
   0x4   : > { %p28_p0 = scmp.ge.s32.totalorder %s27_s10, 4  ;;  %p1131_p1 = scmp.ge.s32.totalorder %s1507_s9, 1 }
   0x5   : > { %p338_p2 = scmp.lt.s32.totalorder %s1507_s9, 9 }
   0x6   : > { %s1814_s10 = smov (%p28_p0, %s27_s10), 0  ;;  %s1816_s11 = smov (!%p28_p0, %s30_s11), %s1503_s30 }
   0x7   : > { %p339_p3 = pnand %p1131_p1, %p338_p2  ;;  %p32_p4 = scmp.ge.s32.totalorder %s1816_s11, 2 }
   0x8   : > { %s1132_s16 = sadd.s32 (!%p339_p3), 4294967295, %s1491_s27  ;;  %p407_p6 = scmp.lt.s32.totalorder (!%p339_p3), %s1495_s28, 1 }
   0x9   : > { %s1818_s11 = smov (%p32_p4, %s1816_s11), 0  ;;  %342 = sbr.rel (%p339_p3) target bundleno = 227 (0xe3), region = 52 }
   0xa   : > { %1807 = sst [smem:[#allocation2_spill]] %s1818_s11  ;;  %p405_p5 = scmp.gt.s32.totalorder (!%p339_p3), %s1132_s16, 0 }
   0xb   : > { %p1133_p7 = scmp.lt.s32.totalorder (!%p339_p3), %s1132_s16, 3  ;;  %s1621_s20 = sadd.s32 (!%p339_p3), 1, %s1491_s27 }
   0xc   : > { %p429_p8 = scmp.lt.s32.totalorder (!%p339_p3), %s1621_s20, 3  ;;  %p421_p9 = scmp.lt.s32.totalorder (!%p339_p3), %s1491_s27, 3 }
   0xd   : > { %p822_p10 = scmp.ge.s32.totalorder (!%p339_p3), %s1491_s27, 1  ;;  %p825_p11 = scmp.le.s32.totalorder (!%p339_p3), %s1621_s20, 3 }
   0xe   : > { %v1400_v0 = vld [vmem:[%s1801_s3 + $0x38] sm:$0xff]  ;;  %v1399_v2 = vld [vmem:[%s1801_s3 + $0x30] sm:$0xff]  ;;  %s406_s14 = scalar_select %p405_p5, %s1132_s16, 0  ;;  %v1398_v8 = vld [vmem:[%s1801_s3 + $0x28] sm:$0xff]  ;;  %vm985_vm0 = vcmask 519168  }
   0xf   : > { %v1408_v1 = vld [vmem:[%s1801_s3 + $0x78] sm:$0xff]  ;;  %626 = vmatpush.bf16.msra.mxu0 %v1400_v0  ;;  %v1407_v3 = vld [vmem:[%s1801_s3 + $0x70] sm:$0xff]  ;;  %v1406_v9 = vld [vmem:[%s1801_s3 + $0x68] sm:$0xff]  ;;  %s1820_s28 = smov (!%p407_p6, %s1495_s28), 1 }
  0x10   : > { %640 = vmatpush.bf16.msra.mxu1 %v1408_v1  ;;  %v1418_v4 = vld [vmem:[%s1803_s5 + $0x38] sm:$0xff]  ;;  %v1417_v6 = vld [vmem:[%s1803_s5 + $0x30] sm:$0xff]  ;;  %v1416_v10 = vld [vmem:[%s1803_s5 + $0x28] sm:$0xff]  ;;  %s1822_s14 = smov (!%p1133_p7, %s406_s14), 3  ;;  %s1650_s22 = sshll.u32 %s1820_s28, 4 }
  0x11   : > { %v1426_v5 = vld [vmem:[%s1803_s5 + $0x78] sm:$0xff]  ;;  %794 = vmatpush.bf16.msra.mxu2 %v1418_v4  ;;  %v1425_v7 = vld [vmem:[%s1803_s5 + $0x70] sm:$0xff]  ;;  %v1424_v11 = vld [vmem:[%s1803_s5 + $0x68] sm:$0xff]  ;;  %s430_s18 = scalar_select %p429_p8, %s1621_s20, 3 }
  0x12   : > { %808 = vmatpush.bf16.msra.mxu3 %v1426_v5  ;;  %v1397_v12 = vld [vmem:[%s1801_s3 + $0x20] sm:$0xff]  ;;  %s1138_s21 = sshll.u32 %s1822_s14, 2  ;;  %v1396_v16 = vld [vmem:[%s1801_s3 + $0x18] sm:$0xff]  ;;  %v1395_v20 = vld [vmem:[%s1801_s3 + $0x10] sm:$0xff]  ;;  %s1151_s25 = sshll.u32 %s1820_s28, 3 }
  0x13   : > { %627 = vmatpush.bf16.msra.mxu0 %v1399_v2  ;;  %v1405_v13 = vld [vmem:[%s1801_s3 + $0x60] sm:$0xff]  ;;  %v1404_v17 = vld [vmem:[%s1801_s3 + $0x58] sm:$0xff]  ;;  %s1824_s18 = smov (!%p429_p8, %s430_s18), 3  ;;  %s413_s14 = sadd.s32 %s1650_s22, %s1138_s21  ;;  %v1403_v21 = vld [vmem:[%s1801_s3 + $0x50] sm:$0xff] }
  0x14   : > { %641 = vmatpush.bf16.msra.mxu1 %v1407_v3  ;;  %v1415_v14 = vld [vmem:[%s1803_s5 + $0x20] sm:$0xff]  ;;  %v1414_v18 = vld [vmem:[%s1803_s5 + $0x18] sm:$0xff]  ;;  %s1147_s16 = sshll.u32 %s1824_s18, 2  ;;  %s1140_s26 = sshll.u32 %s413_s14, 2  ;;  %v1413_v22 = vld [vmem:[%s1803_s5 + $0x10] sm:$0xff] }
  0x15   : > { %795 = vmatpush.bf16.msra.mxu2 %v1417_v6  ;;  %v1423_v15 = vld [vmem:[%s1803_s5 + $0x60] sm:$0xff]  ;;  %v1422_v19 = vld [vmem:[%s1803_s5 + $0x58] sm:$0xff]  ;;  %s437_s13 = sadd.s32 %s1147_s16, %s1650_s22  ;;  %v1421_v23 = vld [vmem:[%s1803_s5 + $0x50] sm:$0xff]  ;;  %s415_s12 = scalar_lea.vmem %s1798_s0, %s1140_s26 }
  0x16   : > { %809 = vmatpush.bf16.msra.mxu3 %v1425_v7  ;;  %v1394_v24 = vld [vmem:[%s1801_s3 + $0x8] sm:$0xff]  ;;  %s1149_s16 = sshll.u32 %s437_s13, 2  ;;  %v1393_v26 = vld [vmem:[%s1801_s3] sm:$0xff]  ;;  %v1382_v34 = vld [vmem:[%s1802_s4 + $0x38] sm:$0xff] }
  0x17   : > { %628 = vmatpush.bf16.msra.mxu0 %v1398_v8  ;;  %v1402_v25 = vld [vmem:[%s1801_s3 + $0x48] sm:$0xff]  ;;  %v1401_v28 = vld [vmem:[%s1801_s3 + $0x40] sm:$0xff]  ;;  %s439_s13 = scalar_lea.vmem %s1800_s2, %s1149_s16  ;;  %v1390_v35 = vld [vmem:[%s1802_s4 + $0x78] sm:$0xff] }
  0x18   : > { %642 = vmatpush.bf16.msra.mxu1 %v1406_v9  ;;  %v1412_v27 = vld [vmem:[%s1803_s5 + $0x8] sm:$0xff]  ;;  %v1155_v29 = vld [vmem:[%s415_s12] sm:$0xf]  ;;  %v1391_v32 = vld [vmem:[%s415_s12 + $0x4] sm:$0xf]  ;;  %s1730_s21 = scalar_select %p421_p9, %s1491_s27, 3 }
  0x19   : > { %796 = vmatpush.bf16.msra.mxu2 %v1416_v10  ;;  %v1420_v30 = vld [vmem:[%s1803_s5 + $0x48] sm:$0xff]  ;;  %v1411_v36 = vld [vmem:[%s1803_s5] sm:$0xff]  ;;  %v1381_v44 = vld [vmem:[%s1802_s4 + $0x30] sm:$0xff]  ;;  %s823_s17 = scalar_select %p822_p10, 1.0, 0.0 }
  0x1a   : > { %810 = vmatpush.bf16.msra.mxu3 %v1424_v11  ;;  %v1392_v31 = vld [vmem:[%s415_s12 + $0x4] sm:$0xf0]  ;;  %v1157_v33 = vld [vmem:[%s415_s12 + $0x8] sm:$0xf0]  ;;  %v1227_v39 = vld [vmem:[%s439_s13] sm:$0xf] }
  0x1b   : > { %629 = vmatpush.bf16.msra.mxu0 %v1397_v12  ;;  %v1156_v37 = vor.u32 %v1392_v31, %v1155_v29  ;;  %v1160_v38 = vor.u32 %v1391_v32, %v1157_v33  ;;  %v1410_v40 = vld [vmem:[%s439_s13 + $0x4] sm:$0xf0]  ;;  %v1419_v41 = vld [vmem:[%s1803_s5 + $0x40] sm:$0xff]  ;;  %v1229_v43 = vld [vmem:[%s439_s13 + $0x8] sm:$0xf0]  ;;  %s1141_s16 = sshll.u32 %s1730_s21, 2  ;;  %v827_v9 = vstv %s823_s17 }
  0x1c   : > { %643 = vmatpush.bf16.msra.mxu1 %v1405_v13  ;;  %v1409_v42 = vld [vmem:[%s439_s13 + $0x4] sm:$0xf]  ;;  %v1389_v45 = vld [vmem:[%s1802_s4 + $0x70] sm:$0xff]  ;;  %v1228_v46 = vor.u32 %v1410_v40, %v1227_v39  ;;  %v1380_v48 = vld [vmem:[%s1802_s4 + $0x28] sm:$0xff]  ;;  %s425_s26 = sadd.s32 %s1141_s16, %s1650_s22  ;;  %s1150_s15 = sshll.u32 %s1730_s21, 1 }
  0x1d   : > { %797 = vmatpush.bf16.msra.mxu2 %v1415_v14  ;;  %v1232_v47 = vor.u32 %v1409_v42, %v1229_v43  ;;  %v1388_v49 = vld [vmem:[%s1802_s4 + $0x68] sm:$0xff]  ;;  %v1379_v50 = vld [vmem:[%s1802_s4 + $0x20] sm:$0xff]  ;;  %v1378_v52 = vld [vmem:[%s1802_s4 + $0x18] sm:$0xff]  ;;  %s1143_s18 = sshll.u32 %s425_s26, 2 }
  0x1e   : > { %811 = vmatpush.bf16.msra.mxu3 %v1423_v15  ;;  %v1387_v51 = vld [vmem:[%s1802_s4 + $0x60] sm:$0xff]  ;;  %v1386_v53 = vld [vmem:[%s1802_s4 + $0x58] sm:$0xff]  ;;  %v1377_v54 = vld [vmem:[%s1802_s4 + $0x10] sm:$0xff]  ;;  %s427_s24 = scalar_lea.vmem %s1799_s1, %s1143_s18  ;;  %s1769_s18 = sadd.s32 %s1151_s25, %s1150_s15 }
  0x1f   : > { %630 = vmatpush.bf16.msra.mxu0 %v1396_v16  ;;  %v1385_v55 = vld [vmem:[%s1802_s4 + $0x50] sm:$0xff]  ;;  %v1376_v56 = vld [vmem:[%s1802_s4 + $0x8] sm:$0xff]  ;;  %v1375_v58 = vld [vmem:[%s1802_s4] sm:$0xff]  ;;  %s826_s12 = scalar_select %p825_p11, 1.0, 0.0 }
  0x20   : > { %644 = vmatpush.bf16.msra.mxu1 %v1404_v17  ;;  %v1384_v57 = vld [vmem:[%s1802_s4 + $0x48] sm:$0xff]  ;;  %v1383_v59 = vld [vmem:[%s1802_s4 + $0x40] sm:$0xff]  ;;  %s1152_s22 = sshll.u32 %s1769_s18, 2 }
  0x21   : > { %798 = vmatpush.bf16.msra.mxu2 %v1414_v18  ;;  %v1299_v60 = vld [vmem:[%s427_s24] sm:$0xf]  ;;  %v1374_v61 = vld [vmem:[%s427_s24 + $0x4] sm:$0xf0]  ;;  %v1373_v62 = vld [vmem:[%s427_s24 + $0x4] sm:$0xf]  ;;  %v964_v11 = vstv %s826_s12  ;;  %s451_s23 = scalar_lea.vmem %s1806_s8, %s1152_s22 }
  0x22   : > { %812 = vmatpush.bf16.msra.mxu3 %v1422_v19  ;;  %v1301_v63 = vld [vmem:[%s427_s24 + $0x8] sm:$0xf0]  ;;  %v1300_v0 = vor.u32 %v1374_v61, %v1299_v60  ;;  %v1467_v19 = vld [vmem:[%s1804_s6] ss:$0 sm:$0xff] }
  0x23   : > { %631 = vmatpush.bf16.msra.mxu0 %v1395_v20  ;;  %v1304_v1 = vor.u32 %v1373_v62, %v1301_v63 }
  0x24   : > { %645 = vmatpush.bf16.msra.mxu1 %v1403_v21 }
  0x25   : > { %799 = vmatpush.bf16.msra.mxu2 %v1413_v22 }
  0x26   : > { %813 = vmatpush.bf16.msra.mxu3 %v1421_v23  ;;  %v1468_v23 = vld [vmem:[%s1805_s7] ss:$0 sm:$0xff] }
  0x27   : > { %632 = vmatpush.bf16.msra.mxu0 %v1394_v24 }
  0x28   : > { %646 = vmatpush.bf16.msra.mxu1 %v1402_v25 }
  0x29   : > { %800 = vmatpush.bf16.msra.mxu2 %v1412_v27 }
  0x2a   : > { %814 = vmatpush.bf16.msra.mxu3 %v1420_v30 }
  0x2b   : > { %633 = vmatpush.bf16.msra.mxu0 %v1393_v26 }
  0x2c   : > { %647 = vmatpush.bf16.msra.mxu1 %v1401_v28 }
  0x2d   : > { %801 = vmatpush.bf16.msra.mxu2 %v1411_v36 }
  0x2e   : > { %634 = vmatmul.bf16.vlgmr.msra.gmra.mxu0 %v1156_v37  ;;  %815 = vmatpush.bf16.msra.mxu3 %v1419_v41 }
  0x2f   : > { %936 = vmatpush.bf16.msrb.mxu0 %v1382_v34  ;;  %648 = vmatmul.bf16.vlgmr.msra.gmra.mxu1 %v1160_v38 }
  0x30   : > { %950 = vmatpush.bf16.msrb.mxu1 %v1390_v35  ;;  %802 = vmatmul.bf16.vlgmr.msra.gmra.mxu2 %v1228_v46 }
  0x31   : > { %816 = vmatmul.bf16.vlgmr.msra.gmra.mxu3 %v1232_v47 }
  0x33   : > { %937 = vmatpush.bf16.msrb.mxu0 %v1381_v44 }
  0x34   : > { %951 = vmatpush.bf16.msrb.mxu1 %v1389_v45 }
  0x37   : > { %938 = vmatpush.bf16.msrb.mxu0 %v1380_v48 }
  0x38   : > { %952 = vmatpush.bf16.msrb.mxu1 %v1388_v49 }
  0x3b   : > { %939 = vmatpush.bf16.msrb.mxu0 %v1379_v50 }
  0x3c   : > { %953 = vmatpush.bf16.msrb.mxu1 %v1387_v51 }
  0x3f   : > { %940 = vmatpush.bf16.msrb.mxu0 %v1378_v52 }
  0x40   : > { %954 = vmatpush.bf16.msrb.mxu1 %v1386_v53 }
  0x43   : > { %941 = vmatpush.bf16.msrb.mxu0 %v1377_v54 }
  0x44   : > { %955 = vmatpush.bf16.msrb.mxu1 %v1385_v55 }
  0x47   : > { %942 = vmatpush.bf16.msrb.mxu0 %v1376_v56 }
  0x48   : > { %956 = vmatpush.bf16.msrb.mxu1 %v1384_v57 }
  0x4b   : > { %943 = vmatpush.bf16.msrb.mxu0 %v1375_v58 }
  0x4c   : > { %957 = vmatpush.bf16.msrb.mxu1 %v1383_v59 }
  0x4e   : > { %944 = vmatmul.bf16.vlgmr.msrb.gmra.mxu0 %v1300_v0 }
  0x4f   : > { %958 = vmatmul.bf16.vlgmr.msrb.gmra.mxu1 %v1304_v1 }
  0xab   : > { %v635_v2 = vpop.f32.mrf.mxu0 }
  0xac   : > { %v649_v3 = vpop.f32.mrf.mxu1 }
  0xad   : > { %v650_v8 = vadd.f32 %v649_v3, %v635_v2 }
  0xaf   : > { %v828_v12 = vmul.f32 %v827_v9, %v650_v8 }
  0xb3   : > { %v637_v4 = vpop.f32.mrf.mxu0  ;;  %v803_v6 = vpop.f32.mrf.mxu2 }
  0xb4   : > { %v651_v5 = vpop.f32.mrf.mxu1  ;;  %v817_v7 = vpop.f32.mrf.mxu3 }
  0xb5   : > { %v818_v10 = vadd.f32 %v817_v7, %v803_v6  ;;  %v652_v17 = vadd.f32 %v651_v5, %v637_v4 }
  0xb7   : > { %v965_v15 = vmul.f32 %v964_v11, %v818_v10  ;;  %v829_v26 = vmul.f32 %v827_v9, %v652_v17 }
  0xbb   : > { %v805_v20 = vpop.f32.mrf.mxu2 }
  0xbc   : > { %v819_v21 = vpop.f32.mrf.mxu3 }
  0xbd   : > { %v820_v24 = vadd.f32 %v819_v21, %v805_v20 }
  0xbf   : > { %v966_v31 = vmul.f32 %v964_v11, %v820_v24 }
  0xcb   : > { %v945_v13 = vpop.f32.mrf.mxu0 }
  0xcc   : > { %v959_v14 = vpop.f32.mrf.mxu1  ;;  %v946_v16 = vadd.f32 %v945_v13, %v828_v12 }
  0xce   : > { %v960_v18 = vadd.f32 %v959_v14, %v946_v16 }
  0xd0   : > { %v967_v22 = vadd.f32 %v965_v15, %v960_v18 }
  0xd2   : > { %v973_v25 = vmul.f32 %v1467_v19, %v967_v22 }
  0xd3   : > { %v947_v27 = vpop.f32.mrf.mxu0 }
  0xd4   : > { %v979_v28 = vadd.f32 %v1468_v23, %v973_v25  ;;  %v948_v29 = vadd.f32 %v947_v27, %v829_v26  ;;  %v961_v30 = vpop.f32.mrf.mxu1 }
  0xd6   : > { %v981_v32 = vmax.f32 %v979_v28, 0.0  ;;  %v962_v33 = vadd.f32 %v961_v30, %v948_v29 }
  0xd8   : > { %v983_v34 = vpack.c.bf16 %v981_v32, %v981_v32  ;;  %v968_v35 = vadd.f32 %v966_v31, %v962_v33 }
  0xda   : > { %986 = vst.msk [vmem:[%s451_s23] sm:$0xf] %vm985_vm0, %v983_v34  ;;  %v974_v36 = vmul.f32 %v1467_v19, %v968_v35 }
  0xdc   : > { %v980_v37 = vadd.f32 %v1468_v23, %v974_v36 }
  0xde   : > { %v982_v38 = vmax.f32 %v980_v37, 0.0 }
  0xe0   : > { %v984_v39 = vpack.c.bf16 %v982_v38, %v982_v38 }
  0xe2   : > { %987 = vst.msk [vmem:[%s451_s23 + $0x4] sm:$0xf] %vm985_vm0, %v984_v39 }
  0xe3 PF: > { %s18_s9 = sadd.s32 1, %s1507_s9   ;;  %s1808_s24 = sld [smem:[#allocation2_spill]] }
  0xe4   : > { %p15_p12 = scmp.ge.s32.totalorder %s18_s9, 10   ;;  %s1809_s27 = smov %s1499_s29 }
  0xe5   : > { %s1810_s28 = smov %s1503_s30  ;;  %s1811_s29 = smov %s1814_s10 }
  0xe6   :  { %17 = sbr.rel (!%p15_p12) target bundleno = 3 (0x3), region = 88 }
  0xe9   : > { %s1812_s30 = smov %s1808_s24 }

// kernel: dense_temporal_block.10
= control target key start
LH: loop header
LB: loop body
LE: loop exit
PB: predicated region body
PF: predicated region fallthrough
CT: control target
= control target key end

     0   :  { %11 = vsyncpa [#allocation3], 0  ;;  %s2001_s24 = smov [#allocation2]   ;;  %s2002_s26 = smov 128   ;;  %s2749_s0 = inlined_call_operand.vmem [shape: bf16[128,512], index: 0, kind: input, shape index: {}]   ;;  %s2750_s1 = inlined_call_operand.vmem [shape: bf16[128,64], index: 1, kind: input, shape index: {}]   ;;  %s2751_s2 = inlined_call_operand.hbm [shape: bf16[512,256], index: 2, kind: input, shape index: {}]   ;;  %s2752_s3 = inlined_call_operand.vmem [shape: bf16[64,256], index: 3, kind: input, shape index: {}]   ;;  %s2753_s4 = inlined_call_operand.vmem [shape: f32[1,256], index: 4, kind: input, shape index: {}]   ;;  %s2754_s5 = inlined_call_operand.vmem [shape: f32[1,256], index: 5, kind: input, shape index: {}]   ;;  %s2755_s6 = inlined_call_operand.vmem [shape: bf16[128,256], index: 6, kind: output, shape index: {}]  }
   0x1   :  { %s20_s23 = sshll.u32 %s2751_s2, 4  ;;  %s22_s25 = sshll.u32 %s2001_s24, 4  ;;  %s21_s23 = int_to_ptr.hbm [resolvable:$true] %s20_s23  ;;  %s23_s25 = int_to_ptr.vmem [resolvable:$true] %s22_s25 }
   0x2   :  { %s2003_s27 = smov 8  }
   0x3   :  { %28 = dma.hbm_to_vmem [thread:$0]  %s21_s23, 8192, %s23_s25, [#allocation3], %s2002_s26, %s2002_s26, %s2003_s27  }
   0x4   :  { %1999 = dma.done.wait [#allocation3], 8192  }
   0x5   :  { %2000 = vsyncadd [#allocation3], 4294959104  ;;  %v1438_v0 = vld [vmem:[%s2752_s3 + $0x30] sm:$0xf]  ;;  %v1955_v1 = vld [vmem:[%s2752_s3 + $0x34] sm:$0xf0] }
   0x6   :  { %v1954_v2 = vld [vmem:[%s2752_s3 + $0x34] sm:$0xf]  ;;  %v1439_v3 = vor.u32 %v1955_v1, %v1438_v0  ;;  %v1440_v4 = vld [vmem:[%s2752_s3 + $0x38] sm:$0xf0]  ;;  %v1430_v5 = vld [vmem:[%s2752_s3 + $0x20] sm:$0xf] }
   0x7   :  { %v1953_v6 = vld [vmem:[%s2752_s3 + $0x24] sm:$0xf0]  ;;  %v1443_v7 = vor.u32 %v1954_v2, %v1440_v4  ;;  %v1952_v8 = vld [vmem:[%s2752_s3 + $0x24] sm:$0xf]  ;;  %v1432_v9 = vld [vmem:[%s2752_s3 + $0x28] sm:$0xf0] }
   0x8   :  { %269 = vmatpush.bf16.msra.mxu0 %v1439_v3  ;;  %1956 = vmatpush.bf16.msra.mxu2 %v1439_v3  ;;  %v1431_v10 = vor.u32 %v1953_v6, %v1430_v5  ;;  %v1435_v11 = vor.u32 %v1952_v8, %v1432_v9  ;;  %v1422_v12 = vld [vmem:[%s2752_s3 + $0x10] sm:$0xf]  ;;  %v1951_v13 = vld [vmem:[%s2752_s3 + $0x14] sm:$0xf0]  ;;  %v1950_v14 = vld [vmem:[%s2752_s3 + $0x14] sm:$0xf] }
   0x9   :  { %1960 = vmatpush.bf16.msra.mxu3 %v1443_v7  ;;  %318 = vmatpush.bf16.msra.mxu1 %v1443_v7  ;;  %v1424_v15 = vld [vmem:[%s2752_s3 + $0x18] sm:$0xf0]  ;;  %v1423_v16 = vor.u32 %v1951_v13, %v1422_v12  ;;  %v1414_v18 = vld [vmem:[%s2752_s3] sm:$0xf]  ;;  %v1949_v19 = vld [vmem:[%s2752_s3 + $0x4] sm:$0xf0] }
   0xa   :  { %v1427_v17 = vor.u32 %v1950_v14, %v1424_v15  ;;  %v1948_v20 = vld [vmem:[%s2752_s3 + $0x4] sm:$0xf]  ;;  %v1416_v21 = vld [vmem:[%s2752_s3 + $0x8] sm:$0xf0]  ;;  %v1710_v22 = vld [vmem:[#allocation2 + $0xf0] sm:$0xf]  ;;  %v1415_v26 = vor.u32 %v1949_v19, %v1414_v18 }
   0xb   :  { %v1907_v23 = vld [vmem:[#allocation2 + $0xf4] sm:$0xf0]  ;;  %v1646_v24 = vld [vmem:[#allocation2 + $0x70] sm:$0xf]  ;;  %v1419_v27 = vor.u32 %v1948_v20, %v1416_v21  ;;  %v1940_v28 = vld [vmem:[%s2750_s1] sm:$0xff]  ;;  %vm240_vm0 = vcmask 523264  }
   0xc   :  { %270 = vmatpush.bf16.msra.mxu0 %v1431_v10  ;;  %1957 = vmatpush.bf16.msra.mxu2 %v1431_v10  ;;  %v1891_v25 = vld [vmem:[#allocation2 + $0x74] sm:$0xf0]  ;;  %v2096_v29 = vld [vmem:[%s2750_s1 + $0x28] sm:$0xff]  ;;  %v1638_v30 = vld [vmem:[#allocation2 + $0x60] sm:$0xf]  ;;  %v1711_v32 = vor.u32 %v1907_v23, %v1710_v22 }
   0xd   :  { %1961 = vmatpush.bf16.msra.mxu3 %v1435_v11  ;;  %319 = vmatpush.bf16.msra.mxu1 %v1435_v11  ;;  %v1774_v31 = vld [vmem:[#allocation2 + $0x170] sm:$0xf]  ;;  %v1647_v33 = vor.u32 %v1891_v25, %v1646_v24  ;;  %v1923_v34 = vld [vmem:[#allocation2 + $0x174] sm:$0xf0]  ;;  %v1889_v37 = vld [vmem:[#allocation2 + $0x64] sm:$0xf0] }
   0xe   :  { %v1838_v35 = vld [vmem:[#allocation2 + $0x1f0] sm:$0xf]  ;;  %v1939_v36 = vld [vmem:[#allocation2 + $0x1f4] sm:$0xf0]  ;;  %v1702_v38 = vld [vmem:[#allocation2 + $0xe0] sm:$0xf]  ;;  %v1775_v41 = vor.u32 %v1923_v34, %v1774_v31  ;;  %v1639_v45 = vor.u32 %v1889_v37, %v1638_v30 }
   0xf   :  { %v1905_v39 = vld [vmem:[#allocation2 + $0xe4] sm:$0xf0]  ;;  %v2101_v40 = vld [vmem:[%s2750_s1 + $0x20] sm:$0xff]  ;;  %v1839_v42 = vor.u32 %v1939_v36, %v1838_v35  ;;  %v1630_v43 = vld [vmem:[#allocation2 + $0x50] sm:$0xf] }
  0x10   :  { %271 = vmatpush.bf16.msra.mxu0 %v1423_v16  ;;  %1958 = vmatpush.bf16.msra.mxu2 %v1423_v16  ;;  %v1766_v44 = vld [vmem:[#allocation2 + $0x160] sm:$0xf]  ;;  %v1703_v46 = vor.u32 %v1905_v39, %v1702_v38  ;;  %v1921_v47 = vld [vmem:[#allocation2 + $0x164] sm:$0xf0]  ;;  %v1887_v50 = vld [vmem:[#allocation2 + $0x54] sm:$0xf0] }
  0x11   :  { %1962 = vmatpush.bf16.msra.mxu3 %v1427_v17  ;;  %320 = vmatpush.bf16.msra.mxu1 %v1427_v17  ;;  %v1830_v48 = vld [vmem:[#allocation2 + $0x1e0] sm:$0xf]  ;;  %v1937_v49 = vld [vmem:[#allocation2 + $0x1e4] sm:$0xf0]  ;;  %v1694_v51 = vld [vmem:[#allocation2 + $0xd0] sm:$0xf]  ;;  %v1767_v53 = vor.u32 %v1921_v47, %v1766_v44  ;;  %v1631_v57 = vor.u32 %v1887_v50, %v1630_v43 }
  0x12   :  { %v1903_v52 = vld [vmem:[#allocation2 + $0xd4] sm:$0xf0]  ;;  %v1831_v54 = vor.u32 %v1937_v49, %v1830_v48  ;;  %v1622_v55 = vld [vmem:[#allocation2 + $0x40] sm:$0xf]  ;;  %v1822_v56 = vld [vmem:[#allocation2 + $0x1d0] sm:$0xf] }
  0x13   :  { %v1695_v58 = vor.u32 %v1903_v52, %v1694_v51  ;;  %v1935_v59 = vld [vmem:[#allocation2 + $0x1d4] sm:$0xf0]  ;;  %v1758_v60 = vld [vmem:[#allocation2 + $0x150] sm:$0xf]  ;;  %v1885_v62 = vld [vmem:[#allocation2 + $0x44] sm:$0xf0] }
  0x14   :  { %272 = vmatpush.bf16.msra.mxu0 %v1415_v26  ;;  %1959 = vmatpush.bf16.msra.mxu2 %v1415_v26  ;;  %v1919_v61 = vld [vmem:[#allocation2 + $0x154] sm:$0xf0]  ;;  %v1686_v63 = vld [vmem:[#allocation2 + $0xc0] sm:$0xf]  ;;  %v1901_v0 = vld [vmem:[#allocation2 + $0xc4] sm:$0xf0]  ;;  %v1823_v2 = vor.u32 %v1935_v59, %v1822_v56  ;;  %v1623_v5 = vor.u32 %v1885_v62, %v1622_v55 }
  0x15   :  { %1963 = vmatpush.bf16.msra.mxu3 %v1419_v27  ;;  %321 = vmatpush.bf16.msra.mxu1 %v1419_v27  ;;  %v1614_v1 = vld [vmem:[#allocation2 + $0x30] sm:$0xf]  ;;  %v1759_v3 = vor.u32 %v1919_v61, %v1758_v60  ;;  %v1814_v4 = vld [vmem:[#allocation2 + $0x1c0] sm:$0xf]  ;;  %v1687_v6 = vor.u32 %v1901_v0, %v1686_v63  ;;  %v1933_v7 = vld [vmem:[#allocation2 + $0x1c4] sm:$0xf0] }
  0x16   :  { %v1750_v8 = vld [vmem:[#allocation2 + $0x140] sm:$0xf]  ;;  %v1917_v9 = vld [vmem:[#allocation2 + $0x144] sm:$0xf0]  ;;  %v1883_v10 = vld [vmem:[#allocation2 + $0x34] sm:$0xf0]  ;;  %v1815_v15 = vor.u32 %v1933_v7, %v1814_v4 }
  0x17   :  { %1444 = vmatmul.msk.bf16.vlgmr.msra.gmra.mxu0 %vm240_vm0, %v1940_v28  ;;  %1449 = vmatmul.msk.bf16.vlgmr.msra.gmra.mxu2 %vm240_vm0, %v2096_v29  ;;  %v1678_v11 = vld [vmem:[#allocation2 + $0xb0] sm:$0xf]  ;;  %v1899_v12 = vld [vmem:[#allocation2 + $0xb4] sm:$0xf0]  ;;  %v1941_v13 = vld [vmem:[%s2750_s1 + $0x8] sm:$0xff]  ;;  %v1751_v16 = vor.u32 %v1917_v9, %v1750_v8  ;;  %v1615_v17 = vor.u32 %v1883_v10, %v1614_v1 }
  0x18   :  { %843 = vmatpush.bf16.msrb.mxu2 %v1647_v33  ;;  %1456 = vmatmul.msk.bf16.vlgmr.msra.gmra.mxu3 %vm240_vm0, %v2101_v40  ;;  %v2115_v14 = vld [vmem:[%s2750_s1 + $0x30] sm:$0xff]  ;;  %v1606_v18 = vld [vmem:[#allocation2 + $0x20] sm:$0xf]  ;;  %v1679_v19 = vor.u32 %v1899_v12, %v1678_v11  ;;  %v1931_v21 = vld [vmem:[#allocation2 + $0x1b4] sm:$0xf0] }
  0x19   :  { %892 = vmatpush.bf16.msrb.mxu3 %v1711_v32  ;;  %1452 = vmatmul.msk.bf16.vlgmr.msra.gmra.mxu1 %vm240_vm0, %v1940_v28  ;;  %v1806_v20 = vld [vmem:[#allocation2 + $0x1b0] sm:$0xf]  ;;  %v1881_v22 = vld [vmem:[#allocation2 + $0x24] sm:$0xf0]  ;;  %v1670_v23 = vld [vmem:[#allocation2 + $0xa0] sm:$0xf] }
  0x1a   :  { %941 = vmatpush.bf16.msrb.mxu0 %v1775_v41  ;;  %990 = vmatpush.bf16.msrb.mxu1 %v1839_v42  ;;  %v1897_v24 = vld [vmem:[#allocation2 + $0xa4] sm:$0xf0]  ;;  %v1807_v25 = vor.u32 %v1931_v21, %v1806_v20  ;;  %v1607_v26 = vor.u32 %v1881_v22, %v1606_v18  ;;  %v1598_v27 = vld [vmem:[#allocation2 + $0x10] sm:$0xf]  ;;  %v1879_v28 = vld [vmem:[#allocation2 + $0x14] sm:$0xf0] }
  0x1b   :  { %v1671_v30 = vor.u32 %v1897_v24, %v1670_v23  ;;  %v1662_v31 = vld [vmem:[#allocation2 + $0x90] sm:$0xf]  ;;  %v1895_v32 = vld [vmem:[#allocation2 + $0x94] sm:$0xf0]  ;;  %v1599_v34 = vor.u32 %v1879_v28, %v1598_v27  ;;  %v1590_v35 = vld [vmem:[#allocation2] sm:$0xf] }
  0x1c   :  { %844 = vmatpush.bf16.msrb.mxu2 %v1639_v45  ;;  %v1742_v33 = vld [vmem:[#allocation2 + $0x130] sm:$0xf]  ;;  %v1915_v36 = vld [vmem:[#allocation2 + $0x134] sm:$0xf0]  ;;  %v1798_v37 = vld [vmem:[#allocation2 + $0x1a0] sm:$0xf]  ;;  %v1663_v41 = vor.u32 %v1895_v32, %v1662_v31 }
  0x1d   :  { %893 = vmatpush.bf16.msrb.mxu3 %v1703_v46  ;;  %v1929_v38 = vld [vmem:[#allocation2 + $0x1a4] sm:$0xf0]  ;;  %v1743_v42 = vor.u32 %v1915_v36, %v1742_v33  ;;  %v1890_v44 = vld [vmem:[#allocation2 + $0x74] sm:$0xf]  ;;  %v1654_v45 = vld [vmem:[#allocation2 + $0x80] sm:$0xf] }
  0x1e   :  { %942 = vmatpush.bf16.msrb.mxu0 %v1767_v53  ;;  %991 = vmatpush.bf16.msrb.mxu1 %v1831_v54  ;;  %v1877_v39 = vld [vmem:[#allocation2 + $0x4] sm:$0xf0]  ;;  %v1799_v43 = vor.u32 %v1929_v38, %v1798_v37  ;;  %v1734_v46 = vld [vmem:[#allocation2 + $0x120] sm:$0xf]  ;;  %v1648_v48 = vld [vmem:[#allocation2 + $0x78] sm:$0xf0] }
  0x1f   :  { %v1913_v47 = vld [vmem:[#allocation2 + $0x124] sm:$0xf0]  ;;  %v1790_v50 = vld [vmem:[#allocation2 + $0x190] sm:$0xf]  ;;  %v1927_v51 = vld [vmem:[#allocation2 + $0x194] sm:$0xf0]  ;;  %v1591_v53 = vor.u32 %v1877_v39, %v1590_v35 }
  0x20   :  { %845 = vmatpush.bf16.msrb.mxu2 %v1631_v57  ;;  %v1735_v49 = vor.u32 %v1913_v47, %v1734_v46  ;;  %v1791_v52 = vor.u32 %v1927_v51, %v1790_v50  ;;  %v1782_v55 = vld [vmem:[#allocation2 + $0x180] sm:$0xf]  ;;  %v1925_v56 = vld [vmem:[#allocation2 + $0x184] sm:$0xf0]  ;;  %v1651_v57 = vor.u32 %v1890_v44, %v1648_v48  ;;  %v1942_v59 = vld [vmem:[%s2750_s1 + $0x10] sm:$0xff] }
  0x21   :  { %894 = vmatpush.bf16.msrb.mxu3 %v1695_v58  ;;  %v1783_v58 = vor.u32 %v1925_v56, %v1782_v55  ;;  %v1947_v60 = vld [vmem:[%s2750_s1 + $0x38] sm:$0xff]  ;;  %v1906_v61 = vld [vmem:[#allocation2 + $0xf4] sm:$0xf]  ;;  %v1888_v63 = vld [vmem:[#allocation2 + $0x64] sm:$0xf] }
  0x22   :  { %992 = vmatpush.bf16.msrb.mxu1 %v1823_v2  ;;  %943 = vmatpush.bf16.msrb.mxu0 %v1759_v3  ;;  %v1712_v62 = vld [vmem:[#allocation2 + $0xf8] sm:$0xf0]  ;;  %v1640_v1 = vld [vmem:[#allocation2 + $0x68] sm:$0xf0]  ;;  %v1726_v2 = vld [vmem:[#allocation2 + $0x110] sm:$0xf] }
  0x23   :  { %v1715_v0 = vor.u32 %v1906_v61, %v1712_v62  ;;  %v1911_v3 = vld [vmem:[#allocation2 + $0x114] sm:$0xf0]  ;;  %v1643_v4 = vor.u32 %v1888_v63, %v1640_v1  ;;  %v1840_v7 = vld [vmem:[#allocation2 + $0x1f8] sm:$0xf0]  ;;  %v1718_v8 = vld [vmem:[#allocation2 + $0x100] sm:$0xf] }
  0x24   :  { %846 = vmatpush.bf16.msrb.mxu2 %v1623_v5  ;;  %v1727_v5 = vor.u32 %v1911_v3, %v1726_v2  ;;  %v1909_v10 = vld [vmem:[#allocation2 + $0x104] sm:$0xf0]  ;;  %v1462_v12 = vld [vmem:[%s2749_s0] sm:$0xf]  ;;  %v1886_v18 = vld [vmem:[#allocation2 + $0x54] sm:$0xf] }
  0x25   :  { %895 = vmatpush.bf16.msrb.mxu3 %v1687_v6  ;;  %v1938_v6 = vld [vmem:[#allocation2 + $0x1f4] sm:$0xf]  ;;  %v1719_v11 = vor.u32 %v1909_v10, %v1718_v8  ;;  %v1632_v20 = vld [vmem:[#allocation2 + $0x58] sm:$0xf0]  ;;  %v1478_v28 = vld [vmem:[%s2749_s0 + $0x20] sm:$0xf] }
  0x26   :  { %993 = vmatpush.bf16.msrb.mxu1 %v1815_v15  ;;  %944 = vmatpush.bf16.msrb.mxu0 %v1751_v16  ;;  %v1843_v9 = vor.u32 %v1938_v6, %v1840_v7  ;;  %v1904_v16 = vld [vmem:[#allocation2 + $0xe4] sm:$0xf]  ;;  %v1922_v21 = vld [vmem:[#allocation2 + $0x174] sm:$0xf]  ;;  %v1776_v22 = vld [vmem:[#allocation2 + $0x178] sm:$0xf0]  ;;  %v1635_v23 = vor.u32 %v1886_v18, %v1632_v20 }
  0x27   :  { %1445 = vmatmul.msk.bf16.gmra.mxu0 %vm240_vm0, %v1941_v13  ;;  %1450 = vmatmul.msk.bf16.gmra.mxu2 %vm240_vm0, %v2115_v14  ;;  %v2149_v24 = vor.u32 %v1922_v21, %v1776_v22  ;;  %v1844_v31 = vld [vmem:[%s2749_s0 + $0x4] sm:$0xf]  ;;  %v1464_v32 = vld [vmem:[%s2749_s0 + $0x10] sm:$0xf0]  ;;  %v1845_v33 = vld [vmem:[%s2749_s0 + $0xc] sm:$0xf] }
  0x28   :  { %847 = vmatpush.bf16.msrb.mxu2 %v1615_v17  ;;  %1457 = vmatmul.msk.bf16.gmra.mxu3 %vm240_vm0, %v2096_v29  ;;  %v1893_v29 = vld [vmem:[#allocation2 + $0x84] sm:$0xf0]  ;;  %v1704_v17 = vld [vmem:[#allocation2 + $0xe8] sm:$0xf0]  ;;  %v2172_v36 = vor.u32 %v1844_v31, %v1464_v32  ;;  %v1902_v38 = vld [vmem:[#allocation2 + $0xd4] sm:$0xf] }
  0x29   :  { %896 = vmatpush.bf16.msrb.mxu3 %v1679_v19  ;;  %1453 = vmatmul.msk.bf16.gmra.mxu1 %vm240_vm0, %v1941_v13  ;;  %v1655_v54 = vor.u32 %v1893_v29, %v1654_v45  ;;  %v1846_v13 = vld [vmem:[%s2749_s0 + $0xc] sm:$0xf0]  ;;  %v1707_v19 = vor.u32 %v1904_v16, %v1704_v17  ;;  %v1696_v39 = vld [vmem:[#allocation2 + $0xd8] sm:$0xf0]  ;;  %v1920_v44 = vld [vmem:[#allocation2 + $0x164] sm:$0xf] }
  0x2a   :  { %994 = vmatpush.bf16.msrb.mxu1 %v1807_v25  ;;  %945 = vmatpush.bf16.msrb.mxu0 %v1743_v42  ;;  %v2143_v15 = vor.u32 %v1846_v13, %v1462_v12  ;;  %v1936_v25 = vld [vmem:[#allocation2 + $0x1e4] sm:$0xf]  ;;  %v1699_v42 = vor.u32 %v1902_v38, %v1696_v39  ;;  %v1768_v45 = vld [vmem:[#allocation2 + $0x168] sm:$0xf0]  ;;  %v1934_v47 = vld [vmem:[#allocation2 + $0x1d4] sm:$0xf] }
  0x2b   :  { %v2181_v46 = vor.u32 %v1920_v44, %v1768_v45  ;;  %v1824_v48 = vld [vmem:[#allocation2 + $0x1d8] sm:$0xf0]  ;;  %v1854_v50 = vld [vmem:[%s2749_s0 + $0x4c] sm:$0xf0]  ;;  %v1848_v51 = vld [vmem:[%s2749_s0 + $0x24] sm:$0xf] }
  0x2c   :  { %848 = vmatpush.bf16.msrb.mxu2 %v1607_v26  ;;  %v1832_v26 = vld [vmem:[#allocation2 + $0x1e8] sm:$0xf0]  ;;  %v1488_v56 = vld [vmem:[%s2749_s0 + $0x38] sm:$0xf0]  ;;  %v1900_v61 = vld [vmem:[#allocation2 + $0xc4] sm:$0xf] }
  0x2d   :  { %897 = vmatpush.bf16.msrb.mxu3 %v1671_v30  ;;  %v1835_v27 = vor.u32 %v1936_v25, %v1832_v26  ;;  %v1850_v30 = vld [vmem:[%s2749_s0 + $0x2c] sm:$0xf0]  ;;  %v1849_v55 = vld [vmem:[%s2749_s0 + $0x2c] sm:$0xf]  ;;  %v1882_v63 = vld [vmem:[#allocation2 + $0x34] sm:$0xf] }
  0x2e   :  { %995 = vmatpush.bf16.msrb.mxu1 %v1799_v43  ;;  %946 = vmatpush.bf16.msrb.mxu0 %v1735_v49  ;;  %v2170_v35 = vor.u32 %v1850_v30, %v1478_v28  ;;  %v1624_v43 = vld [vmem:[#allocation2 + $0x48] sm:$0xf0]  ;;  %v1494_v49 = vld [vmem:[%s2749_s0 + $0x40] sm:$0xf]  ;;  %v1616_v1 = vld [vmem:[#allocation2 + $0x38] sm:$0xf0] }
  0x2f   :  { %v1688_v62 = vld [vmem:[#allocation2 + $0xc8] sm:$0xf0]  ;;  %v1918_v2 = vld [vmem:[#allocation2 + $0x154] sm:$0xf]  ;;  %v1760_v3 = vld [vmem:[#allocation2 + $0x158] sm:$0xf0] }
  0x30   :  { %849 = vmatpush.bf16.msrb.mxu2 %v1599_v34  ;;  %v1472_v34 = vld [vmem:[%s2749_s0 + $0x18] sm:$0xf0]  ;;  %v1932_v6 = vld [vmem:[#allocation2 + $0x1c4] sm:$0xf]  ;;  %v1816_v7 = vld [vmem:[#allocation2 + $0x1c8] sm:$0xf0] }
  0x31   :  { %898 = vmatpush.bf16.msrb.mxu3 %v1663_v41  ;;  %v2174_v37 = vor.u32 %v1845_v33, %v1472_v34  ;;  %v1884_v41 = vld [vmem:[#allocation2 + $0x44] sm:$0xf]  ;;  %v1819_v8 = vor.u32 %v1932_v6, %v1816_v7  ;;  %v1858_v10 = vld [vmem:[%s2749_s0 + $0x6c] sm:$0xf0]  ;;  %v1486_v12 = vld [vmem:[%s2749_s0 + $0x28] sm:$0xf] }
  0x32   :  { %996 = vmatpush.bf16.msrb.mxu1 %v1791_v52  ;;  %947 = vmatpush.bf16.msrb.mxu0 %v1727_v5  ;;  %v1627_v29 = vor.u32 %v1884_v41, %v1624_v43  ;;  %v1470_v52 = vld [vmem:[%s2749_s0 + $0x8] sm:$0xf]  ;;  %v2220_v5 = vor.u32 %v1918_v2, %v1760_v3  ;;  %v1851_v13 = vld [vmem:[%s2749_s0 + $0x34] sm:$0xf0]  ;;  %v1853_v16 = vld [vmem:[%s2749_s0 + $0x4c] sm:$0xf] }
  0x33   :  { %v1504_v17 = vld [vmem:[%s2749_s0 + $0x58] sm:$0xf0]  ;;  %v1898_v22 = vld [vmem:[#allocation2 + $0xb4] sm:$0xf]  ;;  %v1880_v25 = vld [vmem:[#allocation2 + $0x24] sm:$0xf] }
  0x34   :  { %850 = vmatpush.bf16.msrb.mxu2 %v1591_v53  ;;  %v1847_v53 = vld [vmem:[%s2749_s0 + $0x14] sm:$0xf0]  ;;  %v2253_v21 = vor.u32 %v1853_v16, %v1504_v17  ;;  %v1916_v30 = vld [vmem:[#allocation2 + $0x144] sm:$0xf]  ;;  %v1752_v31 = vld [vmem:[#allocation2 + $0x148] sm:$0xf0] }
  0x35   :  { %899 = vmatpush.bf16.msrb.mxu3 %v1655_v54  ;;  %v1480_v54 = vld [vmem:[%s2749_s0 + $0x30] sm:$0xf0]  ;;  %v2259_v33 = vor.u32 %v1916_v30, %v1752_v31  ;;  %v1808_v34 = vld [vmem:[#allocation2 + $0x1b8] sm:$0xf0]  ;;  %v1526_v38 = vld [vmem:[%s2749_s0 + $0x80] sm:$0xf] }
  0x36   :  { %997 = vmatpush.bf16.msrb.mxu1 %v1783_v58  ;;  %948 = vmatpush.bf16.msrb.mxu0 %v1719_v11  ;;  %v2210_v58 = vor.u32 %v1847_v53, %v1470_v52  ;;  %v1852_v11 = vld [vmem:[%s2749_s0 + $0x44] sm:$0xf]  ;;  %v1930_v32 = vld [vmem:[#allocation2 + $0x1b4] sm:$0xf]  ;;  %v1862_v39 = vld [vmem:[%s2749_s0 + $0x8c] sm:$0xf0] }
  0x37   :  { %1446 = vmatmul.msk.bf16.gmra.mxu0 %vm240_vm0, %v1942_v59  ;;  %1451 = vmatmul.msk.bf16.gmra.mxu2 %vm240_vm0, %v1947_v60  ;;  %v1811_v41 = vor.u32 %v1930_v32, %v1808_v34  ;;  %v1502_v43 = vld [vmem:[%s2749_s0 + $0x48] sm:$0xf]  ;;  %v1855_v44 = vld [vmem:[%s2749_s0 + $0x54] sm:$0xf0]  ;;  %v1512_v45 = vld [vmem:[%s2749_s0 + $0x70] sm:$0xf0] }
  0x38   :  { %1039 = vmatpush.bf16.msra.mxu2 %v1651_v57  ;;  %1458 = vmatmul.msk.bf16.gmra.mxu3 %vm240_vm0, %v2115_v14  ;;  %v1943_v14 = vld [vmem:[%s2750_s1 + $0x18] sm:$0xff]  ;;  %v2208_v57 = vor.u32 %v1854_v50, %v1494_v49  ;;  %v1672_v52 = vld [vmem:[#allocation2 + $0xa8] sm:$0xf0]  ;;  %v1878_v53 = vld [vmem:[#allocation2 + $0x14] sm:$0xf] }
  0x39   :  { %1454 = vmatmul.msk.bf16.gmra.mxu1 %vm240_vm0, %v1942_v59  ;;  %1088 = vmatpush.bf16.msra.mxu3 %v1715_v0  ;;  %v2212_v59 = vor.u32 %v1848_v51, %v1480_v54  ;;  %v1691_v0 = vor.u32 %v1900_v61, %v1688_v62  ;;  %v1896_v51 = vld [vmem:[#allocation2 + $0xa4] sm:$0xf]  ;;  %v1914_v61 = vld [vmem:[#allocation2 + $0x134] sm:$0xf]  ;;  %v1744_v62 = vld [vmem:[#allocation2 + $0x138] sm:$0xf0] }
  0x3a   :  { %1186 = vmatpush.bf16.msra.mxu1 %v1843_v9  ;;  %1137 = vmatpush.bf16.msra.mxu0 %v2149_v24  ;;  %v1510_v9 = vld [vmem:[%s2749_s0 + $0x60] sm:$0xf]  ;;  %v1675_v54 = vor.u32 %v1896_v51, %v1672_v52  ;;  %v1866_v3 = vld [vmem:[%s2749_s0 + $0xac] sm:$0xf0]  ;;  %v1860_v6 = vld [vmem:[%s2749_s0 + $0x84] sm:$0xf] }
  0x3b   :  { %v2247_v18 = vor.u32 %v1858_v10, %v1510_v9  ;;  %v1542_v2 = vld [vmem:[%s2749_s0 + $0xa0] sm:$0xf]  ;;  %v1518_v7 = vld [vmem:[%s2749_s0 + $0x68] sm:$0xf]  ;;  %v1528_v9 = vld [vmem:[%s2749_s0 + $0x90] sm:$0xf0] }
  0x3c   :  { %1040 = vmatpush.bf16.msra.mxu2 %v1643_v4  ;;  %v1619_v4 = vor.u32 %v1882_v63, %v1616_v1  ;;  %v1928_v63 = vld [vmem:[#allocation2 + $0x1a4] sm:$0xf]  ;;  %v1800_v1 = vld [vmem:[#allocation2 + $0x1a8] sm:$0xf0]  ;;  %v2331_v16 = vor.u32 %v1860_v6, %v1528_v9  ;;  %v1534_v52 = vld [vmem:[%s2749_s0 + $0x88] sm:$0xf] }
  0x3d   :  { %1089 = vmatpush.bf16.msra.mxu3 %v1707_v19  ;;  %v2249_v19 = vor.u32 %v1851_v13, %v1486_v12  ;;  %v1861_v10 = vld [vmem:[%s2749_s0 + $0x8c] sm:$0xf]  ;;  %v2325_v12 = vor.u32 %v1866_v3, %v1542_v2  ;;  %v1864_v51 = vld [vmem:[%s2749_s0 + $0xa4] sm:$0xf] }
  0x3e   :  { %1187 = vmatpush.bf16.msra.mxu1 %v1835_v27  ;;  %1138 = vmatpush.bf16.msra.mxu0 %v2181_v46  ;;  %v1608_v27 = vld [vmem:[#allocation2 + $0x28] sm:$0xf0] }
  0x3f   :  { %v1611_v28 = vor.u32 %v1880_v25, %v1608_v27  ;;  %v1664_v25 = vld [vmem:[#allocation2 + $0x98] sm:$0xf0]  ;;  %v1656_v6 = vld [vmem:[#allocation2 + $0x88] sm:$0xf0] }
  0x40   :  { %1041 = vmatpush.bf16.msra.mxu2 %v1635_v23  ;;  %v1680_v23 = vld [vmem:[#allocation2 + $0xb8] sm:$0xf0] }
  0x41   :  { %1090 = vmatpush.bf16.msra.mxu3 %v1699_v42  ;;  %v1683_v26 = vor.u32 %v1898_v22, %v1680_v23  ;;  %v1856_v42 = vld [vmem:[%s2749_s0 + $0x64] sm:$0xf]  ;;  %v1894_v23 = vld [vmem:[#allocation2 + $0x94] sm:$0xf] }
  0x42   :  { %1139 = vmatpush.bf16.msra.mxu0 %v2220_v5  ;;  %v2290_v49 = vor.u32 %v1856_v42, %v1512_v45  ;;  %v1667_v27 = vor.u32 %v1894_v23, %v1664_v25  ;;  %v1926_v42 = vld [vmem:[#allocation2 + $0x194] sm:$0xf]  ;;  %v1558_v45 = vld [vmem:[%s2749_s0 + $0xc0] sm:$0xf]  ;;  %v1728_v23 = vld [vmem:[#allocation2 + $0x118] sm:$0xf0] }
  0x43   :  { %v1924_v25 = vld [vmem:[#allocation2 + $0x184] sm:$0xf] }
  0x44   :  { %1042 = vmatpush.bf16.msra.mxu2 %v1627_v29  ;;  %v1857_v29 = vld [vmem:[%s2749_s0 + $0x6c] sm:$0xf] }
  0x45   :  { %1091 = vmatpush.bf16.msra.mxu3 %v1691_v0  ;;  %v2298_v0 = vor.u32 %v1914_v61, %v1744_v62 }
  0x46   :  { %1140 = vmatpush.bf16.msra.mxu0 %v2259_v33 }
  0x47   :  { %1447 = vmatmul.msk.bf16.gmra.mxu0 %vm240_vm0, %v1943_v14  ;;  %851 = vmatmul.bf16.vlgmr.msrb.gmra.mxu2 %v2143_v15 }
  0x48   :  { %1459 = vmatmul.msk.bf16.gmra.mxu3 %vm240_vm0, %v1947_v60  ;;  %v2214_v60 = vor.u32 %v1849_v55, %v1488_v56  ;;  %1043 = vmatpush.bf16.msra.mxu2 %v1619_v4  ;;  %v1600_v55 = vld [vmem:[#allocation2 + $0x18] sm:$0xf0]  ;;  %v1803_v4 = vor.u32 %v1928_v63, %v1800_v1 }
  0x49   :  { %1455 = vmatmul.msk.bf16.gmra.mxu1 %vm240_vm0, %v1943_v14  ;;  %v1496_v14 = vld [vmem:[%s2749_s0 + $0x50] sm:$0xf0]  ;;  %1092 = vmatpush.bf16.msra.mxu3 %v1683_v26  ;;  %v1603_v56 = vor.u32 %v1878_v53, %v1600_v55  ;;  %v1876_v26 = vld [vmem:[#allocation2 + $0x4] sm:$0xf]  ;;  %v1552_v55 = vld [vmem:[%s2749_s0 + $0xb8] sm:$0xf0] }
  0x4a   :  { %v2251_v20 = vor.u32 %v1852_v11, %v1496_v14  ;;  %1141 = vmatpush.bf16.msra.mxu0 %v2298_v0  ;;  %v1536_v11 = vld [vmem:[%s2749_s0 + $0x98] sm:$0xf0]  ;;  %v1544_v53 = vld [vmem:[%s2749_s0 + $0xb0] sm:$0xf0] }
  0x4b   :  { %v2333_v17 = vor.u32 %v1861_v10, %v1536_v11  ;;  %v2385_v2 = vor.u32 %v1864_v51, %v1544_v53  ;;  %v1910_v11 = vld [vmem:[#allocation2 + $0x114] sm:$0xf] }
  0x4c   :  { %1044 = vmatpush.bf16.msra.mxu2 %v1611_v28  ;;  %v1592_v28 = vld [vmem:[#allocation2 + $0x8] sm:$0xf0] }
  0x4d   :  { %1093 = vmatpush.bf16.msra.mxu3 %v1675_v54  ;;  %v1595_v31 = vor.u32 %v1876_v26, %v1592_v28  ;;  %v1865_v54 = vld [vmem:[%s2749_s0 + $0xac] sm:$0xf]  ;;  %v1731_v26 = vor.u32 %v1910_v11, %v1728_v23  ;;  %v1874_v28 = vld [vmem:[%s2749_s0 + $0xec] sm:$0xf0]  ;;  %v1908_v11 = vld [vmem:[#allocation2 + $0x104] sm:$0xf] }
  0x4e   :  { %v2387_v3 = vor.u32 %v1865_v54, %v1552_v55  ;;  %v1720_v23 = vld [vmem:[#allocation2 + $0x108] sm:$0xf0] }
  0x50   :  { %1045 = vmatpush.bf16.msra.mxu2 %v1603_v56 }
  0x51   :  { %1094 = vmatpush.bf16.msra.mxu3 %v1667_v27  ;;  %v1784_v27 = vld [vmem:[#allocation2 + $0x188] sm:$0xf0] }
  0x54   :  { %1046 = vmatpush.bf16.msra.mxu2 %v1595_v31  ;;  %v1787_v31 = vor.u32 %v1924_v25, %v1784_v27  ;;  %v1723_v25 = vor.u32 %v1908_v11, %v1720_v23  ;;  %v1566_v27 = vld [vmem:[%s2749_s0 + $0xc8] sm:$0xf] }
  0x57   :  { %1448 = vmatmul.msk.bf16.gmra.mxu0 %vm240_vm0, %v2101_v40  ;;  %856 = vmatmul.bf16.gmra.mxu2 %v2170_v35  ;;  %v1827_v40 = vor.u32 %v1934_v47, %v1824_v48  ;;  %v1520_v47 = vld [vmem:[%s2749_s0 + $0x78] sm:$0xf0]  ;;  %v2286_v48 = vor.u32 %v1862_v39, %v1526_v38  ;;  %v1912_v39 = vld [vmem:[#allocation2 + $0x124] sm:$0xf] }
  0x58   :  { %900 = vmatmul.bf16.vlgmr.msrb.gmra.mxu3 %v2172_v36  ;;  %v2292_v50 = vor.u32 %v1857_v29, %v1520_v47  ;;  %1964 = vmatpush.bf16.msrb.mxu2 %v2149_v24  ;;  %v1870_v29 = vld [vmem:[%s2749_s0 + $0xcc] sm:$0xf0]  ;;  %v1863_v24 = vld [vmem:[%s2749_s0 + $0x94] sm:$0xf0] }
  0x59   :  { %998 = vmatmul.bf16.vlgmr.msrb.gmra.mxu1 %v2174_v37  ;;  %v2379_v62 = vor.u32 %v1870_v29, %v1558_v45  ;;  %v2381_v63 = vor.u32 %v1863_v24, %v1534_v52  ;;  %v1568_v45 = vld [vmem:[%s2749_s0 + $0xd8] sm:$0xf0] }
  0x5a   :  { %1188 = vmatpush.bf16.msra.mxu1 %v1827_v40  ;;  %v2288_v40 = vor.u32 %v1855_v44, %v1502_v43  ;;  %v1792_v44 = vld [vmem:[#allocation2 + $0x198] sm:$0xf0] }
  0x5b   :  { %v1795_v47 = vor.u32 %v1926_v42, %v1792_v44  ;;  %v1560_v42 = vld [vmem:[%s2749_s0 + $0xd0] sm:$0xf0]  ;;  %v1869_v44 = vld [vmem:[%s2749_s0 + $0xcc] sm:$0xf] }
  0x5c   :  { %1965 = vmatpush.bf16.msrb.mxu2 %v2181_v46  ;;  %v1892_v46 = vld [vmem:[#allocation2 + $0x84] sm:$0xf]  ;;  %v2442_v54 = vor.u32 %v1869_v44, %v1568_v45 }
  0x5e   :  { %1189 = vmatpush.bf16.msra.mxu1 %v1819_v8  ;;  %v1859_v8 = vld [vmem:[%s2749_s0 + $0x74] sm:$0xf0] }
  0x5f   :  { %v2327_v13 = vor.u32 %v1859_v8, %v1518_v7  ;;  %v1659_v7 = vor.u32 %v1892_v46, %v1656_v6 }
  0x60   :  { %1966 = vmatpush.bf16.msrb.mxu2 %v2220_v5 }
  0x61   :  { %1095 = vmatpush.bf16.msra.mxu3 %v1659_v7 }
  0x62   :  { %1190 = vmatpush.bf16.msra.mxu1 %v1811_v41  ;;  %v1736_v41 = vld [vmem:[#allocation2 + $0x128] sm:$0xf0] }
  0x63   :  { %v1739_v43 = vor.u32 %v1912_v39, %v1736_v41  ;;  %v1868_v39 = vld [vmem:[%s2749_s0 + $0xc4] sm:$0xf]  ;;  %v1550_v41 = vld [vmem:[%s2749_s0 + $0xa8] sm:$0xf] }
  0x64   :  { %1967 = vmatpush.bf16.msrb.mxu2 %v2259_v33  ;;  %v1574_v33 = vld [vmem:[%s2749_s0 + $0xe0] sm:$0xf]  ;;  %v2440_v53 = vor.u32 %v1868_v39, %v1560_v42  ;;  %v1584_v39 = vld [vmem:[%s2749_s0 + $0xf8] sm:$0xf0] }
  0x65   :  { %1142 = vmatpush.bf16.msra.mxu0 %v1739_v43  ;;  %v2434_v51 = vor.u32 %v1874_v28, %v1574_v33  ;;  %v1871_v33 = vld [vmem:[%s2749_s0 + $0xd4] sm:$0xf0]  ;;  %v1576_v28 = vld [vmem:[%s2749_s0 + $0xf0] sm:$0xf0] }
  0x66   :  { %1191 = vmatpush.bf16.msra.mxu1 %v1803_v4  ;;  %v2480_v42 = vor.u32 %v1871_v33, %v1566_v27 }
  0x67   :  { %861 = vmatmul.bf16.gmra.mxu2 %v2208_v57  ;;  %949 = vmatmul.bf16.vlgmr.msrb.gmra.mxu0 %v2210_v58 }
  0x68   :  { %905 = vmatmul.bf16.gmra.mxu3 %v2212_v59  ;;  %1968 = vmatpush.bf16.msrb.mxu2 %v2298_v0  ;;  %v1867_v0 = vld [vmem:[%s2749_s0 + $0xb4] sm:$0xf0] }
  0x69   :  { %1003 = vmatmul.bf16.gmra.mxu1 %v2214_v60  ;;  %1143 = vmatpush.bf16.msra.mxu0 %v1731_v26  ;;  %v2436_v52 = vor.u32 %v1867_v0, %v1550_v41 }
  0x6a   :  { %1192 = vmatpush.bf16.msra.mxu1 %v1795_v47 }
  0x6c   :  { %1969 = vmatpush.bf16.msrb.mxu2 %v1739_v43 }
  0x6d   :  { %1144 = vmatpush.bf16.msra.mxu0 %v1723_v25 }
  0x6e   :  { %1193 = vmatpush.bf16.msra.mxu1 %v1787_v31  ;;  %v1873_v31 = vld [vmem:[%s2749_s0 + $0xec] sm:$0xf] }
  0x6f   :  { %v2486_v11 = vor.u32 %v1873_v31, %v1584_v39 }
  0x70   :  { %1970 = vmatpush.bf16.msrb.mxu2 %v1731_v26  ;;  %v1872_v26 = vld [vmem:[%s2749_s0 + $0xe4] sm:$0xf] }
  0x71   :  { %v2484_v45 = vor.u32 %v1872_v26, %v1576_v28  ;;  %v1582_v28 = vld [vmem:[%s2749_s0 + $0xe8] sm:$0xf] }
  0x74   :  { %1971 = vmatpush.bf16.msrb.mxu2 %v1723_v25 }
  0x77   :  { %866 = vmatmul.bf16.gmra.mxu2 %v2247_v18  ;;  %954 = vmatmul.bf16.gmra.mxu0 %v2249_v19 }
  0x78   :  { %910 = vmatmul.bf16.gmra.mxu3 %v2251_v20 }
  0x79   :  { %1008 = vmatmul.bf16.gmra.mxu1 %v2253_v21 }
  0x87   :  { %871 = vmatmul.bf16.gmra.mxu2 %v2286_v48  ;;  %959 = vmatmul.bf16.gmra.mxu0 %v2288_v40 }
  0x88   :  { %915 = vmatmul.bf16.gmra.mxu3 %v2290_v49 }
  0x89   :  { %1013 = vmatmul.bf16.gmra.mxu1 %v2292_v50 }
  0x94   :  { %v2329_v14 = vpop.f32.mrf.mxu0 }
  0x96   :  { %v2335_v22 = vpop.f32.mrf.mxu1 }
  0x97   :  { %876 = vmatmul.bf16.gmra.mxu2 %v2325_v12  ;;  %964 = vmatmul.bf16.gmra.mxu0 %v2327_v13 }
  0x98   :  { %920 = vmatmul.bf16.gmra.mxu3 %v2331_v16 }
  0x99   :  { %1018 = vmatmul.bf16.gmra.mxu1 %v2333_v17 }
  0x9a   :  { %v2341_v30 = vpop.f32.mrf.mxu2 }
  0x9b   :  { %v2343_v32 = vpop.f32.mrf.mxu3 }
  0x9c   :  { %2756 = vst [vmem:[#allocation5_spill] sm:$0xff] %v2343_v32  ;;  %v2345_v34 = vpop.f32.mrf.mxu0 }
  0x9e   :  { %v2347_v38 = vpop.f32.mrf.mxu1 }
  0xa2   :  { %v2375_v56 = vpop.f32.mrf.mxu2 }
  0xa3   :  { %v2377_v61 = vpop.f32.mrf.mxu3 }
  0xa4   :  { %2757 = vst [vmem:[#allocation6_spill] sm:$0xff] %v2377_v61  ;;  %v2383_v1 = vpop.f32.mrf.mxu0 }
  0xa6   :  { %v2389_v4 = vpop.f32.mrf.mxu1 }
  0xa7   :  { %881 = vmatmul.bf16.gmra.mxu2 %v2379_v62  ;;  %969 = vmatmul.bf16.gmra.mxu0 %v2381_v63 }
  0xa8   :  { %925 = vmatmul.bf16.gmra.mxu3 %v2385_v2 }
  0xa9   :  { %1023 = vmatmul.bf16.gmra.mxu1 %v2387_v3 }
  0xaa   :  { %v2397_v8 = vpop.f32.mrf.mxu2 }
  0xab   :  { %v2399_v9 = vpop.f32.mrf.mxu3 }
  0xac   :  { %2758 = vst [vmem:[#allocation7_spill] sm:$0xff] %v2399_v9  ;;  %v2401_v10 = vpop.f32.mrf.mxu0 }
  0xae   :  { %v2403_v5 = vpop.f32.mrf.mxu1 }
  0xb2   :  { %v2430_v29 = vpop.f32.mrf.mxu2 }
  0xb3   :  { %v2432_v47 = vpop.f32.mrf.mxu3 }
  0xb4   :  { %2759 = vst [vmem:[#allocation8_spill] sm:$0xff] %v2432_v47  ;;  %v2438_v24 = vpop.f32.mrf.mxu0 }
  0xb6   :  { %v2444_v55 = vpop.f32.mrf.mxu1 }
  0xb7   :  { %2760 = vst [vmem:[#allocation9_spill] sm:$0xff] %v2444_v55  ;;  %886 = vmatmul.bf16.gmra.mxu2 %v2434_v51  ;;  %974 = vmatmul.bf16.gmra.mxu0 %v2436_v52 }
  0xb8   :  { %930 = vmatmul.bf16.gmra.mxu3 %v2440_v53 }
  0xb9   :  { %1028 = vmatmul.bf16.gmra.mxu1 %v2442_v54 }
  0xba   :  { %v2450_v43 = vpop.f32.mrf.mxu2 }
  0xbb   :  { %v2452_v46 = vpop.f32.mrf.mxu3 }
  0xbc   :  { %2761 = vst [vmem:[#allocation10_spill] sm:$0xff] %v2452_v46  ;;  %v2454_v6 = vpop.f32.mrf.mxu0 }
  0xbe   :  { %v2456_v7 = vpop.f32.mrf.mxu1 }
  0xbf   :  { %2762 = vst [vmem:[#allocation11_spill] sm:$0xff] %v2456_v7 }
  0xc2   :  { %v2476_v41 = vpop.f32.mrf.mxu2 }
  0xc3   :  { %v2478_v0 = vpop.f32.mrf.mxu3 }
  0xc4   :  { %2763 = vst [vmem:[#allocation12_spill] sm:$0xff] %v2478_v0  ;;  %v2482_v44 = vpop.f32.mrf.mxu0 }
  0xc6   :  { %v2488_v23 = vpop.f32.mrf.mxu1 }
  0xc7   :  { %2764 = vst [vmem:[#allocation13_spill] sm:$0xff] %v2488_v23  ;;  %979 = vmatmul.bf16.gmra.mxu0 %v2480_v42  ;;  %1047 = vmatmul.bf16.vlgmr.msra.gmra.mxu2 %v2143_v15  ;;  %v1875_v15 = vld [vmem:[%s2749_s0 + $0xf4] sm:$0xf0] }
  0xc8   :  { %935 = vmatmul.bf16.gmra.mxu3 %v2484_v45  ;;  %v2508_v47 = vor.u32 %v1875_v15, %v1582_v28 }
  0xc9   :  { %1033 = vmatmul.bf16.gmra.mxu1 %v2486_v11 }
  0xca   :  { %v852_v25 = vpop.f32.mrf.mxu2 }
  0xcb   :  { %v2494_v0 = vpop.f32.mrf.mxu3  ;;  %v853_v27 = vadd.f32 %v852_v25, %v2329_v14 }
  0xcc   :  { %2765 = vst [vmem:[#allocation14_spill] sm:$0xff] %v2494_v0  ;;  %v291_v33 = vpop.f32.mrf.mxu0 }
  0xce   :  { %v2497_v26 = vpop.f32.mrf.mxu1 }
  0xcf   :  { %2766 = vst [vmem:[#allocation15_spill] sm:$0xff] %v2497_v26 }
  0xd2   :  { %v854_v31 = vpop.f32.mrf.mxu2 }
  0xd3   :  { %v2505_v39 = vpop.f32.mrf.mxu3  ;;  %v855_v46 = vadd.f32 %v854_v31, %v2345_v34 }
  0xd4   :  { %2767 = vst [vmem:[#allocation16_spill] sm:$0xff] %v2505_v39  ;;  %v2510_v0 = vpop.f32.mrf.mxu0 }
  0xd6   :  { %v999_v14 = vpop.f32.mrf.mxu1 }
  0xd7   :  { %984 = vmatmul.bf16.gmra.mxu0 %v2508_v47  ;;  %1052 = vmatmul.bf16.gmra.mxu2 %v2170_v35 }
  0xd8   :  { %1096 = vmatmul.bf16.vlgmr.msra.gmra.mxu3 %v2172_v36 }
  0xd9   :  { %1194 = vmatmul.bf16.vlgmr.msra.gmra.mxu1 %v2174_v37 }
  0xda   :  { %v857_v25 = vpop.f32.mrf.mxu2 }
  0xdb   :  { %v858_v9 = vadd.f32 %v857_v25, %v2383_v1  ;;  %v901_v61 = vpop.f32.mrf.mxu3 }
  0xdc   :  { %v902_v39 = vadd.f32 %v901_v61, %v853_v27  ;;  %v2517_v32 = vpop.f32.mrf.mxu0 }
  0xde   :  { %v1001_v34 = vpop.f32.mrf.mxu1 }
  0xe2   :  { %v859_v28 = vpop.f32.mrf.mxu2 }
  0xe3   :  { %v860_v15 = vadd.f32 %v859_v28, %v2401_v10  ;;  %v903_v31 = vpop.f32.mrf.mxu3 }
  0xe4   :  { %v904_v26 = vadd.f32 %v903_v31, %v855_v46  ;;  %v950_v23 = vpop.f32.mrf.mxu0 }
  0xe5   :  { %v951_v7 = vadd.f32 %v950_v23, %v902_v39 }
  0xe6   :  { %v1004_v35 = vpop.f32.mrf.mxu1 }
  0xe7   :  { %v2520_v55 = vadd.f32 %v999_v14, %v951_v7  ;;  %1057 = vmatmul.bf16.gmra.mxu2 %v2208_v57  ;;  %1145 = vmatmul.bf16.vlgmr.msra.gmra.mxu0 %v2210_v58 }
  0xe8   :  { %1101 = vmatmul.bf16.gmra.mxu3 %v2212_v59 }
  0xe9   :  { %1199 = vmatmul.bf16.gmra.mxu1 %v2214_v60 }
  0xea   :  { %v862_v36 = vpop.f32.mrf.mxu2 }
  0xeb   :  { %v863_v37 = vadd.f32 %v862_v36, %v2438_v24  ;;  %v906_v61 = vpop.f32.mrf.mxu3 }
  0xec   :  { %v907_v1 = vadd.f32 %v906_v61, %v858_v9  ;;  %v952_v10 = vpop.f32.mrf.mxu0 }
  0xed   :  { %v953_v46 = vadd.f32 %v952_v10, %v904_v26 }
  0xee   :  { %v1006_v27 = vpop.f32.mrf.mxu1 }
  0xef   :  { %v2527_v23 = vadd.f32 %v1001_v34, %v953_v46 }
  0xf2   :  { %v864_v7 = vpop.f32.mrf.mxu2 }
  0xf3   :  { %v865_v39 = vadd.f32 %v864_v7, %v2454_v6  ;;  %v908_v57 = vpop.f32.mrf.mxu3 }
  0xf4   :  { %v909_v14 = vadd.f32 %v908_v57, %v860_v15  ;;  %v955_v58 = vpop.f32.mrf.mxu0 }
  0xf5   :  { %v956_v25 = vadd.f32 %v955_v58, %v907_v1 }
  0xf6   :  { %v1009_v59 = vpop.f32.mrf.mxu1 }
  0xf7   :  { %v2530_v28 = vadd.f32 %v1004_v35, %v956_v25  ;;  %1062 = vmatmul.bf16.gmra.mxu2 %v2247_v18  ;;  %1150 = vmatmul.bf16.gmra.mxu0 %v2249_v19 }
  0xf8   :  { %1106 = vmatmul.bf16.gmra.mxu3 %v2251_v20 }
  0xf9   :  { %1204 = vmatmul.bf16.gmra.mxu1 %v2253_v21 }
  0xfa   :  { %v867_v60 = vpop.f32.mrf.mxu2 }
  0xfb   :  { %v868_v9 = vadd.f32 %v867_v60, %v2482_v44  ;;  %v911_v24 = vpop.f32.mrf.mxu3 }
  0xfc   :  { %v912_v6 = vadd.f32 %v911_v24, %v863_v37  ;;  %v957_v26 = vpop.f32.mrf.mxu0 }
  0xfd   :  { %v958_v34 = vadd.f32 %v957_v26, %v909_v14 }
  0xfe   :  { %v1011_v15 = vpop.f32.mrf.mxu1 }
  0xff   :  { %v2537_v31 = vadd.f32 %v1006_v27, %v958_v34 }
 0x102   :  { %v869_v35 = vpop.f32.mrf.mxu2 }
 0x103   :  { %v870_v36 = vadd.f32 %v869_v35, %v291_v33  ;;  %v913_v61 = vpop.f32.mrf.mxu3 }
 0x104   :  { %v914_v18 = vadd.f32 %v913_v61, %v865_v39  ;;  %v960_v1 = vpop.f32.mrf.mxu0 }
 0x105   :  { %v961_v19 = vadd.f32 %v960_v1, %v912_v6 }
 0x106   :  { %v1014_v10 = vpop.f32.mrf.mxu1 }
 0x107   :  { %v2539_v20 = vadd.f32 %v1009_v59, %v961_v19  ;;  %1067 = vmatmul.bf16.gmra.mxu2 %v2286_v48  ;;  %1155 = vmatmul.bf16.gmra.mxu0 %v2288_v40 }
 0x108   :  { %1111 = vmatmul.bf16.gmra.mxu3 %v2290_v49 }
 0x109   :  { %1209 = vmatmul.bf16.gmra.mxu1 %v2292_v50 }
 0x10a   :  { %v872_v21 = vpop.f32.mrf.mxu2 }
 0x10b   :  { %v873_v44 = vadd.f32 %v872_v21, %v2510_v0  ;;  %v916_v37 = vpop.f32.mrf.mxu3 }
 0x10c   :  { %v917_v33 = vadd.f32 %v916_v37, %v868_v9  ;;  %v962_v46 = vpop.f32.mrf.mxu0 }
 0x10d   :  { %v963_v27 = vadd.f32 %v962_v46, %v914_v18 }
 0x10e   :  { %v1016_v7 = vpop.f32.mrf.mxu1 }
 0x10f   :  { %v2546_v39 = vadd.f32 %v1011_v15, %v963_v27 }
 0x112   :  { %v874_v57 = vpop.f32.mrf.mxu2 }
 0x113   :  { %v875_v14 = vadd.f32 %v874_v57, %v2517_v32  ;;  %v918_v48 = vpop.f32.mrf.mxu3 }
 0x114   :  { %v919_v58 = vadd.f32 %v918_v48, %v870_v36  ;;  %v965_v40 = vpop.f32.mrf.mxu0 }
 0x115   :  { %v966_v25 = vadd.f32 %v965_v40, %v917_v33 }
 0x116   :  { %v1019_v49 = vpop.f32.mrf.mxu1 }
 0x117   :  { %v2549_v59 = vadd.f32 %v1014_v10, %v966_v25  ;;  %1072 = vmatmul.bf16.gmra.mxu2 %v2325_v12  ;;  %1160 = vmatmul.bf16.gmra.mxu0 %v2327_v13 }
 0x118   :  { %1116 = vmatmul.bf16.gmra.mxu3 %v2331_v16 }
 0x119   :  { %1214 = vmatmul.bf16.gmra.mxu1 %v2333_v17 }
 0x11a   :  { %v877_v50 = vpop.f32.mrf.mxu2 }
 0x11b   :  { %v921_v0 = vpop.f32.mrf.mxu3  ;;  %v878_v13 = vadd.f32 %v877_v50, %v2341_v30 }
 0x11c   :  { %v922_v60 = vadd.f32 %v921_v0, %v873_v44  ;;  %v967_v9 = vpop.f32.mrf.mxu0 }
 0x11d   :  { %v968_v32 = vadd.f32 %v967_v9, %v919_v58 }
 0x11e   :  { %v1021_v24 = vpop.f32.mrf.mxu1 }
 0x11f   :  { %v2555_v6 = vadd.f32 %v1016_v7, %v968_v32 }
 0x122   :  { %v879_v26 = vpop.f32.mrf.mxu2 }
 0x123   :  { %v923_v34 = vpop.f32.mrf.mxu3  ;;  %v880_v44 = vadd.f32 %v879_v26, %v2375_v56 }
 0x124   :  { %v924_v15 = vadd.f32 %v923_v34, %v875_v14  ;;  %v970_v35 = vpop.f32.mrf.mxu0 }
 0x125   :  { %v971_v36 = vadd.f32 %v970_v35, %v922_v60 }
 0x126   :  { %v1024_v12 = vpop.f32.mrf.mxu1 }
 0x127   :  { %v2557_v61 = vadd.f32 %v1019_v49, %v971_v36  ;;  %1077 = vmatmul.bf16.gmra.mxu2 %v2379_v62  ;;  %1165 = vmatmul.bf16.gmra.mxu0 %v2381_v63 }
 0x128   :  { %1121 = vmatmul.bf16.gmra.mxu3 %v2385_v2 }
 0x129   :  { %1219 = vmatmul.bf16.gmra.mxu1 %v2387_v3 }
 0x12a   :  { %v882_v16 = vpop.f32.mrf.mxu2 }
 0x12b   :  { %v926_v17 = vpop.f32.mrf.mxu3  ;;  %v883_v30 = vadd.f32 %v882_v16, %v2397_v8 }
 0x12c   :  { %v927_v18 = vadd.f32 %v926_v17, %v878_v13  ;;  %v972_v1 = vpop.f32.mrf.mxu0 }
 0x12d   :  { %v973_v19 = vadd.f32 %v972_v1, %v924_v15 }
 0x12e   :  { %v1026_v10 = vpop.f32.mrf.mxu1 }
 0x12f   :  { %v2564_v21 = vadd.f32 %v1021_v24, %v973_v19 }
 0x132   :  { %v884_v37 = vpop.f32.mrf.mxu2 }
 0x133   :  { %v928_v62 = vpop.f32.mrf.mxu3  ;;  %v885_v40 = vadd.f32 %v884_v37, %v2430_v29 }
 0x134   :  { %v929_v33 = vadd.f32 %v928_v62, %v880_v44  ;;  %v975_v63 = vpop.f32.mrf.mxu0 }
 0x135   :  { %v976_v46 = vadd.f32 %v975_v63, %v927_v18  ;;  %v1235_v18 = vld [vmem:[%s2753_s4] sm:$0x3] }
 0x136   :  { %v1029_v2 = vpop.f32.mrf.mxu1 }
 0x137   :  { %v2567_v27 = vadd.f32 %v1024_v12, %v976_v46  ;;  %1082 = vmatmul.bf16.gmra.mxu2 %v2434_v51  ;;  %1170 = vmatmul.bf16.gmra.mxu0 %v2436_v52 }
 0x138   :  { %1126 = vmatmul.bf16.gmra.mxu3 %v2440_v53 }
 0x139   :  { %1224 = vmatmul.bf16.gmra.mxu1 %v2442_v54 }
 0x13a   :  { %v887_v3 = vpop.f32.mrf.mxu2 }
 0x13b   :  { %v931_v56 = vpop.f32.mrf.mxu3  ;;  %v888_v8 = vadd.f32 %v887_v3, %v2450_v43 }
 0x13c   :  { %v932_v7 = vadd.f32 %v931_v56, %v883_v30  ;;  %v977_v57 = vpop.f32.mrf.mxu0  ;;  %v2604_v30 = vperm.slane %v1235_v18, 1 }
 0x13d   :  { %v978_v14 = vadd.f32 %v977_v57, %v929_v33 }
 0x13e   :  { %v1031_v48 = vpop.f32.mrf.mxu1 }
 0x13f   :  { %v2574_v58 = vadd.f32 %v1026_v10, %v978_v14  ;;  %v1273_v10 = vld [vmem:[%s2754_s5] sm:$0x3] }
 0x140   :  { %v2602_v46 = vperm.slane %v1273_v10, 0 }
 0x142   :  { %v889_v25 = vpop.f32.mrf.mxu2 }
 0x143   :  { %v933_v51 = vpop.f32.mrf.mxu3  ;;  %v890_v34 = vadd.f32 %v889_v25, %v2476_v41  ;;  %v2594_v41 = vperm.slane %v1235_v18, 0 }
 0x144   :  { %v934_v49 = vadd.f32 %v933_v51, %v885_v40  ;;  %v980_v52 = vpop.f32.mrf.mxu0 }
 0x145   :  { %v981_v50 = vadd.f32 %v980_v52, %v932_v7  ;;  %v1241_v63 = vmul.f32 %v2594_v41, %v2520_v55  ;;  %v2606_v7 = vperm.slane %v1273_v10, 1  ;;  %v1243_v52 = vmul.f32 %v2594_v41, %v2527_v23 }
 0x146   :  { %v1034_v53 = vpop.f32.mrf.mxu1 }
 0x147   :  { %v2577_v0 = vadd.f32 %v1029_v2, %v981_v50  ;;  %1175 = vmatmul.bf16.gmra.mxu0 %v2480_v42  ;;  %1180 = vmatmul.bf16.vlgmr.msrb.gmra.mxu2 %v2508_v47 }
 0x148   :  { %1131 = vmatmul.bf16.gmra.mxu3 %v2484_v45 }
 0x149   :  { %1229 = vmatmul.bf16.gmra.mxu1 %v2486_v11 }
 0x14a   :  { %v1048_v54 = vpop.f32.mrf.mxu2 }
 0x14b   :  { %v936_v29 = vpop.f32.mrf.mxu3  ;;  %v1049_v19 = vadd.f32 %v1048_v54, %v2335_v22  ;;  %v1279_v22 = vadd.f32 %v2602_v46, %v1241_v63 }
 0x14c   :  { %v937_v60 = vadd.f32 %v936_v29, %v888_v8  ;;  %v982_v9 = vpop.f32.mrf.mxu0 }
 0x14d   :  { %v983_v32 = vadd.f32 %v982_v9, %v934_v49  ;;  %v1311_v49 = vmax.f32 %v1279_v22, 0.0 }
 0x14e   :  { %v1036_v24 = vpop.f32.mrf.mxu1 }
 0x14f   :  { %v2584_v26 = vadd.f32 %v1031_v48, %v983_v32 }
 0x152   :  { %v1050_v15 = vpop.f32.mrf.mxu2 }
 0x153   :  { %v938_v42 = vpop.f32.mrf.mxu3  ;;  %v1051_v57 = vadd.f32 %v1050_v15, %v2347_v38 }
 0x154   :  { %v939_v35 = vadd.f32 %v938_v42, %v890_v34  ;;  %v985_v47 = vpop.f32.mrf.mxu0 }
 0x155   :  { %v986_v36 = vadd.f32 %v985_v47, %v937_v60  ;;  %v1281_v60 = vadd.f32 %v2602_v46, %v1243_v52 }
 0x156   :  { %v1195_v45 = vpop.f32.mrf.mxu1 }
 0x157   :  { %v2587_v12 = vadd.f32 %v1034_v53, %v986_v36  ;;  %v1313_v42 = vmax.f32 %v1281_v60, 0.0 }
 0x15a   :  { %v1053_v11 = vpop.f32.mrf.mxu2 }
 0x15b   :  { %v1097_v43 = vpop.f32.mrf.mxu3  ;;  %v1054_v38 = vadd.f32 %v1053_v11, %v2389_v4 }
 0x15c   :  { %v987_v13 = vpop.f32.mrf.mxu0  ;;  %v1098_v37 = vadd.f32 %v1097_v43, %v1049_v19 }
 0x15d   :  { %v988_v16 = vadd.f32 %v987_v13, %v939_v35  ;;  %v1245_v35 = vmul.f32 %v2594_v41, %v2530_v28 }
 0x15e   :  { %v1197_v17 = vpop.f32.mrf.mxu1 }
 0x15f   :  { %v2592_v1 = vadd.f32 %v1036_v24, %v988_v16  ;;  %v1283_v43 = vadd.f32 %v2602_v46, %v1245_v35 }
 0x162   :  { %v1055_v44 = vpop.f32.mrf.mxu2 }
 0x163   :  { %v1099_v62 = vpop.f32.mrf.mxu3  ;;  %v1056_v13 = vadd.f32 %v1055_v44, %v2403_v5 }
 0x164   :  { %v1146_v33 = vpop.f32.mrf.mxu0  ;;  %v1100_v40 = vadd.f32 %v1099_v62, %v1051_v57  ;;  %v1247_v62 = vmul.f32 %v2594_v41, %v2537_v31 }
 0x165   :  { %v1147_v2 = vadd.f32 %v1146_v33, %v1098_v37  ;;  %v1315_v37 = vmax.f32 %v1283_v43, 0.0 }
 0x166   :  { %v1200_v3 = vpop.f32.mrf.mxu1 }
 0x167   :  { %v1196_v56 = vadd.f32 %v1195_v45, %v1147_v2 }
 0x169   :  { %v1242_v14 = vmul.f32 %v2604_v30, %v1196_v56  ;;  %v2768_v56 = vld [vmem:[#allocation9_spill] sm:$0xff] }
 0x16a   :  { %v1058_v48 = vpop.f32.mrf.mxu2 }
 0x16b   :  { %v1280_v25 = vadd.f32 %v2606_v7, %v1242_v14  ;;  %v1102_v55 = vpop.f32.mrf.mxu3  ;;  %v1059_v22 = vadd.f32 %v1058_v48, %v2768_v56 }
 0x16c   :  { %v1148_v51 = vpop.f32.mrf.mxu0  ;;  %v1103_v24 = vadd.f32 %v1102_v55, %v1054_v38 }
 0x16d   :  { %v1312_v50 = vmax.f32 %v1280_v25, 0.0  ;;  %v1149_v53 = vadd.f32 %v1148_v51, %v1100_v40 }
 0x16e   :  { %v1202_v8 = vpop.f32.mrf.mxu1 }
 0x16f   :  { %v1343_v54 = vpack.c.bf16 %v1312_v50, %v1311_v49  ;;  %v1198_v29 = vadd.f32 %v1197_v17, %v1149_v53  ;;  %v1249_v49 = vmul.f32 %v2594_v41, %v2539_v20 }
 0x171   :  { %1359 = vst [vmem:[%s2755_s6] sm:$0xff] %v1343_v54  ;;  %v1244_v9 = vmul.f32 %v2604_v30, %v1198_v29  ;;  %v1287_v54 = vadd.f32 %v2602_v46, %v1249_v49  ;;  %v2769_v29 = vld [vmem:[#allocation11_spill] sm:$0xff] }
 0x172   :  { %v1060_v32 = vpop.f32.mrf.mxu2 }
 0x173   :  { %v1282_v34 = vadd.f32 %v2606_v7, %v1244_v9  ;;  %v1104_v23 = vpop.f32.mrf.mxu3  ;;  %v1061_v60 = vadd.f32 %v1060_v32, %v2769_v29 }
 0x174   :  { %v1151_v15 = vpop.f32.mrf.mxu0  ;;  %v1105_v18 = vadd.f32 %v1104_v23, %v1056_v13 }
 0x175   :  { %v1314_v47 = vmax.f32 %v1282_v34, 0.0  ;;  %v1152_v36 = vadd.f32 %v1151_v15, %v1103_v24  ;;  %v1319_v15 = vmax.f32 %v1287_v54, 0.0 }
 0x176   :  { %v1205_v45 = vpop.f32.mrf.mxu1 }
 0x177   :  { %v1344_v4 = vpack.c.bf16 %v1314_v47, %v1313_v42  ;;  %v1201_v11 = vadd.f32 %v1200_v3, %v1152_v36  ;;  %v1285_v3 = vadd.f32 %v2602_v46, %v1247_v62  ;;  %v1251_v42 = vmul.f32 %v2594_v41, %v2546_v39 }
 0x179   :  { %1360 = vst [vmem:[%s2755_s6 + $0x8] sm:$0xff] %v1344_v4  ;;  %v1246_v16 = vmul.f32 %v2604_v30, %v1201_v11  ;;  %v1317_v51 = vmax.f32 %v1285_v3, 0.0  ;;  %v1289_v4 = vadd.f32 %v2602_v46, %v1251_v42  ;;  %v2770_v11 = vld [vmem:[#allocation13_spill] sm:$0xff] }
 0x17a   :  { %v1063_v17 = vpop.f32.mrf.mxu2 }
 0x17b   :  { %v1284_v19 = vadd.f32 %v2606_v7, %v1246_v16  ;;  %v1107_v28 = vpop.f32.mrf.mxu3  ;;  %v1064_v43 = vadd.f32 %v1063_v17, %v2770_v11 }
 0x17c   :  { %v1153_v10 = vpop.f32.mrf.mxu0  ;;  %v1108_v40 = vadd.f32 %v1107_v28, %v1059_v22 }
 0x17d   :  { %v1316_v33 = vmax.f32 %v1284_v19, 0.0  ;;  %v1154_v63 = vadd.f32 %v1153_v10, %v1105_v18  ;;  %v1321_v10 = vmax.f32 %v1289_v4, 0.0 }
 0x17e   :  { %v1207_v2 = vpop.f32.mrf.mxu1 }
 0x17f   :  { %v1345_v5 = vpack.c.bf16 %v1316_v33, %v1315_v37  ;;  %v1203_v44 = vadd.f32 %v1202_v8, %v1154_v63  ;;  %v1253_v37 = vmul.f32 %v2594_v41, %v2549_v59 }
 0x181   :  { %1361 = vst [vmem:[%s2755_s6 + $0x10] sm:$0xff] %v1345_v5  ;;  %v1248_v57 = vmul.f32 %v2604_v30, %v1203_v44  ;;  %v1291_v5 = vadd.f32 %v2602_v46, %v1253_v37  ;;  %v2771_v44 = vld [vmem:[#allocation15_spill] sm:$0xff] }
 0x182   :  { %v1065_v14 = vpop.f32.mrf.mxu2 }
 0x183   :  { %v1286_v25 = vadd.f32 %v2606_v7, %v1248_v57  ;;  %v1109_v31 = vpop.f32.mrf.mxu3  ;;  %v1066_v3 = vadd.f32 %v1065_v14, %v2771_v44 }
 0x184   :  { %v1156_v55 = vpop.f32.mrf.mxu0  ;;  %v1110_v24 = vadd.f32 %v1109_v31, %v1061_v60  ;;  %v1323_v31 = vmax.f32 %v1291_v5, 0.0 }
 0x185   :  { %v1318_v52 = vmax.f32 %v1286_v25, 0.0  ;;  %v1157_v50 = vadd.f32 %v1156_v55, %v1108_v40  ;;  %v1255_v55 = vmul.f32 %v2594_v41, %v2555_v6 }
 0x186   :  { %v1210_v53 = vpop.f32.mrf.mxu1 }
 0x187   :  { %v1346_v48 = vpack.c.bf16 %v1318_v52, %v1317_v51  ;;  %v1206_v8 = vadd.f32 %v1205_v45, %v1157_v50 }
 0x189   :  { %1362 = vst [vmem:[%s2755_s6 + $0x18] sm:$0xff] %v1346_v48  ;;  %v1250_v38 = vmul.f32 %v2604_v30, %v1206_v8  ;;  %v2772_v48 = vld [vmem:[#allocation5_spill] sm:$0xff] }
 0x18a   :  { %v1068_v9 = vpop.f32.mrf.mxu2 }
 0x18b   :  { %v1288_v34 = vadd.f32 %v2606_v7, %v1250_v38  ;;  %v1112_v20 = vpop.f32.mrf.mxu3  ;;  %v1069_v8 = vadd.f32 %v1068_v9, %v2772_v48 }
 0x18c   :  { %v1158_v23 = vpop.f32.mrf.mxu0  ;;  %v1113_v18 = vadd.f32 %v1112_v20, %v1064_v43  ;;  %v1257_v20 = vmul.f32 %v2594_v41, %v2557_v61 }
 0x18d   :  { %v1320_v35 = vmax.f32 %v1288_v34, 0.0  ;;  %v1159_v47 = vadd.f32 %v1158_v23, %v1110_v24 }
 0x18e   :  { %v1212_v36 = vpop.f32.mrf.mxu1 }
 0x18f   :  { %v1347_v32 = vpack.c.bf16 %v1320_v35, %v1319_v15  ;;  %v1208_v45 = vadd.f32 %v1207_v2, %v1159_v47  ;;  %v1295_v47 = vadd.f32 %v2602_v46, %v1257_v20 }
 0x191   :  { %1363 = vst [vmem:[%s2755_s6 + $0x20] sm:$0xff] %v1347_v32  ;;  %v1252_v13 = vmul.f32 %v2604_v30, %v1208_v45 }
 0x192   :  { %v1070_v16 = vpop.f32.mrf.mxu2 }
 0x193   :  { %v1290_v19 = vadd.f32 %v2606_v7, %v1252_v13  ;;  %v1114_v39 = vpop.f32.mrf.mxu3 }
 0x194   :  { %v1161_v28 = vpop.f32.mrf.mxu0  ;;  %v1115_v57 = vadd.f32 %v1114_v39, %v1066_v3 }
 0x195   :  { %v1322_v62 = vmax.f32 %v1290_v19, 0.0  ;;  %v1162_v33 = vadd.f32 %v1161_v28, %v1113_v18  ;;  %v1327_v18 = vmax.f32 %v1295_v47, 0.0  ;;  %v1259_v19 = vmul.f32 %v2594_v41, %v2564_v21 }
 0x196   :  { %v1215_v63 = vpop.f32.mrf.mxu1 }
 0x197   :  { %v1348_v17 = vpack.c.bf16 %v1322_v62, %v1321_v10  ;;  %v1211_v2 = vadd.f32 %v1210_v53, %v1162_v33  ;;  %v1293_v53 = vadd.f32 %v2602_v46, %v1255_v55  ;;  %v1297_v62 = vadd.f32 %v2602_v46, %v1259_v19  ;;  %v2774_v33 = vld [vmem:[#allocation7_spill] sm:$0xff]  ;;  %v2775_v55 = vld [vmem:[#allocation8_spill] sm:$0xff] }
 0x199   :  { %1364 = vst [vmem:[%s2755_s6 + $0x28] sm:$0xff] %v1348_v17  ;;  %v1254_v56 = vmul.f32 %v2604_v30, %v1211_v2  ;;  %v1325_v34 = vmax.f32 %v1293_v53, 0.0 }
 0x19a   :  { %v1073_v22 = vpop.f32.mrf.mxu2 }
 0x19b   :  { %v1292_v40 = vadd.f32 %v2606_v7, %v1254_v56  ;;  %v1117_v59 = vpop.f32.mrf.mxu3  ;;  %v1329_v56 = vmax.f32 %v1297_v62, 0.0 }
 0x19c   :  { %v1163_v25 = vpop.f32.mrf.mxu0  ;;  %v1118_v60 = vadd.f32 %v1117_v59, %v1069_v8 }
 0x19d   :  { %v1324_v51 = vmax.f32 %v1292_v40, 0.0  ;;  %v1164_v49 = vadd.f32 %v1163_v25, %v1115_v57  ;;  %v1261_v57 = vmul.f32 %v2594_v41, %v2567_v27 }
 0x19e   :  { %v1217_v52 = vpop.f32.mrf.mxu1 }
 0x19f   :  { %v1349_v14 = vpack.c.bf16 %v1324_v51, %v1323_v31  ;;  %v1213_v50 = vadd.f32 %v1212_v36, %v1164_v49  ;;  %v2773_v36 = vld [vmem:[#allocation6_spill] sm:$0xff]  ;;  %v1299_v31 = vadd.f32 %v2602_v46, %v1261_v57 }
 0x1a0   :  { %v1071_v32 = vadd.f32 %v1070_v16, %v2773_v36 }
 0x1a1   :  { %1365 = vst [vmem:[%s2755_s6 + $0x30] sm:$0xff] %v1349_v14  ;;  %v1256_v54 = vmul.f32 %v2604_v30, %v1213_v50  ;;  %v1331_v8 = vmax.f32 %v1299_v31, 0.0 }
 0x1a2   :  { %v1075_v29 = vpop.f32.mrf.mxu2 }
 0x1a3   :  { %v1294_v38 = vadd.f32 %v2606_v7, %v1256_v54  ;;  %v1119_v6 = vpop.f32.mrf.mxu3  ;;  %v1076_v51 = vadd.f32 %v1075_v29, %v2775_v55  ;;  %v1263_v54 = vmul.f32 %v2594_v41, %v2574_v58 }
 0x1a4   :  { %v1166_v24 = vpop.f32.mrf.mxu0  ;;  %v1120_v11 = vadd.f32 %v1119_v6, %v1071_v32  ;;  %v1265_v32 = vmul.f32 %v2594_v41, %v2577_v0 }
 0x1a5   :  { %v1326_v23 = vmax.f32 %v1294_v38, 0.0  ;;  %v1167_v15 = vadd.f32 %v1166_v24, %v1118_v60  ;;  %v1301_v24 = vadd.f32 %v2602_v46, %v1263_v54 }
 0x1a6   :  { %v1220_v42 = vpop.f32.mrf.mxu1 }
 0x1a7   :  { %v1350_v9 = vpack.c.bf16 %v1326_v23, %v1325_v34  ;;  %v1216_v35 = vadd.f32 %v1215_v63, %v1167_v15  ;;  %v1074_v63 = vadd.f32 %v1073_v22, %v2774_v33  ;;  %v2776_v34 = vld [vmem:[#allocation10_spill] sm:$0xff]  ;;  %v1333_v36 = vmax.f32 %v1301_v24, 0.0 }
 0x1a9   :  { %1366 = vst [vmem:[%s2755_s6 + $0x38] sm:$0xff] %v1350_v9  ;;  %v1258_v45 = vmul.f32 %v2604_v30, %v1216_v35 }
 0x1aa   :  { %v1078_v4 = vpop.f32.mrf.mxu2 }
 0x1ab   :  { %v1296_v43 = vadd.f32 %v2606_v7, %v1258_v45  ;;  %v1122_v61 = vpop.f32.mrf.mxu3  ;;  %v1079_v20 = vadd.f32 %v1078_v4, %v2776_v34 }
 0x1ac   :  { %v1168_v13 = vpop.f32.mrf.mxu0  ;;  %v1123_v5 = vadd.f32 %v1122_v61, %v1074_v63  ;;  %v1303_v61 = vadd.f32 %v2602_v46, %v1265_v32 }
 0x1ad   :  { %v1328_v39 = vmax.f32 %v1296_v43, 0.0  ;;  %v1169_v28 = vadd.f32 %v1168_v13, %v1120_v11  ;;  %v2777_v13 = vld [vmem:[#allocation12_spill] sm:$0xff] }
 0x1ae   :  { %v1222_v37 = vpop.f32.mrf.mxu1  ;;  %v1335_v63 = vmax.f32 %v1303_v61, 0.0 }
 0x1af   :  { %v1351_v10 = vpack.c.bf16 %v1328_v39, %v1327_v18  ;;  %v1218_v16 = vadd.f32 %v1217_v52, %v1169_v28  ;;  %v2778_v39 = vld [vmem:[#allocation14_spill] sm:$0xff] }
 0x1b1   :  { %1367 = vst [vmem:[%s2755_s6 + $0x40] sm:$0xff] %v1351_v10  ;;  %v1260_v17 = vmul.f32 %v2604_v30, %v1218_v16 }
 0x1b2   :  { %v1080_v2 = vpop.f32.mrf.mxu2 }
 0x1b3   :  { %v1298_v44 = vadd.f32 %v2606_v7, %v1260_v17  ;;  %v1124_v21 = vpop.f32.mrf.mxu3  ;;  %v1081_v18 = vadd.f32 %v1080_v2, %v2777_v13  ;;  %v1267_v17 = vmul.f32 %v2594_v41, %v2584_v26 }
 0x1b4   :  { %v1171_v3 = vpop.f32.mrf.mxu0  ;;  %v1125_v50 = vadd.f32 %v1124_v21, %v1076_v51  ;;  %v1269_v21 = vmul.f32 %v2594_v41, %v2587_v12 }
 0x1b5   :  { %v1330_v40 = vmax.f32 %v1298_v44, 0.0  ;;  %v1172_v59 = vadd.f32 %v1171_v3, %v1123_v5 }
 0x1b6   :  { %v1225_v52 = vpop.f32.mrf.mxu1  ;;  %v1307_v26 = vadd.f32 %v2602_v46, %v1269_v21 }
 0x1b7   :  { %v1352_v25 = vpack.c.bf16 %v1330_v40, %v1329_v56  ;;  %v1221_v22 = vadd.f32 %v1220_v42, %v1172_v59  ;;  %v1305_v59 = vadd.f32 %v2602_v46, %v1267_v17 }
 0x1b9   :  { %1368 = vst [vmem:[%s2755_s6 + $0x48] sm:$0xff] %v1352_v25  ;;  %v1262_v49 = vmul.f32 %v2604_v30, %v1221_v22  ;;  %v2779_v22 = vld [vmem:[#allocation16_spill] sm:$0xff] }
 0x1ba   :  { %v1083_v14 = vpop.f32.mrf.mxu2 }
 0x1bb   :  { %v1300_v53 = vadd.f32 %v2606_v7, %v1262_v49  ;;  %v1127_v27 = vpop.f32.mrf.mxu3  ;;  %v1084_v28 = vadd.f32 %v1083_v14, %v2778_v39  ;;  %v1337_v14 = vmax.f32 %v1305_v59, 0.0 }
 0x1bc   :  { %v1173_v48 = vpop.f32.mrf.mxu0  ;;  %v1128_v42 = vadd.f32 %v1127_v27, %v1079_v20  ;;  %v1339_v27 = vmax.f32 %v1307_v26, 0.0 }
 0x1bd   :  { %v1332_v60 = vmax.f32 %v1300_v53, 0.0  ;;  %v1174_v38 = vadd.f32 %v1173_v48, %v1125_v50  ;;  %v1271_v48 = vmul.f32 %v2594_v41, %v2592_v1 }
 0x1be   :  { %v1227_v35 = vpop.f32.mrf.mxu1 }
 0x1bf   :  { %v1353_v29 = vpack.c.bf16 %v1332_v60, %v1331_v8  ;;  %v1223_v6 = vadd.f32 %v1222_v37, %v1174_v38  ;;  %v1309_v24 = vadd.f32 %v2602_v46, %v1271_v48 }
 0x1c1   :  { %1369 = vst [vmem:[%s2755_s6 + $0x50] sm:$0xff] %v1353_v29  ;;  %v1264_v23 = vmul.f32 %v2604_v30, %v1223_v6  ;;  %v1341_v41 = vmax.f32 %v1309_v24, 0.0 }
 0x1c2   :  { %v1085_v15 = vpop.f32.mrf.mxu2 }
 0x1c3   :  { %v1302_v9 = vadd.f32 %v2606_v7, %v1264_v23  ;;  %v1129_v58 = vpop.f32.mrf.mxu3  ;;  %v1086_v31 = vadd.f32 %v1085_v15, %v2779_v22 }
 0x1c4   :  { %v1176_v47 = vpop.f32.mrf.mxu0  ;;  %v1130_v10 = vadd.f32 %v1129_v58, %v1081_v18 }
 0x1c5   :  { %v1334_v45 = vmax.f32 %v1302_v9, 0.0  ;;  %v1177_v11 = vadd.f32 %v1176_v47, %v1128_v42 }
 0x1c6   :  { %v1230_v5 = vpop.f32.mrf.mxu1 }
 0x1c7   :  { %v1354_v4 = vpack.c.bf16 %v1334_v45, %v1333_v36  ;;  %v1226_v43 = vadd.f32 %v1225_v52, %v1177_v11 }
 0x1c9   :  { %1370 = vst [vmem:[%s2755_s6 + $0x58] sm:$0xff] %v1354_v4  ;;  %v1266_v19 = vmul.f32 %v2604_v30, %v1226_v43 }
 0x1ca   :  { %v1181_v37 = vpop.f32.mrf.mxu2 }
 0x1cb   :  { %v1304_v16 = vadd.f32 %v2606_v7, %v1266_v19  ;;  %v1132_v0 = vpop.f32.mrf.mxu3 }
 0x1cc   :  { %v1133_v62 = vadd.f32 %v1132_v0, %v1084_v28  ;;  %v1178_v33 = vpop.f32.mrf.mxu0 }
 0x1cd   :  { %v1336_v2 = vmax.f32 %v1304_v16, 0.0  ;;  %v1179_v44 = vadd.f32 %v1178_v33, %v1130_v10 }
 0x1ce   :  { %v1182_v3 = vadd.f32 %v1181_v37, %v1133_v62  ;;  %v1232_v38 = vpop.f32.mrf.mxu1 }
 0x1cf   :  { %v1355_v56 = vpack.c.bf16 %v1336_v2, %v1335_v63  ;;  %v1228_v57 = vadd.f32 %v1227_v35, %v1179_v44 }
 0x1d0   :  { %v1231_v40 = vadd.f32 %v1230_v5, %v1182_v3 }
 0x1d1   :  { %1371 = vst [vmem:[%s2755_s6 + $0x60] sm:$0xff] %v1355_v56  ;;  %v1268_v25 = vmul.f32 %v2604_v30, %v1228_v57 }
 0x1d2   :  { %v1270_v55 = vmul.f32 %v2604_v30, %v1231_v40  ;;  %v1183_v53 = vpop.f32.mrf.mxu2 }
 0x1d3   :  { %v1306_v12 = vadd.f32 %v2606_v7, %v1268_v25  ;;  %v1134_v51 = vpop.f32.mrf.mxu3 }
 0x1d4   :  { %v1308_v49 = vadd.f32 %v2606_v7, %v1270_v55  ;;  %v1135_v52 = vadd.f32 %v1134_v51, %v1086_v31 }
 0x1d5   :  { %v1338_v50 = vmax.f32 %v1306_v12, 0.0 }
 0x1d6   :  { %v1340_v8 = vmax.f32 %v1308_v49, 0.0  ;;  %v1184_v54 = vadd.f32 %v1183_v53, %v1135_v52 }
 0x1d7   :  { %v1356_v60 = vpack.c.bf16 %v1338_v50, %v1337_v14 }
 0x1d8   :  { %v1357_v29 = vpack.c.bf16 %v1340_v8, %v1339_v27  ;;  %v1233_v6 = vadd.f32 %v1232_v38, %v1184_v54 }
 0x1d9   :  { %1372 = vst [vmem:[%s2755_s6 + $0x68] sm:$0xff] %v1356_v60 }
 0x1da   :  { %1373 = vst [vmem:[%s2755_s6 + $0x70] sm:$0xff] %v1357_v29  ;;  %v1272_v34 = vmul.f32 %v2604_v30, %v1233_v6 }
 0x1dc   :  { %v1310_v1 = vadd.f32 %v2606_v7, %v1272_v34 }
 0x1de   :  { %v1342_v20 = vmax.f32 %v1310_v1, 0.0 }
 0x1e0   :  { %v1358_v23 = vpack.c.bf16 %v1342_v20, %v1341_v41 }
 0x1e2   :  { %1374 = vst [vmem:[%s2755_s6 + $0x78] sm:$0xff] %v1358_v23 }
 0x1e3   :  { %1379 = vsyncpa [#allocation3], 1 }

// kernel: dense_temporal_block.11
= control target key start
LH: loop header
LB: loop body
LE: loop exit
PB: predicated region body
PF: predicated region fallthrough
CT: control target
= control target key end

     0   :  { %s1554_s27 = smov 0   ;;  %s1556_s28 = smov 0   ;;  %s1798_s0 = inlined_call_operand.vmem [shape: bf16[2,4,16,256], index: 0, kind: input, shape index: {}, may-alias: {0,1,2}]   ;;  %s1799_s1 = inlined_call_operand.vmem [shape: bf16[2,4,16,256], index: 1, kind: input, shape index: {}, may-alias: {0,1,2}]   ;;  %s1800_s2 = inlined_call_operand.vmem [shape: bf16[2,4,16,256], index: 2, kind: input, shape index: {}, may-alias: {0,1,2}]   ;;  %s1801_s3 = inlined_call_operand.vmem [shape: bf16[256,64], index: 3, kind: input, shape index: {}]   ;;  %s1802_s4 = inlined_call_operand.vmem [shape: bf16[256,64], index: 4, kind: input, shape index: {}]   ;;  %s1803_s5 = inlined_call_operand.vmem [shape: bf16[256,64], index: 5, kind: input, shape index: {}]   ;;  %s1804_s6 = inlined_call_operand.vmem [shape: f32[1,64], index: 6, kind: input, shape index: {}]   ;;  %s1805_s7 = inlined_call_operand.vmem [shape: f32[1,64], index: 7, kind: input, shape index: {}]   ;;  %s1806_s8 = inlined_call_operand.vmem [shape: bf16[2,4,16,64], index: 8, kind: output, shape index: {}]  }
   0x1   :  { %s1558_s29 = smov 0   ;;  %s1560_s30 = smov 0  }
   0x2   :  { %s1562_s9 = smov 0  }
   0x3 LB: > { %s27_s10 = sadd.s32 1, %s1499_s29  ;;  %s30_s11 = sadd.s32 1, %s1503_s30  ;;  %s1507_s9 = sphi %s1562_s9, %s18_s9   ;;  %s1503_s30 = sphi %s1560_s30, %s1812_s30   ;;  %s1499_s29 = sphi %s1558_s29, %s1811_s29   ;;  %s1495_s28 = sphi %s1556_s28, %s1810_s28   ;;  %s1491_s27 = sphi %s1554_s27, %s1809_s27  }
   0x4   : > { %p28_p0 = scmp.ge.s32.totalorder %s27_s10, 4  ;;  %p1131_p1 = scmp.ge.s32.totalorder %s1507_s9, 1 }
   0x5   : > { %p338_p2 = scmp.lt.s32.totalorder %s1507_s9, 9 }
   0x6   : > { %s1814_s10 = smov (%p28_p0, %s27_s10), 0  ;;  %s1816_s11 = smov (!%p28_p0, %s30_s11), %s1503_s30 }
   0x7   : > { %p339_p3 = pnand %p1131_p1, %p338_p2  ;;  %p32_p4 = scmp.ge.s32.totalorder %s1816_s11, 2 }
   0x8   : > { %s1132_s16 = sadd.s32 (!%p339_p3), 4294967294, %s1491_s27  ;;  %p407_p6 = scmp.lt.s32.totalorder (!%p339_p3), %s1495_s28, 1 }
   0x9   : > { %s1818_s11 = smov (%p32_p4, %s1816_s11), 0  ;;  %342 = sbr.rel (%p339_p3) target bundleno = 227 (0xe3), region = 52 }
   0xa   : > { %1807 = sst [smem:[#allocation2_spill]] %s1818_s11  ;;  %p405_p5 = scmp.gt.s32.totalorder (!%p339_p3), %s1132_s16, 0 }
   0xb   : > { %p1133_p7 = scmp.lt.s32.totalorder (!%p339_p3), %s1132_s16, 3  ;;  %s1621_s20 = sadd.s32 (!%p339_p3), 2, %s1491_s27 }
   0xc   : > { %p429_p8 = scmp.lt.s32.totalorder (!%p339_p3), %s1621_s20, 3  ;;  %p421_p9 = scmp.lt.s32.totalorder (!%p339_p3), %s1491_s27, 3 }
   0xd   : > { %p822_p10 = scmp.ge.s32.totalorder (!%p339_p3), %s1491_s27, 2  ;;  %p825_p11 = scmp.le.s32.totalorder (!%p339_p3), %s1621_s20, 3 }
   0xe   : > { %v1400_v0 = vld [vmem:[%s1801_s3 + $0x38] sm:$0xff]  ;;  %v1399_v2 = vld [vmem:[%s1801_s3 + $0x30] sm:$0xff]  ;;  %s406_s14 = scalar_select %p405_p5, %s1132_s16, 0  ;;  %v1398_v8 = vld [vmem:[%s1801_s3 + $0x28] sm:$0xff]  ;;  %vm985_vm0 = vcmask 519168  }
   0xf   : > { %v1408_v1 = vld [vmem:[%s1801_s3 + $0x78] sm:$0xff]  ;;  %626 = vmatpush.bf16.msra.mxu0 %v1400_v0  ;;  %v1407_v3 = vld [vmem:[%s1801_s3 + $0x70] sm:$0xff]  ;;  %v1406_v9 = vld [vmem:[%s1801_s3 + $0x68] sm:$0xff]  ;;  %s1820_s28 = smov (!%p407_p6, %s1495_s28), 1 }
  0x10   : > { %640 = vmatpush.bf16.msra.mxu1 %v1408_v1  ;;  %v1418_v4 = vld [vmem:[%s1803_s5 + $0x38] sm:$0xff]  ;;  %v1417_v6 = vld [vmem:[%s1803_s5 + $0x30] sm:$0xff]  ;;  %v1416_v10 = vld [vmem:[%s1803_s5 + $0x28] sm:$0xff]  ;;  %s1822_s14 = smov (!%p1133_p7, %s406_s14), 3  ;;  %s1650_s22 = sshll.u32 %s1820_s28, 4 }
  0x11   : > { %v1426_v5 = vld [vmem:[%s1803_s5 + $0x78] sm:$0xff]  ;;  %794 = vmatpush.bf16.msra.mxu2 %v1418_v4  ;;  %v1425_v7 = vld [vmem:[%s1803_s5 + $0x70] sm:$0xff]  ;;  %v1424_v11 = vld [vmem:[%s1803_s5 + $0x68] sm:$0xff]  ;;  %s430_s18 = scalar_select %p429_p8, %s1621_s20, 3 }
  0x12   : > { %808 = vmatpush.bf16.msra.mxu3 %v1426_v5  ;;  %v1397_v12 = vld [vmem:[%s1801_s3 + $0x20] sm:$0xff]  ;;  %s1138_s21 = sshll.u32 %s1822_s14, 2  ;;  %v1396_v16 = vld [vmem:[%s1801_s3 + $0x18] sm:$0xff]  ;;  %v1395_v20 = vld [vmem:[%s1801_s3 + $0x10] sm:$0xff]  ;;  %s1151_s25 = sshll.u32 %s1820_s28, 3 }
  0x13   : > { %627 = vmatpush.bf16.msra.mxu0 %v1399_v2  ;;  %v1405_v13 = vld [vmem:[%s1801_s3 + $0x60] sm:$0xff]  ;;  %v1404_v17 = vld [vmem:[%s1801_s3 + $0x58] sm:$0xff]  ;;  %s1824_s18 = smov (!%p429_p8, %s430_s18), 3  ;;  %s413_s14 = sadd.s32 %s1650_s22, %s1138_s21  ;;  %v1403_v21 = vld [vmem:[%s1801_s3 + $0x50] sm:$0xff] }
  0x14   : > { %641 = vmatpush.bf16.msra.mxu1 %v1407_v3  ;;  %v1415_v14 = vld [vmem:[%s1803_s5 + $0x20] sm:$0xff]  ;;  %v1414_v18 = vld [vmem:[%s1803_s5 + $0x18] sm:$0xff]  ;;  %s1147_s16 = sshll.u32 %s1824_s18, 2  ;;  %s1140_s26 = sshll.u32 %s413_s14, 2  ;;  %v1413_v22 = vld [vmem:[%s1803_s5 + $0x10] sm:$0xff] }
  0x15   : > { %795 = vmatpush.bf16.msra.mxu2 %v1417_v6  ;;  %v1423_v15 = vld [vmem:[%s1803_s5 + $0x60] sm:$0xff]  ;;  %v1422_v19 = vld [vmem:[%s1803_s5 + $0x58] sm:$0xff]  ;;  %s437_s13 = sadd.s32 %s1147_s16, %s1650_s22  ;;  %v1421_v23 = vld [vmem:[%s1803_s5 + $0x50] sm:$0xff]  ;;  %s415_s12 = scalar_lea.vmem %s1798_s0, %s1140_s26 }
  0x16   : > { %809 = vmatpush.bf16.msra.mxu3 %v1425_v7  ;;  %v1394_v24 = vld [vmem:[%s1801_s3 + $0x8] sm:$0xff]  ;;  %s1149_s16 = sshll.u32 %s437_s13, 2  ;;  %v1393_v26 = vld [vmem:[%s1801_s3] sm:$0xff]  ;;  %v1382_v34 = vld [vmem:[%s1802_s4 + $0x38] sm:$0xff] }
  0x17   : > { %628 = vmatpush.bf16.msra.mxu0 %v1398_v8  ;;  %v1402_v25 = vld [vmem:[%s1801_s3 + $0x48] sm:$0xff]  ;;  %v1401_v28 = vld [vmem:[%s1801_s3 + $0x40] sm:$0xff]  ;;  %s439_s13 = scalar_lea.vmem %s1800_s2, %s1149_s16  ;;  %v1390_v35 = vld [vmem:[%s1802_s4 + $0x78] sm:$0xff] }
  0x18   : > { %642 = vmatpush.bf16.msra.mxu1 %v1406_v9  ;;  %v1412_v27 = vld [vmem:[%s1803_s5 + $0x8] sm:$0xff]  ;;  %v1155_v29 = vld [vmem:[%s415_s12] sm:$0xf]  ;;  %v1391_v32 = vld [vmem:[%s415_s12 + $0x4] sm:$0xf]  ;;  %s1730_s21 = scalar_select %p421_p9, %s1491_s27, 3 }
  0x19   : > { %796 = vmatpush.bf16.msra.mxu2 %v1416_v10  ;;  %v1420_v30 = vld [vmem:[%s1803_s5 + $0x48] sm:$0xff]  ;;  %v1411_v36 = vld [vmem:[%s1803_s5] sm:$0xff]  ;;  %v1381_v44 = vld [vmem:[%s1802_s4 + $0x30] sm:$0xff]  ;;  %s823_s17 = scalar_select %p822_p10, 1.0, 0.0 }
  0x1a   : > { %810 = vmatpush.bf16.msra.mxu3 %v1424_v11  ;;  %v1392_v31 = vld [vmem:[%s415_s12 + $0x4] sm:$0xf0]  ;;  %v1157_v33 = vld [vmem:[%s415_s12 + $0x8] sm:$0xf0]  ;;  %v1227_v39 = vld [vmem:[%s439_s13] sm:$0xf] }
  0x1b   : > { %629 = vmatpush.bf16.msra.mxu0 %v1397_v12  ;;  %v1156_v37 = vor.u32 %v1392_v31, %v1155_v29  ;;  %v1160_v38 = vor.u32 %v1391_v32, %v1157_v33  ;;  %v1410_v40 = vld [vmem:[%s439_s13 + $0x4] sm:$0xf0]  ;;  %v1419_v41 = vld [vmem:[%s1803_s5 + $0x40] sm:$0xff]  ;;  %v1229_v43 = vld [vmem:[%s439_s13 + $0x8] sm:$0xf0]  ;;  %s1141_s16 = sshll.u32 %s1730_s21, 2  ;;  %v827_v9 = vstv %s823_s17 }
  0x1c   : > { %643 = vmatpush.bf16.msra.mxu1 %v1405_v13  ;;  %v1409_v42 = vld [vmem:[%s439_s13 + $0x4] sm:$0xf]  ;;  %v1389_v45 = vld [vmem:[%s1802_s4 + $0x70] sm:$0xff]  ;;  %v1228_v46 = vor.u32 %v1410_v40, %v1227_v39  ;;  %v1380_v48 = vld [vmem:[%s1802_s4 + $0x28] sm:$0xff]  ;;  %s425_s26 = sadd.s32 %s1141_s16, %s1650_s22  ;;  %s1150_s15 = sshll.u32 %s1730_s21, 1 }
  0x1d   : > { %797 = vmatpush.bf16.msra.mxu2 %v1415_v14  ;;  %v1232_v47 = vor.u32 %v1409_v42, %v1229_v43  ;;  %v1388_v49 = vld [vmem:[%s1802_s4 + $0x68] sm:$0xff]  ;;  %v1379_v50 = vld [vmem:[%s1802_s4 + $0x20] sm:$0xff]  ;;  %v1378_v52 = vld [vmem:[%s1802_s4 + $0x18] sm:$0xff]  ;;  %s1143_s18 = sshll.u32 %s425_s26, 2 }
  0x1e   : > { %811 = vmatpush.bf16.msra.mxu3 %v1423_v15  ;;  %v1387_v51 = vld [vmem:[%s1802_s4 + $0x60] sm:$0xff]  ;;  %v1386_v53 = vld [vmem:[%s1802_s4 + $0x58] sm:$0xff]  ;;  %v1377_v54 = vld [vmem:[%s1802_s4 + $0x10] sm:$0xff]  ;;  %s427_s24 = scalar_lea.vmem %s1799_s1, %s1143_s18  ;;  %s1769_s18 = sadd.s32 %s1151_s25, %s1150_s15 }
  0x1f   : > { %630 = vmatpush.bf16.msra.mxu0 %v1396_v16  ;;  %v1385_v55 = vld [vmem:[%s1802_s4 + $0x50] sm:$0xff]  ;;  %v1376_v56 = vld [vmem:[%s1802_s4 + $0x8] sm:$0xff]  ;;  %v1375_v58 = vld [vmem:[%s1802_s4] sm:$0xff]  ;;  %s826_s12 = scalar_select %p825_p11, 1.0, 0.0 }
  0x20   : > { %644 = vmatpush.bf16.msra.mxu1 %v1404_v17  ;;  %v1384_v57 = vld [vmem:[%s1802_s4 + $0x48] sm:$0xff]  ;;  %v1383_v59 = vld [vmem:[%s1802_s4 + $0x40] sm:$0xff]  ;;  %s1152_s22 = sshll.u32 %s1769_s18, 2 }
  0x21   : > { %798 = vmatpush.bf16.msra.mxu2 %v1414_v18  ;;  %v1299_v60 = vld [vmem:[%s427_s24] sm:$0xf]  ;;  %v1374_v61 = vld [vmem:[%s427_s24 + $0x4] sm:$0xf0]  ;;  %v1373_v62 = vld [vmem:[%s427_s24 + $0x4] sm:$0xf]  ;;  %v964_v11 = vstv %s826_s12  ;;  %s451_s23 = scalar_lea.vmem %s1806_s8, %s1152_s22 }
  0x22   : > { %812 = vmatpush.bf16.msra.mxu3 %v1422_v19  ;;  %v1301_v63 = vld [vmem:[%s427_s24 + $0x8] sm:$0xf0]  ;;  %v1300_v0 = vor.u32 %v1374_v61, %v1299_v60  ;;  %v1467_v19 = vld [vmem:[%s1804_s6] ss:$0 sm:$0xff] }
  0x23   : > { %631 = vmatpush.bf16.msra.mxu0 %v1395_v20  ;;  %v1304_v1 = vor.u32 %v1373_v62, %v1301_v63 }
  0x24   : > { %645 = vmatpush.bf16.msra.mxu1 %v1403_v21 }
  0x25   : > { %799 = vmatpush.bf16.msra.mxu2 %v1413_v22 }
  0x26   : > { %813 = vmatpush.bf16.msra.mxu3 %v1421_v23  ;;  %v1468_v23 = vld [vmem:[%s1805_s7] ss:$0 sm:$0xff] }
  0x27   : > { %632 = vmatpush.bf16.msra.mxu0 %v1394_v24 }
  0x28   : > { %646 = vmatpush.bf16.msra.mxu1 %v1402_v25 }
  0x29   : > { %800 = vmatpush.bf16.msra.mxu2 %v1412_v27 }
  0x2a   : > { %814 = vmatpush.bf16.msra.mxu3 %v1420_v30 }
  0x2b   : > { %633 = vmatpush.bf16.msra.mxu0 %v1393_v26 }
  0x2c   : > { %647 = vmatpush.bf16.msra.mxu1 %v1401_v28 }
  0x2d   : > { %801 = vmatpush.bf16.msra.mxu2 %v1411_v36 }
  0x2e   : > { %634 = vmatmul.bf16.vlgmr.msra.gmra.mxu0 %v1156_v37  ;;  %815 = vmatpush.bf16.msra.mxu3 %v1419_v41 }
  0x2f   : > { %936 = vmatpush.bf16.msrb.mxu0 %v1382_v34  ;;  %648 = vmatmul.bf16.vlgmr.msra.gmra.mxu1 %v1160_v38 }
  0x30   : > { %950 = vmatpush.bf16.msrb.mxu1 %v1390_v35  ;;  %802 = vmatmul.bf16.vlgmr.msra.gmra.mxu2 %v1228_v46 }
  0x31   : > { %816 = vmatmul.bf16.vlgmr.msra.gmra.mxu3 %v1232_v47 }
  0x33   : > { %937 = vmatpush.bf16.msrb.mxu0 %v1381_v44 }
  0x34   : > { %951 = vmatpush.bf16.msrb.mxu1 %v1389_v45 }
  0x37   : > { %938 = vmatpush.bf16.msrb.mxu0 %v1380_v48 }
  0x38   : > { %952 = vmatpush.bf16.msrb.mxu1 %v1388_v49 }
  0x3b   : > { %939 = vmatpush.bf16.msrb.mxu0 %v1379_v50 }
  0x3c   : > { %953 = vmatpush.bf16.msrb.mxu1 %v1387_v51 }
  0x3f   : > { %940 = vmatpush.bf16.msrb.mxu0 %v1378_v52 }
  0x40   : > { %954 = vmatpush.bf16.msrb.mxu1 %v1386_v53 }
  0x43   : > { %941 = vmatpush.bf16.msrb.mxu0 %v1377_v54 }
  0x44   : > { %955 = vmatpush.bf16.msrb.mxu1 %v1385_v55 }
  0x47   : > { %942 = vmatpush.bf16.msrb.mxu0 %v1376_v56 }
  0x48   : > { %956 = vmatpush.bf16.msrb.mxu1 %v1384_v57 }
  0x4b   : > { %943 = vmatpush.bf16.msrb.mxu0 %v1375_v58 }
  0x4c   : > { %957 = vmatpush.bf16.msrb.mxu1 %v1383_v59 }
  0x4e   : > { %944 = vmatmul.bf16.vlgmr.msrb.gmra.mxu0 %v1300_v0 }
  0x4f   : > { %958 = vmatmul.bf16.vlgmr.msrb.gmra.mxu1 %v1304_v1 }
  0xab   : > { %v635_v2 = vpop.f32.mrf.mxu0 }
  0xac   : > { %v649_v3 = vpop.f32.mrf.mxu1 }
  0xad   : > { %v650_v8 = vadd.f32 %v649_v3, %v635_v2 }
  0xaf   : > { %v828_v12 = vmul.f32 %v827_v9, %v650_v8 }
  0xb3   : > { %v637_v4 = vpop.f32.mrf.mxu0  ;;  %v803_v6 = vpop.f32.mrf.mxu2 }
  0xb4   : > { %v651_v5 = vpop.f32.mrf.mxu1  ;;  %v817_v7 = vpop.f32.mrf.mxu3 }
  0xb5   : > { %v818_v10 = vadd.f32 %v817_v7, %v803_v6  ;;  %v652_v17 = vadd.f32 %v651_v5, %v637_v4 }
  0xb7   : > { %v965_v15 = vmul.f32 %v964_v11, %v818_v10  ;;  %v829_v26 = vmul.f32 %v827_v9, %v652_v17 }
  0xbb   : > { %v805_v20 = vpop.f32.mrf.mxu2 }
  0xbc   : > { %v819_v21 = vpop.f32.mrf.mxu3 }
  0xbd   : > { %v820_v24 = vadd.f32 %v819_v21, %v805_v20 }
  0xbf   : > { %v966_v31 = vmul.f32 %v964_v11, %v820_v24 }
  0xcb   : > { %v945_v13 = vpop.f32.mrf.mxu0 }
  0xcc   : > { %v959_v14 = vpop.f32.mrf.mxu1  ;;  %v946_v16 = vadd.f32 %v945_v13, %v828_v12 }
  0xce   : > { %v960_v18 = vadd.f32 %v959_v14, %v946_v16 }
  0xd0   : > { %v967_v22 = vadd.f32 %v965_v15, %v960_v18 }
  0xd2   : > { %v973_v25 = vmul.f32 %v1467_v19, %v967_v22 }
  0xd3   : > { %v947_v27 = vpop.f32.mrf.mxu0 }
  0xd4   : > { %v979_v28 = vadd.f32 %v1468_v23, %v973_v25  ;;  %v948_v29 = vadd.f32 %v947_v27, %v829_v26  ;;  %v961_v30 = vpop.f32.mrf.mxu1 }
  0xd6   : > { %v981_v32 = vmax.f32 %v979_v28, 0.0  ;;  %v962_v33 = vadd.f32 %v961_v30, %v948_v29 }
  0xd8   : > { %v983_v34 = vpack.c.bf16 %v981_v32, %v981_v32  ;;  %v968_v35 = vadd.f32 %v966_v31, %v962_v33 }
  0xda   : > { %986 = vst.msk [vmem:[%s451_s23] sm:$0xf] %vm985_vm0, %v983_v34  ;;  %v974_v36 = vmul.f32 %v1467_v19, %v968_v35 }
  0xdc   : > { %v980_v37 = vadd.f32 %v1468_v23, %v974_v36 }
  0xde   : > { %v982_v38 = vmax.f32 %v980_v37, 0.0 }
  0xe0   : > { %v984_v39 = vpack.c.bf16 %v982_v38, %v982_v38 }
  0xe2   : > { %987 = vst.msk [vmem:[%s451_s23 + $0x4] sm:$0xf] %vm985_vm0, %v984_v39 }
  0xe3 PF: > { %s18_s9 = sadd.s32 1, %s1507_s9   ;;  %s1808_s24 = sld [smem:[#allocation2_spill]] }
  0xe4   : > { %p15_p12 = scmp.ge.s32.totalorder %s18_s9, 10   ;;  %s1809_s27 = smov %s1499_s29 }
  0xe5   : > { %s1810_s28 = smov %s1503_s30  ;;  %s1811_s29 = smov %s1814_s10 }
  0xe6   :  { %17 = sbr.rel (!%p15_p12) target bundleno = 3 (0x3), region = 88 }
  0xe9   : > { %s1812_s30 = smov %s1808_s24 }

// kernel: dense_temporal_block.13
= control target key start
LH: loop header
LB: loop body
LE: loop exit
PB: predicated region body
PF: predicated region fallthrough
CT: control target
= control target key end

     0   :  { %s1554_s27 = smov 0   ;;  %s1556_s28 = smov 0   ;;  %s1798_s0 = inlined_call_operand.vmem [shape: bf16[2,4,16,256], index: 0, kind: input, shape index: {}, may-alias: {0,1,2}]   ;;  %s1799_s1 = inlined_call_operand.vmem [shape: bf16[2,4,16,256], index: 1, kind: input, shape index: {}, may-alias: {0,1,2}]   ;;  %s1800_s2 = inlined_call_operand.vmem [shape: bf16[2,4,16,256], index: 2, kind: input, shape index: {}, may-alias: {0,1,2}]   ;;  %s1801_s3 = inlined_call_operand.vmem [shape: bf16[256,64], index: 3, kind: input, shape index: {}]   ;;  %s1802_s4 = inlined_call_operand.vmem [shape: bf16[256,64], index: 4, kind: input, shape index: {}]   ;;  %s1803_s5 = inlined_call_operand.vmem [shape: bf16[256,64], index: 5, kind: input, shape index: {}]   ;;  %s1804_s6 = inlined_call_operand.vmem [shape: f32[1,64], index: 6, kind: input, shape index: {}]   ;;  %s1805_s7 = inlined_call_operand.vmem [shape: f32[1,64], index: 7, kind: input, shape index: {}]   ;;  %s1806_s8 = inlined_call_operand.vmem [shape: bf16[2,4,16,64], index: 8, kind: output, shape index: {}]  }
   0x1   :  { %s1558_s29 = smov 0   ;;  %s1560_s30 = smov 0  }
   0x2   :  { %s1562_s9 = smov 0  }
   0x3 LB: > { %s27_s10 = sadd.s32 1, %s1499_s29  ;;  %s30_s11 = sadd.s32 1, %s1503_s30  ;;  %s1507_s9 = sphi %s1562_s9, %s18_s9   ;;  %s1503_s30 = sphi %s1560_s30, %s1812_s30   ;;  %s1499_s29 = sphi %s1558_s29, %s1811_s29   ;;  %s1495_s28 = sphi %s1556_s28, %s1810_s28   ;;  %s1491_s27 = sphi %s1554_s27, %s1809_s27  }
   0x4   : > { %p28_p0 = scmp.ge.s32.totalorder %s27_s10, 4  ;;  %p1131_p1 = scmp.ge.s32.totalorder %s1507_s9, 1 }
   0x5   : > { %p338_p2 = scmp.lt.s32.totalorder %s1507_s9, 9 }
   0x6   : > { %s1814_s10 = smov (%p28_p0, %s27_s10), 0  ;;  %s1816_s11 = smov (!%p28_p0, %s30_s11), %s1503_s30 }
   0x7   : > { %p339_p3 = pnand %p1131_p1, %p338_p2  ;;  %p32_p4 = scmp.ge.s32.totalorder %s1816_s11, 2 }
   0x8   : > { %s1132_s16 = sadd.s32 (!%p339_p3), 4294967293, %s1491_s27  ;;  %p407_p6 = scmp.lt.s32.totalorder (!%p339_p3), %s1495_s28, 1 }
   0x9   : > { %s1818_s11 = smov (%p32_p4, %s1816_s11), 0  ;;  %342 = sbr.rel (%p339_p3) target bundleno = 227 (0xe3), region = 52 }
   0xa   : > { %1807 = sst [smem:[#allocation2_spill]] %s1818_s11  ;;  %p405_p5 = scmp.gt.s32.totalorder (!%p339_p3), %s1132_s16, 0 }
   0xb   : > { %p1133_p7 = scmp.lt.s32.totalorder (!%p339_p3), %s1132_s16, 3  ;;  %s1621_s20 = sadd.s32 (!%p339_p3), 3, %s1491_s27 }
   0xc   : > { %p429_p8 = scmp.lt.s32.totalorder (!%p339_p3), %s1621_s20, 3  ;;  %p421_p9 = scmp.lt.s32.totalorder (!%p339_p3), %s1491_s27, 3 }
   0xd   : > { %p822_p10 = scmp.ge.s32.totalorder (!%p339_p3), %s1491_s27, 3  ;;  %p825_p11 = scmp.le.s32.totalorder (!%p339_p3), %s1621_s20, 3 }
   0xe   : > { %v1400_v0 = vld [vmem:[%s1801_s3 + $0x38] sm:$0xff]  ;;  %v1399_v2 = vld [vmem:[%s1801_s3 + $0x30] sm:$0xff]  ;;  %s406_s14 = scalar_select %p405_p5, %s1132_s16, 0  ;;  %v1398_v8 = vld [vmem:[%s1801_s3 + $0x28] sm:$0xff]  ;;  %vm985_vm0 = vcmask 519168  }
   0xf   : > { %v1408_v1 = vld [vmem:[%s1801_s3 + $0x78] sm:$0xff]  ;;  %626 = vmatpush.bf16.msra.mxu0 %v1400_v0  ;;  %v1407_v3 = vld [vmem:[%s1801_s3 + $0x70] sm:$0xff]  ;;  %v1406_v9 = vld [vmem:[%s1801_s3 + $0x68] sm:$0xff]  ;;  %s1820_s28 = smov (!%p407_p6, %s1495_s28), 1 }
  0x10   : > { %640 = vmatpush.bf16.msra.mxu1 %v1408_v1  ;;  %v1418_v4 = vld [vmem:[%s1803_s5 + $0x38] sm:$0xff]  ;;  %v1417_v6 = vld [vmem:[%s1803_s5 + $0x30] sm:$0xff]  ;;  %v1416_v10 = vld [vmem:[%s1803_s5 + $0x28] sm:$0xff]  ;;  %s1822_s14 = smov (!%p1133_p7, %s406_s14), 3  ;;  %s1650_s22 = sshll.u32 %s1820_s28, 4 }
  0x11   : > { %v1426_v5 = vld [vmem:[%s1803_s5 + $0x78] sm:$0xff]  ;;  %794 = vmatpush.bf16.msra.mxu2 %v1418_v4  ;;  %v1425_v7 = vld [vmem:[%s1803_s5 + $0x70] sm:$0xff]  ;;  %v1424_v11 = vld [vmem:[%s1803_s5 + $0x68] sm:$0xff]  ;;  %s430_s18 = scalar_select %p429_p8, %s1621_s20, 3 }
  0x12   : > { %808 = vmatpush.bf16.msra.mxu3 %v1426_v5  ;;  %v1397_v12 = vld [vmem:[%s1801_s3 + $0x20] sm:$0xff]  ;;  %s1138_s21 = sshll.u32 %s1822_s14, 2  ;;  %v1396_v16 = vld [vmem:[%s1801_s3 + $0x18] sm:$0xff]  ;;  %v1395_v20 = vld [vmem:[%s1801_s3 + $0x10] sm:$0xff]  ;;  %s1151_s25 = sshll.u32 %s1820_s28, 3 }
  0x13   : > { %627 = vmatpush.bf16.msra.mxu0 %v1399_v2  ;;  %v1405_v13 = vld [vmem:[%s1801_s3 + $0x60] sm:$0xff]  ;;  %v1404_v17 = vld [vmem:[%s1801_s3 + $0x58] sm:$0xff]  ;;  %s1824_s18 = smov (!%p429_p8, %s430_s18), 3  ;;  %s413_s14 = sadd.s32 %s1650_s22, %s1138_s21  ;;  %v1403_v21 = vld [vmem:[%s1801_s3 + $0x50] sm:$0xff] }
  0x14   : > { %641 = vmatpush.bf16.msra.mxu1 %v1407_v3  ;;  %v1415_v14 = vld [vmem:[%s1803_s5 + $0x20] sm:$0xff]  ;;  %v1414_v18 = vld [vmem:[%s1803_s5 + $0x18] sm:$0xff]  ;;  %s1147_s16 = sshll.u32 %s1824_s18, 2  ;;  %s1140_s26 = sshll.u32 %s413_s14, 2  ;;  %v1413_v22 = vld [vmem:[%s1803_s5 + $0x10] sm:$0xff] }
  0x15   : > { %795 = vmatpush.bf16.msra.mxu2 %v1417_v6  ;;  %v1423_v15 = vld [vmem:[%s1803_s5 + $0x60] sm:$0xff]  ;;  %v1422_v19 = vld [vmem:[%s1803_s5 + $0x58] sm:$0xff]  ;;  %s437_s13 = sadd.s32 %s1147_s16, %s1650_s22  ;;  %v1421_v23 = vld [vmem:[%s1803_s5 + $0x50] sm:$0xff]  ;;  %s415_s12 = scalar_lea.vmem %s1798_s0, %s1140_s26 }
  0x16   : > { %809 = vmatpush.bf16.msra.mxu3 %v1425_v7  ;;  %v1394_v24 = vld [vmem:[%s1801_s3 + $0x8] sm:$0xff]  ;;  %s1149_s16 = sshll.u32 %s437_s13, 2  ;;  %v1393_v26 = vld [vmem:[%s1801_s3] sm:$0xff]  ;;  %v1382_v34 = vld [vmem:[%s1802_s4 + $0x38] sm:$0xff] }
  0x17   : > { %628 = vmatpush.bf16.msra.mxu0 %v1398_v8  ;;  %v1402_v25 = vld [vmem:[%s1801_s3 + $0x48] sm:$0xff]  ;;  %v1401_v28 = vld [vmem:[%s1801_s3 + $0x40] sm:$0xff]  ;;  %s439_s13 = scalar_lea.vmem %s1800_s2, %s1149_s16  ;;  %v1390_v35 = vld [vmem:[%s1802_s4 + $0x78] sm:$0xff] }
  0x18   : > { %642 = vmatpush.bf16.msra.mxu1 %v1406_v9  ;;  %v1412_v27 = vld [vmem:[%s1803_s5 + $0x8] sm:$0xff]  ;;  %v1155_v29 = vld [vmem:[%s415_s12] sm:$0xf]  ;;  %v1391_v32 = vld [vmem:[%s415_s12 + $0x4] sm:$0xf]  ;;  %s1730_s21 = scalar_select %p421_p9, %s1491_s27, 3 }
  0x19   : > { %796 = vmatpush.bf16.msra.mxu2 %v1416_v10  ;;  %v1420_v30 = vld [vmem:[%s1803_s5 + $0x48] sm:$0xff]  ;;  %v1411_v36 = vld [vmem:[%s1803_s5] sm:$0xff]  ;;  %v1381_v44 = vld [vmem:[%s1802_s4 + $0x30] sm:$0xff]  ;;  %s823_s17 = scalar_select %p822_p10, 1.0, 0.0 }
  0x1a   : > { %810 = vmatpush.bf16.msra.mxu3 %v1424_v11  ;;  %v1392_v31 = vld [vmem:[%s415_s12 + $0x4] sm:$0xf0]  ;;  %v1157_v33 = vld [vmem:[%s415_s12 + $0x8] sm:$0xf0]  ;;  %v1227_v39 = vld [vmem:[%s439_s13] sm:$0xf] }
  0x1b   : > { %629 = vmatpush.bf16.msra.mxu0 %v1397_v12  ;;  %v1156_v37 = vor.u32 %v1392_v31, %v1155_v29  ;;  %v1160_v38 = vor.u32 %v1391_v32, %v1157_v33  ;;  %v1410_v40 = vld [vmem:[%s439_s13 + $0x4] sm:$0xf0]  ;;  %v1419_v41 = vld [vmem:[%s1803_s5 + $0x40] sm:$0xff]  ;;  %v1229_v43 = vld [vmem:[%s439_s13 + $0x8] sm:$0xf0]  ;;  %s1141_s16 = sshll.u32 %s1730_s21, 2  ;;  %v827_v9 = vstv %s823_s17 }
  0x1c   : > { %643 = vmatpush.bf16.msra.mxu1 %v1405_v13  ;;  %v1409_v42 = vld [vmem:[%s439_s13 + $0x4] sm:$0xf]  ;;  %v1389_v45 = vld [vmem:[%s1802_s4 + $0x70] sm:$0xff]  ;;  %v1228_v46 = vor.u32 %v1410_v40, %v1227_v39  ;;  %v1380_v48 = vld [vmem:[%s1802_s4 + $0x28] sm:$0xff]  ;;  %s425_s26 = sadd.s32 %s1141_s16, %s1650_s22  ;;  %s1150_s15 = sshll.u32 %s1730_s21, 1 }
  0x1d   : > { %797 = vmatpush.bf16.msra.mxu2 %v1415_v14  ;;  %v1232_v47 = vor.u32 %v1409_v42, %v1229_v43  ;;  %v1388_v49 = vld [vmem:[%s1802_s4 + $0x68] sm:$0xff]  ;;  %v1379_v50 = vld [vmem:[%s1802_s4 + $0x20] sm:$0xff]  ;;  %v1378_v52 = vld [vmem:[%s1802_s4 + $0x18] sm:$0xff]  ;;  %s1143_s18 = sshll.u32 %s425_s26, 2 }
  0x1e   : > { %811 = vmatpush.bf16.msra.mxu3 %v1423_v15  ;;  %v1387_v51 = vld [vmem:[%s1802_s4 + $0x60] sm:$0xff]  ;;  %v1386_v53 = vld [vmem:[%s1802_s4 + $0x58] sm:$0xff]  ;;  %v1377_v54 = vld [vmem:[%s1802_s4 + $0x10] sm:$0xff]  ;;  %s427_s24 = scalar_lea.vmem %s1799_s1, %s1143_s18  ;;  %s1769_s18 = sadd.s32 %s1151_s25, %s1150_s15 }
  0x1f   : > { %630 = vmatpush.bf16.msra.mxu0 %v1396_v16  ;;  %v1385_v55 = vld [vmem:[%s1802_s4 + $0x50] sm:$0xff]  ;;  %v1376_v56 = vld [vmem:[%s1802_s4 + $0x8] sm:$0xff]  ;;  %v1375_v58 = vld [vmem:[%s1802_s4] sm:$0xff]  ;;  %s826_s12 = scalar_select %p825_p11, 1.0, 0.0 }
  0x20   : > { %644 = vmatpush.bf16.msra.mxu1 %v1404_v17  ;;  %v1384_v57 = vld [vmem:[%s1802_s4 + $0x48] sm:$0xff]  ;;  %v1383_v59 = vld [vmem:[%s1802_s4 + $0x40] sm:$0xff]  ;;  %s1152_s22 = sshll.u32 %s1769_s18, 2 }
  0x21   : > { %798 = vmatpush.bf16.msra.mxu2 %v1414_v18  ;;  %v1299_v60 = vld [vmem:[%s427_s24] sm:$0xf]  ;;  %v1374_v61 = vld [vmem:[%s427_s24 + $0x4] sm:$0xf0]  ;;  %v1373_v62 = vld [vmem:[%s427_s24 + $0x4] sm:$0xf]  ;;  %v964_v11 = vstv %s826_s12  ;;  %s451_s23 = scalar_lea.vmem %s1806_s8, %s1152_s22 }
  0x22   : > { %812 = vmatpush.bf16.msra.mxu3 %v1422_v19  ;;  %v1301_v63 = vld [vmem:[%s427_s24 + $0x8] sm:$0xf0]  ;;  %v1300_v0 = vor.u32 %v1374_v61, %v1299_v60  ;;  %v1467_v19 = vld [vmem:[%s1804_s6] ss:$0 sm:$0xff] }
  0x23   : > { %631 = vmatpush.bf16.msra.mxu0 %v1395_v20  ;;  %v1304_v1 = vor.u32 %v1373_v62, %v1301_v63 }
  0x24   : > { %645 = vmatpush.bf16.msra.mxu1 %v1403_v21 }
  0x25   : > { %799 = vmatpush.bf16.msra.mxu2 %v1413_v22 }
  0x26   : > { %813 = vmatpush.bf16.msra.mxu3 %v1421_v23  ;;  %v1468_v23 = vld [vmem:[%s1805_s7] ss:$0 sm:$0xff] }
  0x27   : > { %632 = vmatpush.bf16.msra.mxu0 %v1394_v24 }
  0x28   : > { %646 = vmatpush.bf16.msra.mxu1 %v1402_v25 }
  0x29   : > { %800 = vmatpush.bf16.msra.mxu2 %v1412_v27 }
  0x2a   : > { %814 = vmatpush.bf16.msra.mxu3 %v1420_v30 }
  0x2b   : > { %633 = vmatpush.bf16.msra.mxu0 %v1393_v26 }
  0x2c   : > { %647 = vmatpush.bf16.msra.mxu1 %v1401_v28 }
  0x2d   : > { %801 = vmatpush.bf16.msra.mxu2 %v1411_v36 }
  0x2e   : > { %634 = vmatmul.bf16.vlgmr.msra.gmra.mxu0 %v1156_v37  ;;  %815 = vmatpush.bf16.msra.mxu3 %v1419_v41 }
  0x2f   : > { %936 = vmatpush.bf16.msrb.mxu0 %v1382_v34  ;;  %648 = vmatmul.bf16.vlgmr.msra.gmra.mxu1 %v1160_v38 }
  0x30   : > { %950 = vmatpush.bf16.msrb.mxu1 %v1390_v35  ;;  %802 = vmatmul.bf16.vlgmr.msra.gmra.mxu2 %v1228_v46 }
  0x31   : > { %816 = vmatmul.bf16.vlgmr.msra.gmra.mxu3 %v1232_v47 }
  0x33   : > { %937 = vmatpush.bf16.msrb.mxu0 %v1381_v44 }
  0x34   : > { %951 = vmatpush.bf16.msrb.mxu1 %v1389_v45 }
  0x37   : > { %938 = vmatpush.bf16.msrb.mxu0 %v1380_v48 }
  0x38   : > { %952 = vmatpush.bf16.msrb.mxu1 %v1388_v49 }
  0x3b   : > { %939 = vmatpush.bf16.msrb.mxu0 %v1379_v50 }
  0x3c   : > { %953 = vmatpush.bf16.msrb.mxu1 %v1387_v51 }
  0x3f   : > { %940 = vmatpush.bf16.msrb.mxu0 %v1378_v52 }
  0x40   : > { %954 = vmatpush.bf16.msrb.mxu1 %v1386_v53 }
  0x43   : > { %941 = vmatpush.bf16.msrb.mxu0 %v1377_v54 }
  0x44   : > { %955 = vmatpush.bf16.msrb.mxu1 %v1385_v55 }
  0x47   : > { %942 = vmatpush.bf16.msrb.mxu0 %v1376_v56 }
  0x48   : > { %956 = vmatpush.bf16.msrb.mxu1 %v1384_v57 }
  0x4b   : > { %943 = vmatpush.bf16.msrb.mxu0 %v1375_v58 }
  0x4c   : > { %957 = vmatpush.bf16.msrb.mxu1 %v1383_v59 }
  0x4e   : > { %944 = vmatmul.bf16.vlgmr.msrb.gmra.mxu0 %v1300_v0 }
  0x4f   : > { %958 = vmatmul.bf16.vlgmr.msrb.gmra.mxu1 %v1304_v1 }
  0xab   : > { %v635_v2 = vpop.f32.mrf.mxu0 }
  0xac   : > { %v649_v3 = vpop.f32.mrf.mxu1 }
  0xad   : > { %v650_v8 = vadd.f32 %v649_v3, %v635_v2 }
  0xaf   : > { %v828_v12 = vmul.f32 %v827_v9, %v650_v8 }
  0xb3   : > { %v637_v4 = vpop.f32.mrf.mxu0  ;;  %v803_v6 = vpop.f32.mrf.mxu2 }
  0xb4   : > { %v651_v5 = vpop.f32.mrf.mxu1  ;;  %v817_v7 = vpop.f32.mrf.mxu3 }
  0xb5   : > { %v818_v10 = vadd.f32 %v817_v7, %v803_v6  ;;  %v652_v17 = vadd.f32 %v651_v5, %v637_v4 }
  0xb7   : > { %v965_v15 = vmul.f32 %v964_v11, %v818_v10  ;;  %v829_v26 = vmul.f32 %v827_v9, %v652_v17 }
  0xbb   : > { %v805_v20 = vpop.f32.mrf.mxu2 }
  0xbc   : > { %v819_v21 = vpop.f32.mrf.mxu3 }
  0xbd   : > { %v820_v24 = vadd.f32 %v819_v21, %v805_v20 }
  0xbf   : > { %v966_v31 = vmul.f32 %v964_v11, %v820_v24 }
  0xcb   : > { %v945_v13 = vpop.f32.mrf.mxu0 }
  0xcc   : > { %v959_v14 = vpop.f32.mrf.mxu1  ;;  %v946_v16 = vadd.f32 %v945_v13, %v828_v12 }
  0xce   : > { %v960_v18 = vadd.f32 %v959_v14, %v946_v16 }
  0xd0   : > { %v967_v22 = vadd.f32 %v965_v15, %v960_v18 }
  0xd2   : > { %v973_v25 = vmul.f32 %v1467_v19, %v967_v22 }
  0xd3   : > { %v947_v27 = vpop.f32.mrf.mxu0 }
  0xd4   : > { %v979_v28 = vadd.f32 %v1468_v23, %v973_v25  ;;  %v948_v29 = vadd.f32 %v947_v27, %v829_v26  ;;  %v961_v30 = vpop.f32.mrf.mxu1 }
  0xd6   : > { %v981_v32 = vmax.f32 %v979_v28, 0.0  ;;  %v962_v33 = vadd.f32 %v961_v30, %v948_v29 }
  0xd8   : > { %v983_v34 = vpack.c.bf16 %v981_v32, %v981_v32  ;;  %v968_v35 = vadd.f32 %v966_v31, %v962_v33 }
  0xda   : > { %986 = vst.msk [vmem:[%s451_s23] sm:$0xf] %vm985_vm0, %v983_v34  ;;  %v974_v36 = vmul.f32 %v1467_v19, %v968_v35 }
  0xdc   : > { %v980_v37 = vadd.f32 %v1468_v23, %v974_v36 }
  0xde   : > { %v982_v38 = vmax.f32 %v980_v37, 0.0 }
  0xe0   : > { %v984_v39 = vpack.c.bf16 %v982_v38, %v982_v38 }
  0xe2   : > { %987 = vst.msk [vmem:[%s451_s23 + $0x4] sm:$0xf] %vm985_vm0, %v984_v39 }
  0xe3 PF: > { %s18_s9 = sadd.s32 1, %s1507_s9   ;;  %s1808_s24 = sld [smem:[#allocation2_spill]] }
  0xe4   : > { %p15_p12 = scmp.ge.s32.totalorder %s18_s9, 10   ;;  %s1809_s27 = smov %s1499_s29 }
  0xe5   : > { %s1810_s28 = smov %s1503_s30  ;;  %s1811_s29 = smov %s1814_s10 }
  0xe6   :  { %17 = sbr.rel (!%p15_p12) target bundleno = 3 (0x3), region = 88 }
  0xe9   : > { %s1812_s30 = smov %s1808_s24 }

// kernel: dense_temporal_block.12
= control target key start
LH: loop header
LB: loop body
LE: loop exit
PB: predicated region body
PF: predicated region fallthrough
CT: control target
= control target key end

     0   :  { %13 = vsyncpa [#allocation3], 0  ;;  %s2345_s30 = smov [#allocation2]   ;;  %s2346_s10 = smov 128   ;;  %s3210_s0 = inlined_call_operand.vmem [shape: bf16[128,512], index: 0, kind: input, shape index: {}]   ;;  %s3211_s1 = inlined_call_operand.vmem [shape: bf16[128,64], index: 1, kind: input, shape index: {}]   ;;  %s3212_s2 = inlined_call_operand.vmem [shape: bf16[128,64], index: 2, kind: input, shape index: {}]   ;;  %s3213_s3 = inlined_call_operand.hbm [shape: bf16[512,256], index: 3, kind: input, shape index: {}]   ;;  %s3214_s4 = inlined_call_operand.vmem [shape: bf16[64,256], index: 4, kind: input, shape index: {}]   ;;  %s3215_s5 = inlined_call_operand.vmem [shape: bf16[64,256], index: 5, kind: input, shape index: {}]   ;;  %s3216_s6 = inlined_call_operand.vmem [shape: f32[1,256], index: 6, kind: input, shape index: {}]   ;;  %s3217_s7 = inlined_call_operand.vmem [shape: f32[1,256], index: 7, kind: input, shape index: {}]   ;;  %s3218_s8 = inlined_call_operand.vmem [shape: bf16[128,256], index: 8, kind: output, shape index: {}]  }
   0x1   :  { %s24_s29 = sshll.u32 %s3213_s3, 4  ;;  %s26_s9 = sshll.u32 %s2345_s30, 4  ;;  %s25_s29 = int_to_ptr.hbm [resolvable:$true] %s24_s29  ;;  %s27_s9 = int_to_ptr.vmem [resolvable:$true] %s26_s9 }
   0x2   :  { %s2347_s11 = smov 8  }
   0x3   :  { %32 = dma.hbm_to_vmem [thread:$0]  %s25_s29, 8192, %s27_s9, [#allocation3], %s2346_s10, %s2346_s10, %s2347_s11  }
   0x4   :  { %2343 = dma.done.wait [#allocation3], 8192  }
   0x5   :  { %2344 = vsyncadd [#allocation3], 4294959104  ;;  %v1702_v0 = vld [vmem:[%s3214_s4 + $0x30] sm:$0xf]  ;;  %v2299_v1 = vld [vmem:[%s3214_s4 + $0x34] sm:$0xf0] }
   0x6   :  { %v1910_v2 = vld [vmem:[#allocation2 + $0x70] sm:$0xf]  ;;  %v1703_v3 = vor.u32 %v2299_v1, %v1702_v0  ;;  %v2235_v4 = vld [vmem:[#allocation2 + $0x74] sm:$0xf0]  ;;  %v2298_v9 = vld [vmem:[%s3214_s4 + $0x34] sm:$0xf] }
   0x7   :  { %v1974_v5 = vld [vmem:[#allocation2 + $0xf0] sm:$0xf]  ;;  %v2251_v6 = vld [vmem:[#allocation2 + $0xf4] sm:$0xf0]  ;;  %v1911_v7 = vor.u32 %v2235_v4, %v1910_v2  ;;  %v1704_v10 = vld [vmem:[%s3214_s4 + $0x38] sm:$0xf0] }
   0x8   :  { %v1975_v8 = vor.u32 %v2251_v6, %v1974_v5  ;;  %v1694_v11 = vld [vmem:[%s3214_s4 + $0x20] sm:$0xf]  ;;  %275 = vmatpush.bf16.msra.mxu0 %v1703_v3  ;;  %v1707_v12 = vor.u32 %v2298_v9, %v1704_v10  ;;  %v2297_v13 = vld [vmem:[%s3214_s4 + $0x24] sm:$0xf0]  ;;  %v2296_v20 = vld [vmem:[%s3214_s4 + $0x24] sm:$0xf] }
   0x9   :  { %v1902_v14 = vld [vmem:[#allocation2 + $0x60] sm:$0xf]  ;;  %v2233_v15 = vld [vmem:[#allocation2 + $0x64] sm:$0xf0]  ;;  %849 = vmatpush.bf16.msra.mxu2 %v1911_v7  ;;  %v1695_v16 = vor.u32 %v2297_v13, %v1694_v11  ;;  %v1696_v22 = vld [vmem:[%s3214_s4 + $0x28] sm:$0xf0] }
   0xa   :  { %898 = vmatpush.bf16.msra.mxu3 %v1975_v8  ;;  %v1903_v17 = vor.u32 %v2233_v15, %v1902_v14  ;;  %v1966_v18 = vld [vmem:[#allocation2 + $0xe0] sm:$0xf]  ;;  %v2249_v19 = vld [vmem:[#allocation2 + $0xe4] sm:$0xf0]  ;;  %324 = vmatpush.bf16.msra.mxu1 %v1707_v12  ;;  %v1686_v23 = vld [vmem:[%s3214_s4 + $0x10] sm:$0xf]  ;;  %v1699_v25 = vor.u32 %v2296_v20, %v1696_v22 }
   0xb   :  { %v1967_v21 = vor.u32 %v2249_v19, %v1966_v18  ;;  %v2295_v24 = vld [vmem:[%s3214_s4 + $0x14] sm:$0xf0]  ;;  %v1894_v26 = vld [vmem:[#allocation2 + $0x50] sm:$0xf]  ;;  %v2294_v31 = vld [vmem:[%s3214_s4 + $0x14] sm:$0xf] }
   0xc   :  { %v2231_v27 = vld [vmem:[#allocation2 + $0x54] sm:$0xf0]  ;;  %v1958_v28 = vld [vmem:[#allocation2 + $0xd0] sm:$0xf]  ;;  %276 = vmatpush.bf16.msra.mxu0 %v1695_v16  ;;  %v1687_v29 = vor.u32 %v2295_v24, %v1686_v23  ;;  %v1688_v32 = vld [vmem:[%s3214_s4 + $0x18] sm:$0xf0] }
   0xd   :  { %v2247_v30 = vld [vmem:[#allocation2 + $0xd4] sm:$0xf0]  ;;  %850 = vmatpush.bf16.msra.mxu2 %v1903_v17  ;;  %v1895_v33 = vor.u32 %v2231_v27, %v1894_v26  ;;  %v1678_v35 = vld [vmem:[%s3214_s4] sm:$0xf]  ;;  %v2293_v36 = vld [vmem:[%s3214_s4 + $0x4] sm:$0xf0]  ;;  %v1691_v38 = vor.u32 %v2294_v31, %v1688_v32 }
   0xe   :  { %899 = vmatpush.bf16.msra.mxu3 %v1967_v21  ;;  %v1959_v34 = vor.u32 %v2247_v30, %v1958_v28  ;;  %v1886_v37 = vld [vmem:[#allocation2 + $0x40] sm:$0xf]  ;;  %325 = vmatpush.bf16.msra.mxu1 %v1699_v25  ;;  %v2229_v39 = vld [vmem:[#allocation2 + $0x44] sm:$0xf0]  ;;  %v2292_v42 = vld [vmem:[%s3214_s4 + $0x4] sm:$0xf]  ;;  %v1679_v44 = vor.u32 %v2293_v36, %v1678_v35 }
   0xf   :  { %v1950_v40 = vld [vmem:[#allocation2 + $0xc0] sm:$0xf]  ;;  %v2245_v41 = vld [vmem:[#allocation2 + $0xc4] sm:$0xf0]  ;;  %v1680_v43 = vld [vmem:[%s3214_s4 + $0x8] sm:$0xf0]  ;;  %v1887_v45 = vor.u32 %v2229_v39, %v1886_v37 }
  0x10   :  { %277 = vmatpush.bf16.msra.mxu0 %v1687_v29  ;;  %v1951_v46 = vor.u32 %v2245_v41, %v1950_v40  ;;  %v1878_v47 = vld [vmem:[#allocation2 + $0x30] sm:$0xf]  ;;  %v1683_v48 = vor.u32 %v2292_v42, %v1680_v43  ;;  %v2227_v49 = vld [vmem:[#allocation2 + $0x34] sm:$0xf0]  ;;  %v2284_v52 = vld [vmem:[%s3211_s1] sm:$0xff]  ;;  %vm246_vm0 = vcmask 523264  }
  0x11   :  { %851 = vmatpush.bf16.msra.mxu2 %v1895_v33  ;;  %v1942_v50 = vld [vmem:[#allocation2 + $0xb0] sm:$0xf]  ;;  %v2243_v51 = vld [vmem:[#allocation2 + $0xb4] sm:$0xf0]  ;;  %v1879_v53 = vor.u32 %v2227_v49, %v1878_v47  ;;  %v1870_v55 = vld [vmem:[#allocation2 + $0x20] sm:$0xf] }
  0x12   :  { %900 = vmatpush.bf16.msra.mxu3 %v1959_v34  ;;  %326 = vmatpush.bf16.msra.mxu1 %v1691_v38  ;;  %v1943_v54 = vor.u32 %v2243_v51, %v1942_v50  ;;  %v2225_v56 = vld [vmem:[#allocation2 + $0x24] sm:$0xf0]  ;;  %v1934_v57 = vld [vmem:[#allocation2 + $0xa0] sm:$0xf]  ;;  %v2038_v59 = vld [vmem:[#allocation2 + $0x170] sm:$0xf] }
  0x13   :  { %v2241_v58 = vld [vmem:[#allocation2 + $0xa4] sm:$0xf0]  ;;  %v2267_v60 = vld [vmem:[#allocation2 + $0x174] sm:$0xf0]  ;;  %v1871_v61 = vor.u32 %v2225_v56, %v1870_v55  ;;  %v1862_v63 = vld [vmem:[#allocation2 + $0x10] sm:$0xf] }
  0x14   :  { %278 = vmatpush.bf16.msra.mxu0 %v1679_v44  ;;  %v1935_v62 = vor.u32 %v2241_v58, %v1934_v57  ;;  %v2039_v0 = vor.u32 %v2267_v60, %v2038_v59  ;;  %v2102_v1 = vld [vmem:[#allocation2 + $0x1f0] sm:$0xf]  ;;  %v2283_v2 = vld [vmem:[#allocation2 + $0x1f4] sm:$0xf0]  ;;  %v1854_v7 = vld [vmem:[#allocation2] sm:$0xf] }
  0x15   :  { %852 = vmatpush.bf16.msra.mxu2 %v1887_v45  ;;  %v2223_v3 = vld [vmem:[#allocation2 + $0x14] sm:$0xf0]  ;;  %v1926_v4 = vld [vmem:[#allocation2 + $0x90] sm:$0xf]  ;;  %v2103_v6 = vor.u32 %v2283_v2, %v2102_v1  ;;  %v2221_v8 = vld [vmem:[#allocation2 + $0x4] sm:$0xf0] }
  0x16   :  { %901 = vmatpush.bf16.msra.mxu3 %v1951_v46  ;;  %327 = vmatpush.bf16.msra.mxu1 %v1683_v48  ;;  %v2239_v5 = vld [vmem:[#allocation2 + $0x94] sm:$0xf0]  ;;  %v2030_v9 = vld [vmem:[#allocation2 + $0x160] sm:$0xf]  ;;  %v1863_v10 = vor.u32 %v2223_v3, %v1862_v63  ;;  %v2265_v12 = vld [vmem:[#allocation2 + $0x164] sm:$0xf0]  ;;  %v1855_v24 = vor.u32 %v2221_v8, %v1854_v7 }
  0x17   :  { %1708 = vmatmul.msk.bf16.vlgmr.msra.gmra.mxu0 %vm246_vm0, %v2284_v52  ;;  %v1927_v11 = vor.u32 %v2239_v5, %v1926_v4  ;;  %v2094_v13 = vld [vmem:[#allocation2 + $0x1e0] sm:$0xf]  ;;  %v2281_v14 = vld [vmem:[#allocation2 + $0x1e4] sm:$0xf0]  ;;  %v2234_v17 = vld [vmem:[#allocation2 + $0x74] sm:$0xf]  ;;  %v2031_v18 = vor.u32 %v2265_v12, %v2030_v9 }
  0x18   :  { %947 = vmatpush.bf16.msrb.mxu0 %v2039_v0  ;;  %v1918_v15 = vld [vmem:[#allocation2 + $0x80] sm:$0xf]  ;;  %v2237_v16 = vld [vmem:[#allocation2 + $0x84] sm:$0xf0]  ;;  %v2095_v19 = vor.u32 %v2281_v14, %v2094_v13  ;;  %v1912_v20 = vld [vmem:[#allocation2 + $0x78] sm:$0xf0] }
  0x19   :  { %853 = vmatpush.bf16.msra.mxu2 %v1879_v53  ;;  %1716 = vmatmul.msk.bf16.vlgmr.msra.gmra.mxu1 %vm246_vm0, %v2284_v52  ;;  %v2250_v21 = vld [vmem:[#allocation2 + $0xf4] sm:$0xf]  ;;  %v1976_v22 = vld [vmem:[#allocation2 + $0xf8] sm:$0xf0]  ;;  %v1726_v23 = vld [vmem:[%s3210_s0] sm:$0xf]  ;;  %v1919_v25 = vor.u32 %v2237_v16, %v1918_v15  ;;  %v1915_v29 = vor.u32 %v2234_v17, %v1912_v20 }
  0x1a   :  { %902 = vmatpush.bf16.msra.mxu3 %v1943_v54  ;;  %996 = vmatpush.bf16.msrb.mxu1 %v2103_v6  ;;  %v2190_v26 = vld [vmem:[%s3210_s0 + $0xc] sm:$0xf0]  ;;  %v2188_v27 = vld [vmem:[%s3210_s0 + $0x4] sm:$0xf]  ;;  %v1728_v28 = vld [vmem:[%s3210_s0 + $0x10] sm:$0xf0]  ;;  %v1979_v30 = vor.u32 %v2250_v21, %v1976_v22 }
  0x1b   :  { %v2285_v31 = vld [vmem:[%s3211_s1 + $0x8] sm:$0xff]  ;;  %v2232_v32 = vld [vmem:[#allocation2 + $0x64] sm:$0xf]  ;;  %v2464_v34 = vor.u32 %v2190_v26, %v1726_v23  ;;  %v2466_v35 = vor.u32 %v2188_v27, %v1728_v28  ;;  %v2230_v40 = vld [vmem:[#allocation2 + $0x54] sm:$0xf] }
  0x1c   :  { %948 = vmatpush.bf16.msrb.mxu0 %v2031_v18  ;;  %v1904_v33 = vld [vmem:[#allocation2 + $0x68] sm:$0xf0]  ;;  %v2248_v36 = vld [vmem:[#allocation2 + $0xe4] sm:$0xf]  ;;  %v1896_v41 = vld [vmem:[#allocation2 + $0x58] sm:$0xf0] }
  0x1d   :  { %854 = vmatpush.bf16.msra.mxu2 %v1871_v61  ;;  %v1968_v37 = vld [vmem:[#allocation2 + $0xe8] sm:$0xf0]  ;;  %v1907_v38 = vor.u32 %v2232_v32, %v1904_v33  ;;  %v2246_v42 = vld [vmem:[#allocation2 + $0xd4] sm:$0xf]  ;;  %v1960_v43 = vld [vmem:[#allocation2 + $0xd8] sm:$0xf0]  ;;  %v1899_v44 = vor.u32 %v2230_v40, %v1896_v41 }
  0x1e   :  { %903 = vmatpush.bf16.msra.mxu3 %v1935_v62  ;;  %997 = vmatpush.bf16.msrb.mxu1 %v2095_v19  ;;  %v1971_v39 = vor.u32 %v2248_v36, %v1968_v37  ;;  %v2022_v45 = vld [vmem:[#allocation2 + $0x150] sm:$0xf]  ;;  %v2263_v46 = vld [vmem:[#allocation2 + $0x154] sm:$0xf0]  ;;  %v1963_v48 = vor.u32 %v2246_v42, %v1960_v43  ;;  %v1742_v52 = vld [vmem:[%s3210_s0 + $0x20] sm:$0xf] }
  0x1f   :  { %v2086_v47 = vld [vmem:[#allocation2 + $0x1d0] sm:$0xf]  ;;  %v2023_v49 = vor.u32 %v2263_v46, %v2022_v45  ;;  %v2279_v50 = vld [vmem:[#allocation2 + $0x1d4] sm:$0xf0]  ;;  %v2192_v54 = vld [vmem:[%s3210_s0 + $0x24] sm:$0xf] }
  0x20   :  { %v2087_v51 = vor.u32 %v2279_v50, %v2086_v47  ;;  %v2194_v53 = vld [vmem:[%s3210_s0 + $0x2c] sm:$0xf0]  ;;  %v1744_v55 = vld [vmem:[%s3210_s0 + $0x30] sm:$0xf0]  ;;  %v2228_v59 = vld [vmem:[#allocation2 + $0x44] sm:$0xf] }
  0x21   :  { %855 = vmatpush.bf16.msra.mxu2 %v1863_v10  ;;  %949 = vmatpush.bf16.msrb.mxu0 %v2023_v49  ;;  %v2286_v56 = vld [vmem:[%s3211_s1 + $0x10] sm:$0xff]  ;;  %v2487_v57 = vor.u32 %v2194_v53, %v1742_v52  ;;  %v2489_v58 = vor.u32 %v2192_v54, %v1744_v55  ;;  %v1888_v60 = vld [vmem:[#allocation2 + $0x48] sm:$0xf0]  ;;  %v2244_v61 = vld [vmem:[#allocation2 + $0xc4] sm:$0xf] }
  0x22   :  { %904 = vmatpush.bf16.msra.mxu3 %v1927_v11  ;;  %998 = vmatpush.bf16.msrb.mxu1 %v2087_v51  ;;  %v1891_v62 = vor.u32 %v2228_v59, %v1888_v60  ;;  %v1952_v63 = vld [vmem:[#allocation2 + $0xc8] sm:$0xf0]  ;;  %v2014_v1 = vld [vmem:[#allocation2 + $0x140] sm:$0xf]  ;;  %v2261_v2 = vld [vmem:[#allocation2 + $0x144] sm:$0xf0] }
  0x23   :  { %v1955_v0 = vor.u32 %v2244_v61, %v1952_v63  ;;  %v2078_v3 = vld [vmem:[#allocation2 + $0x1c0] sm:$0xf]  ;;  %v2015_v4 = vor.u32 %v2261_v2, %v2014_v1  ;;  %v2277_v5 = vld [vmem:[#allocation2 + $0x1c4] sm:$0xf0]  ;;  %v2198_v8 = vld [vmem:[%s3210_s0 + $0x4c] sm:$0xf0] }
  0x24   :  { %v2079_v6 = vor.u32 %v2277_v5, %v2078_v3  ;;  %v1758_v7 = vld [vmem:[%s3210_s0 + $0x40] sm:$0xf]  ;;  %v2196_v9 = vld [vmem:[%s3210_s0 + $0x44] sm:$0xf]  ;;  %v1760_v10 = vld [vmem:[%s3210_s0 + $0x50] sm:$0xf0] }
  0x25   :  { %856 = vmatpush.bf16.msra.mxu2 %v1855_v24  ;;  %950 = vmatpush.bf16.msrb.mxu0 %v2015_v4  ;;  %v2287_v11 = vld [vmem:[%s3211_s1 + $0x18] sm:$0xff]  ;;  %v2510_v12 = vor.u32 %v2198_v8, %v1758_v7  ;;  %v2512_v13 = vor.u32 %v2196_v9, %v1760_v10  ;;  %v2226_v14 = vld [vmem:[#allocation2 + $0x34] sm:$0xf]  ;;  %v2006_v20 = vld [vmem:[#allocation2 + $0x130] sm:$0xf] }
  0x26   :  { %905 = vmatpush.bf16.msra.mxu3 %v1919_v25  ;;  %999 = vmatpush.bf16.msrb.mxu1 %v2079_v6  ;;  %v1880_v15 = vld [vmem:[#allocation2 + $0x38] sm:$0xf0]  ;;  %v2242_v16 = vld [vmem:[#allocation2 + $0xb4] sm:$0xf]  ;;  %v2259_v21 = vld [vmem:[#allocation2 + $0x134] sm:$0xf0] }
  0x27   :  { %1709 = vmatmul.msk.bf16.gmra.mxu0 %vm246_vm0, %v2285_v31  ;;  %v1883_v17 = vor.u32 %v2226_v14, %v1880_v15  ;;  %v1944_v18 = vld [vmem:[#allocation2 + $0xb8] sm:$0xf0]  ;;  %v2070_v22 = vld [vmem:[#allocation2 + $0x1b0] sm:$0xf]  ;;  %v2007_v23 = vor.u32 %v2259_v21, %v2006_v20  ;;  %v2275_v24 = vld [vmem:[#allocation2 + $0x1b4] sm:$0xf0] }
  0x28   :  { %857 = vmatmul.bf16.vlgmr.msra.gmra.mxu2 %v2464_v34  ;;  %v1947_v19 = vor.u32 %v2242_v16, %v1944_v18  ;;  %v2071_v25 = vor.u32 %v2275_v24, %v2070_v22  ;;  %v1774_v26 = vld [vmem:[%s3210_s0 + $0x60] sm:$0xf]  ;;  %v2202_v27 = vld [vmem:[%s3210_s0 + $0x6c] sm:$0xf0]  ;;  %v2200_v28 = vld [vmem:[%s3210_s0 + $0x64] sm:$0xf] }
  0x29   :  { %1045 = vmatpush.bf16.msrb.mxu2 %v1915_v29  ;;  %906 = vmatmul.bf16.vlgmr.msra.gmra.mxu3 %v2466_v35  ;;  %v1776_v29 = vld [vmem:[%s3210_s0 + $0x70] sm:$0xf0]  ;;  %v2224_v33 = vld [vmem:[#allocation2 + $0x24] sm:$0xf]  ;;  %v1872_v36 = vld [vmem:[#allocation2 + $0x28] sm:$0xf0] }
  0x2a   :  { %1094 = vmatpush.bf16.msrb.mxu3 %v1979_v30  ;;  %1717 = vmatmul.msk.bf16.gmra.mxu1 %vm246_vm0, %v2285_v31  ;;  %v2288_v30 = vld [vmem:[%s3211_s1 + $0x20] sm:$0xff]  ;;  %v2533_v31 = vor.u32 %v2202_v27, %v1774_v26  ;;  %v2535_v32 = vor.u32 %v2200_v28, %v1776_v29  ;;  %v2257_v42 = vld [vmem:[#allocation2 + $0x124] sm:$0xf0]  ;;  %v1792_v50 = vld [vmem:[%s3210_s0 + $0x90] sm:$0xf0] }
  0x2b   :  { %951 = vmatpush.bf16.msrb.mxu0 %v2007_v23  ;;  %1000 = vmatpush.bf16.msrb.mxu1 %v2071_v25  ;;  %v2240_v37 = vld [vmem:[#allocation2 + $0xa4] sm:$0xf]  ;;  %v1998_v41 = vld [vmem:[#allocation2 + $0x120] sm:$0xf]  ;;  %v2273_v45 = vld [vmem:[#allocation2 + $0x1a4] sm:$0xf0] }
  0x2c   :  { %v2062_v43 = vld [vmem:[#allocation2 + $0x1a0] sm:$0xf]  ;;  %v2204_v49 = vld [vmem:[%s3210_s0 + $0x84] sm:$0xf]  ;;  %v2289_v51 = vld [vmem:[%s3211_s1 + $0x28] sm:$0xff] }
  0x2d   :  { %1046 = vmatpush.bf16.msrb.mxu2 %v1907_v38  ;;  %v1875_v38 = vor.u32 %v2224_v33, %v1872_v36  ;;  %v2063_v46 = vor.u32 %v2273_v45, %v2062_v43  ;;  %v1790_v47 = vld [vmem:[%s3210_s0 + $0x80] sm:$0xf]  ;;  %v2558_v53 = vor.u32 %v2204_v49, %v1792_v50  ;;  %v2222_v54 = vld [vmem:[#allocation2 + $0x14] sm:$0xf]  ;;  %v1864_v55 = vld [vmem:[#allocation2 + $0x18] sm:$0xf0] }
  0x2e   :  { %1095 = vmatpush.bf16.msrb.mxu3 %v1971_v39  ;;  %v1936_v39 = vld [vmem:[#allocation2 + $0xa8] sm:$0xf0]  ;;  %v1867_v59 = vor.u32 %v2222_v54, %v1864_v55  ;;  %v1928_v60 = vld [vmem:[#allocation2 + $0x98] sm:$0xf0]  ;;  %v2255_v63 = vld [vmem:[#allocation2 + $0x114] sm:$0xf0] }
  0x2f   :  { %v1939_v40 = vor.u32 %v2240_v37, %v1936_v39  ;;  %1001 = vmatpush.bf16.msrb.mxu1 %v2063_v46  ;;  %v2271_v2 = vld [vmem:[#allocation2 + $0x194] sm:$0xf0]  ;;  %v1806_v4 = vld [vmem:[%s3210_s0 + $0xa0] sm:$0xf]  ;;  %v2210_v5 = vld [vmem:[%s3210_s0 + $0xac] sm:$0xf0] }
  0x30   :  { %v2208_v6 = vld [vmem:[%s3210_s0 + $0xa4] sm:$0xf]  ;;  %v1808_v7 = vld [vmem:[%s3210_s0 + $0xb0] sm:$0xf0]  ;;  %v1982_v8 = vld [vmem:[#allocation2 + $0x100] sm:$0xf]  ;;  %v2579_v14 = vor.u32 %v2210_v5, %v1806_v4 }
  0x31   :  { %1047 = vmatpush.bf16.msrb.mxu2 %v1899_v44  ;;  %v1999_v44 = vor.u32 %v2257_v42, %v1998_v41  ;;  %v2253_v9 = vld [vmem:[#allocation2 + $0x104] sm:$0xf0]  ;;  %v2290_v10 = vld [vmem:[%s3211_s1 + $0x30] sm:$0xff]  ;;  %v2581_v15 = vor.u32 %v2208_v6, %v1808_v7  ;;  %v2046_v16 = vld [vmem:[#allocation2 + $0x180] sm:$0xf] }
  0x32   :  { %1096 = vmatpush.bf16.msrb.mxu3 %v1963_v48  ;;  %v2206_v48 = vld [vmem:[%s3210_s0 + $0x8c] sm:$0xf0]  ;;  %v1856_v20 = vld [vmem:[#allocation2 + $0x8] sm:$0xf0]  ;;  %v2236_v21 = vld [vmem:[#allocation2 + $0x84] sm:$0xf] }
  0x33   :  { %952 = vmatpush.bf16.msrb.mxu0 %v1999_v44  ;;  %v2556_v52 = vor.u32 %v2206_v48, %v1790_v47  ;;  %v1920_v23 = vld [vmem:[#allocation2 + $0x88] sm:$0xf0]  ;;  %v1822_v25 = vld [vmem:[%s3210_s0 + $0xc0] sm:$0xf]  ;;  %v2214_v26 = vld [vmem:[%s3210_s0 + $0xcc] sm:$0xf0] }
  0x34   :  { %v1923_v24 = vor.u32 %v2236_v21, %v1920_v23  ;;  %v2212_v27 = vld [vmem:[%s3210_s0 + $0xc4] sm:$0xf]  ;;  %v1824_v28 = vld [vmem:[%s3210_s0 + $0xd0] sm:$0xf0]  ;;  %v2291_v29 = vld [vmem:[%s3211_s1 + $0x38] sm:$0xff] }
  0x35   :  { %1048 = vmatpush.bf16.msrb.mxu2 %v1891_v62  ;;  %v1990_v62 = vld [vmem:[#allocation2 + $0x110] sm:$0xf]  ;;  %v2604_v33 = vor.u32 %v2212_v27, %v1824_v28  ;;  %v2315_v37 = vld [vmem:[%s3215_s5 + $0x34] sm:$0xf0]  ;;  %v2266_v42 = vld [vmem:[#allocation2 + $0x174] sm:$0xf] }
  0x36   :  { %1097 = vmatpush.bf16.msrb.mxu3 %v1955_v0  ;;  %v2054_v0 = vld [vmem:[#allocation2 + $0x190] sm:$0xf]  ;;  %v1991_v1 = vor.u32 %v2255_v63, %v1990_v62  ;;  %v2040_v43 = vld [vmem:[#allocation2 + $0x178] sm:$0xf0]  ;;  %v2282_v45 = vld [vmem:[#allocation2 + $0x1f4] sm:$0xf] }
  0x37   :  { %1710 = vmatmul.msk.bf16.gmra.mxu0 %vm246_vm0, %v2286_v56  ;;  %v2055_v3 = vor.u32 %v2271_v2, %v2054_v0  ;;  %v2166_v36 = vld [vmem:[%s3215_s5 + $0x30] sm:$0xf]  ;;  %v2043_v44 = vor.u32 %v2266_v42, %v2040_v43  ;;  %v2104_v46 = vld [vmem:[#allocation2 + $0x1f8] sm:$0xf0]  ;;  %v1838_v48 = vld [vmem:[%s3210_s0 + $0xe0] sm:$0xf] }
  0x38   :  { %862 = vmatmul.bf16.gmra.mxu2 %v2487_v57  ;;  %953 = vmatpush.bf16.msrb.mxu0 %v1991_v1  ;;  %v2167_v39 = vor.u32 %v2315_v37, %v2166_v36  ;;  %v2107_v47 = vor.u32 %v2282_v45, %v2104_v46  ;;  %v1734_v49 = vld [vmem:[%s3210_s0 + $0x8] sm:$0xf]  ;;  %v2191_v50 = vld [vmem:[%s3210_s0 + $0x14] sm:$0xf0]  ;;  %v2216_v54 = vld [vmem:[%s3210_s0 + $0xe4] sm:$0xf] }
  0x39   :  { %911 = vmatmul.bf16.gmra.mxu3 %v2489_v58  ;;  %1049 = vmatpush.bf16.msrb.mxu2 %v1883_v17  ;;  %v2269_v17 = vld [vmem:[#allocation2 + $0x184] sm:$0xf0]  ;;  %v1840_v55 = vld [vmem:[%s3210_s0 + $0xf0] sm:$0xf0]  ;;  %v2264_v2 = vld [vmem:[#allocation2 + $0x164] sm:$0xf] }
  0x3a   :  { %1718 = vmatmul.msk.bf16.gmra.mxu1 %vm246_vm0, %v2286_v56  ;;  %1098 = vmatpush.bf16.msrb.mxu3 %v1947_v19  ;;  %v2238_v56 = vld [vmem:[#allocation2 + $0x94] sm:$0xf]  ;;  %v2047_v18 = vor.u32 %v2269_v17, %v2046_v16  ;;  %v2220_v19 = vld [vmem:[#allocation2 + $0x4] sm:$0xf]  ;;  %v2650_v63 = vor.u32 %v2216_v54, %v1840_v55  ;;  %v2096_v7 = vld [vmem:[#allocation2 + $0x1e8] sm:$0xf0] }
  0x3b   :  { %v1931_v61 = vor.u32 %v2238_v56, %v1928_v60  ;;  %1002 = vmatpush.bf16.msrb.mxu1 %v2055_v3  ;;  %v1859_v22 = vor.u32 %v2220_v19, %v1856_v20  ;;  %v2640_v56 = vor.u32 %v2191_v50, %v1734_v49  ;;  %v1736_v60 = vld [vmem:[%s3210_s0 + $0x18] sm:$0xf0]  ;;  %v2032_v3 = vld [vmem:[#allocation2 + $0x168] sm:$0xf0]  ;;  %v2280_v6 = vld [vmem:[#allocation2 + $0x1e4] sm:$0xf] }
  0x3c   :  { %v2035_v4 = vor.u32 %v2264_v2, %v2032_v3  ;;  %v2193_v17 = vld [vmem:[%s3210_s0 + $0x2c] sm:$0xf]  ;;  %v2313_v23 = vld [vmem:[%s3215_s5 + $0x24] sm:$0xf0]  ;;  %v2024_v27 = vld [vmem:[#allocation2 + $0x158] sm:$0xf0] }
  0x3d   :  { %1050 = vmatpush.bf16.msrb.mxu2 %v1875_v38  ;;  %v2314_v38 = vld [vmem:[%s3215_s5 + $0x34] sm:$0xf]  ;;  %v2199_v45 = vld [vmem:[%s3210_s0 + $0x54] sm:$0xf0]  ;;  %v2197_v49 = vld [vmem:[%s3210_s0 + $0x4c] sm:$0xf] }
  0x3e   :  { %1099 = vmatpush.bf16.msrb.mxu3 %v1939_v40  ;;  %v2168_v40 = vld [vmem:[%s3215_s5 + $0x38] sm:$0xf0]  ;;  %v2016_v2 = vld [vmem:[#allocation2 + $0x148] sm:$0xf0] }
  0x3f   :  { %1003 = vmatpush.bf16.msrb.mxu1 %v2047_v18  ;;  %v2171_v41 = vor.u32 %v2314_v38, %v2168_v40  ;;  %v1752_v18 = vld [vmem:[%s3210_s0 + $0x38] sm:$0xf0]  ;;  %v2278_v40 = vld [vmem:[#allocation2 + $0x1d4] sm:$0xf] }
  0x40   :  { %v2676_v20 = vor.u32 %v2193_v17, %v1752_v18  ;;  %v1768_v50 = vld [vmem:[%s3210_s0 + $0x58] sm:$0xf0] }
  0x41   :  { %1051 = vmatpush.bf16.msrb.mxu2 %v1867_v59  ;;  %v2189_v59 = vld [vmem:[%s3210_s0 + $0xc] sm:$0xf] }
  0x42   :  { %1100 = vmatpush.bf16.msrb.mxu3 %v1931_v61  ;;  %v2652_v0 = vor.u32 %v2189_v59, %v1736_v60  ;;  %v2716_v59 = vor.u32 %v2197_v49, %v1768_v50  ;;  %v2274_v50 = vld [vmem:[#allocation2 + $0x1b4] sm:$0xf] }
  0x43   :  { %1192 = vmatpush.bf16.msra.mxu1 %v2107_v47 }
  0x45   :  { %1052 = vmatpush.bf16.msrb.mxu2 %v1859_v22  ;;  %v2158_v22 = vld [vmem:[%s3215_s5 + $0x20] sm:$0xf] }
  0x46   :  { %1101 = vmatpush.bf16.msrb.mxu3 %v1923_v24  ;;  %v2312_v24 = vld [vmem:[%s3215_s5 + $0x24] sm:$0xf] }
  0x47   :  { %1711 = vmatmul.msk.bf16.gmra.mxu0 %vm246_vm0, %v2287_v11 }
  0x48   :  { %867 = vmatmul.bf16.gmra.mxu2 %v2510_v12 }
  0x49   :  { %916 = vmatmul.bf16.gmra.mxu3 %v2512_v13  ;;  %1373 = vmatpush.bf16.msra.mxu2 %v2167_v39 }
  0x4a   :  { %1719 = vmatmul.msk.bf16.gmra.mxu1 %vm246_vm0, %v2287_v11  ;;  %v1983_v11 = vor.u32 %v2253_v9, %v1982_v8  ;;  %1422 = vmatpush.bf16.msra.mxu3 %v2171_v41  ;;  %v2099_v9 = vor.u32 %v2280_v6, %v2096_v7  ;;  %v2088_v41 = vld [vmem:[#allocation2 + $0x1d8] sm:$0xf0] }
  0x4b   :  { %v2091_v43 = vor.u32 %v2278_v40, %v2088_v41  ;;  %v2152_v40 = vld [vmem:[%s3215_s5 + $0x18] sm:$0xf0] }
  0x4c   :  { %954 = vmatpush.bf16.msrb.mxu0 %v1983_v11  ;;  %v2195_v11 = vld [vmem:[%s3210_s0 + $0x34] sm:$0xf0]  ;;  %1193 = vmatpush.bf16.msra.mxu1 %v2099_v9  ;;  %v2008_v41 = vld [vmem:[#allocation2 + $0x138] sm:$0xf0] }
  0x50   :  { %1143 = vmatpush.bf16.msra.mxu0 %v2043_v44  ;;  %v1766_v44 = vld [vmem:[%s3210_s0 + $0x48] sm:$0xf]  ;;  %1194 = vmatpush.bf16.msra.mxu1 %v2091_v43 }
  0x54   :  { %1144 = vmatpush.bf16.msra.mxu0 %v2035_v4 }
  0x57   :  { %1712 = vmatmul.msk.bf16.gmra.mxu0 %vm246_vm0, %v2288_v30 }
  0x58   :  { %872 = vmatmul.bf16.gmra.mxu2 %v2533_v31 }
  0x59   :  { %921 = vmatmul.bf16.gmra.mxu3 %v2535_v32 }
  0x5a   :  { %1720 = vmatmul.msk.bf16.gmra.mxu1 %vm246_vm0, %v2288_v30  ;;  %v2602_v30 = vor.u32 %v2214_v26, %v1822_v25  ;;  %v2159_v25 = vor.u32 %v2313_v23, %v2158_v22  ;;  %v2160_v26 = vld [vmem:[%s3215_s5 + $0x28] sm:$0xf0] }
  0x5c   :  { %1374 = vmatpush.bf16.msra.mxu2 %v2159_v25  ;;  %v1784_v25 = vld [vmem:[%s3210_s0 + $0x78] sm:$0xf0] }
  0x67   :  { %1713 = vmatmul.msk.bf16.gmra.mxu0 %vm246_vm0, %v2289_v51 }
  0x68   :  { %877 = vmatmul.bf16.gmra.mxu2 %v2556_v52 }
  0x69   :  { %926 = vmatmul.bf16.gmra.mxu3 %v2558_v53 }
  0x6a   :  { %1721 = vmatmul.msk.bf16.gmra.mxu1 %vm246_vm0, %v2289_v51  ;;  %v2218_v51 = vld [vmem:[%s3210_s0 + $0xec] sm:$0xf0] }
  0x6b   :  { %v2648_v62 = vor.u32 %v2218_v51, %v1838_v48  ;;  %v2706_v48 = vor.u32 %v2199_v45, %v1766_v44 }
  0x77   :  { %1714 = vmatmul.msk.bf16.gmra.mxu0 %vm246_vm0, %v2290_v10 }
  0x78   :  { %882 = vmatmul.bf16.gmra.mxu2 %v2579_v14 }
  0x79   :  { %931 = vmatmul.bf16.gmra.mxu3 %v2581_v15 }
  0x7a   :  { %1722 = vmatmul.msk.bf16.gmra.mxu1 %vm246_vm0, %v2290_v10  ;;  %v1750_v10 = vld [vmem:[%s3210_s0 + $0x28] sm:$0xf] }
  0x7b   :  { %v2668_v16 = vor.u32 %v2195_v11, %v1750_v10  ;;  %v2276_v10 = vld [vmem:[#allocation2 + $0x1c4] sm:$0xf]  ;;  %v2080_v11 = vld [vmem:[#allocation2 + $0x1c8] sm:$0xf0] }
  0x7c   :  { %v2083_v18 = vor.u32 %v2276_v10, %v2080_v11  ;;  %v2205_v10 = vld [vmem:[%s3210_s0 + $0x8c] sm:$0xf]  ;;  %v1800_v11 = vld [vmem:[%s3210_s0 + $0x98] sm:$0xf0] }
  0x7e   :  { %1195 = vmatpush.bf16.msra.mxu1 %v2083_v18 }
  0x87   :  { %1715 = vmatmul.msk.bf16.gmra.mxu0 %vm246_vm0, %v2291_v29 }
  0x88   :  { %887 = vmatmul.bf16.gmra.mxu2 %v2602_v30 }
  0x89   :  { %936 = vmatmul.bf16.gmra.mxu3 %v2604_v33 }
  0x8a   :  { %1723 = vmatmul.msk.bf16.gmra.mxu1 %vm246_vm0, %v2291_v29 }
  0x94   :  { %v280_v61 = vpop.f32.mrf.mxu0 }
  0x96   :  { %v2654_v1 = vpop.f32.mrf.mxu1 }
  0x97   :  { %955 = vmatmul.bf16.vlgmr.msrb.gmra.mxu0 %v2640_v56 }
  0x98   :  { %892 = vmatmul.bf16.gmra.mxu2 %v2648_v62 }
  0x99   :  { %941 = vmatmul.bf16.gmra.mxu3 %v2650_v63 }
  0x9a   :  { %1004 = vmatmul.bf16.vlgmr.msrb.gmra.mxu1 %v2652_v0 }
  0x9c   :  { %v282_v5 = vpop.f32.mrf.mxu0 }
  0x9e   :  { %v2660_v8 = vpop.f32.mrf.mxu1 }
  0xa4   :  { %v285_v19 = vpop.f32.mrf.mxu0 }
  0xa7   :  { %v2678_v21 = vpop.f32.mrf.mxu1  ;;  %960 = vmatmul.bf16.gmra.mxu0 %v2668_v16 }
  0xa8   :  { %1053 = vmatmul.bf16.vlgmr.msrb.gmra.mxu2 %v2464_v34  ;;  %v2163_v34 = vor.u32 %v2312_v24, %v2160_v26  ;;  %v2201_v24 = vld [vmem:[%s3210_s0 + $0x6c] sm:$0xf] }
  0xa9   :  { %1102 = vmatmul.bf16.vlgmr.msrb.gmra.mxu3 %v2466_v35  ;;  %v2262_v35 = vld [vmem:[#allocation2 + $0x154] sm:$0xf] }
  0xaa   :  { %1009 = vmatmul.bf16.gmra.mxu1 %v2676_v20  ;;  %v2027_v36 = vor.u32 %v2262_v35, %v2024_v27  ;;  %1423 = vmatpush.bf16.msra.mxu3 %v2163_v34  ;;  %v2744_v27 = vor.u32 %v2201_v24, %v1784_v25  ;;  %v2256_v24 = vld [vmem:[#allocation2 + $0x124] sm:$0xf]  ;;  %v2000_v25 = vld [vmem:[#allocation2 + $0x128] sm:$0xf0] }
  0xab   :  { %v858_v28 = vpop.f32.mrf.mxu2 }
  0xac   :  { %v907_v29 = vpop.f32.mrf.mxu3  ;;  %v859_v37 = vadd.f32 %v858_v28, %v280_v61  ;;  %v287_v38 = vpop.f32.mrf.mxu0  ;;  %1145 = vmatpush.bf16.msra.mxu0 %v2027_v36  ;;  %v2260_v61 = vld [vmem:[#allocation2 + $0x144] sm:$0xf]  ;;  %v2311_v36 = vld [vmem:[%s3215_s5 + $0x14] sm:$0xf0] }
  0xae   :  { %v2696_v39 = vadd.f32 %v907_v29, %v859_v37  ;;  %v2150_v29 = vld [vmem:[%s3215_s5 + $0x10] sm:$0xf]  ;;  %v2310_v37 = vld [vmem:[%s3215_s5 + $0x14] sm:$0xf] }
  0xaf   :  { %v2698_v42 = vpop.f32.mrf.mxu1 }
  0xb3   :  { %v860_v46 = vpop.f32.mrf.mxu2 }
  0xb4   :  { %v909_v47 = vpop.f32.mrf.mxu3  ;;  %v861_v51 = vadd.f32 %v860_v46, %v282_v5  ;;  %v290_v54 = vpop.f32.mrf.mxu0  ;;  %v2019_v5 = vor.u32 %v2260_v61, %v2016_v2 }
  0xb6   :  { %v2714_v55 = vadd.f32 %v909_v47, %v861_v51  ;;  %1146 = vmatpush.bf16.msra.mxu0 %v2019_v5  ;;  %v2072_v51 = vld [vmem:[#allocation2 + $0x1b8] sm:$0xf0] }
  0xb7   :  { %v2718_v60 = vpop.f32.mrf.mxu1  ;;  %965 = vmatmul.bf16.gmra.mxu0 %v2706_v48  ;;  %v2075_v2 = vor.u32 %v2274_v50, %v2072_v51 }
  0xb8   :  { %1058 = vmatmul.bf16.gmra.mxu2 %v2487_v57  ;;  %v1782_v57 = vld [vmem:[%s3210_s0 + $0x68] sm:$0xf] }
  0xb9   :  { %1107 = vmatmul.bf16.gmra.mxu3 %v2489_v58  ;;  %v2203_v58 = vld [vmem:[%s3210_s0 + $0x74] sm:$0xf0]  ;;  %1196 = vmatpush.bf16.msra.mxu1 %v2075_v2 }
  0xba   :  { %1014 = vmatmul.bf16.gmra.mxu1 %v2716_v59  ;;  %v2734_v23 = vor.u32 %v2203_v58, %v1782_v57 }
  0xbb   :  { %v863_v3 = vpop.f32.mrf.mxu2 }
  0xbc   :  { %v912_v4 = vpop.f32.mrf.mxu3  ;;  %v864_v6 = vadd.f32 %v863_v3, %v285_v19  ;;  %v292_v7 = vpop.f32.mrf.mxu0  ;;  %v1798_v3 = vld [vmem:[%s3210_s0 + $0x88] sm:$0xf] }
  0xbe   :  { %v2724_v9 = vadd.f32 %v912_v4, %v864_v6  ;;  %v2207_v4 = vld [vmem:[%s3210_s0 + $0x94] sm:$0xf0] }
  0xbf   :  { %v2726_v17 = vpop.f32.mrf.mxu1  ;;  %v2774_v6 = vor.u32 %v2207_v4, %v1798_v3 }
  0xc3   :  { %v865_v22 = vpop.f32.mrf.mxu2 }
  0xc4   :  { %v914_v19 = vpop.f32.mrf.mxu3  ;;  %v866_v26 = vadd.f32 %v865_v22, %v287_v38  ;;  %v295_v34 = vpop.f32.mrf.mxu0  ;;  %v2151_v38 = vor.u32 %v2311_v36, %v2150_v29  ;;  %v2784_v22 = vor.u32 %v2205_v10, %v1800_v11  ;;  %v2144_v11 = vld [vmem:[%s3215_s5 + $0x8] sm:$0xf0] }
  0xc6   :  { %v2742_v35 = vadd.f32 %v914_v19, %v866_v26  ;;  %1375 = vmatpush.bf16.msra.mxu2 %v2151_v38 }
  0xc7   :  { %v2746_v28 = vpop.f32.mrf.mxu1  ;;  %970 = vmatmul.bf16.gmra.mxu0 %v2734_v23 }
  0xc8   :  { %1063 = vmatmul.bf16.gmra.mxu2 %v2510_v12  ;;  %v2155_v12 = vor.u32 %v2310_v37, %v2152_v40  ;;  %v2272_v40 = vld [vmem:[#allocation2 + $0x1a4] sm:$0xf] }
  0xc9   :  { %1112 = vmatmul.bf16.gmra.mxu3 %v2512_v13  ;;  %v2258_v13 = vld [vmem:[#allocation2 + $0x134] sm:$0xf] }
  0xca   :  { %1019 = vmatmul.bf16.gmra.mxu1 %v2744_v27  ;;  %v2011_v45 = vor.u32 %v2258_v13, %v2008_v41  ;;  %1424 = vmatpush.bf16.msra.mxu3 %v2155_v12  ;;  %v2064_v12 = vld [vmem:[#allocation2 + $0x1a8] sm:$0xf0] }
  0xcb   :  { %v868_v43 = vpop.f32.mrf.mxu2  ;;  %v2067_v41 = vor.u32 %v2272_v40, %v2064_v12  ;;  %v2270_v40 = vld [vmem:[#allocation2 + $0x194] sm:$0xf]  ;;  %v2056_v12 = vld [vmem:[#allocation2 + $0x198] sm:$0xf0] }
  0xcc   :  { %v917_v44 = vpop.f32.mrf.mxu3  ;;  %v869_v46 = vadd.f32 %v868_v43, %v290_v54  ;;  %v297_v47 = vpop.f32.mrf.mxu0  ;;  %1147 = vmatpush.bf16.msra.mxu0 %v2011_v45  ;;  %v2209_v45 = vld [vmem:[%s3210_s0 + $0xac] sm:$0xf] }
  0xcd   :  { %1197 = vmatpush.bf16.msra.mxu1 %v2067_v41 }
  0xce   :  { %v2764_v49 = vadd.f32 %v917_v44, %v869_v46  ;;  %v1816_v46 = vld [vmem:[%s3210_s0 + $0xb8] sm:$0xf0] }
  0xcf   :  { %v2766_v61 = vpop.f32.mrf.mxu1  ;;  %v2812_v3 = vor.u32 %v2209_v45, %v1816_v46 }
  0xd3   :  { %v870_v54 = vpop.f32.mrf.mxu2 }
  0xd4   :  { %v919_v5 = vpop.f32.mrf.mxu3  ;;  %v871_v18 = vadd.f32 %v870_v54, %v292_v7  ;;  %v300_v57 = vpop.f32.mrf.mxu0  ;;  %v2003_v7 = vor.u32 %v2256_v24, %v2000_v25  ;;  %v2142_v54 = vld [vmem:[%s3215_s5] sm:$0xf] }
  0xd6   :  { %v2782_v58 = vadd.f32 %v919_v5, %v871_v18  ;;  %1148 = vmatpush.bf16.msra.mxu0 %v2003_v7  ;;  %v2308_v5 = vld [vmem:[%s3215_s5 + $0x4] sm:$0xf]  ;;  %v1992_v18 = vld [vmem:[#allocation2 + $0x118] sm:$0xf0] }
  0xd7   :  { %v2786_v19 = vpop.f32.mrf.mxu1  ;;  %975 = vmatmul.bf16.gmra.mxu0 %v2774_v6 }
  0xd8   :  { %1068 = vmatmul.bf16.gmra.mxu2 %v2533_v31  ;;  %v1814_v31 = vld [vmem:[%s3210_s0 + $0xa8] sm:$0xf] }
  0xd9   :  { %1117 = vmatmul.bf16.gmra.mxu3 %v2535_v32  ;;  %v2211_v32 = vld [vmem:[%s3210_s0 + $0xb4] sm:$0xf0] }
  0xda   :  { %1024 = vmatmul.bf16.gmra.mxu1 %v2784_v22  ;;  %v2802_v44 = vor.u32 %v2211_v32, %v1814_v31  ;;  %v2059_v31 = vor.u32 %v2270_v40, %v2056_v12  ;;  %v1830_v32 = vld [vmem:[%s3210_s0 + $0xc8] sm:$0xf] }
  0xdb   :  { %v873_v26 = vpop.f32.mrf.mxu2 }
  0xdc   :  { %v922_v29 = vpop.f32.mrf.mxu3  ;;  %v874_v36 = vadd.f32 %v873_v26, %v295_v34  ;;  %v302_v37 = vpop.f32.mrf.mxu0  ;;  %1198 = vmatpush.bf16.msra.mxu1 %v2059_v31 }
  0xde   :  { %v2792_v38 = vadd.f32 %v922_v29, %v874_v36 }
  0xdf   :  { %v2794_v13 = vpop.f32.mrf.mxu1 }
  0xe3   :  { %v875_v43 = vpop.f32.mrf.mxu2 }
  0xe4   :  { %v924_v34 = vpop.f32.mrf.mxu3  ;;  %v876_v50 = vadd.f32 %v875_v43, %v297_v47  ;;  %v305_v51 = vpop.f32.mrf.mxu0  ;;  %v2309_v47 = vld [vmem:[%s3215_s5 + $0x4] sm:$0xf0]  ;;  %v2215_v43 = vld [vmem:[%s3210_s0 + $0xd4] sm:$0xf0] }
  0xe5   :  { %v2143_v10 = vor.u32 %v2309_v47, %v2142_v54  ;;  %v2213_v54 = vld [vmem:[%s3210_s0 + $0xcc] sm:$0xf]  ;;  %v1832_v47 = vld [vmem:[%s3210_s0 + $0xd8] sm:$0xf0] }
  0xe6   :  { %v2810_v2 = vadd.f32 %v924_v34, %v876_v50  ;;  %v1984_v34 = vld [vmem:[#allocation2 + $0x108] sm:$0xf0]  ;;  %v2842_v50 = vor.u32 %v2215_v43, %v1830_v32  ;;  %v1846_v43 = vld [vmem:[%s3210_s0 + $0xe8] sm:$0xf] }
  0xe7   :  { %v2814_v4 = vpop.f32.mrf.mxu1  ;;  %980 = vmatmul.bf16.gmra.mxu0 %v2802_v44  ;;  %1376 = vmatpush.bf16.msra.mxu2 %v2143_v10 }
  0xe8   :  { %1073 = vmatmul.bf16.gmra.mxu2 %v2556_v52  ;;  %v2147_v52 = vor.u32 %v2308_v5, %v2144_v11 }
  0xe9   :  { %1122 = vmatmul.bf16.gmra.mxu3 %v2558_v53  ;;  %v2254_v53 = vld [vmem:[#allocation2 + $0x114] sm:$0xf] }
  0xea   :  { %1029 = vmatmul.bf16.gmra.mxu1 %v2812_v3  ;;  %v1995_v26 = vor.u32 %v2254_v53, %v1992_v18  ;;  %1425 = vmatpush.bf16.msra.mxu3 %v2147_v52  ;;  %v2268_v52 = vld [vmem:[#allocation2 + $0x184] sm:$0xf]  ;;  %v2048_v53 = vld [vmem:[#allocation2 + $0x188] sm:$0xf0] }
  0xeb   :  { %v878_v24 = vpop.f32.mrf.mxu2  ;;  %v2051_v18 = vor.u32 %v2268_v52, %v2048_v53 }
  0xec   :  { %v927_v25 = vpop.f32.mrf.mxu3  ;;  %v879_v29 = vadd.f32 %v878_v24, %v300_v57  ;;  %v307_v7 = vpop.f32.mrf.mxu0  ;;  %1149 = vmatpush.bf16.msra.mxu0 %v1995_v26  ;;  %v2252_v57 = vld [vmem:[#allocation2 + $0x104] sm:$0xf] }
  0xed   :  { %v1987_v5 = vor.u32 %v2252_v57, %v1984_v34  ;;  %1199 = vmatpush.bf16.msra.mxu1 %v2051_v18 }
  0xee   :  { %v2832_v36 = vadd.f32 %v927_v25, %v879_v29  ;;  %v2852_v25 = vor.u32 %v2213_v54, %v1832_v47 }
  0xef   :  { %v2834_v41 = vpop.f32.mrf.mxu1 }
  0xf0   :  { %1150 = vmatpush.bf16.msra.mxu0 %v1987_v5 }
  0xf3   :  { %v880_v45 = vpop.f32.mrf.mxu2 }
  0xf4   :  { %v929_v46 = vpop.f32.mrf.mxu3  ;;  %v881_v10 = vadd.f32 %v880_v45, %v302_v37  ;;  %v310_v11 = vpop.f32.mrf.mxu0  ;;  %v1848_v45 = vld [vmem:[%s3210_s0 + $0xf8] sm:$0xf0] }
  0xf6   :  { %v2850_v24 = vadd.f32 %v929_v46, %v881_v10 }
  0xf7   :  { %v2854_v26 = vpop.f32.mrf.mxu1  ;;  %985 = vmatmul.bf16.gmra.mxu0 %v2842_v50 }
  0xf8   :  { %1078 = vmatmul.bf16.gmra.mxu2 %v2579_v14  ;;  %v2219_v14 = vld [vmem:[%s3210_s0 + $0xf4] sm:$0xf0] }
  0xf9   :  { %1127 = vmatmul.bf16.gmra.mxu3 %v2581_v15  ;;  %v2870_v34 = vor.u32 %v2219_v14, %v1846_v43 }
  0xfa   :  { %1034 = vmatmul.bf16.gmra.mxu1 %v2852_v25 }
  0xfb   :  { %v883_v37 = vpop.f32.mrf.mxu2 }
  0xfc   :  { %v932_v29 = vpop.f32.mrf.mxu3  ;;  %v884_v40 = vadd.f32 %v883_v37, %v305_v51  ;;  %v312_v12 = vpop.f32.mrf.mxu0  ;;  %v2217_v51 = vld [vmem:[%s3210_s0 + $0xec] sm:$0xf] }
  0xfd   :  { %v2880_v5 = vor.u32 %v2217_v51, %v1848_v45 }
  0xfe   :  { %v2860_v31 = vadd.f32 %v932_v29, %v884_v40 }
  0xff   :  { %v2862_v32 = vpop.f32.mrf.mxu1 }
 0x103   :  { %v885_v57 = vpop.f32.mrf.mxu2 }
 0x104   :  { %v934_v15 = vpop.f32.mrf.mxu3  ;;  %v886_v46 = vadd.f32 %v885_v57, %v307_v7  ;;  %v315_v54 = vpop.f32.mrf.mxu0 }
 0x106   :  { %v2878_v47 = vadd.f32 %v934_v15, %v886_v46 }
 0x107   :  { %v2882_v10 = vpop.f32.mrf.mxu1  ;;  %990 = vmatmul.bf16.gmra.mxu0 %v2870_v34 }
 0x108   :  { %1083 = vmatmul.bf16.gmra.mxu2 %v2602_v30 }
 0x109   :  { %1132 = vmatmul.bf16.gmra.mxu3 %v2604_v33 }
 0x10a   :  { %1039 = vmatmul.bf16.gmra.mxu1 %v2880_v5 }
 0x10b   :  { %v888_v52 = vpop.f32.mrf.mxu2 }
 0x10c   :  { %v937_v53 = vpop.f32.mrf.mxu3  ;;  %v889_v18 = vadd.f32 %v888_v52, %v310_v11  ;;  %v317_v37 = vpop.f32.mrf.mxu0 }
 0x10e   :  { %v2888_v7 = vadd.f32 %v937_v53, %v889_v18 }
 0x10f   :  { %v2890_v29 = vpop.f32.mrf.mxu1 }
 0x113   :  { %v890_v40 = vpop.f32.mrf.mxu2 }
 0x114   :  { %v939_v43 = vpop.f32.mrf.mxu3  ;;  %v891_v14 = vadd.f32 %v890_v40, %v312_v12  ;;  %v956_v57 = vpop.f32.mrf.mxu0 }
 0x115   :  { %v957_v15 = vadd.f32 %v956_v57, %v2696_v39 }
 0x116   :  { %v2893_v51 = vadd.f32 %v939_v43, %v891_v14 }
 0x117   :  { %v1005_v30 = vpop.f32.mrf.mxu1  ;;  %1151 = vmatmul.bf16.vlgmr.msra.gmra.mxu0 %v2640_v56 }
 0x118   :  { %v2896_v33 = vadd.f32 %v1005_v30, %v957_v15  ;;  %1088 = vmatmul.bf16.gmra.mxu2 %v2648_v62  ;;  %v2300_v62 = vld [vmem:[%s3212_s2] sm:$0xff] }
 0x119   :  { %1137 = vmatmul.bf16.gmra.mxu3 %v2650_v63 }
 0x11a   :  { %1200 = vmatmul.bf16.vlgmr.msra.gmra.mxu1 %v2652_v0 }
 0x11b   :  { %v893_v11 = vpop.f32.mrf.mxu2 }
 0x11c   :  { %v942_v45 = vpop.f32.mrf.mxu3  ;;  %v894_v46 = vadd.f32 %v893_v11, %v315_v54  ;;  %v958_v12 = vpop.f32.mrf.mxu0 }
 0x11d   :  { %v959_v52 = vadd.f32 %v958_v12, %v2714_v55 }
 0x11e   :  { %v2902_v39 = vadd.f32 %v942_v45, %v894_v46 }
 0x11f   :  { %v1007_v53 = vpop.f32.mrf.mxu1 }
 0x120   :  { %v2904_v18 = vadd.f32 %v1007_v53, %v959_v52 }
 0x123   :  { %v895_v56 = vpop.f32.mrf.mxu2 }
 0x124   :  { %v944_v40 = vpop.f32.mrf.mxu3  ;;  %v896_v43 = vadd.f32 %v895_v56, %v317_v37  ;;  %v961_v14 = vpop.f32.mrf.mxu0 }
 0x125   :  { %v962_v63 = vadd.f32 %v961_v14, %v2724_v9 }
 0x126   :  { %v2910_v0 = vadd.f32 %v944_v40, %v896_v43 }
 0x127   :  { %v1010_v54 = vpop.f32.mrf.mxu1  ;;  %1156 = vmatmul.bf16.gmra.mxu0 %v2668_v16 }
 0x128   :  { %v2913_v55 = vadd.f32 %v1010_v54, %v962_v63  ;;  %2172 = vmatmul.msk.bf16.vlgmr.msra.gmra.mxu2 %vm246_vm0, %v2300_v62 }
 0x129   :  { %2180 = vmatmul.msk.bf16.vlgmr.msra.gmra.mxu3 %vm246_vm0, %v2300_v62 }
 0x12a   :  { %1205 = vmatmul.bf16.gmra.mxu1 %v2676_v20  ;;  %v2301_v20 = vld [vmem:[%s3212_s2 + $0x8] sm:$0xff] }
 0x12b   :  { %v1054_v37 = vpop.f32.mrf.mxu2 }
 0x12c   :  { %v1103_v57 = vpop.f32.mrf.mxu3  ;;  %v1055_v15 = vadd.f32 %v1054_v37, %v2654_v1  ;;  %v963_v30 = vpop.f32.mrf.mxu0 }
 0x12d   :  { %v964_v9 = vadd.f32 %v963_v30, %v2742_v35 }
 0x12e   :  { %v2920_v11 = vadd.f32 %v1103_v57, %v1055_v15 }
 0x12f   :  { %v1012_v45 = vpop.f32.mrf.mxu1 }
 0x130   :  { %v2922_v46 = vadd.f32 %v1012_v45, %v964_v9 }
 0x133   :  { %v1056_v16 = vpop.f32.mrf.mxu2 }
 0x134   :  { %v1105_v12 = vpop.f32.mrf.mxu3  ;;  %v1057_v52 = vadd.f32 %v1056_v16, %v2660_v8  ;;  %v966_v53 = vpop.f32.mrf.mxu0 }
 0x135   :  { %v967_v56 = vadd.f32 %v966_v53, %v2764_v49 }
 0x136   :  { %v2929_v1 = vadd.f32 %v1105_v12, %v1057_v52 }
 0x137   :  { %v1015_v40 = vpop.f32.mrf.mxu1  ;;  %1161 = vmatmul.bf16.gmra.mxu0 %v2706_v48 }
 0x138   :  { %v2932_v35 = vadd.f32 %v1015_v40, %v967_v56  ;;  %2173 = vmatmul.msk.bf16.gmra.mxu2 %vm246_vm0, %v2301_v20 }
 0x139   :  { %2181 = vmatmul.msk.bf16.gmra.mxu3 %vm246_vm0, %v2301_v20 }
 0x13a   :  { %1210 = vmatmul.bf16.gmra.mxu1 %v2716_v59  ;;  %v2302_v59 = vld [vmem:[%s3212_s2 + $0x10] sm:$0xff] }
 0x13b   :  { %v1059_v8 = vpop.f32.mrf.mxu2 }
 0x13c   :  { %v1108_v43 = vpop.f32.mrf.mxu3  ;;  %v1060_v14 = vadd.f32 %v1059_v8, %v2678_v21  ;;  %v968_v62 = vpop.f32.mrf.mxu0 }
 0x13d   :  { %v969_v49 = vadd.f32 %v968_v62, %v2782_v58 }
 0x13e   :  { %v2939_v63 = vadd.f32 %v1108_v43, %v1060_v14 }
 0x13f   :  { %v1017_v54 = vpop.f32.mrf.mxu1 }
 0x140   :  { %v2941_v37 = vadd.f32 %v1017_v54, %v969_v49 }
 0x143   :  { %v1061_v48 = vpop.f32.mrf.mxu2 }
 0x144   :  { %v1110_v57 = vpop.f32.mrf.mxu3  ;;  %v1062_v15 = vadd.f32 %v1061_v48, %v2698_v42  ;;  %v971_v30 = vpop.f32.mrf.mxu0 }
 0x145   :  { %v972_v9 = vadd.f32 %v971_v30, %v2792_v38 }
 0x146   :  { %v2948_v21 = vadd.f32 %v1110_v57, %v1062_v15 }
 0x147   :  { %v1020_v45 = vpop.f32.mrf.mxu1  ;;  %1166 = vmatmul.bf16.gmra.mxu0 %v2734_v23 }
 0x148   :  { %v2951_v58 = vadd.f32 %v1020_v45, %v972_v9  ;;  %2174 = vmatmul.msk.bf16.gmra.mxu2 %vm246_vm0, %v2302_v59 }
 0x149   :  { %2182 = vmatmul.msk.bf16.gmra.mxu3 %vm246_vm0, %v2302_v59 }
 0x14a   :  { %1215 = vmatmul.bf16.gmra.mxu1 %v2744_v27  ;;  %v2303_v27 = vld [vmem:[%s3212_s2 + $0x18] sm:$0xff] }
 0x14b   :  { %v1064_v42 = vpop.f32.mrf.mxu2 }
 0x14c   :  { %v1113_v16 = vpop.f32.mrf.mxu3  ;;  %v1065_v12 = vadd.f32 %v1064_v42, %v2718_v60  ;;  %v973_v52 = vpop.f32.mrf.mxu0 }
 0x14d   :  { %v974_v38 = vadd.f32 %v973_v52, %v2810_v2 }
 0x14e   :  { %v2958_v53 = vadd.f32 %v1113_v16, %v1065_v12 }
 0x14f   :  { %v1022_v20 = vpop.f32.mrf.mxu1 }
 0x150   :  { %v2960_v56 = vadd.f32 %v1022_v20, %v974_v38 }
 0x153   :  { %v1066_v23 = vpop.f32.mrf.mxu2 }
 0x154   :  { %v1115_v40 = vpop.f32.mrf.mxu3  ;;  %v1067_v8 = vadd.f32 %v1066_v23, %v2726_v17  ;;  %v976_v43 = vpop.f32.mrf.mxu0 }
 0x155   :  { %v977_v14 = vadd.f32 %v976_v43, %v2832_v36 }
 0x156   :  { %v2967_v60 = vadd.f32 %v1115_v40, %v1067_v8 }
 0x157   :  { %v1025_v62 = vpop.f32.mrf.mxu1  ;;  %1171 = vmatmul.bf16.gmra.mxu0 %v2774_v6 }
 0x158   :  { %v2970_v2 = vadd.f32 %v1025_v62, %v977_v14  ;;  %2175 = vmatmul.msk.bf16.gmra.mxu2 %vm246_vm0, %v2303_v27 }
 0x159   :  { %2183 = vmatmul.msk.bf16.gmra.mxu3 %vm246_vm0, %v2303_v27 }
 0x15a   :  { %1220 = vmatmul.bf16.gmra.mxu1 %v2784_v22  ;;  %v2304_v22 = vld [vmem:[%s3212_s2 + $0x20] sm:$0xff] }
 0x15b   :  { %v1069_v17 = vpop.f32.mrf.mxu2 }
 0x15c   :  { %v1118_v49 = vpop.f32.mrf.mxu3  ;;  %v1070_v54 = vadd.f32 %v1069_v17, %v2746_v28  ;;  %v978_v48 = vpop.f32.mrf.mxu0 }
 0x15d   :  { %v979_v36 = vadd.f32 %v978_v48, %v2850_v24 }
 0x15e   :  { %v2977_v57 = vadd.f32 %v1118_v49, %v1070_v54 }
 0x15f   :  { %v1027_v15 = vpop.f32.mrf.mxu1 }
 0x160   :  { %v2979_v30 = vadd.f32 %v1027_v15, %v979_v36 }
 0x163   :  { %v1071_v6 = vpop.f32.mrf.mxu2 }
 0x164   :  { %v1120_v59 = vpop.f32.mrf.mxu3  ;;  %v1072_v9 = vadd.f32 %v1071_v6, %v2766_v61  ;;  %v981_v45 = vpop.f32.mrf.mxu0 }
 0x165   :  { %v982_v42 = vadd.f32 %v981_v45, %v2860_v31 }
 0x166   :  { %v2986_v28 = vadd.f32 %v1120_v59, %v1072_v9 }
 0x167   :  { %v1030_v16 = vpop.f32.mrf.mxu1  ;;  %1176 = vmatmul.bf16.gmra.mxu0 %v2802_v44 }
 0x168   :  { %v2989_v24 = vadd.f32 %v1030_v16, %v982_v42  ;;  %2176 = vmatmul.msk.bf16.gmra.mxu2 %vm246_vm0, %v2304_v22 }
 0x169   :  { %2184 = vmatmul.msk.bf16.gmra.mxu3 %vm246_vm0, %v2304_v22 }
 0x16a   :  { %1225 = vmatmul.bf16.gmra.mxu1 %v2812_v3  ;;  %v2305_v3 = vld [vmem:[%s3212_s2 + $0x28] sm:$0xff] }
 0x16b   :  { %v1074_v61 = vpop.f32.mrf.mxu2 }
 0x16c   :  { %v1123_v12 = vpop.f32.mrf.mxu3  ;;  %v1075_v52 = vadd.f32 %v1074_v61, %v2786_v19  ;;  %v983_v38 = vpop.f32.mrf.mxu0 }
 0x16d   :  { %v984_v31 = vadd.f32 %v983_v38, %v2878_v47 }
 0x16e   :  { %v2996_v20 = vadd.f32 %v1123_v12, %v1075_v52 }
 0x16f   :  { %v1032_v23 = vpop.f32.mrf.mxu1 }
 0x170   :  { %v2998_v40 = vadd.f32 %v1032_v23, %v984_v31 }
 0x173   :  { %v1076_v44 = vpop.f32.mrf.mxu2 }
 0x174   :  { %v1125_v8 = vpop.f32.mrf.mxu3  ;;  %v1077_v43 = vadd.f32 %v1076_v44, %v2794_v13  ;;  %v986_v27 = vpop.f32.mrf.mxu0 }
 0x175   :  { %v987_v14 = vadd.f32 %v986_v27, %v2888_v7 }
 0x176   :  { %v3005_v19 = vadd.f32 %v1125_v8, %v1077_v43 }
 0x177   :  { %v1035_v62 = vpop.f32.mrf.mxu1  ;;  %1181 = vmatmul.bf16.gmra.mxu0 %v2842_v50 }
 0x178   :  { %v3008_v47 = vadd.f32 %v1035_v62, %v987_v14  ;;  %2177 = vmatmul.msk.bf16.gmra.mxu2 %vm246_vm0, %v2305_v3 }
 0x179   :  { %2185 = vmatmul.msk.bf16.gmra.mxu3 %vm246_vm0, %v2305_v3 }
 0x17a   :  { %1230 = vmatmul.bf16.gmra.mxu1 %v2852_v25  ;;  %v2306_v25 = vld [vmem:[%s3212_s2 + $0x30] sm:$0xff] }
 0x17b   :  { %v1079_v13 = vpop.f32.mrf.mxu2 }
 0x17c   :  { %v1128_v17 = vpop.f32.mrf.mxu3  ;;  %v1080_v49 = vadd.f32 %v1079_v13, %v2814_v4  ;;  %v988_v54 = vpop.f32.mrf.mxu0 }
 0x17d   :  { %v989_v7 = vadd.f32 %v988_v54, %v2893_v51 }
 0x17e   :  { %v3015_v48 = vadd.f32 %v1128_v17, %v1080_v49 }
 0x17f   :  { %v1037_v36 = vpop.f32.mrf.mxu1 }
 0x180   :  { %v3017_v15 = vadd.f32 %v1037_v36, %v989_v7 }
 0x183   :  { %v1081_v50 = vpop.f32.mrf.mxu2 }
 0x184   :  { %v1130_v6 = vpop.f32.mrf.mxu3  ;;  %v1082_v59 = vadd.f32 %v1081_v50, %v2834_v41  ;;  %v991_v9 = vpop.f32.mrf.mxu0  ;;  %v1499_v50 = vld [vmem:[%s3216_s6] sm:$0x3] }
 0x185   :  { %v992_v45 = vadd.f32 %v991_v9, %v2902_v39  ;;  %v3061_v9 = vperm.slane %v1499_v50, 1 }
 0x186   :  { %v3024_v4 = vadd.f32 %v1130_v6, %v1082_v59  ;;  %v3059_v59 = vperm.slane %v1499_v50, 0 }
 0x187   :  { %v1040_v22 = vpop.f32.mrf.mxu1  ;;  %1186 = vmatmul.bf16.gmra.mxu0 %v2870_v34 }
 0x188   :  { %v3027_v51 = vadd.f32 %v1040_v22, %v992_v45  ;;  %2178 = vmatmul.msk.bf16.gmra.mxu2 %vm246_vm0, %v2306_v25 }
 0x189   :  { %2186 = vmatmul.msk.bf16.gmra.mxu3 %vm246_vm0, %v2306_v25 }
 0x18a   :  { %1235 = vmatmul.bf16.gmra.mxu1 %v2880_v5  ;;  %v2307_v5 = vld [vmem:[%s3212_s2 + $0x38] sm:$0xff] }
 0x18b   :  { %v1084_v41 = vpop.f32.mrf.mxu2 }
 0x18c   :  { %v1133_v42 = vpop.f32.mrf.mxu3  ;;  %v1085_v16 = vadd.f32 %v1084_v41, %v2854_v26  ;;  %v993_v61 = vpop.f32.mrf.mxu0 }
 0x18d   :  { %v994_v39 = vadd.f32 %v993_v61, %v2910_v0 }
 0x18e   :  { %v3034_v12 = vadd.f32 %v1133_v42, %v1085_v16 }
 0x18f   :  { %v1042_v52 = vpop.f32.mrf.mxu1 }
 0x190   :  { %v3036_v38 = vadd.f32 %v1042_v52, %v994_v39 }
 0x193   :  { %v1086_v34 = vpop.f32.mrf.mxu2 }
 0x194   :  { %v1135_v31 = vpop.f32.mrf.mxu3  ;;  %v1087_v23 = vadd.f32 %v1086_v34, %v2862_v32  ;;  %v1152_v44 = vpop.f32.mrf.mxu0 }
 0x195   :  { %v1153_v54 = vadd.f32 %v1152_v44, %v2920_v11 }
 0x196   :  { %v3042_v8 = vadd.f32 %v1135_v31, %v1087_v23 }
 0x197   :  { %v1201_v26 = vpop.f32.mrf.mxu1 }
 0x198   :  { %2179 = vmatmul.msk.bf16.gmra.mxu2 %vm246_vm0, %v2307_v5  ;;  %v1202_v6 = vadd.f32 %v1201_v26, %v1153_v54 }
 0x199   :  { %2187 = vmatmul.msk.bf16.gmra.mxu3 %vm246_vm0, %v2307_v5 }
 0x19b   :  { %v1089_v0 = vpop.f32.mrf.mxu2 }
 0x19c   :  { %v1138_v43 = vpop.f32.mrf.mxu3  ;;  %v1090_v27 = vadd.f32 %v1089_v0, %v2882_v10  ;;  %v1154_v3 = vpop.f32.mrf.mxu0  ;;  %v1537_v10 = vld [vmem:[%s3217_s7] sm:$0x3] }
 0x19d   :  { %v3064_v45 = vperm.slane %v1537_v10, 0  ;;  %v3066_v41 = vperm.slane %v1537_v10, 1  ;;  %v1155_v16 = vadd.f32 %v1154_v3, %v2929_v1 }
 0x19e   :  { %v3047_v14 = vadd.f32 %v1138_v43, %v1090_v27 }
 0x19f   :  { %v1203_v32 = vpop.f32.mrf.mxu1 }
 0x1a0   :  { %v1204_v23 = vadd.f32 %v1203_v32, %v1155_v16 }
 0x1a3   :  { %v1091_v62 = vpop.f32.mrf.mxu2 }
 0x1a4   :  { %v1140_v13 = vpop.f32.mrf.mxu3  ;;  %v1092_v17 = vadd.f32 %v1091_v62, %v2890_v29  ;;  %v1157_v49 = vpop.f32.mrf.mxu0 }
 0x1a5   :  { %v1158_v1 = vadd.f32 %v1157_v49, %v2939_v63 }
 0x1a6   :  { %v3051_v7 = vadd.f32 %v1140_v13, %v1092_v17 }
 0x1a7   :  { %v1206_v36 = vpop.f32.mrf.mxu1 }
 0x1a8   :  { %v1207_v50 = vadd.f32 %v1206_v36, %v1158_v1 }
 0x1ab   :  { %v1378_v29 = vpop.f32.mrf.mxu2 }
 0x1ac   :  { %v1427_v25 = vpop.f32.mrf.mxu3  ;;  %v1467_v11 = vadd.f32 %v1378_v29, %v2896_v33  ;;  %v1159_v42 = vpop.f32.mrf.mxu0 }
 0x1ad   :  { %v1468_v22 = vadd.f32 %v1427_v25, %v1202_v6 }
 0x1ae   :  { %v1505_v61 = vmul.f32 %v3059_v59, %v1467_v11 }
 0x1af   :  { %v1506_v39 = vmul.f32 %v3061_v9, %v1468_v22  ;;  %v1208_v52 = vpop.f32.mrf.mxu1  ;;  %v1160_v22 = vadd.f32 %v1159_v42, %v2948_v21 }
 0x1b0   :  { %v1543_v34 = vadd.f32 %v3064_v45, %v1505_v61 }
 0x1b1   :  { %v1544_v31 = vadd.f32 %v3066_v41, %v1506_v39 }
 0x1b2   :  { %v1575_v44 = vmax.f32 %v1543_v34, 0.0 }
 0x1b3   :  { %v1576_v33 = vmax.f32 %v1544_v31, 0.0  ;;  %v1380_v5 = vpop.f32.mrf.mxu2  ;;  %v1209_v31 = vadd.f32 %v1208_v52, %v1160_v22 }
 0x1b4   :  { %v1429_v26 = vpop.f32.mrf.mxu3  ;;  %v1469_v43 = vadd.f32 %v1380_v5, %v2904_v18  ;;  %v1162_v62 = vpop.f32.mrf.mxu0 }
 0x1b5   :  { %v1607_v0 = vpack.c.bf16 %v1576_v33, %v1575_v44  ;;  %v1470_v27 = vadd.f32 %v1429_v26, %v1204_v23 }
 0x1b6   :  { %v1507_v3 = vmul.f32 %v3059_v59, %v1469_v43 }
 0x1b7   :  { %1623 = vst [vmem:[%s3218_s8] sm:$0xff] %v1607_v0  ;;  %v1508_v13 = vmul.f32 %v3061_v9, %v1470_v27  ;;  %v1211_v32 = vpop.f32.mrf.mxu1  ;;  %v1163_v0 = vadd.f32 %v1162_v62, %v2958_v53 }
 0x1b8   :  { %v1545_v17 = vadd.f32 %v3064_v45, %v1507_v3 }
 0x1b9   :  { %v1546_v54 = vadd.f32 %v3066_v41, %v1508_v13  ;;  %v1212_v13 = vadd.f32 %v1211_v32, %v1163_v0 }
 0x1ba   :  { %v1577_v10 = vmax.f32 %v1545_v17, 0.0 }
 0x1bb   :  { %v1578_v18 = vmax.f32 %v1546_v54, 0.0  ;;  %v1383_v6 = vpop.f32.mrf.mxu2 }
 0x1bc   :  { %v1432_v29 = vpop.f32.mrf.mxu3  ;;  %v1471_v63 = vadd.f32 %v1383_v6, %v2913_v55  ;;  %v1164_v11 = vpop.f32.mrf.mxu0 }
 0x1bd   :  { %v1608_v25 = vpack.c.bf16 %v1578_v18, %v1577_v10  ;;  %v1472_v49 = vadd.f32 %v1432_v29, %v1207_v50  ;;  %v1165_v6 = vadd.f32 %v1164_v11, %v2967_v60 }
 0x1be   :  { %v1509_v16 = vmul.f32 %v3059_v59, %v1471_v63 }
 0x1bf   :  { %1624 = vst [vmem:[%s3218_s8 + $0x8] sm:$0xff] %v1608_v25  ;;  %v1510_v61 = vmul.f32 %v3061_v9, %v1472_v49  ;;  %v1213_v36 = vpop.f32.mrf.mxu1 }
 0x1c0   :  { %v1547_v39 = vadd.f32 %v3064_v45, %v1509_v16  ;;  %v1214_v22 = vadd.f32 %v1213_v36, %v1165_v6 }
 0x1c1   :  { %v1548_v34 = vadd.f32 %v3066_v41, %v1510_v61 }
 0x1c2   :  { %v1579_v23 = vmax.f32 %v1547_v39, 0.0 }
 0x1c3   :  { %v1580_v55 = vmax.f32 %v1548_v34, 0.0  ;;  %v1385_v44 = vpop.f32.mrf.mxu2 }
 0x1c4   :  { %v1434_v33 = vpop.f32.mrf.mxu3  ;;  %v1473_v21 = vadd.f32 %v1385_v44, %v2922_v46  ;;  %v1167_v26 = vpop.f32.mrf.mxu0 }
 0x1c5   :  { %v1609_v5 = vpack.c.bf16 %v1580_v55, %v1579_v23  ;;  %v1474_v42 = vadd.f32 %v1434_v33, %v1209_v31  ;;  %v1168_v23 = vadd.f32 %v1167_v26, %v2977_v57 }
 0x1c6   :  { %v1511_v43 = vmul.f32 %v3059_v59, %v1473_v21 }
 0x1c7   :  { %1625 = vst [vmem:[%s3218_s8 + $0x10] sm:$0xff] %v1609_v5  ;;  %v1512_v27 = vmul.f32 %v3061_v9, %v1474_v42  ;;  %v1216_v52 = vpop.f32.mrf.mxu1 }
 0x1c8   :  { %v1549_v1 = vadd.f32 %v3064_v45, %v1511_v43  ;;  %v1217_v21 = vadd.f32 %v1216_v52, %v1168_v23 }
 0x1c9   :  { %v1550_v3 = vadd.f32 %v3066_v41, %v1512_v27 }
 0x1ca   :  { %v1581_v17 = vmax.f32 %v1549_v1, 0.0 }
 0x1cb   :  { %v1582_v46 = vmax.f32 %v1550_v3, 0.0  ;;  %v1388_v54 = vpop.f32.mrf.mxu2 }
 0x1cc   :  { %v1437_v50 = vpop.f32.mrf.mxu3  ;;  %v1475_v53 = vadd.f32 %v1388_v54, %v2932_v35  ;;  %v1169_v18 = vpop.f32.mrf.mxu0 }
 0x1cd   :  { %v1610_v10 = vpack.c.bf16 %v1582_v46, %v1581_v17  ;;  %v1476_v62 = vadd.f32 %v1437_v50, %v1212_v13  ;;  %v1170_v1 = vadd.f32 %v1169_v18, %v2986_v28 }
 0x1ce   :  { %v1513_v29 = vmul.f32 %v3059_v59, %v1475_v53 }
 0x1cf   :  { %1626 = vst [vmem:[%s3218_s8 + $0x18] sm:$0xff] %v1610_v10  ;;  %v1514_v25 = vmul.f32 %v3061_v9, %v1476_v62  ;;  %v1218_v32 = vpop.f32.mrf.mxu1 }
 0x1d0   :  { %v1551_v63 = vadd.f32 %v3064_v45, %v1513_v29  ;;  %v1219_v54 = vadd.f32 %v1218_v32, %v1170_v1 }
 0x1d1   :  { %v1552_v49 = vadd.f32 %v3066_v41, %v1514_v25 }
 0x1d2   :  { %v1583_v16 = vmax.f32 %v1551_v63, 0.0 }
 0x1d3   :  { %v1584_v35 = vmax.f32 %v1552_v49, 0.0  ;;  %v1390_v61 = vpop.f32.mrf.mxu2 }
 0x1d4   :  { %v1439_v39 = vpop.f32.mrf.mxu3  ;;  %v1477_v60 = vadd.f32 %v1390_v61, %v2941_v37  ;;  %v1172_v31 = vpop.f32.mrf.mxu0 }
 0x1d5   :  { %v1611_v34 = vpack.c.bf16 %v1584_v35, %v1583_v16  ;;  %v1478_v11 = vadd.f32 %v1439_v39, %v1214_v22  ;;  %v1173_v29 = vadd.f32 %v1172_v31, %v2996_v20 }
 0x1d6   :  { %v1515_v55 = vmul.f32 %v3059_v59, %v1477_v60 }
 0x1d7   :  { %1627 = vst [vmem:[%s3218_s8 + $0x20] sm:$0xff] %v1611_v34  ;;  %v1516_v44 = vmul.f32 %v3061_v9, %v1478_v11  ;;  %v1221_v5 = vpop.f32.mrf.mxu1 }
 0x1d8   :  { %v1553_v36 = vadd.f32 %v3064_v45, %v1515_v55  ;;  %v1222_v16 = vadd.f32 %v1221_v5, %v1173_v29 }
 0x1d9   :  { %v1554_v33 = vadd.f32 %v3066_v41, %v1516_v44 }
 0x1da   :  { %v1585_v42 = vmax.f32 %v1553_v36, 0.0 }
 0x1db   :  { %v1586_v37 = vmax.f32 %v1554_v33, 0.0  ;;  %v1393_v0 = vpop.f32.mrf.mxu2 }
 0x1dc   :  { %v1442_v43 = vpop.f32.mrf.mxu3  ;;  %v1479_v57 = vadd.f32 %v1393_v0, %v2951_v58  ;;  %v1174_v17 = vpop.f32.mrf.mxu0 }
 0x1dd   :  { %v1612_v27 = vpack.c.bf16 %v1586_v37, %v1585_v42  ;;  %v1480_v26 = vadd.f32 %v1442_v43, %v1217_v21  ;;  %v1175_v31 = vadd.f32 %v1174_v17, %v3005_v19 }
 0x1de   :  { %v1517_v3 = vmul.f32 %v3059_v59, %v1479_v57 }
 0x1df   :  { %1628 = vst [vmem:[%s3218_s8 + $0x28] sm:$0xff] %v1612_v27  ;;  %v1518_v13 = vmul.f32 %v3061_v9, %v1480_v26  ;;  %v1223_v58 = vpop.f32.mrf.mxu1 }
 0x1e0   :  { %v1555_v52 = vadd.f32 %v3064_v45, %v1517_v3  ;;  %v1224_v33 = vadd.f32 %v1223_v58, %v1175_v31 }
 0x1e1   :  { %v1556_v46 = vadd.f32 %v3066_v41, %v1518_v13 }
 0x1e2   :  { %v1587_v50 = vmax.f32 %v1555_v52, 0.0 }
 0x1e3   :  { %v1588_v10 = vmax.f32 %v1556_v46, 0.0  ;;  %v1395_v53 = vpop.f32.mrf.mxu2 }
 0x1e4   :  { %v1444_v62 = vpop.f32.mrf.mxu3  ;;  %v1481_v18 = vadd.f32 %v1395_v53, %v2960_v56  ;;  %v1177_v22 = vpop.f32.mrf.mxu0 }
 0x1e5   :  { %v1613_v28 = vpack.c.bf16 %v1588_v10, %v1587_v50  ;;  %v1482_v6 = vadd.f32 %v1444_v62, %v1219_v54  ;;  %v1178_v27 = vadd.f32 %v1177_v22, %v3015_v48 }
 0x1e6   :  { %v1519_v25 = vmul.f32 %v3059_v59, %v1481_v18 }
 0x1e7   :  { %1629 = vst [vmem:[%s3218_s8 + $0x30] sm:$0xff] %v1613_v28  ;;  %v1520_v63 = vmul.f32 %v3061_v9, %v1482_v6  ;;  %v1226_v20 = vpop.f32.mrf.mxu1 }
 0x1e8   :  { %v1557_v32 = vadd.f32 %v3064_v45, %v1519_v25  ;;  %v1227_v17 = vadd.f32 %v1226_v20, %v1178_v27 }
 0x1e9   :  { %v1558_v49 = vadd.f32 %v3066_v41, %v1520_v63 }
 0x1ea   :  { %v1589_v35 = vmax.f32 %v1557_v32, 0.0 }
 0x1eb   :  { %v1590_v61 = vmax.f32 %v1558_v49, 0.0  ;;  %v1398_v56 = vpop.f32.mrf.mxu2 }
 0x1ec   :  { %v1447_v39 = vpop.f32.mrf.mxu3  ;;  %v1483_v60 = vadd.f32 %v1398_v56, %v2970_v2  ;;  %v1179_v42 = vpop.f32.mrf.mxu0 }
 0x1ed   :  { %v1614_v34 = vpack.c.bf16 %v1590_v61, %v1589_v35  ;;  %v1484_v11 = vadd.f32 %v1447_v39, %v1222_v16  ;;  %v1180_v53 = vadd.f32 %v1179_v42, %v3024_v4 }
 0x1ee   :  { %v1521_v23 = vmul.f32 %v3059_v59, %v1483_v60 }
 0x1ef   :  { %1630 = vst [vmem:[%s3218_s8 + $0x38] sm:$0xff] %v1614_v34  ;;  %v1522_v55 = vmul.f32 %v3061_v9, %v1484_v11  ;;  %v1228_v57 = vpop.f32.mrf.mxu1 }
 0x1f0   :  { %v1559_v44 = vadd.f32 %v3064_v45, %v1521_v23  ;;  %v1229_v25 = vadd.f32 %v1228_v57, %v1180_v53 }
 0x1f1   :  { %v1560_v36 = vadd.f32 %v3066_v41, %v1522_v55 }
 0x1f2   :  { %v1591_v5 = vmax.f32 %v1559_v44, 0.0 }
 0x1f3   :  { %v1592_v21 = vmax.f32 %v1560_v36, 0.0  ;;  %v1400_v2 = vpop.f32.mrf.mxu2 }
 0x1f4   :  { %v1449_v37 = vpop.f32.mrf.mxu3  ;;  %v1485_v19 = vadd.f32 %v1400_v2, %v2979_v30  ;;  %v1182_v48 = vpop.f32.mrf.mxu0 }
 0x1f5   :  { %v1615_v0 = vpack.c.bf16 %v1592_v21, %v1591_v5  ;;  %v1486_v43 = vadd.f32 %v1449_v37, %v1224_v33  ;;  %v1183_v35 = vadd.f32 %v1182_v48, %v3034_v12 }
 0x1f6   :  { %v1523_v26 = vmul.f32 %v3059_v59, %v1485_v19 }
 0x1f7   :  { %1631 = vst [vmem:[%s3218_s8 + $0x40] sm:$0xff] %v1615_v0  ;;  %v1524_v1 = vmul.f32 %v3061_v9, %v1486_v43  ;;  %v1231_v18 = vpop.f32.mrf.mxu1 }
 0x1f8   :  { %v1561_v3 = vadd.f32 %v3064_v45, %v1523_v26  ;;  %v1232_v60 = vadd.f32 %v1231_v18, %v1183_v35 }
 0x1f9   :  { %v1562_v13 = vadd.f32 %v3066_v41, %v1524_v1 }
 0x1fa   :  { %v1593_v52 = vmax.f32 %v1561_v3, 0.0 }
 0x1fb   :  { %v1594_v46 = vmax.f32 %v1562_v13, 0.0  ;;  %v1403_v30 = vpop.f32.mrf.mxu2 }
 0x1fc   :  { %v1452_v54 = vpop.f32.mrf.mxu3  ;;  %v1487_v10 = vadd.f32 %v1403_v30, %v2989_v24  ;;  %v1184_v61 = vpop.f32.mrf.mxu0 }
 0x1fd   :  { %v1616_v50 = vpack.c.bf16 %v1594_v46, %v1593_v52  ;;  %v1488_v58 = vadd.f32 %v1452_v54, %v1227_v17  ;;  %v1185_v33 = vadd.f32 %v1184_v61, %v3042_v8 }
 0x1fe   :  { %v1525_v62 = vmul.f32 %v3059_v59, %v1487_v10 }
 0x1ff   :  { %1632 = vst [vmem:[%s3218_s8 + $0x48] sm:$0xff] %v1616_v50  ;;  %v1526_v28 = vmul.f32 %v3061_v9, %v1488_v58  ;;  %v1233_v11 = vpop.f32.mrf.mxu1 }
 0x200   :  { %v1563_v6 = vadd.f32 %v3064_v45, %v1525_v62  ;;  %v1234_v0 = vadd.f32 %v1233_v11, %v1185_v33 }
 0x201   :  { %v1564_v29 = vadd.f32 %v3066_v41, %v1526_v28 }
 0x202   :  { %v1595_v63 = vmax.f32 %v1563_v6, 0.0 }
 0x203   :  { %v1596_v32 = vmax.f32 %v1564_v29, 0.0  ;;  %v1405_v24 = vpop.f32.mrf.mxu2 }
 0x204   :  { %v1454_v49 = vpop.f32.mrf.mxu3  ;;  %v1489_v4 = vadd.f32 %v1405_v24, %v2998_v40  ;;  %v1187_v42 = vpop.f32.mrf.mxu0 }
 0x205   :  { %v1617_v22 = vpack.c.bf16 %v1596_v32, %v1595_v63  ;;  %v1490_v16 = vadd.f32 %v1454_v49, %v1229_v25  ;;  %v1188_v3 = vadd.f32 %v1187_v42, %v3047_v14 }
 0x206   :  { %v1527_v56 = vmul.f32 %v3059_v59, %v1489_v4 }
 0x207   :  { %1633 = vst [vmem:[%s3218_s8 + $0x50] sm:$0xff] %v1617_v22  ;;  %v1528_v39 = vmul.f32 %v3061_v9, %v1490_v16  ;;  %v1236_v1 = vpop.f32.mrf.mxu1 }
 0x208   :  { %v1565_v34 = vadd.f32 %v3064_v45, %v1527_v56  ;;  %v1237_v30 = vadd.f32 %v1236_v1, %v1188_v3 }
 0x209   :  { %v1566_v20 = vadd.f32 %v3066_v41, %v1528_v39 }
 0x20a   :  { %v1597_v31 = vmax.f32 %v1565_v34, 0.0 }
 0x20b   :  { %v1598_v40 = vmax.f32 %v1566_v20, 0.0  ;;  %v1408_v23 = vpop.f32.mrf.mxu2 }
 0x20c   :  { %v1457_v55 = vpop.f32.mrf.mxu3  ;;  %v1491_v44 = vadd.f32 %v1408_v23, %v3008_v47  ;;  %v1189_v54 = vpop.f32.mrf.mxu0 }
 0x20d   :  { %v1618_v12 = vpack.c.bf16 %v1598_v40, %v1597_v31  ;;  %v1492_v36 = vadd.f32 %v1457_v55, %v1232_v60  ;;  %v1190_v62 = vadd.f32 %v1189_v54, %v3051_v7 }
 0x20e   :  { %v1529_v5 = vmul.f32 %v3059_v59, %v1491_v44 }
 0x20f   :  { %1634 = vst [vmem:[%s3218_s8 + $0x58] sm:$0xff] %v1618_v12  ;;  %v1530_v21 = vmul.f32 %v3061_v9, %v1492_v36  ;;  %v1238_v6 = vpop.f32.mrf.mxu1 }
 0x210   :  { %v1567_v2 = vadd.f32 %v3064_v45, %v1529_v5  ;;  %v1239_v63 = vadd.f32 %v1238_v6, %v1190_v62 }
 0x211   :  { %v1568_v37 = vadd.f32 %v3066_v41, %v1530_v21 }
 0x212   :  { %v1599_v19 = vmax.f32 %v1567_v2, 0.0 }
 0x213   :  { %v1600_v43 = vmax.f32 %v1568_v37, 0.0  ;;  %v1410_v47 = vpop.f32.mrf.mxu2 }
 0x214   :  { %v1459_v27 = vpop.f32.mrf.mxu3  ;;  %v1493_v8 = vadd.f32 %v1410_v47, %v3017_v15 }
 0x215   :  { %v1619_v57 = vpack.c.bf16 %v1600_v43, %v1599_v19  ;;  %v1494_v26 = vadd.f32 %v1459_v27, %v1234_v0 }
 0x216   :  { %v1531_v13 = vmul.f32 %v3059_v59, %v1493_v8 }
 0x217   :  { %1635 = vst [vmem:[%s3218_s8 + $0x60] sm:$0xff] %v1619_v57  ;;  %v1532_v17 = vmul.f32 %v3061_v9, %v1494_v26 }
 0x218   :  { %v1569_v52 = vadd.f32 %v3064_v45, %v1531_v13 }
 0x219   :  { %v1570_v46 = vadd.f32 %v3066_v41, %v1532_v17 }
 0x21a   :  { %v1601_v50 = vmax.f32 %v1569_v52, 0.0 }
 0x21b   :  { %v1602_v15 = vmax.f32 %v1570_v46, 0.0  ;;  %v1413_v48 = vpop.f32.mrf.mxu2 }
 0x21c   :  { %v1462_v10 = vpop.f32.mrf.mxu3  ;;  %v1495_v14 = vadd.f32 %v1413_v48, %v3027_v51 }
 0x21d   :  { %v1620_v58 = vpack.c.bf16 %v1602_v15, %v1601_v50  ;;  %v1496_v53 = vadd.f32 %v1462_v10, %v1237_v30 }
 0x21e   :  { %v1533_v28 = vmul.f32 %v3059_v59, %v1495_v14 }
 0x21f   :  { %1636 = vst [vmem:[%s3218_s8 + $0x68] sm:$0xff] %v1620_v58  ;;  %v1534_v18 = vmul.f32 %v3061_v9, %v1496_v53 }
 0x220   :  { %v1571_v29 = vadd.f32 %v3064_v45, %v1533_v28 }
 0x221   :  { %v1572_v25 = vadd.f32 %v3066_v41, %v1534_v18 }
 0x222   :  { %v1603_v32 = vmax.f32 %v1571_v29, 0.0 }
 0x223   :  { %v1604_v24 = vmax.f32 %v1572_v25, 0.0  ;;  %v1415_v51 = vpop.f32.mrf.mxu2 }
 0x224   :  { %v1464_v49 = vpop.f32.mrf.mxu3  ;;  %v1497_v7 = vadd.f32 %v1415_v51, %v3036_v38 }
 0x225   :  { %v1621_v22 = vpack.c.bf16 %v1604_v24, %v1603_v32  ;;  %v1498_v4 = vadd.f32 %v1464_v49, %v1239_v63 }
 0x226   :  { %v1535_v16 = vmul.f32 %v3059_v59, %v1497_v7 }
 0x227   :  { %1637 = vst [vmem:[%s3218_s8 + $0x70] sm:$0xff] %v1621_v22  ;;  %v1536_v35 = vmul.f32 %v3061_v9, %v1498_v4 }
 0x228   :  { %v1573_v61 = vadd.f32 %v3064_v45, %v1535_v16 }
 0x229   :  { %v1574_v56 = vadd.f32 %v3066_v41, %v1536_v35 }
 0x22a   :  { %v1605_v39 = vmax.f32 %v1573_v61, 0.0 }
 0x22b   :  { %v1606_v34 = vmax.f32 %v1574_v56, 0.0 }
 0x22d   :  { %v1622_v20 = vpack.c.bf16 %v1606_v34, %v1605_v39 }
 0x22f   :  { %1638 = vst [vmem:[%s3218_s8 + $0x78] sm:$0xff] %v1622_v20 }
 0x230   :  { %1643 = vsyncpa [#allocation3], 1 }

// kernel: dense_temporal_block.15
= control target key start
LH: loop header
LB: loop body
LE: loop exit
PB: predicated region body
PF: predicated region fallthrough
CT: control target
= control target key end

     0   :  { %11 = vsyncpa [#allocation4], 0  ;;  %s1147_s21 = smov 0   ;;  %s1149_s22 = smov 0   ;;  %s1522_s0 = inlined_call_operand.vmem [shape: f32[2,1,512], index: 0, kind: input, shape index: {}]   ;;  %s1523_s1 = inlined_call_operand.vmem [shape: f32[512,128], index: 1, kind: input, shape index: {}]   ;;  %s1524_s2 = inlined_call_operand.vmem [shape: f32[1,128], index: 2, kind: input, shape index: {}]   ;;  %s1525_s3 = inlined_call_operand.hbm [shape: f32[128,512], index: 3, kind: input, shape index: {}]   ;;  %s1526_s4 = inlined_call_operand.vmem [shape: f32[1,512], index: 4, kind: input, shape index: {}]   ;;  %s1527_s5 = inlined_call_operand.vmem [shape: bf16[2,64,512], index: 5, kind: input, shape index: {}]   ;;  %s1528_s6 = inlined_call_operand.vmem [shape: f32[2,64,512], index: 6, kind: output, shape index: {}]  }
   0x1   :  { %s1151_s23 = smov 0  }
   0x2 LB: > { %s982_s24 = sadd.s32 4294967295, %s1107_s23   ;;  %s29_s25 = sadd.s32 1, %s1103_s22  ;;  %s1107_s23 = sphi %s1151_s23, %s17_s23   ;;  %s1103_s22 = sphi %s1149_s22, %s1536_s22   ;;  %s1099_s21 = sphi %s1147_s21, %s1535_s21  }
   0x3   : > { %p31_p0 = scmp.ge.s32.totalorder %s29_s25, 2  ;;  %p984_p1 = scmp.ge.s32.totalorder %s1107_s23, 1 }
   0x4   : > { %p200_p2 = scmp.lt.s32.totalorder %s1107_s23, 3  ;;  %p1006_p4 = scmp.eq.s32.totalorder %s982_s24, 0 }
   0x5   : > { %s1538_s25 = smov (%p31_p0, %s29_s25), 0  ;;  %s217_s28 = sshll.u32 %s1525_s3, 4  ;;  %s218_s28 = int_to_ptr.hbm [resolvable:$true] %s217_s28 }
   0x6   : > { %p201_p3 = pnand %p984_p1, %p200_p2  ;;  %s1109_s29 = smov [#allocation3]  }
   0x7   : > { %s219_s30 = sshll.u32 %s1109_s29, 4  ;;  %s1110_s7 = smov 512   ;;  %s220_s30 = int_to_ptr.vmem [resolvable:$true] %s219_s30 }
   0x8   : > { %p1002_p5 = pneg %p201_p3  ;;  %s1111_s8 = smov 32  }
   0x9   : > { %259 = sbr.rel (%p201_p3) target bundleno = 400 (0x190), region = 44 }
   0xa   : > { %p1003_p6 = pnand %p1006_p4, %p1002_p5 }
   0xc   : > { %1005 = dma.hbm_to_vmem [thread:$0]  (!%p1003_p6), %s218_s28, 8192, %s220_s30, [#allocation4], %s1110_s7, %s1110_s7, %s1111_s8  }
   0xe   : > { %1094 = dma.done.wait (%p1006_p4), [#allocation4], 8192  }
   0xf   : > { %1096 = vsyncadd (%p1006_p4), [#allocation4], 4294959104  ;;  %v383_v0 = vld [vmem:[%s1523_s1 + $0x178] sm:$0xff]  ;;  %v382_v2 = vld [vmem:[%s1523_s1 + $0x170] sm:$0xff]  ;;  %p304_p7 = scmp.lt.s32.totalorder %s1099_s21, 1  ;;  %vm728_vm15 = vcmask 1040384  }
  0x10   : > { %v351_v1 = vld [vmem:[%s1523_s1 + $0x78] sm:$0xff]  ;;  %450 = vmatpush.msra.mxu2 %v383_v0  ;;  %v350_v4 = vld [vmem:[%s1523_s1 + $0x70] sm:$0xff]  ;;  %v381_v6 = vld [vmem:[%s1523_s1 + $0x168] sm:$0xff] }
  0x11   : > { %410 = vmatpush.msra.mxu0 %v351_v1  ;;  %v399_v3 = vld [vmem:[%s1523_s1 + $0x1f8] sm:$0xff]  ;;  %v398_v7 = vld [vmem:[%s1523_s1 + $0x1f0] sm:$0xff]  ;;  %v349_v8 = vld [vmem:[%s1523_s1 + $0x68] sm:$0xff]  ;;  %s1540_s21 = smov (!%p304_p7, %s1099_s21), 1 }
  0x12   : > { %v367_v5 = vld [vmem:[%s1523_s1 + $0xf8] sm:$0xff]  ;;  %470 = vmatpush.msra.mxu3 %v399_v3  ;;  %451 = vmatpush.msra.mxu2 %v382_v2  ;;  %v366_v9 = vld [vmem:[%s1523_s1 + $0xf0] sm:$0xff]  ;;  %v397_v10 = vld [vmem:[%s1523_s1 + $0x1e8] sm:$0xff]  ;;  %s989_s24 = sshll.u32 %s1540_s21, 2  ;;  %s997_s9 = sshll.u32 %s1540_s21, 8 }
  0x13   : > { %430 = vmatpush.msra.mxu1 %v367_v5  ;;  %411 = vmatpush.msra.mxu0 %v350_v4  ;;  %v380_v11 = vld [vmem:[%s1523_s1 + $0x160] sm:$0xff]  ;;  %v365_v13 = vld [vmem:[%s1523_s1 + $0xe8] sm:$0xff]  ;;  %v379_v16 = vld [vmem:[%s1523_s1 + $0x158] sm:$0xff]  ;;  %s307_s16 = scalar_lea.vmem %s1522_s0, %s989_s24  ;;  %s996_s24 = sshll.u32 %s1540_s21, 7 }
  0x14   : > { %471 = vmatpush.msra.mxu3 %v398_v7  ;;  %v348_v12 = vld [vmem:[%s1523_s1 + $0x60] sm:$0xff]  ;;  %452 = vmatpush.msra.mxu2 %v381_v6  ;;  %v347_v17 = vld [vmem:[%s1523_s1 + $0x58] sm:$0xff]  ;;  %v378_v20 = vld [vmem:[%s1523_s1 + $0x150] sm:$0xff]  ;;  %s1417_s8 = scalar_lea.vmem %s1527_s5, %s996_s24  ;;  %s1435_s21 = scalar_lea.vmem %s1528_s6, %s997_s9 }
  0x15   : > { %431 = vmatpush.msra.mxu1 %v366_v9  ;;  %412 = vmatpush.msra.mxu0 %v349_v8  ;;  %v396_v14 = vld [vmem:[%s1523_s1 + $0x1e0] sm:$0xff]  ;;  %v395_v18 = vld [vmem:[%s1523_s1 + $0x1d8] sm:$0xff]  ;;  %v346_v21 = vld [vmem:[%s1523_s1 + $0x50] sm:$0xff] }
  0x16   : > { %v364_v15 = vld [vmem:[%s1523_s1 + $0xe0] sm:$0xff]  ;;  %472 = vmatpush.msra.mxu3 %v397_v10  ;;  %453 = vmatpush.msra.mxu2 %v380_v11  ;;  %v363_v19 = vld [vmem:[%s1523_s1 + $0xd8] sm:$0xff]  ;;  %v394_v22 = vld [vmem:[%s1523_s1 + $0x1d0] sm:$0xff] }
  0x17   : > { %432 = vmatpush.msra.mxu1 %v365_v13  ;;  %413 = vmatpush.msra.mxu0 %v348_v12  ;;  %v362_v23 = vld [vmem:[%s1523_s1 + $0xd0] sm:$0xff]  ;;  %v377_v24 = vld [vmem:[%s1523_s1 + $0x148] sm:$0xff]  ;;  %v376_v28 = vld [vmem:[%s1523_s1 + $0x140] sm:$0xff] }
  0x18   : > { %473 = vmatpush.msra.mxu3 %v396_v14  ;;  %454 = vmatpush.msra.mxu2 %v379_v16  ;;  %v345_v25 = vld [vmem:[%s1523_s1 + $0x48] sm:$0xff]  ;;  %v344_v29 = vld [vmem:[%s1523_s1 + $0x40] sm:$0xff]  ;;  %v375_v32 = vld [vmem:[%s1523_s1 + $0x138] sm:$0xff] }
  0x19   : > { %433 = vmatpush.msra.mxu1 %v364_v15  ;;  %414 = vmatpush.msra.mxu0 %v347_v17  ;;  %v393_v26 = vld [vmem:[%s1523_s1 + $0x1c8] sm:$0xff]  ;;  %v392_v30 = vld [vmem:[%s1523_s1 + $0x1c0] sm:$0xff]  ;;  %v343_v33 = vld [vmem:[%s1523_s1 + $0x38] sm:$0xff] }
  0x1a   : > { %474 = vmatpush.msra.mxu3 %v395_v18  ;;  %455 = vmatpush.msra.mxu2 %v378_v20  ;;  %v361_v27 = vld [vmem:[%s1523_s1 + $0xc8] sm:$0xff]  ;;  %v360_v31 = vld [vmem:[%s1523_s1 + $0xc0] sm:$0xff]  ;;  %v391_v34 = vld [vmem:[%s1523_s1 + $0x1b8] sm:$0xff] }
  0x1b   : > { %434 = vmatpush.msra.mxu1 %v363_v19  ;;  %415 = vmatpush.msra.mxu0 %v346_v21  ;;  %v359_v35 = vld [vmem:[%s1523_s1 + $0xb8] sm:$0xff]  ;;  %v374_v36 = vld [vmem:[%s1523_s1 + $0x130] sm:$0xff]  ;;  %v373_v40 = vld [vmem:[%s1523_s1 + $0x128] sm:$0xff] }
  0x1c   : > { %475 = vmatpush.msra.mxu3 %v394_v22  ;;  %456 = vmatpush.msra.mxu2 %v377_v24  ;;  %v342_v37 = vld [vmem:[%s1523_s1 + $0x30] sm:$0xff]  ;;  %v341_v41 = vld [vmem:[%s1523_s1 + $0x28] sm:$0xff]  ;;  %v372_v44 = vld [vmem:[%s1523_s1 + $0x120] sm:$0xff] }
  0x1d   : > { %435 = vmatpush.msra.mxu1 %v362_v23  ;;  %416 = vmatpush.msra.mxu0 %v345_v25  ;;  %v390_v38 = vld [vmem:[%s1523_s1 + $0x1b0] sm:$0xff]  ;;  %v389_v42 = vld [vmem:[%s1523_s1 + $0x1a8] sm:$0xff]  ;;  %v340_v45 = vld [vmem:[%s1523_s1 + $0x20] sm:$0xff] }
  0x1e   : > { %476 = vmatpush.msra.mxu3 %v393_v26  ;;  %457 = vmatpush.msra.mxu2 %v376_v28  ;;  %v358_v39 = vld [vmem:[%s1523_s1 + $0xb0] sm:$0xff]  ;;  %v357_v43 = vld [vmem:[%s1523_s1 + $0xa8] sm:$0xff]  ;;  %v388_v46 = vld [vmem:[%s1523_s1 + $0x1a0] sm:$0xff] }
  0x1f   : > { %436 = vmatpush.msra.mxu1 %v361_v27  ;;  %417 = vmatpush.msra.mxu0 %v344_v29  ;;  %v356_v47 = vld [vmem:[%s1523_s1 + $0xa0] sm:$0xff]  ;;  %v371_v49 = vld [vmem:[%s1523_s1 + $0x118] sm:$0xff]  ;;  %v370_v53 = vld [vmem:[%s1523_s1 + $0x110] sm:$0xff] }
  0x20   : > { %477 = vmatpush.msra.mxu3 %v392_v30  ;;  %458 = vmatpush.msra.mxu2 %v375_v32  ;;  %v334_v48 = vld [vmem:[%s307_s16] sm:$0xf]  ;;  %v339_v50 = vld [vmem:[%s1523_s1 + $0x18] sm:$0xff]  ;;  %v338_v54 = vld [vmem:[%s1523_s1 + $0x10] sm:$0xff] }
  0x21   : > { %437 = vmatpush.msra.mxu1 %v360_v31  ;;  %418 = vmatpush.msra.mxu0 %v343_v33  ;;  %v387_v51 = vld [vmem:[%s1523_s1 + $0x198] sm:$0xff]  ;;  %v335_v55 = vmul.f32 0.015625, %v334_v48  ;;  %v386_v56 = vld [vmem:[%s1523_s1 + $0x190] sm:$0xff]  ;;  %v369_v58 = vld [vmem:[%s1523_s1 + $0x108] sm:$0xff] }
  0x22   : > { %478 = vmatpush.msra.mxu3 %v391_v34  ;;  %459 = vmatpush.msra.mxu2 %v374_v36  ;;  %v355_v52 = vld [vmem:[%s1523_s1 + $0x98] sm:$0xff]  ;;  %v354_v57 = vld [vmem:[%s1523_s1 + $0x90] sm:$0xff]  ;;  %v337_v59 = vld [vmem:[%s1523_s1 + $0x8] sm:$0xff] }
  0x23   : > { %438 = vmatpush.msra.mxu1 %v359_v35  ;;  %419 = vmatpush.msra.mxu0 %v342_v37  ;;  %v385_v60 = vld [vmem:[%s1523_s1 + $0x188] sm:$0xff]  ;;  %v368_v62 = vld [vmem:[%s1523_s1 + $0x100] sm:$0xff]  ;;  %v404_v63 = vperm.slane %v335_v55, 2  ;;  %v402_v2 = vperm.slane %v335_v55, 0  ;;  %v405_v3 = vperm.slane %v335_v55, 3  ;;  %v403_v5 = vperm.slane %v335_v55, 1 }
  0x24   : > { %479 = vmatpush.msra.mxu3 %v390_v38  ;;  %460 = vmatpush.msra.mxu2 %v373_v40  ;;  %v353_v61 = vld [vmem:[%s1523_s1 + $0x88] sm:$0xff]  ;;  %v336_v0 = vld [vmem:[%s1523_s1] sm:$0xff]  ;;  %v553_v7 = vld [vmem:[#allocation3 + $0x1f0] sm:$0xff] }
  0x25   : > { %439 = vmatpush.msra.mxu1 %v358_v39  ;;  %420 = vmatpush.msra.mxu0 %v341_v41  ;;  %v384_v1 = vld [vmem:[%s1523_s1 + $0x180] sm:$0xff]  ;;  %v552_v8 = vld [vmem:[#allocation3 + $0x1e8] sm:$0xff]  ;;  %v549_v11 = vld [vmem:[#allocation3 + $0x1d0] sm:$0xff] }
  0x26   : > { %480 = vmatpush.msra.mxu3 %v389_v42  ;;  %461 = vmatpush.msra.mxu2 %v372_v44  ;;  %v352_v4 = vld [vmem:[%s1523_s1 + $0x80] sm:$0xff]  ;;  %v548_v12 = vld [vmem:[#allocation3 + $0x1c8] sm:$0xff]  ;;  %v545_v15 = vld [vmem:[#allocation3 + $0x1b0] sm:$0xff] }
  0x27   : > { %440 = vmatpush.msra.mxu1 %v357_v43  ;;  %421 = vmatpush.msra.mxu0 %v340_v45  ;;  %v551_v6 = vld [vmem:[#allocation3 + $0x1e0] sm:$0xff]  ;;  %v554_v9 = vld [vmem:[#allocation3 + $0x1f8] sm:$0xff]  ;;  %v544_v16 = vld [vmem:[#allocation3 + $0x1a8] sm:$0xff] }
  0x28   : > { %481 = vmatpush.msra.mxu3 %v388_v46  ;;  %462 = vmatpush.msra.mxu2 %v371_v49  ;;  %v547_v10 = vld [vmem:[#allocation3 + $0x1c0] sm:$0xff]  ;;  %v550_v13 = vld [vmem:[#allocation3 + $0x1d8] sm:$0xff]  ;;  %v541_v19 = vld [vmem:[#allocation3 + $0x190] sm:$0xff] }
  0x29   : > { %441 = vmatpush.msra.mxu1 %v356_v47  ;;  %422 = vmatpush.msra.mxu0 %v339_v50  ;;  %v543_v14 = vld [vmem:[#allocation3 + $0x1a0] sm:$0xff]  ;;  %v546_v17 = vld [vmem:[#allocation3 + $0x1b8] sm:$0xff]  ;;  %v540_v20 = vld [vmem:[#allocation3 + $0x188] sm:$0xff] }
  0x2a   : > { %482 = vmatpush.msra.mxu3 %v387_v51  ;;  %463 = vmatpush.msra.mxu2 %v370_v53  ;;  %v539_v18 = vld [vmem:[#allocation3 + $0x180] sm:$0xff]  ;;  %v542_v21 = vld [vmem:[#allocation3 + $0x198] sm:$0xff]  ;;  %v537_v23 = vld [vmem:[#allocation3 + $0x170] sm:$0xff] }
  0x2b   : > { %442 = vmatpush.msra.mxu1 %v355_v52  ;;  %423 = vmatpush.msra.mxu0 %v338_v54  ;;  %v535_v22 = vld [vmem:[#allocation3 + $0x160] sm:$0xff]  ;;  %v536_v24 = vld [vmem:[#allocation3 + $0x168] sm:$0xff]  ;;  %v538_v25 = vld [vmem:[#allocation3 + $0x178] sm:$0xff] }
  0x2c   : > { %483 = vmatpush.msra.mxu3 %v386_v56  ;;  %464 = vmatpush.msra.mxu2 %v369_v58  ;;  %v531_v26 = vld [vmem:[#allocation3 + $0x140] sm:$0xff]  ;;  %v533_v27 = vld [vmem:[#allocation3 + $0x150] sm:$0xff]  ;;  %v532_v28 = vld [vmem:[#allocation3 + $0x148] sm:$0xff] }
  0x2d   : > { %443 = vmatpush.msra.mxu1 %v354_v57  ;;  %424 = vmatpush.msra.mxu0 %v337_v59  ;;  %v534_v29 = vld [vmem:[#allocation3 + $0x158] sm:$0xff]  ;;  %v527_v30 = vld [vmem:[#allocation3 + $0x120] sm:$0xff]  ;;  %v529_v31 = vld [vmem:[#allocation3 + $0x130] sm:$0xff] }
  0x2e   : > { %484 = vmatpush.msra.mxu3 %v385_v60  ;;  %465 = vmatpush.msra.mxu2 %v368_v62  ;;  %v528_v32 = vld [vmem:[#allocation3 + $0x128] sm:$0xff]  ;;  %v530_v33 = vld [vmem:[#allocation3 + $0x138] sm:$0xff]  ;;  %v523_v34 = vld [vmem:[#allocation3 + $0x100] sm:$0xff] }
  0x2f   : > { %444 = vmatpush.msra.mxu1 %v353_v61  ;;  %425 = vmatpush.msra.mxu0 %v336_v0  ;;  %v525_v35 = vld [vmem:[#allocation3 + $0x110] sm:$0xff]  ;;  %v524_v36 = vld [vmem:[#allocation3 + $0x108] sm:$0xff]  ;;  %v526_v37 = vld [vmem:[#allocation3 + $0x118] sm:$0xff] }
  0x30   : > { %466 = vmatmul.f32.vlgmr.msra.gmra.mxu2 %v404_v63  ;;  %485 = vmatpush.msra.mxu3 %v384_v1  ;;  %v519_v38 = vld [vmem:[#allocation3 + $0xe0] sm:$0xff]  ;;  %v521_v39 = vld [vmem:[#allocation3 + $0xf0] sm:$0xff]  ;;  %v520_v40 = vld [vmem:[#allocation3 + $0xe8] sm:$0xff] }
  0x31   : > { %426 = vmatmul.f32.vlgmr.msra.gmra.mxu0 %v402_v2  ;;  %486 = vmatmul.f32.vlgmr.msra.gmra.mxu3 %v405_v3  ;;  %v522_v41 = vld [vmem:[#allocation3 + $0xf8] sm:$0xff]  ;;  %v515_v42 = vld [vmem:[#allocation3 + $0xc0] sm:$0xff]  ;;  %v517_v43 = vld [vmem:[#allocation3 + $0xd0] sm:$0xff] }
  0x32   : > { %445 = vmatpush.msra.mxu1 %v352_v4  ;;  %565 = vmatpush.msrb.mxu0 %v551_v6  ;;  %v516_v44 = vld [vmem:[#allocation3 + $0xc8] sm:$0xff]  ;;  %v518_v45 = vld [vmem:[#allocation3 + $0xd8] sm:$0xff]  ;;  %v511_v46 = vld [vmem:[#allocation3 + $0xa0] sm:$0xff] }
  0x33   : > { %446 = vmatmul.f32.vlgmr.msra.gmra.mxu1 %v403_v5  ;;  %605 = vmatpush.msrb.mxu2 %v553_v7  ;;  %v512_v47 = vld [vmem:[#allocation3 + $0xa8] sm:$0xff]  ;;  %v513_v48 = vld [vmem:[#allocation3 + $0xb0] sm:$0xff]  ;;  %v514_v49 = vld [vmem:[#allocation3 + $0xb8] sm:$0xff] }
  0x34   : > { %585 = vmatpush.msrb.mxu1 %v552_v8  ;;  %625 = vmatpush.msrb.mxu3 %v554_v9  ;;  %v507_v50 = vld [vmem:[#allocation3 + $0x80] sm:$0xff]  ;;  %v508_v51 = vld [vmem:[#allocation3 + $0x88] sm:$0xff]  ;;  %v509_v52 = vld [vmem:[#allocation3 + $0x90] sm:$0xff] }
  0x35   : > { %566 = vmatpush.msrb.mxu0 %v547_v10  ;;  %606 = vmatpush.msrb.mxu2 %v549_v11  ;;  %v510_v53 = vld [vmem:[#allocation3 + $0x98] sm:$0xff]  ;;  %v503_v54 = vld [vmem:[#allocation3 + $0x60] sm:$0xff]  ;;  %v504_v55 = vld [vmem:[#allocation3 + $0x68] sm:$0xff] }
  0x36   : > { %586 = vmatpush.msrb.mxu1 %v548_v12  ;;  %626 = vmatpush.msrb.mxu3 %v550_v13  ;;  %v505_v56 = vld [vmem:[#allocation3 + $0x70] sm:$0xff]  ;;  %v506_v57 = vld [vmem:[#allocation3 + $0x78] sm:$0xff]  ;;  %v499_v58 = vld [vmem:[#allocation3 + $0x40] sm:$0xff] }
  0x37   : > { %567 = vmatpush.msrb.mxu0 %v543_v14  ;;  %607 = vmatpush.msrb.mxu2 %v545_v15  ;;  %v500_v59 = vld [vmem:[#allocation3 + $0x48] sm:$0xff]  ;;  %v501_v60 = vld [vmem:[#allocation3 + $0x50] sm:$0xff]  ;;  %v502_v61 = vld [vmem:[#allocation3 + $0x58] sm:$0xff] }
  0x38   : > { %587 = vmatpush.msrb.mxu1 %v544_v16  ;;  %627 = vmatpush.msrb.mxu3 %v546_v17  ;;  %v495_v62 = vld [vmem:[#allocation3 + $0x20] sm:$0xff]  ;;  %v496_v63 = vld [vmem:[#allocation3 + $0x28] sm:$0xff]  ;;  %v497_v0 = vld [vmem:[#allocation3 + $0x30] sm:$0xff] }
  0x39   : > { %568 = vmatpush.msrb.mxu0 %v539_v18  ;;  %608 = vmatpush.msrb.mxu2 %v541_v19  ;;  %v498_v1 = vld [vmem:[#allocation3 + $0x38] sm:$0xff]  ;;  %v491_v2 = vld [vmem:[#allocation3] sm:$0xff]  ;;  %v492_v3 = vld [vmem:[#allocation3 + $0x8] sm:$0xff] }
  0x3a   : > { %588 = vmatpush.msrb.mxu1 %v540_v20  ;;  %628 = vmatpush.msrb.mxu3 %v542_v21  ;;  %v493_v4 = vld [vmem:[#allocation3 + $0x10] sm:$0xff]  ;;  %v494_v5 = vld [vmem:[#allocation3 + $0x18] sm:$0xff] }
  0x3b   : > { %569 = vmatpush.msrb.mxu0 %v535_v22  ;;  %609 = vmatpush.msrb.mxu2 %v537_v23  ;;  %v400_v6 = vld [vmem:[%s1524_s2] sm:$0x1] }
  0x3c   : > { %589 = vmatpush.msrb.mxu1 %v536_v24  ;;  %629 = vmatpush.msrb.mxu3 %v538_v25  ;;  %v555_v16 = vld [vmem:[%s1526_s4] sm:$0xf] }
  0x3d   : > { %570 = vmatpush.msrb.mxu0 %v531_v26  ;;  %610 = vmatpush.msrb.mxu2 %v533_v27  ;;  %v557_v17 = vperm.slane %v555_v16, 0  ;;  %v558_v18 = vperm.slane %v555_v16, 1  ;;  %v559_v25 = vperm.slane %v555_v16, 2  ;;  %v560_v26 = vperm.slane %v555_v16, 3 }
  0x3e   : > { %590 = vmatpush.msrb.mxu1 %v532_v28  ;;  %630 = vmatpush.msrb.mxu3 %v534_v29 }
  0x3f   : > { %571 = vmatpush.msrb.mxu0 %v527_v30  ;;  %611 = vmatpush.msrb.mxu2 %v529_v31 }
  0x40   : > { %591 = vmatpush.msrb.mxu1 %v528_v32  ;;  %631 = vmatpush.msrb.mxu3 %v530_v33 }
  0x41   : > { %572 = vmatpush.msrb.mxu0 %v523_v34  ;;  %612 = vmatpush.msrb.mxu2 %v525_v35 }
  0x42   : > { %592 = vmatpush.msrb.mxu1 %v524_v36  ;;  %632 = vmatpush.msrb.mxu3 %v526_v37 }
  0x43   : > { %573 = vmatpush.msrb.mxu0 %v519_v38  ;;  %613 = vmatpush.msrb.mxu2 %v521_v39 }
  0x44   : > { %593 = vmatpush.msrb.mxu1 %v520_v40  ;;  %633 = vmatpush.msrb.mxu3 %v522_v41 }
  0x45   : > { %574 = vmatpush.msrb.mxu0 %v515_v42  ;;  %614 = vmatpush.msrb.mxu2 %v517_v43 }
  0x46   : > { %594 = vmatpush.msrb.mxu1 %v516_v44  ;;  %634 = vmatpush.msrb.mxu3 %v518_v45 }
  0x47   : > { %575 = vmatpush.msrb.mxu0 %v511_v46  ;;  %615 = vmatpush.msrb.mxu2 %v513_v48 }
  0x48   : > { %595 = vmatpush.msrb.mxu1 %v512_v47  ;;  %635 = vmatpush.msrb.mxu3 %v514_v49 }
  0x49   : > { %576 = vmatpush.msrb.mxu0 %v507_v50  ;;  %616 = vmatpush.msrb.mxu2 %v509_v52 }
  0x4a   : > { %596 = vmatpush.msrb.mxu1 %v508_v51  ;;  %636 = vmatpush.msrb.mxu3 %v510_v53 }
  0x4b   : > { %577 = vmatpush.msrb.mxu0 %v503_v54  ;;  %617 = vmatpush.msrb.mxu2 %v505_v56 }
  0x4c   : > { %597 = vmatpush.msrb.mxu1 %v504_v55  ;;  %637 = vmatpush.msrb.mxu3 %v506_v57 }
  0x4d   : > { %578 = vmatpush.msrb.mxu0 %v499_v58  ;;  %618 = vmatpush.msrb.mxu2 %v501_v60 }
  0x4e   : > { %598 = vmatpush.msrb.mxu1 %v500_v59  ;;  %638 = vmatpush.msrb.mxu3 %v502_v61  ;;  %v747_v61 = vld [vmem:[%s1417_s8 + $0x38] sm:$0xff] }
  0x4f   : > { %579 = vmatpush.msrb.mxu0 %v495_v62  ;;  %619 = vmatpush.msrb.mxu2 %v497_v0 }
  0x50   : > { %599 = vmatpush.msrb.mxu1 %v496_v63  ;;  %639 = vmatpush.msrb.mxu3 %v498_v1 }
  0x51   : > { %580 = vmatpush.msrb.mxu0 %v491_v2  ;;  %620 = vmatpush.msrb.mxu2 %v493_v4 }
  0x52   : > { %600 = vmatpush.msrb.mxu1 %v492_v3  ;;  %640 = vmatpush.msrb.mxu3 %v494_v5 }
  0xae   : > { %v427_v7 = vpop.f32.mrf.mxu0 }
  0xaf   : > { %v428_v8 = vadd.f32 %v427_v7, %v400_v6 }
  0xb0   : > { %v447_v9 = vpop.f32.mrf.mxu1 }
  0xb1   : > { %v448_v10 = vadd.f32 %v447_v9, %v428_v8 }
  0xb3   : > { %v467_v11 = vpop.f32.mrf.mxu2 }
  0xb4   : > { %v468_v12 = vadd.f32 %v467_v11, %v448_v10  ;;  %v487_v13 = vpop.f32.mrf.mxu3 }
  0xb6   : > { %v488_v14 = vadd.f32 %v487_v13, %v468_v12 }
  0xb8   : > { %v490_v15 = vmax.f32 %v488_v14, 0.0 }
  0xba   : > { %581 = vmatmul.f32.vlgmr.msrb.gmra.mxu0 %v490_v15  ;;  %601 = vmatmul.f32.vlgmr.msrb.gmra.mxu1 %v490_v15 }
  0xbb   : > { %621 = vmatmul.f32.vlgmr.msrb.gmra.mxu2 %v490_v15  ;;  %641 = vmatmul.f32.vlgmr.msrb.gmra.mxu3 %v490_v15 }
 0x137   : > { %v582_v19 = vpop.f32.mrf.mxu0  ;;  %v602_v20 = vpop.f32.mrf.mxu1 }
 0x138   : > { %v583_v21 = vadd.f32 %v582_v19, %v557_v17  ;;  %v603_v22 = vadd.f32 %v602_v20, %v558_v18  ;;  %v735_v19 = vlaneseq }
 0x13a   : > { %v645_v23 = vsub.f32 0.0, %v583_v21  ;;  %v646_v24 = vsub.f32 0.0, %v603_v22 }
 0x13c   : > { %v649_v27 = vmul.f32 1.442695, %v645_v23  ;;  %v651_v28 = vmul.f32 1.442695, %v646_v24 }
 0x13e   : > { %1035 = vpow2.f32 %v649_v27  ;;  %v622_v29 = vpop.f32.mrf.mxu2  ;;  %v642_v30 = vpop.f32.mrf.mxu3 }
 0x13f   : > { %1037 = vpow2.f32 %v651_v28  ;;  %v623_v31 = vadd.f32 %v622_v29, %v559_v25  ;;  %v643_v32 = vadd.f32 %v642_v30, %v560_v26 }
 0x141   : > { %v647_v33 = vsub.f32 0.0, %v623_v31  ;;  %v648_v34 = vsub.f32 0.0, %v643_v32  ;;  %v740_v31 = vld [vmem:[%s1417_s8] sm:$0xff]  ;;  %v741_v32 = vld [vmem:[%s1417_s8 + $0x8] sm:$0xff] }
 0x143   : > { %v653_v35 = vmul.f32 1.442695, %v647_v33  ;;  %v655_v36 = vmul.f32 1.442695, %v648_v34  ;;  %v742_v33 = vld [vmem:[%s1417_s8 + $0x10] sm:$0xff]  ;;  %v756_v34 = vunpack.c.l.bf16 %v740_v31 }
 0x144   : > { %v1036_v37 = vpop.eup %1035 }
 0x145   : > { %v1038_v38 = vpop.eup %1037  ;;  %v1379_v39 = vadd.f32 1.0, %v1036_v37  ;;  %1039 = vpow2.f32 %v653_v35  ;;  %v757_v35 = vunpack.c.h.bf16 %v740_v31  ;;  %v743_v37 = vld [vmem:[%s1417_s8 + $0x18] sm:$0xff] }
 0x146   : > { %v658_v40 = vadd.f32 1.0, %v1038_v38  ;;  %1041 = vpow2.f32 %v655_v36  ;;  %v758_v36 = vunpack.c.l.bf16 %v741_v32  ;;  %v759_v38 = vunpack.c.h.bf16 %v741_v32  ;;  %v754_v32 = vld [vmem:[%s1417_s8 + $0x70] sm:$0xff] }
 0x147   : > { %1043 = vrcp.f32 %v1379_v39  ;;  %vm666_vm1 = vweird.f32 %v1379_v39  ;;  %v670_v10 = vand.u32 2147483647, %v1379_v39  ;;  %v672_v11 = vand.u32 2147483648, %v1379_v39 }
 0x148   : > { %1045 = vrcp.f32 %v658_v40  ;;  %v685_v53 = vand.u32 2147483647, %v658_v40  ;;  %v687_v54 = vand.u32 2147483648, %v658_v40  ;;  %vm681_vm2 = vweird.f32 %v658_v40 }
 0x149   : > { %v673_v24 = vor.u32 1.1754944e-38, %v672_v11 }
 0x14a   : > { %vm1392_vm4 = vcmp.eq.f32.partialorder %v685_v53, 8.507059e+37  ;;  %v688_v63 = vor.u32 1.1754944e-38, %v687_v54 }
 0x14b   : > { %v1040_v41 = vpop.eup %1039 }
 0x14c   : > { %v1042_v42 = vpop.eup %1041  ;;  %v659_v43 = vadd.f32 1.0, %v1040_v41 }
 0x14d   : > { %v1382_v44 = vpop.eup %1043  ;;  %v660_v45 = vadd.f32 1.0, %v1042_v42 }
 0x14e   : > { %v1046_v46 = vpop.eup %1045  ;;  %1047 = vrcp.f32 %v659_v43  ;;  %v662_v47 = vmul.f32 %v1382_v44, %v1379_v39  ;;  %v700_v0 = vand.u32 2147483647, %v659_v43  ;;  %v702_v1 = vand.u32 2147483648, %v659_v43 }
 0x14f   : > { %v677_v48 = vmul.f32 %v1046_v46, %v658_v40  ;;  %1049 = vrcp.f32 %v660_v45  ;;  %vm682_vm0 = vweird.f32 %v1046_v46  ;;  %vm667_vm6 = vweird.f32 %v1382_v44 }
 0x150   : > { %v663_v50 = vsub.f32 1.0, %v662_v47  ;;  %vm1388_vm3 = vmor %vm681_vm2, %vm682_vm0  ;;  %vm696_vm7 = vweird.f32 %v659_v43  ;;  %v715_v5 = vand.u32 2147483647, %v660_v45  ;;  %v717_v6 = vand.u32 2147483648, %v660_v45 }
 0x151   : > { %v678_v49 = vsub.f32 1.0, %v677_v48  ;;  %v703_v13 = vor.u32 1.1754944e-38, %v702_v1  ;;  %vm1406_vm10 = vmor %vm666_vm1, %vm667_vm6  ;;  %vm701_vm11 = vcmp.eq.f32.partialorder %v700_v0, 8.507059e+37  ;;  %vm711_vm12 = vweird.f32 %v660_v45 }
 0x152   : > { %v664_v58 = vmul.f32 %v1382_v44, %v663_v50  ;;  %vm716_vm14 = vcmp.eq.f32.partialorder %v715_v5, 8.507059e+37  ;;  %v718_v18 = vor.u32 1.1754944e-38, %v717_v6  ;;  %vm730_vm0 = vcmask 1042434  }
 0x153   : > { %v679_v51 = vmul.f32 %v1046_v46, %v678_v49  ;;  %vm671_vm1 = vcmp.eq.f32.partialorder %v670_v10, 8.507059e+37  ;;  %vm732_vm2 = vcmask 1041408   ;;  %v760_v39 = vunpack.c.l.bf16 %v742_v33 }
 0x154   : > { %v1048_v52 = vpop.eup %1047  ;;  %v665_v7 = vadd.f32 %v1382_v44, %v664_v58  ;;  %v762_v47 = vunpack.c.l.bf16 %v743_v37  ;;  %v770_v5 = vunpack.c.l.bf16 %v747_v61 }
 0x155   : > { %v680_v55 = vadd.f32 %v1046_v46, %v679_v51  ;;  %v692_v56 = vmul.f32 %v1048_v52, %v659_v43  ;;  %v1050_v57 = vpop.eup %1049  ;;  %vm697_vm5 = vweird.f32 %v1048_v52  ;;  %v745_v51 = vld [vmem:[%s1417_s8 + $0x28] sm:$0xff] }
 0x156   : > { %v707_v60 = vmul.f32 %v1050_v57, %v660_v45  ;;  %vm712_vm8 = vweird.f32 %v1050_v57  ;;  %vm698_vm9 = vmor %vm696_vm7, %vm697_vm5  ;;  %v669_v20 = vsel %vm1406_vm10, %v1382_v44, %v665_v7  ;;  %v744_v45 = vld [vmem:[%s1417_s8 + $0x20] sm:$0xff]  ;;  %v767_v62 = vunpack.c.h.bf16 %v745_v51  ;;  %v749_v7 = vld [vmem:[%s1417_s8 + $0x48] sm:$0xff] }
 0x157   : > { %v693_v59 = vsub.f32 1.0, %v692_v56  ;;  %v684_v2 = vsel %vm1388_vm3, %v1046_v46, %v680_v55  ;;  %vm713_vm13 = vmor %vm711_vm12, %vm712_vm8  ;;  %v674_v27 = vsel %vm671_vm1, %v673_v24, %v669_v20  ;;  %vm737_vm3 = vcmp.lt.s32.totalorder %v735_v19, 512  ;;  %v746_v56 = vld [vmem:[%s1417_s8 + $0x30] sm:$0xff] }
 0x158   : > { %v708_v4 = vsub.f32 1.0, %v707_v60  ;;  %v689_v12 = vsel %vm1392_vm4, %v688_v63, %v684_v2  ;;  %v761_v46 = vunpack.c.h.bf16 %v742_v33  ;;  %v764_v54 = vunpack.c.l.bf16 %v744_v45  ;;  %v748_v2 = vld [vmem:[%s1417_s8 + $0x40] sm:$0xff] }
 0x159   : > { %v694_v3 = vmul.f32 %v1048_v52, %v693_v59  ;;  %v725_v21 = vrot.slane %v689_v12, 7  ;;  %v766_v59 = vunpack.c.l.bf16 %v745_v51  ;;  %v768_v0 = vunpack.c.l.bf16 %v746_v56  ;;  %v750_v12 = vld [vmem:[%s1417_s8 + $0x50] sm:$0xff] }
 0x15a   : > { %v709_v9 = vmul.f32 %v1050_v57, %v708_v4  ;;  %v772_v10 = vunpack.c.l.bf16 %v748_v2  ;;  %v776_v20 = vunpack.c.l.bf16 %v750_v12 }
 0x15b   : > { %v695_v8 = vadd.f32 %v1048_v52, %v694_v3  ;;  %v729_v28 = vsel %vm728_vm15, %v674_v27, %v725_v21  ;;  %v769_v3 = vunpack.c.h.bf16 %v746_v56  ;;  %v753_v27 = vld [vmem:[%s1417_s8 + $0x68] sm:$0xff] }
 0x15c   : > { %v710_v16 = vadd.f32 %v1050_v57, %v709_v9 }
 0x15d   : > { %v699_v15 = vsel %vm698_vm9, %v1048_v52, %v695_v8  ;;  %v763_v52 = vunpack.c.h.bf16 %v743_v37  ;;  %v771_v8 = vunpack.c.h.bf16 %v747_v61  ;;  %v755_v37 = vld [vmem:[%s1417_s8 + $0x78] sm:$0xff] }
 0x15e   : > { %v704_v17 = vsel %vm701_vm11, %v703_v13, %v699_v15  ;;  %v714_v23 = vsel %vm713_vm13, %v1050_v57, %v710_v16  ;;  %v765_v57 = vunpack.c.h.bf16 %v744_v45  ;;  %v773_v13 = vunpack.c.h.bf16 %v748_v2 }
 0x15f   : > { %v726_v22 = vrot.slane %v704_v17, 6  ;;  %v719_v25 = vsel %vm716_vm14, %v718_v18, %v714_v23  ;;  %v774_v15 = vunpack.c.l.bf16 %v749_v7  ;;  %v751_v17 = vld [vmem:[%s1417_s8 + $0x58] sm:$0xff]  ;;  %v775_v18 = vunpack.c.h.bf16 %v749_v7 }
 0x160   : > { %v727_v26 = vrot.slane %v719_v25, 5  ;;  %v777_v23 = vunpack.c.h.bf16 %v750_v12  ;;  %v778_v25 = vunpack.c.l.bf16 %v751_v17 }
 0x162   : > { %v731_v29 = vsel %vm730_vm0, %v726_v22, %v727_v26  ;;  %v752_v22 = vld [vmem:[%s1417_s8 + $0x60] sm:$0xff] }
 0x163   : > { %v733_v30 = vsel %vm732_vm2, %v729_v28, %v731_v29  ;;  %v779_v28 = vunpack.c.h.bf16 %v751_v17  ;;  %v781_v33 = vunpack.c.h.bf16 %v752_v22 }
 0x164   : > { %739 = vst.msk [vmem:[#allocation2] sm:$0xf] %vm737_vm3, %v733_v30  ;;  %v780_v30 = vunpack.c.l.bf16 %v752_v22 }
 0x16b   : > { %v788_v40 = vld [vmem:[#allocation2] sm:$0xf] }
 0x16c   : > { %v1424_v41 = vperm.slane %v788_v40, 0  ;;  %v1426_v42 = vperm.slane %v788_v40, 1  ;;  %v1428_v43 = vperm.slane %v788_v40, 2  ;;  %v1430_v44 = vperm.slane %v788_v40, 3 }
 0x16d   : > { %v784_v40 = vunpack.c.l.bf16 %v754_v32 }
 0x16e   : > { %v798_v48 = vmul.f32 %v1424_v41, %v756_v34  ;;  %v799_v49 = vmul.f32 %v1426_v42, %v757_v35  ;;  %v800_v50 = vmul.f32 %v1428_v43, %v758_v36  ;;  %v801_v53 = vmul.f32 %v1430_v44, %v759_v38 }
 0x16f   : > { %v802_v55 = vmul.f32 %v1424_v41, %v760_v39  ;;  %v803_v58 = vmul.f32 %v1426_v42, %v761_v46  ;;  %v804_v60 = vmul.f32 %v1428_v43, %v762_v47  ;;  %v805_v63 = vmul.f32 %v1430_v44, %v763_v52 }
 0x170   : > { %830 = vst [vmem:[%s1435_s21] sm:$0xff] %v798_v48  ;;  %v806_v1 = vmul.f32 %v1424_v41, %v764_v54  ;;  %v807_v4 = vmul.f32 %v1426_v42, %v765_v57  ;;  %v808_v6 = vmul.f32 %v1428_v43, %v766_v59  ;;  %v809_v9 = vmul.f32 %v1430_v44, %v767_v62 }
 0x171   : > { %831 = vst [vmem:[%s1435_s21 + $0x8] sm:$0xff] %v799_v49  ;;  %v810_v11 = vmul.f32 %v1424_v41, %v768_v0  ;;  %v811_v14 = vmul.f32 %v1426_v42, %v769_v3  ;;  %v812_v16 = vmul.f32 %v1428_v43, %v770_v5  ;;  %v813_v19 = vmul.f32 %v1430_v44, %v771_v8 }
 0x172   : > { %832 = vst [vmem:[%s1435_s21 + $0x10] sm:$0xff] %v800_v50  ;;  %v814_v21 = vmul.f32 %v1424_v41, %v772_v10  ;;  %v815_v24 = vmul.f32 %v1426_v42, %v773_v13  ;;  %v816_v26 = vmul.f32 %v1428_v43, %v774_v15  ;;  %v817_v29 = vmul.f32 %v1430_v44, %v775_v18 }
 0x173   : > { %833 = vst [vmem:[%s1435_s21 + $0x18] sm:$0xff] %v801_v53  ;;  %v818_v31 = vmul.f32 %v1424_v41, %v776_v20  ;;  %v819_v34 = vmul.f32 %v1426_v42, %v777_v23  ;;  %v782_v35 = vunpack.c.l.bf16 %v753_v27  ;;  %v820_v36 = vmul.f32 %v1428_v43, %v778_v25 }
 0x174   : > { %834 = vst [vmem:[%s1435_s21 + $0x20] sm:$0xff] %v802_v55  ;;  %v783_v38 = vunpack.c.h.bf16 %v753_v27  ;;  %v821_v39 = vmul.f32 %v1430_v44, %v779_v28  ;;  %v822_v45 = vmul.f32 %v1424_v41, %v780_v30  ;;  %v785_v46 = vunpack.c.h.bf16 %v754_v32 }
 0x175   : > { %835 = vst [vmem:[%s1435_s21 + $0x28] sm:$0xff] %v803_v58  ;;  %v823_v47 = vmul.f32 %v1426_v42, %v781_v33  ;;  %v786_v48 = vunpack.c.l.bf16 %v755_v37  ;;  %v824_v49 = vmul.f32 %v1428_v43, %v782_v35  ;;  %v787_v50 = vunpack.c.h.bf16 %v755_v37 }
 0x176   : > { %836 = vst [vmem:[%s1435_s21 + $0x30] sm:$0xff] %v804_v60  ;;  %v825_v51 = vmul.f32 %v1430_v44, %v783_v38  ;;  %v826_v52 = vmul.f32 %v1424_v41, %v784_v40  ;;  %v827_v53 = vmul.f32 %v1426_v42, %v785_v46 }
 0x177   : > { %837 = vst [vmem:[%s1435_s21 + $0x38] sm:$0xff] %v805_v63  ;;  %v828_v54 = vmul.f32 %v1428_v43, %v786_v48  ;;  %v829_v55 = vmul.f32 %v1430_v44, %v787_v50 }
 0x178   : > { %838 = vst [vmem:[%s1435_s21 + $0x40] sm:$0xff] %v806_v1 }
 0x179   : > { %839 = vst [vmem:[%s1435_s21 + $0x48] sm:$0xff] %v807_v4 }
 0x17a   : > { %840 = vst [vmem:[%s1435_s21 + $0x50] sm:$0xff] %v808_v6 }
 0x17b   : > { %841 = vst [vmem:[%s1435_s21 + $0x58] sm:$0xff] %v809_v9 }
 0x17c   : > { %842 = vst [vmem:[%s1435_s21 + $0x60] sm:$0xff] %v810_v11 }
 0x17d   : > { %843 = vst [vmem:[%s1435_s21 + $0x68] sm:$0xff] %v811_v14 }
 0x17e   : > { %844 = vst [vmem:[%s1435_s21 + $0x70] sm:$0xff] %v812_v16 }
 0x17f   : > { %845 = vst [vmem:[%s1435_s21 + $0x78] sm:$0xff] %v813_v19 }
 0x180   : > { %846 = vst [vmem:[%s1435_s21 + $0x80] sm:$0xff] %v814_v21 }
 0x181   : > { %847 = vst [vmem:[%s1435_s21 + $0x88] sm:$0xff] %v815_v24 }
 0x182   : > { %848 = vst [vmem:[%s1435_s21 + $0x90] sm:$0xff] %v816_v26 }
 0x183   : > { %849 = vst [vmem:[%s1435_s21 + $0x98] sm:$0xff] %v817_v29 }
 0x184   : > { %850 = vst [vmem:[%s1435_s21 + $0xa0] sm:$0xff] %v818_v31 }
 0x185   : > { %851 = vst [vmem:[%s1435_s21 + $0xa8] sm:$0xff] %v819_v34 }
 0x186   : > { %852 = vst [vmem:[%s1435_s21 + $0xb0] sm:$0xff] %v820_v36 }
 0x187   : > { %853 = vst [vmem:[%s1435_s21 + $0xb8] sm:$0xff] %v821_v39 }
 0x188   : > { %854 = vst [vmem:[%s1435_s21 + $0xc0] sm:$0xff] %v822_v45 }
 0x189   : > { %855 = vst [vmem:[%s1435_s21 + $0xc8] sm:$0xff] %v823_v47 }
 0x18a   : > { %856 = vst [vmem:[%s1435_s21 + $0xd0] sm:$0xff] %v824_v49 }
 0x18b   : > { %857 = vst [vmem:[%s1435_s21 + $0xd8] sm:$0xff] %v825_v51 }
 0x18c   : > { %858 = vst [vmem:[%s1435_s21 + $0xe0] sm:$0xff] %v826_v52 }
 0x18d   : > { %859 = vst [vmem:[%s1435_s21 + $0xe8] sm:$0xff] %v827_v53 }
 0x18e   : > { %860 = vst [vmem:[%s1435_s21 + $0xf0] sm:$0xff] %v828_v54 }
 0x18f   : > { %861 = vst [vmem:[%s1435_s21 + $0xf8] sm:$0xff] %v829_v55 }
 0x190 PF: > { %s17_s23 = sadd.s32 1, %s1107_s23   ;;  %s1535_s21 = smov %s1103_s22 }
 0x191   : > { %p14_p8 = scmp.ge.s32.totalorder %s17_s23, 4   ;;  %s1536_s22 = smov %s1538_s25 }
 0x193   :  { %16 = sbr.rel (!%p14_p8) target bundleno = 2 (0x2), region = 86 }
 0x198   :  { %894 = vsyncpa [#allocation4], 1 }
 0x199   :  { %896 = vsyncpa [#allocation4 + $0x1], 1 }

// kernel: dense_temporal_block.14
= control target key start
LH: loop header
LB: loop body
LE: loop exit
PB: predicated region body
PF: predicated region fallthrough
CT: control target
= control target key end

     0   :  { %s4387_s17 = smov 0   ;;  %s4389_s18 = smov 0   ;;  %s6089_s0 = inlined_call_operand.vmem [shape: bf16[2,64,512], index: 0, kind: input, shape index: {}]   ;;  %s6090_s1 = inlined_call_operand.vmem [shape: bf16[2,64,64], index: 1, kind: input, shape index: {}]   ;;  %s6091_s2 = inlined_call_operand.vmem [shape: bf16[2,64,64], index: 2, kind: input, shape index: {}]   ;;  %s6092_s3 = inlined_call_operand.vmem [shape: bf16[2,64,64], index: 3, kind: input, shape index: {}]   ;;  %s6093_s4 = inlined_call_operand.vmem [shape: bf16[512,512], index: 4, kind: input, shape index: {}]   ;;  %s6094_s5 = inlined_call_operand.vmem [shape: bf16[64,512], index: 5, kind: input, shape index: {}]   ;;  %s6095_s6 = inlined_call_operand.vmem [shape: bf16[64,512], index: 6, kind: input, shape index: {}]   ;;  %s6096_s7 = inlined_call_operand.vmem [shape: bf16[64,512], index: 7, kind: input, shape index: {}]   ;;  %s6097_s8 = inlined_call_operand.vmem [shape: f32[1,512], index: 8, kind: input, shape index: {}]   ;;  %s6098_s9 = inlined_call_operand.vmem [shape: f32[1,512], index: 9, kind: input, shape index: {}]   ;;  %s6099_s10 = inlined_call_operand.vmem [shape: bf16[2,64,512], index: 10, kind: output, shape index: {0}]   ;;  %s6100_s11 = inlined_call_operand.vmem [shape: f32[2,1,512], index: 11, kind: output, shape index: {1}]  }
   0x1   :  { %s4391_s19 = smov 0  }
   0x2 LB: > { %s34_s20 = sadd.s32 1, %s4320_s18  ;;  %p3190_p0 = scmp.ge.s32.totalorder %s4324_s19, 1  ;;  %s4324_s19 = sphi %s4391_s19, %s22_s19   ;;  %s4320_s18 = sphi %s4389_s18, %s6134_s18   ;;  %s4316_s17 = sphi %s4387_s17, %s6133_s17  }
   0x3   : > { %p36_p1 = scmp.ge.s32.totalorder %s34_s20, 2  ;;  %p413_p2 = scmp.lt.s32.totalorder %s4324_s19, 3 }
   0x5   : > { %s6136_s20 = smov (%p36_p1, %s34_s20), 0  ;;  %p414_p3 = pnand %p3190_p0, %p413_p2 }
   0x7   : > { %417 = sbr.rel (%p414_p3) target bundleno = 634 (0x27a), region = 60 }
   0xc   : > { %v3268_v0 = vld [vmem:[%s6094_s5 + $0x60] sm:$0xf]  ;;  %v4235_v1 = vld [vmem:[%s6094_s5 + $0x6c] sm:$0xf0]  ;;  %v4233_v2 = vld [vmem:[%s6094_s5 + $0x64] sm:$0xf] }
   0xd   : > { %v3269_v3 = vor.u32 %v4235_v1, %v3268_v0  ;;  %v3270_v4 = vld [vmem:[%s6094_s5 + $0x70] sm:$0xf0]  ;;  %v3276_v5 = vld [vmem:[%s6094_s5 + $0x68] sm:$0xf]  ;;  %v4236_v6 = vld [vmem:[%s6094_s5 + $0x74] sm:$0xf0] }
   0xe   : > { %v3273_v7 = vor.u32 %v4233_v2, %v3270_v4  ;;  %v3277_v8 = vor.u32 %v4236_v6, %v3276_v5  ;;  %v4234_v9 = vld [vmem:[%s6094_s5 + $0x6c] sm:$0xf]  ;;  %v3278_v10 = vld [vmem:[%s6094_s5 + $0x78] sm:$0xf0]  ;;  %v3252_v11 = vld [vmem:[%s6094_s5 + $0x40] sm:$0xf] }
   0xf   : > { %836 = vmatpush.bf16.msra.mxu0 %v3269_v3  ;;  %v3281_v12 = vor.u32 %v4234_v9, %v3278_v10  ;;  %v4231_v13 = vld [vmem:[%s6094_s5 + $0x4c] sm:$0xf0]  ;;  %v4229_v14 = vld [vmem:[%s6094_s5 + $0x44] sm:$0xf]  ;;  %v3254_v15 = vld [vmem:[%s6094_s5 + $0x50] sm:$0xf0] }
  0x10   : > { %865 = vmatpush.bf16.msra.mxu1 %v3273_v7  ;;  %894 = vmatpush.bf16.msra.mxu2 %v3277_v8  ;;  %v3253_v16 = vor.u32 %v4231_v13, %v3252_v11  ;;  %v3257_v17 = vor.u32 %v4229_v14, %v3254_v15  ;;  %v3260_v18 = vld [vmem:[%s6094_s5 + $0x48] sm:$0xf]  ;;  %v4232_v19 = vld [vmem:[%s6094_s5 + $0x54] sm:$0xf0]  ;;  %v4230_v20 = vld [vmem:[%s6094_s5 + $0x4c] sm:$0xf] }
  0x11   : > { %923 = vmatpush.bf16.msra.mxu3 %v3281_v12  ;;  %v3261_v21 = vor.u32 %v4232_v19, %v3260_v18  ;;  %v3262_v22 = vld [vmem:[%s6094_s5 + $0x58] sm:$0xf0]  ;;  %v3236_v23 = vld [vmem:[%s6094_s5 + $0x20] sm:$0xf]  ;;  %v4227_v24 = vld [vmem:[%s6094_s5 + $0x2c] sm:$0xf0] }
  0x12   : > { %v3265_v25 = vor.u32 %v4230_v20, %v3262_v22  ;;  %v4225_v26 = vld [vmem:[%s6094_s5 + $0x24] sm:$0xf]  ;;  %v3238_v27 = vld [vmem:[%s6094_s5 + $0x30] sm:$0xf0]  ;;  %v3244_v28 = vld [vmem:[%s6094_s5 + $0x28] sm:$0xf]  ;;  %v3237_v29 = vor.u32 %v4227_v24, %v3236_v23 }
  0x13   : > { %837 = vmatpush.bf16.msra.mxu0 %v3253_v16  ;;  %v4228_v30 = vld [vmem:[%s6094_s5 + $0x34] sm:$0xf0]  ;;  %v4226_v31 = vld [vmem:[%s6094_s5 + $0x2c] sm:$0xf]  ;;  %v3246_v32 = vld [vmem:[%s6094_s5 + $0x38] sm:$0xf0]  ;;  %v3241_v33 = vor.u32 %v4225_v26, %v3238_v27 }
  0x14   : > { %866 = vmatpush.bf16.msra.mxu1 %v3257_v17  ;;  %895 = vmatpush.bf16.msra.mxu2 %v3261_v21  ;;  %v3245_v34 = vor.u32 %v4228_v30, %v3244_v28  ;;  %v3220_v35 = vld [vmem:[%s6094_s5] sm:$0xf]  ;;  %v4223_v36 = vld [vmem:[%s6094_s5 + $0xc] sm:$0xf0]  ;;  %v4221_v37 = vld [vmem:[%s6094_s5 + $0x4] sm:$0xf]  ;;  %v3249_v38 = vor.u32 %v4226_v31, %v3246_v32 }
  0x15   : > { %924 = vmatpush.bf16.msra.mxu3 %v3265_v25  ;;  %v3222_v39 = vld [vmem:[%s6094_s5 + $0x10] sm:$0xf0]  ;;  %v3228_v40 = vld [vmem:[%s6094_s5 + $0x8] sm:$0xf]  ;;  %v4224_v41 = vld [vmem:[%s6094_s5 + $0x14] sm:$0xf0]  ;;  %v3221_v44 = vor.u32 %v4223_v36, %v3220_v35 }
  0x16   : > { %v4222_v42 = vld [vmem:[%s6094_s5 + $0xc] sm:$0xf]  ;;  %v3230_v43 = vld [vmem:[%s6094_s5 + $0x18] sm:$0xf0]  ;;  %p495_p4 = scmp.lt.s32.totalorder %s4316_s17, 1  ;;  %v3225_v48 = vor.u32 %v4221_v37, %v3222_v39  ;;  %v3229_v49 = vor.u32 %v4224_v41, %v3228_v40  ;;  %vm819_vm0 = vcmask 523264  }
  0x17   : > { %838 = vmatpush.bf16.msra.mxu0 %v3237_v29  ;;  %v3732_v45 = vld [vmem:[%s6093_s4 + $0x2e0] sm:$0xf]  ;;  %v4183_v46 = vld [vmem:[%s6093_s4 + $0x2ec] sm:$0xf0]  ;;  %v3233_v52 = vor.u32 %v4222_v42, %v3230_v43  ;;  %vm2992_vm2 = vcmask 1040384   ;;  %vm2994_vm3 = vcmask 1042434  }
  0x18   : > { %v3860_v47 = vld [vmem:[%s6093_s4 + $0x3e0] sm:$0xf]  ;;  %867 = vmatpush.bf16.msra.mxu1 %v3241_v33  ;;  %896 = vmatpush.bf16.msra.mxu2 %v3245_v34  ;;  %s6138_s17 = smov (!%p495_p4, %s4316_s17), 1  ;;  %v4215_v50 = vld [vmem:[%s6093_s4 + $0x3ec] sm:$0xf0]  ;;  %v3733_v53 = vor.u32 %v4183_v46, %v3732_v45  ;;  %vm2996_vm4 = vcmask 1041408  }
  0x19   : > { %v3604_v51 = vld [vmem:[%s6093_s4 + $0x1e0] sm:$0xf]  ;;  %925 = vmatpush.bf16.msra.mxu3 %v3249_v38  ;;  %v4151_v54 = vld [vmem:[%s6093_s4 + $0x1ec] sm:$0xf0]  ;;  %s4532_s26 = sshll.u32 %s6138_s17, 5  ;;  %v3861_v57 = vor.u32 %v4215_v50, %v3860_v47  ;;  %s4068_s25 = sshll.u32 %s6138_s17, 7 }
  0x1a   : > { %v3476_v55 = vld [vmem:[%s6093_s4 + $0xe0] sm:$0xf]  ;;  %v4119_v56 = vld [vmem:[%s6093_s4 + $0xec] sm:$0xf0]  ;;  %s4544_s14 = scalar_lea.vmem %s6090_s1, %s4532_s26  ;;  %v3605_v63 = vor.u32 %v4151_v54, %v3604_v51  ;;  %s4812_s27 = scalar_lea.vmem %s6089_s0, %s4068_s25 }
  0x1b   : > { %v3716_v58 = vld [vmem:[%s6093_s4 + $0x2c0] sm:$0xf]  ;;  %v4179_v59 = vld [vmem:[%s6093_s4 + $0x2cc] sm:$0xf0]  ;;  %839 = vmatpush.bf16.msra.mxu0 %v3221_v44  ;;  %v3477_v0 = vor.u32 %v4119_v56, %v3476_v55  ;;  %v4218_v35 = vld [vmem:[%s4544_s14 + $0x8] sm:$0xff]  ;;  %s5695_s16 = scalar_lea.vmem %s6091_s2, %s4532_s26  ;;  %s5796_s15 = scalar_lea.vmem %s6092_s3, %s4532_s26 }
  0x1c   : > { %v3844_v60 = vld [vmem:[%s6093_s4 + $0x3c0] sm:$0xf]  ;;  %v4211_v61 = vld [vmem:[%s6093_s4 + $0x3cc] sm:$0xf0]  ;;  %868 = vmatpush.bf16.msra.mxu1 %v3225_v48  ;;  %897 = vmatpush.bf16.msra.mxu2 %v3229_v49  ;;  %v3717_v1 = vor.u32 %v4179_v59, %v3716_v58  ;;  %s5933_s28 = scalar_lea.vmem %s6099_s10, %s4068_s25  ;;  %s3201_s25 = sshll.u32 %s6138_s17, 2 }
  0x1d   : > { %v4217_v62 = vld [vmem:[%s4544_s14] sm:$0xff]  ;;  %926 = vmatpush.bf16.msra.mxu3 %v3233_v52  ;;  %v4147_v3 = vld [vmem:[%s6093_s4 + $0x1cc] sm:$0xf0]  ;;  %v3845_v5 = vor.u32 %v4211_v61, %v3844_v60  ;;  %s6032_s12 = scalar_lea.vmem %s6100_s11, %s3201_s25 }
  0x1e   : > { %v3588_v2 = vld [vmem:[%s6093_s4 + $0x1c0] sm:$0xf]  ;;  %3282 = vmatmul.msk.bf16.vlgmr.msra.gmra.mxu0 %vm819_vm0, %v4217_v62  ;;  %v4115_v6 = vld [vmem:[%s6093_s4 + $0xcc] sm:$0xf0] }
  0x1f   : > { %v3460_v4 = vld [vmem:[%s6093_s4 + $0xc0] sm:$0xf]  ;;  %v4175_v8 = vld [vmem:[%s6093_s4 + $0x2ac] sm:$0xf0]  ;;  %3286 = vmatmul.msk.bf16.vlgmr.msra.gmra.mxu1 %vm819_vm0, %v4217_v62  ;;  %3290 = vmatmul.msk.bf16.vlgmr.msra.gmra.mxu2 %vm819_vm0, %v4217_v62  ;;  %v3589_v11 = vor.u32 %v4147_v3, %v3588_v2 }
  0x20   : > { %1726 = vmatpush.bf16.msrb.mxu2 %v3733_v53  ;;  %v3700_v7 = vld [vmem:[%s6093_s4 + $0x2a0] sm:$0xf]  ;;  %v4207_v10 = vld [vmem:[%s6093_s4 + $0x3ac] sm:$0xf0]  ;;  %3294 = vmatmul.msk.bf16.vlgmr.msra.gmra.mxu3 %vm819_vm0, %v4217_v62  ;;  %v3461_v12 = vor.u32 %v4115_v6, %v3460_v4 }
  0x21   : > { %1755 = vmatpush.bf16.msrb.mxu3 %v3861_v57  ;;  %v3828_v9 = vld [vmem:[%s6093_s4 + $0x3a0] sm:$0xf]  ;;  %1697 = vmatpush.bf16.msrb.mxu1 %v3605_v63  ;;  %v3701_v13 = vor.u32 %v4175_v8, %v3700_v7  ;;  %v4143_v15 = vld [vmem:[%s6093_s4 + $0x1ac] sm:$0xf0] }
  0x22   : > { %1668 = vmatpush.bf16.msrb.mxu0 %v3477_v0  ;;  %v3572_v14 = vld [vmem:[%s6093_s4 + $0x1a0] sm:$0xf]  ;;  %v3829_v17 = vor.u32 %v4207_v10, %v3828_v9  ;;  %v4111_v18 = vld [vmem:[%s6093_s4 + $0xac] sm:$0xf0] }
  0x23   : > { %v3444_v16 = vld [vmem:[%s6093_s4 + $0xa0] sm:$0xf]  ;;  %v4171_v20 = vld [vmem:[%s6093_s4 + $0x28c] sm:$0xf0]  ;;  %v3573_v23 = vor.u32 %v4143_v15, %v3572_v14 }
  0x24   : > { %1727 = vmatpush.bf16.msrb.mxu2 %v3717_v1  ;;  %v3684_v19 = vld [vmem:[%s6093_s4 + $0x280] sm:$0xf]  ;;  %v4203_v22 = vld [vmem:[%s6093_s4 + $0x38c] sm:$0xf0]  ;;  %v3445_v24 = vor.u32 %v4111_v18, %v3444_v16 }
  0x25   : > { %1756 = vmatpush.bf16.msrb.mxu3 %v3845_v5  ;;  %v3812_v21 = vld [vmem:[%s6093_s4 + $0x380] sm:$0xf]  ;;  %1698 = vmatpush.bf16.msrb.mxu1 %v3589_v11  ;;  %v3685_v25 = vor.u32 %v4171_v20, %v3684_v19  ;;  %v4139_v27 = vld [vmem:[%s6093_s4 + $0x18c] sm:$0xf0]  ;;  %v4181_v19 = vld [vmem:[%s6093_s4 + $0x2e4] sm:$0xf] }
  0x26   : > { %1669 = vmatpush.bf16.msrb.mxu0 %v3461_v12  ;;  %v3556_v26 = vld [vmem:[%s6093_s4 + $0x180] sm:$0xf]  ;;  %v3813_v29 = vor.u32 %v4203_v22, %v3812_v21  ;;  %v4107_v30 = vld [vmem:[%s6093_s4 + $0x8c] sm:$0xf0]  ;;  %v3734_v20 = vld [vmem:[%s6093_s4 + $0x2f0] sm:$0xf0] }
  0x27   : > { %v3428_v28 = vld [vmem:[%s6093_s4 + $0x80] sm:$0xf]  ;;  %v4167_v32 = vld [vmem:[%s6093_s4 + $0x26c] sm:$0xf0]  ;;  %v3557_v36 = vor.u32 %v4139_v27, %v3556_v26  ;;  %v4213_v21 = vld [vmem:[%s6093_s4 + $0x3e4] sm:$0xf]  ;;  %v3737_v22 = vor.u32 %v4181_v19, %v3734_v20 }
  0x28   : > { %1728 = vmatpush.bf16.msrb.mxu2 %v3701_v13  ;;  %v3668_v31 = vld [vmem:[%s6093_s4 + $0x260] sm:$0xf]  ;;  %v4199_v34 = vld [vmem:[%s6093_s4 + $0x36c] sm:$0xf0]  ;;  %v3429_v37 = vor.u32 %v4107_v30, %v3428_v28  ;;  %v4117_v28 = vld [vmem:[%s6093_s4 + $0xe4] sm:$0xf] }
  0x29   : > { %1757 = vmatpush.bf16.msrb.mxu3 %v3829_v17  ;;  %v3796_v33 = vld [vmem:[%s6093_s4 + $0x360] sm:$0xf]  ;;  %1699 = vmatpush.bf16.msrb.mxu1 %v3573_v23  ;;  %v3669_v38 = vor.u32 %v4167_v32, %v3668_v31  ;;  %v4135_v40 = vld [vmem:[%s6093_s4 + $0x16c] sm:$0xf0]  ;;  %v3862_v23 = vld [vmem:[%s6093_s4 + $0x3f0] sm:$0xf0] }
  0x2a   : > { %1670 = vmatpush.bf16.msrb.mxu0 %v3445_v24  ;;  %v3540_v39 = vld [vmem:[%s6093_s4 + $0x160] sm:$0xf]  ;;  %v3797_v42 = vor.u32 %v4199_v34, %v3796_v33  ;;  %v4103_v43 = vld [vmem:[%s6093_s4 + $0x6c] sm:$0xf0]  ;;  %v4149_v24 = vld [vmem:[%s6093_s4 + $0x1e4] sm:$0xf]  ;;  %v3865_v26 = vor.u32 %v4213_v21, %v3862_v23 }
  0x2b   : > { %v3412_v41 = vld [vmem:[%s6093_s4 + $0x60] sm:$0xf]  ;;  %v4163_v45 = vld [vmem:[%s6093_s4 + $0x24c] sm:$0xf0]  ;;  %v3541_v48 = vor.u32 %v4135_v40, %v3540_v39  ;;  %v4177_v30 = vld [vmem:[%s6093_s4 + $0x2c4] sm:$0xf] }
  0x2c   : > { %1729 = vmatpush.bf16.msrb.mxu2 %v3685_v25  ;;  %v3652_v44 = vld [vmem:[%s6093_s4 + $0x240] sm:$0xf]  ;;  %v4195_v47 = vld [vmem:[%s6093_s4 + $0x34c] sm:$0xf0]  ;;  %v3413_v49 = vor.u32 %v4103_v43, %v3412_v41  ;;  %v3606_v25 = vld [vmem:[%s6093_s4 + $0x1f0] sm:$0xf0] }
  0x2d   : > { %1758 = vmatpush.bf16.msrb.mxu3 %v3813_v29  ;;  %v3780_v46 = vld [vmem:[%s6093_s4 + $0x340] sm:$0xf]  ;;  %1700 = vmatpush.bf16.msrb.mxu1 %v3557_v36  ;;  %v3653_v50 = vor.u32 %v4163_v45, %v3652_v44  ;;  %v4131_v52 = vld [vmem:[%s6093_s4 + $0x14c] sm:$0xf0]  ;;  %v3609_v27 = vor.u32 %v4149_v24, %v3606_v25  ;;  %v3478_v29 = vld [vmem:[%s6093_s4 + $0xf0] sm:$0xf0] }
  0x2e   : > { %1671 = vmatpush.bf16.msrb.mxu0 %v3429_v37  ;;  %v3524_v51 = vld [vmem:[%s6093_s4 + $0x140] sm:$0xf]  ;;  %v3781_v53 = vor.u32 %v4195_v47, %v3780_v46  ;;  %v4099_v56 = vld [vmem:[%s6093_s4 + $0x4c] sm:$0xf0]  ;;  %v3481_v31 = vor.u32 %v4117_v28, %v3478_v29  ;;  %v3718_v32 = vld [vmem:[%s6093_s4 + $0x2d0] sm:$0xf0] }
  0x2f   : > { %3283 = vmatmul.msk.bf16.gmra.mxu0 %vm819_vm0, %v4218_v35  ;;  %3287 = vmatmul.msk.bf16.gmra.mxu1 %vm819_vm0, %v4218_v35  ;;  %v3525_v54 = vor.u32 %v4131_v52, %v3524_v51  ;;  %v3396_v55 = vld [vmem:[%s6093_s4 + $0x40] sm:$0xf]  ;;  %v4159_v59 = vld [vmem:[%s6093_s4 + $0x22c] sm:$0xf0]  ;;  %v4209_v33 = vld [vmem:[%s6093_s4 + $0x3c4] sm:$0xf] }
  0x30   : > { %1730 = vmatpush.bf16.msrb.mxu2 %v3669_v38  ;;  %3295 = vmatmul.msk.bf16.gmra.mxu3 %vm819_vm0, %v4218_v35  ;;  %v3636_v57 = vld [vmem:[%s6093_s4 + $0x220] sm:$0xf]  ;;  %v3397_v58 = vor.u32 %v4099_v56, %v3396_v55  ;;  %v4191_v61 = vld [vmem:[%s6093_s4 + $0x32c] sm:$0xf0]  ;;  %v3846_v34 = vld [vmem:[%s6093_s4 + $0x3d0] sm:$0xf0] }
  0x31   : > { %1759 = vmatpush.bf16.msrb.mxu3 %v3797_v42  ;;  %3291 = vmatmul.msk.bf16.gmra.mxu2 %vm819_vm0, %v4218_v35  ;;  %v3764_v60 = vld [vmem:[%s6093_s4 + $0x320] sm:$0xf]  ;;  %v3637_v62 = vor.u32 %v4159_v59, %v3636_v57  ;;  %v4127_v1 = vld [vmem:[%s6093_s4 + $0x12c] sm:$0xf0]  ;;  %v3721_v35 = vor.u32 %v4177_v30, %v3718_v32  ;;  %v3849_v36 = vor.u32 %v4209_v33, %v3846_v34  ;;  %v4145_v37 = vld [vmem:[%s6093_s4 + $0x1c4] sm:$0xf] }
  0x32   : > { %1701 = vmatpush.bf16.msrb.mxu1 %v3541_v48  ;;  %1672 = vmatpush.bf16.msrb.mxu0 %v3413_v49  ;;  %v3765_v63 = vor.u32 %v4191_v61, %v3764_v60  ;;  %v3508_v0 = vld [vmem:[%s6093_s4 + $0x120] sm:$0xf]  ;;  %v4095_v3 = vld [vmem:[%s6093_s4 + $0x2c] sm:$0xf0]  ;;  %v3590_v38 = vld [vmem:[%s6093_s4 + $0x1d0] sm:$0xf0] }
  0x33   : > { %v3380_v2 = vld [vmem:[%s6093_s4 + $0x20] sm:$0xf]  ;;  %v4155_v5 = vld [vmem:[%s6093_s4 + $0x20c] sm:$0xf0]  ;;  %v3509_v6 = vor.u32 %v4127_v1, %v3508_v0  ;;  %v3593_v39 = vor.u32 %v4145_v37, %v3590_v38  ;;  %v4220_v40 = vld [vmem:[%s4544_s14 + $0x18] sm:$0xff] }
  0x34   : > { %1731 = vmatpush.bf16.msrb.mxu2 %v3653_v50  ;;  %v3620_v4 = vld [vmem:[%s6093_s4 + $0x200] sm:$0xf]  ;;  %v4187_v8 = vld [vmem:[%s6093_s4 + $0x30c] sm:$0xf0]  ;;  %v3381_v9 = vor.u32 %v4095_v3, %v3380_v2  ;;  %v4113_v41 = vld [vmem:[%s6093_s4 + $0xc4] sm:$0xf] }
  0x35   : > { %1760 = vmatpush.bf16.msrb.mxu3 %v3781_v53  ;;  %v3748_v7 = vld [vmem:[%s6093_s4 + $0x300] sm:$0xf]  ;;  %v3621_v10 = vor.u32 %v4155_v5, %v3620_v4  ;;  %v4123_v12 = vld [vmem:[%s6093_s4 + $0x10c] sm:$0xf0]  ;;  %v3462_v42 = vld [vmem:[%s6093_s4 + $0xd0] sm:$0xf0] }
  0x36   : > { %1702 = vmatpush.bf16.msrb.mxu1 %v3525_v54  ;;  %1673 = vmatpush.bf16.msrb.mxu0 %v3397_v58  ;;  %v3492_v11 = vld [vmem:[%s6093_s4 + $0x100] sm:$0xf]  ;;  %v3749_v13 = vor.u32 %v4187_v8, %v3748_v7  ;;  %v4091_v15 = vld [vmem:[%s6093_s4 + $0xc] sm:$0xf0]  ;;  %v4173_v43 = vld [vmem:[%s6093_s4 + $0x2a4] sm:$0xf]  ;;  %v3465_v44 = vor.u32 %v4113_v41, %v3462_v42 }
  0x37   : > { %v3364_v14 = vld [vmem:[%s6093_s4] sm:$0xf]  ;;  %v3493_v16 = vor.u32 %v4123_v12, %v3492_v11  ;;  %v4219_v18 = vld [vmem:[%s4544_s14 + $0x10] sm:$0xff]  ;;  %v4205_v46 = vld [vmem:[%s6093_s4 + $0x3a4] sm:$0xf] }
  0x38   : > { %1732 = vmatpush.bf16.msrb.mxu2 %v3637_v62  ;;  %v3365_v17 = vor.u32 %v4091_v15, %v3364_v14  ;;  %v3702_v45 = vld [vmem:[%s6093_s4 + $0x2b0] sm:$0xf0]  ;;  %v4141_v50 = vld [vmem:[%s6093_s4 + $0x1a4] sm:$0xf]  ;;  %v3300_v1 = vld [vmem:[%s4812_s27] sm:$0xf] }
  0x39   : > { %1761 = vmatpush.bf16.msrb.mxu3 %v3765_v63  ;;  %v3830_v47 = vld [vmem:[%s6093_s4 + $0x3b0] sm:$0xf0]  ;;  %v3705_v48 = vor.u32 %v4173_v43, %v3702_v45  ;;  %v4109_v52 = vld [vmem:[%s6093_s4 + $0xa4] sm:$0xf]  ;;  %v4075_v2 = vld [vmem:[%s4812_s27 + $0xc] sm:$0xf0] }
  0x3a   : > { %1703 = vmatpush.bf16.msrb.mxu1 %v3509_v6  ;;  %1674 = vmatpush.bf16.msrb.mxu0 %v3381_v9  ;;  %v3833_v49 = vor.u32 %v4205_v46, %v3830_v47  ;;  %v3574_v51 = vld [vmem:[%s6093_s4 + $0x1b0] sm:$0xf0]  ;;  %v4169_v55 = vld [vmem:[%s6093_s4 + $0x284] sm:$0xf]  ;;  %v3308_v5 = vld [vmem:[%s4812_s27 + $0x8] sm:$0xf]  ;;  %v4834_v9 = vor.u32 %v4075_v2, %v3300_v1 }
  0x3b   : > { %v3577_v53 = vor.u32 %v4141_v50, %v3574_v51  ;;  %v3446_v54 = vld [vmem:[%s6093_s4 + $0xb0] sm:$0xf0]  ;;  %v4201_v59 = vld [vmem:[%s6093_s4 + $0x384] sm:$0xf]  ;;  %v4076_v6 = vld [vmem:[%s4812_s27 + $0x14] sm:$0xf0] }
  0x3c   : > { %1733 = vmatpush.bf16.msrb.mxu2 %v3621_v10  ;;  %v3686_v56 = vld [vmem:[%s6093_s4 + $0x290] sm:$0xf0]  ;;  %v3449_v57 = vor.u32 %v4109_v52, %v3446_v54  ;;  %v4137_v61 = vld [vmem:[%s6093_s4 + $0x184] sm:$0xf]  ;;  %v4074_v7 = vld [vmem:[%s4812_s27 + $0xc] sm:$0xf]  ;;  %v4838_v11 = vor.u32 %v4076_v6, %v3308_v5 }
  0x3d   : > { %1762 = vmatpush.bf16.msrb.mxu3 %v3749_v13  ;;  %v3689_v58 = vor.u32 %v4169_v55, %v3686_v56  ;;  %v3814_v60 = vld [vmem:[%s6093_s4 + $0x390] sm:$0xf0]  ;;  %v4073_v3 = vld [vmem:[%s4812_s27 + $0x4] sm:$0xf]  ;;  %v3310_v8 = vld [vmem:[%s4812_s27 + $0x18] sm:$0xf0] }
  0x3e   : > { %1704 = vmatpush.bf16.msrb.mxu1 %v3493_v16  ;;  %1675 = vmatpush.bf16.msrb.mxu0 %v3365_v17  ;;  %v3817_v62 = vor.u32 %v4201_v59, %v3814_v60  ;;  %v3558_v63 = vld [vmem:[%s6093_s4 + $0x190] sm:$0xf0]  ;;  %v4840_v12 = vor.u32 %v4074_v7, %v3310_v8  ;;  %v4105_v13 = vld [vmem:[%s6093_s4 + $0x84] sm:$0xf]  ;;  %v3316_v37 = vld [vmem:[%s4812_s27 + $0x20] sm:$0xf] }
  0x3f   : > { %3284 = vmatmul.msk.bf16.gmra.mxu0 %vm819_vm0, %v4219_v18  ;;  %3288 = vmatmul.msk.bf16.gmra.mxu1 %vm819_vm0, %v4219_v18  ;;  %v3561_v0 = vor.u32 %v4137_v61, %v3558_v63  ;;  %v3302_v4 = vld [vmem:[%s4812_s27 + $0x10] sm:$0xf0]  ;;  %v4165_v15 = vld [vmem:[%s6093_s4 + $0x264] sm:$0xf]  ;;  %v4079_v38 = vld [vmem:[%s4812_s27 + $0x2c] sm:$0xf0] }
  0x40   : > { %3296 = vmatmul.msk.bf16.gmra.mxu3 %vm819_vm0, %v4219_v18  ;;  %1842 = vmatpush.bf16.msra.mxu2 %v3737_v22  ;;  %v4836_v10 = vor.u32 %v4073_v3, %v3302_v4  ;;  %v3430_v14 = vld [vmem:[%s6093_s4 + $0x90] sm:$0xf0]  ;;  %v4133_v22 = vld [vmem:[%s6093_s4 + $0x164] sm:$0xf]  ;;  %v3324_v41 = vld [vmem:[%s4812_s27 + $0x28] sm:$0xf]  ;;  %v4902_v45 = vor.u32 %v4079_v38, %v3316_v37 }
  0x41   : > { %3292 = vmatmul.msk.bf16.gmra.mxu2 %vm819_vm0, %v4219_v18  ;;  %1871 = vmatpush.bf16.msra.mxu3 %v3865_v26  ;;  %v3433_v16 = vor.u32 %v4105_v13, %v3430_v14  ;;  %v3670_v17 = vld [vmem:[%s6093_s4 + $0x270] sm:$0xf0]  ;;  %v4197_v18 = vld [vmem:[%s6093_s4 + $0x364] sm:$0xf]  ;;  %v4080_v42 = vld [vmem:[%s4812_s27 + $0x34] sm:$0xf0] }
  0x42   : > { %1813 = vmatpush.bf16.msra.mxu1 %v3609_v27  ;;  %1784 = vmatpush.bf16.msra.mxu0 %v3481_v31  ;;  %v3798_v19 = vld [vmem:[%s6093_s4 + $0x370] sm:$0xf0]  ;;  %v3673_v20 = vor.u32 %v4165_v15, %v3670_v17  ;;  %v4101_v24 = vld [vmem:[%s6093_s4 + $0x64] sm:$0xf]  ;;  %v4078_v43 = vld [vmem:[%s4812_s27 + $0x2c] sm:$0xf]  ;;  %v4906_v47 = vor.u32 %v4080_v42, %v3324_v41 }
  0x43   : > { %v3801_v21 = vor.u32 %v4197_v18, %v3798_v19  ;;  %v3542_v23 = vld [vmem:[%s6093_s4 + $0x170] sm:$0xf0]  ;;  %v4161_v27 = vld [vmem:[%s6093_s4 + $0x244] sm:$0xf]  ;;  %v3332_v6 = vld [vmem:[%s4812_s27 + $0x40] sm:$0xf] }
  0x44   : > { %1843 = vmatpush.bf16.msra.mxu2 %v3721_v35  ;;  %v3545_v25 = vor.u32 %v4133_v22, %v3542_v23  ;;  %v3414_v26 = vld [vmem:[%s6093_s4 + $0x70] sm:$0xf0]  ;;  %v4193_v31 = vld [vmem:[%s6093_s4 + $0x344] sm:$0xf]  ;;  %v4083_v7 = vld [vmem:[%s4812_s27 + $0x4c] sm:$0xf0] }
  0x45   : > { %1872 = vmatpush.bf16.msra.mxu3 %v3849_v36  ;;  %v3654_v28 = vld [vmem:[%s6093_s4 + $0x250] sm:$0xf0]  ;;  %v3417_v29 = vor.u32 %v4101_v24, %v3414_v26  ;;  %v4129_v33 = vld [vmem:[%s6093_s4 + $0x144] sm:$0xf]  ;;  %v3340_v14 = vld [vmem:[%s4812_s27 + $0x48] sm:$0xf]  ;;  %v4964_v18 = vor.u32 %v4083_v7, %v3332_v6 }
  0x46   : > { %1814 = vmatpush.bf16.msra.mxu1 %v3593_v39  ;;  %1785 = vmatpush.bf16.msra.mxu0 %v3465_v44  ;;  %v3657_v30 = vor.u32 %v4161_v27, %v3654_v28  ;;  %v3782_v32 = vld [vmem:[%s6093_s4 + $0x350] sm:$0xf0]  ;;  %v4077_v39 = vld [vmem:[%s4812_s27 + $0x24] sm:$0xf]  ;;  %v3326_v44 = vld [vmem:[%s4812_s27 + $0x38] sm:$0xf0] }
  0x47   : > { %v3785_v34 = vor.u32 %v4193_v31, %v3782_v32  ;;  %v3526_v35 = vld [vmem:[%s6093_s4 + $0x150] sm:$0xf0]  ;;  %v4157_v51 = vld [vmem:[%s6093_s4 + $0x224] sm:$0xf]  ;;  %v4084_v15 = vld [vmem:[%s4812_s27 + $0x54] sm:$0xf0] }
  0x48   : > { %1844 = vmatpush.bf16.msra.mxu2 %v3705_v48  ;;  %v3529_v36 = vor.u32 %v4129_v33, %v3526_v35  ;;  %v4908_v48 = vor.u32 %v4078_v43, %v3326_v44  ;;  %v3398_v50 = vld [vmem:[%s6093_s4 + $0x50] sm:$0xf0]  ;;  %v4189_v54 = vld [vmem:[%s6093_s4 + $0x324] sm:$0xf]  ;;  %v3342_v17 = vld [vmem:[%s4812_s27 + $0x58] sm:$0xf0]  ;;  %v4977_v23 = vor.u32 %v4084_v15, %v3340_v14 }
  0x49   : > { %1873 = vmatpush.bf16.msra.mxu3 %v3833_v49  ;;  %v4097_v49 = vld [vmem:[%s6093_s4 + $0x44] sm:$0xf]  ;;  %v3766_v55 = vld [vmem:[%s6093_s4 + $0x330] sm:$0xf0]  ;;  %v3740_v28 = vld [vmem:[%s6093_s4 + $0x2e8] sm:$0xf] }
  0x4a   : > { %1815 = vmatpush.bf16.msra.mxu1 %v3577_v53  ;;  %1786 = vmatpush.bf16.msra.mxu0 %v3449_v57  ;;  %v3401_v52 = vor.u32 %v4097_v49, %v3398_v50  ;;  %v3638_v53 = vld [vmem:[%s6093_s4 + $0x230] sm:$0xf0]  ;;  %v3769_v57 = vor.u32 %v4189_v54, %v3766_v55  ;;  %v4093_v60 = vld [vmem:[%s6093_s4 + $0x24] sm:$0xf]  ;;  %v4216_v32 = vld [vmem:[%s6093_s4 + $0x3f4] sm:$0xf0] }
  0x4b   : > { %v3641_v56 = vor.u32 %v4157_v51, %v3638_v53  ;;  %v3510_v59 = vld [vmem:[%s6093_s4 + $0x130] sm:$0xf0]  ;;  %v4153_v63 = vld [vmem:[%s6093_s4 + $0x204] sm:$0xf]  ;;  %v4152_v35 = vld [vmem:[%s6093_s4 + $0x1f4] sm:$0xf0] }
  0x4c   : > { %1845 = vmatpush.bf16.msra.mxu2 %v3689_v58  ;;  %v4125_v58 = vld [vmem:[%s6093_s4 + $0x124] sm:$0xf]  ;;  %v3750_v4 = vld [vmem:[%s6093_s4 + $0x310] sm:$0xf0]  ;;  %v4120_v38 = vld [vmem:[%s6093_s4 + $0xf4] sm:$0xf0] }
  0x4d   : > { %1874 = vmatpush.bf16.msra.mxu3 %v3817_v62  ;;  %v3513_v61 = vor.u32 %v4125_v58, %v3510_v59  ;;  %v3382_v62 = vld [vmem:[%s6093_s4 + $0x30] sm:$0xf0]  ;;  %v4185_v3 = vld [vmem:[%s6093_s4 + $0x304] sm:$0xf]  ;;  %v3852_v43 = vld [vmem:[%s6093_s4 + $0x3c8] sm:$0xf] }
  0x4e   : > { %1816 = vmatpush.bf16.msra.mxu1 %v3561_v0  ;;  %1787 = vmatpush.bf16.msra.mxu0 %v3433_v16  ;;  %v3622_v0 = vld [vmem:[%s6093_s4 + $0x210] sm:$0xf0]  ;;  %v3385_v1 = vor.u32 %v4093_v60, %v3382_v62  ;;  %v3753_v5 = vor.u32 %v4185_v3, %v3750_v4  ;;  %v4081_v8 = vld [vmem:[%s4812_s27 + $0x44] sm:$0xf]  ;;  %v4082_v16 = vld [vmem:[%s4812_s27 + $0x4c] sm:$0xf] }
  0x4f   : > { %3285 = vmatmul.msk.bf16.gmra.mxu0 %vm819_vm0, %v4220_v40  ;;  %3289 = vmatmul.msk.bf16.gmra.mxu1 %vm819_vm0, %v4220_v40  ;;  %v3625_v2 = vor.u32 %v4153_v63, %v3622_v0  ;;  %v3334_v13 = vld [vmem:[%s4812_s27 + $0x50] sm:$0xf0]  ;;  %v4089_v19 = vld [vmem:[%s6093_s4 + $0x4] sm:$0xf]  ;;  %v4982_v26 = vor.u32 %v4082_v16, %v3342_v17  ;;  %v4212_v44 = vld [vmem:[%s6093_s4 + $0x3d4] sm:$0xf0] }
  0x50   : > { %3297 = vmatmul.msk.bf16.gmra.mxu3 %vm819_vm0, %v4220_v40  ;;  %1846 = vmatpush.bf16.msra.mxu2 %v3673_v20  ;;  %v3366_v20 = vld [vmem:[%s6093_s4 + $0x10] sm:$0xf0]  ;;  %v4975_v22 = vor.u32 %v4081_v8, %v3334_v13  ;;  %v3348_v49 = vld [vmem:[%s4812_s27 + $0x60] sm:$0xf]  ;;  %v4087_v50 = vld [vmem:[%s4812_s27 + $0x6c] sm:$0xf0] }
  0x51   : > { %3293 = vmatmul.msk.bf16.gmra.mxu2 %vm819_vm0, %v4220_v40  ;;  %1875 = vmatpush.bf16.msra.mxu3 %v3801_v21  ;;  %v3318_v40 = vld [vmem:[%s4812_s27 + $0x30] sm:$0xf0]  ;;  %v4121_v21 = vld [vmem:[%s6093_s4 + $0x104] sm:$0xf]  ;;  %v3369_v24 = vor.u32 %v4089_v19, %v3366_v20  ;;  %v3356_v54 = vld [vmem:[%s4812_s27 + $0x68] sm:$0xf]  ;;  %v5032_v58 = vor.u32 %v4087_v50, %v3348_v49 }
  0x52   : > { %1817 = vmatpush.bf16.msra.mxu1 %v3545_v25  ;;  %1788 = vmatpush.bf16.msra.mxu0 %v3417_v29  ;;  %v4904_v46 = vor.u32 %v4077_v39, %v3318_v40  ;;  %v3494_v25 = vld [vmem:[%s6093_s4 + $0x110] sm:$0xf0]  ;;  %v4184_v29 = vld [vmem:[%s6093_s4 + $0x2f4] sm:$0xf0]  ;;  %v3724_v39 = vld [vmem:[%s6093_s4 + $0x2c8] sm:$0xf] }
  0x53   : > { %v3497_v27 = vor.u32 %v4121_v21, %v3494_v25  ;;  %v3741_v31 = vor.u32 %v4184_v29, %v3740_v28  ;;  %v4180_v40 = vld [vmem:[%s6093_s4 + $0x2d4] sm:$0xf0]  ;;  %v4085_v51 = vld [vmem:[%s4812_s27 + $0x64] sm:$0xf]  ;;  %v3350_v53 = vld [vmem:[%s4812_s27 + $0x70] sm:$0xf0] }
  0x54   : > { %1847 = vmatpush.bf16.msra.mxu2 %v3657_v30  ;;  %v3868_v30 = vld [vmem:[%s6093_s4 + $0x3e8] sm:$0xf]  ;;  %v3725_v42 = vor.u32 %v4180_v40, %v3724_v39  ;;  %v4088_v55 = vld [vmem:[%s4812_s27 + $0x74] sm:$0xf0]  ;;  %v5034_v59 = vor.u32 %v4085_v51, %v3350_v53 }
  0x55   : > { %1876 = vmatpush.bf16.msra.mxu3 %v3785_v34  ;;  %v3869_v33 = vor.u32 %v4216_v32, %v3868_v30  ;;  %v3612_v34 = vld [vmem:[%s6093_s4 + $0x1e8] sm:$0xf]  ;;  %v5036_v60 = vor.u32 %v4088_v55, %v3356_v54  ;;  %v4148_v63 = vld [vmem:[%s6093_s4 + $0x1d4] sm:$0xf0] }
  0x56   : > { %1818 = vmatpush.bf16.msra.mxu1 %v3529_v36  ;;  %1789 = vmatpush.bf16.msra.mxu0 %v3401_v52  ;;  %v3484_v36 = vld [vmem:[%s6093_s4 + $0xe8] sm:$0xf]  ;;  %v3613_v37 = vor.u32 %v4152_v35, %v3612_v34  ;;  %v3853_v52 = vor.u32 %v4212_v44, %v3852_v43  ;;  %v4208_v7 = vld [vmem:[%s6093_s4 + $0x3b4] sm:$0xf0] }
  0x57   : > { %v3485_v41 = vor.u32 %v4120_v38, %v3484_v36  ;;  %v3596_v62 = vld [vmem:[%s6093_s4 + $0x1c8] sm:$0xf]  ;;  %v4144_v15 = vld [vmem:[%s6093_s4 + $0x1b4] sm:$0xf0] }
  0x58   : > { %1848 = vmatpush.bf16.msra.mxu2 %v3641_v56  ;;  %v4086_v56 = vld [vmem:[%s4812_s27 + $0x6c] sm:$0xf]  ;;  %v3597_v0 = vor.u32 %v4148_v63, %v3596_v62  ;;  %v3708_v3 = vld [vmem:[%s6093_s4 + $0x2a8] sm:$0xf]  ;;  %v4112_v19 = vld [vmem:[%s6093_s4 + $0xb4] sm:$0xf0] }
  0x59   : > { %1877 = vmatpush.bf16.msra.mxu3 %v3769_v57  ;;  %v3358_v57 = vld [vmem:[%s4812_s27 + $0x78] sm:$0xf0]  ;;  %v3836_v6 = vld [vmem:[%s6093_s4 + $0x3a8] sm:$0xf]  ;;  %v4172_v21 = vld [vmem:[%s6093_s4 + $0x294] sm:$0xf0] }
  0x5a   : > { %1819 = vmatpush.bf16.msra.mxu1 %v3513_v61  ;;  %1790 = vmatpush.bf16.msra.mxu0 %v3385_v1  ;;  %v5038_v61 = vor.u32 %v4086_v56, %v3358_v57  ;;  %v3468_v1 = vld [vmem:[%s6093_s4 + $0xc8] sm:$0xf]  ;;  %v3837_v13 = vor.u32 %v4208_v7, %v3836_v6  ;;  %v4204_v28 = vld [vmem:[%s6093_s4 + $0x394] sm:$0xf0] }
  0x5b   : > { %v3580_v14 = vld [vmem:[%s6093_s4 + $0x1a8] sm:$0xf]  ;;  %v4108_v36 = vld [vmem:[%s6093_s4 + $0x94] sm:$0xf0] }
  0x5c   : > { %1849 = vmatpush.bf16.msra.mxu2 %v3625_v2  ;;  %v4116_v2 = vld [vmem:[%s6093_s4 + $0xd4] sm:$0xf0]  ;;  %v3452_v16 = vld [vmem:[%s6093_s4 + $0xa8] sm:$0xf]  ;;  %v3581_v17 = vor.u32 %v4144_v15, %v3580_v14 }
  0x5d   : > { %1878 = vmatpush.bf16.msra.mxu3 %v3753_v5  ;;  %v3469_v4 = vor.u32 %v4116_v2, %v3468_v1  ;;  %v4176_v5 = vld [vmem:[%s6093_s4 + $0x2b4] sm:$0xf0]  ;;  %v3692_v20 = vld [vmem:[%s6093_s4 + $0x288] sm:$0xf] }
  0x5e   : > { %1791 = vmatpush.bf16.msra.mxu0 %v3369_v24  ;;  %1820 = vmatpush.bf16.msra.mxu1 %v3497_v27  ;;  %v3709_v8 = vor.u32 %v4176_v5, %v3708_v3  ;;  %v3453_v24 = vor.u32 %v4112_v19, %v3452_v16  ;;  %v3693_v25 = vor.u32 %v4172_v21, %v3692_v20  ;;  %v3820_v27 = vld [vmem:[%s6093_s4 + $0x388] sm:$0xf]  ;;  %v4168_v39 = vld [vmem:[%s6093_s4 + $0x274] sm:$0xf0] }
  0x5f   : > { %1676 = vmatmul.bf16.vlgmr.msrb.gmra.mxu0 %v4834_v9  ;;  %1705 = vmatmul.bf16.vlgmr.msrb.gmra.mxu1 %v4836_v10  ;;  %v3821_v29 = vor.u32 %v4204_v28, %v3820_v27  ;;  %v3564_v32 = vld [vmem:[%s6093_s4 + $0x188] sm:$0xf]  ;;  %v4136_v53 = vld [vmem:[%s6093_s4 + $0x174] sm:$0xf0] }
  0x60   : > { %1763 = vmatmul.bf16.vlgmr.msrb.gmra.mxu3 %v4840_v12  ;;  %v3436_v35 = vld [vmem:[%s6093_s4 + $0x88] sm:$0xf]  ;;  %v4104_v56 = vld [vmem:[%s6093_s4 + $0x74] sm:$0xf0] }
  0x61   : > { %1734 = vmatmul.bf16.vlgmr.msrb.gmra.mxu2 %v4838_v11  ;;  %1987 = vmatpush.bf16.msrb.mxu3 %v3869_v33  ;;  %v4140_v33 = vld [vmem:[%s6093_s4 + $0x194] sm:$0xf0]  ;;  %v3437_v38 = vor.u32 %v4108_v36, %v3436_v35  ;;  %v3804_v40 = vld [vmem:[%s6093_s4 + $0x368] sm:$0xf] }
  0x62   : > { %1958 = vmatpush.bf16.msrb.mxu2 %v3741_v31  ;;  %1929 = vmatpush.bf16.msrb.mxu1 %v3613_v37  ;;  %v3565_v34 = vor.u32 %v4140_v33, %v3564_v32  ;;  %v3676_v37 = vld [vmem:[%s6093_s4 + $0x268] sm:$0xf]  ;;  %v4164_v62 = vld [vmem:[%s6093_s4 + $0x254] sm:$0xf0] }
  0x63   : > { %1900 = vmatpush.bf16.msrb.mxu0 %v3485_v41  ;;  %v4200_v41 = vld [vmem:[%s6093_s4 + $0x374] sm:$0xf0]  ;;  %v3677_v43 = vor.u32 %v4168_v39, %v3676_v37  ;;  %v3420_v54 = vld [vmem:[%s6093_s4 + $0x68] sm:$0xf] }
  0x64   : > { %v3805_v44 = vor.u32 %v4200_v41, %v3804_v40  ;;  %v3660_v57 = vld [vmem:[%s6093_s4 + $0x248] sm:$0xf]  ;;  %v3421_v63 = vor.u32 %v4104_v56, %v3420_v54  ;;  %v4196_v2 = vld [vmem:[%s6093_s4 + $0x354] sm:$0xf0] }
  0x65   : > { %1988 = vmatpush.bf16.msrb.mxu3 %v3853_v52  ;;  %v3548_v52 = vld [vmem:[%s6093_s4 + $0x168] sm:$0xf]  ;;  %v4100_v16 = vld [vmem:[%s6093_s4 + $0x54] sm:$0xf0] }
  0x66   : > { %1959 = vmatpush.bf16.msrb.mxu2 %v3725_v42  ;;  %1930 = vmatpush.bf16.msrb.mxu1 %v3597_v0  ;;  %v3549_v55 = vor.u32 %v4136_v53, %v3548_v52  ;;  %v3661_v0 = vor.u32 %v4164_v62, %v3660_v57  ;;  %v3788_v1 = vld [vmem:[%s6093_s4 + $0x348] sm:$0xf]  ;;  %v4160_v20 = vld [vmem:[%s6093_s4 + $0x234] sm:$0xf0] }
  0x67   : > { %1901 = vmatpush.bf16.msrb.mxu0 %v3469_v4  ;;  %v3789_v3 = vor.u32 %v4196_v2, %v3788_v1  ;;  %v3404_v15 = vld [vmem:[%s6093_s4 + $0x48] sm:$0xf]  ;;  %v4128_v35 = vld [vmem:[%s6093_s4 + $0x134] sm:$0xf0] }
  0x68   : > { %v3405_v19 = vor.u32 %v4100_v16, %v3404_v15  ;;  %v3772_v21 = vld [vmem:[%s6093_s4 + $0x328] sm:$0xf]  ;;  %v4156_v40 = vld [vmem:[%s6093_s4 + $0x214] sm:$0xf0]  ;;  %v3870_v16 = vld [vmem:[%s6093_s4 + $0x3f8] sm:$0xf0] }
  0x69   : > { %1989 = vmatpush.bf16.msrb.mxu3 %v3837_v13  ;;  %v4132_v13 = vld [vmem:[%s6093_s4 + $0x154] sm:$0xf0]  ;;  %v3388_v36 = vld [vmem:[%s6093_s4 + $0x28] sm:$0xf] }
  0x6a   : > { %1960 = vmatpush.bf16.msrb.mxu2 %v3709_v8  ;;  %1931 = vmatpush.bf16.msrb.mxu1 %v3581_v17  ;;  %v3532_v8 = vld [vmem:[%s6093_s4 + $0x148] sm:$0xf]  ;;  %v4188_v52 = vld [vmem:[%s6093_s4 + $0x314] sm:$0xf0] }
  0x6b   : > { %1902 = vmatpush.bf16.msrb.mxu0 %v3453_v24  ;;  %v3533_v14 = vor.u32 %v4132_v13, %v3532_v8  ;;  %v3644_v17 = vld [vmem:[%s6093_s4 + $0x228] sm:$0xf]  ;;  %v4192_v24 = vld [vmem:[%s6093_s4 + $0x334] sm:$0xf0]  ;;  %v4182_v8 = vld [vmem:[%s6093_s4 + $0x2ec] sm:$0xf] }
  0x6c   : > { %v3645_v27 = vor.u32 %v4160_v20, %v3644_v17  ;;  %v3773_v28 = vor.u32 %v4192_v24, %v3772_v21  ;;  %v3628_v39 = vld [vmem:[%s6093_s4 + $0x208] sm:$0xf]  ;;  %v4092_v56 = vld [vmem:[%s6093_s4 + $0x14] sm:$0xf0]  ;;  %v3742_v13 = vld [vmem:[%s6093_s4 + $0x2f8] sm:$0xf0] }
  0x6d   : > { %1990 = vmatpush.bf16.msrb.mxu3 %v3821_v29  ;;  %v3500_v57 = vld [vmem:[%s6093_s4 + $0x108] sm:$0xf]  ;;  %v4124_v1 = vld [vmem:[%s6093_s4 + $0x114] sm:$0xf0]  ;;  %v3745_v15 = vor.u32 %v4182_v8, %v3742_v13  ;;  %v3470_v8 = vld [vmem:[%s6093_s4 + $0xd8] sm:$0xf0] }
  0x6e   : > { %1961 = vmatpush.bf16.msrb.mxu2 %v3693_v25  ;;  %1932 = vmatpush.bf16.msrb.mxu1 %v3565_v34  ;;  %v3516_v34 = vld [vmem:[%s6093_s4 + $0x128] sm:$0xf]  ;;  %v4174_v13 = vld [vmem:[%s6093_s4 + $0x2ac] sm:$0xf] }
  0x6f   : > { %1681 = vmatmul.bf16.gmra.mxu0 %v4902_v45  ;;  %1710 = vmatmul.bf16.gmra.mxu1 %v4904_v46  ;;  %v3517_v37 = vor.u32 %v4128_v35, %v3516_v34  ;;  %v4118_v34 = vld [vmem:[%s6093_s4 + $0xec] sm:$0xf] }
  0x70   : > { %1768 = vmatmul.bf16.gmra.mxu3 %v4908_v48  ;;  %1903 = vmatpush.bf16.msrb.mxu0 %v3437_v38  ;;  %v4096_v38 = vld [vmem:[%s6093_s4 + $0x34] sm:$0xf0] }
  0x71   : > { %1739 = vmatmul.bf16.gmra.mxu2 %v4906_v47  ;;  %1991 = vmatpush.bf16.msrb.mxu3 %v3805_v44  ;;  %v3389_v41 = vor.u32 %v4096_v38, %v3388_v36  ;;  %v3756_v44 = vld [vmem:[%s6093_s4 + $0x308] sm:$0xf]  ;;  %v3486_v36 = vld [vmem:[%s6093_s4 + $0xf8] sm:$0xf0] }
  0x72   : > { %1962 = vmatpush.bf16.msrb.mxu2 %v3677_v43  ;;  %1933 = vmatpush.bf16.msrb.mxu1 %v3549_v55  ;;  %v3629_v43 = vor.u32 %v4156_v40, %v3628_v39  ;;  %v3757_v53 = vor.u32 %v4188_v52, %v3756_v44  ;;  %v3372_v55 = vld [vmem:[%s6093_s4 + $0x8] sm:$0xf]  ;;  %v3726_v38 = vld [vmem:[%s6093_s4 + $0x2d8] sm:$0xf0]  ;;  %v3489_v39 = vor.u32 %v4118_v34, %v3486_v36 }
  0x74   : > { %1904 = vmatpush.bf16.msrb.mxu0 %v3421_v63 }
  0x75   : > { %1992 = vmatpush.bf16.msrb.mxu3 %v3789_v3  ;;  %v3501_v3 = vor.u32 %v4124_v1, %v3500_v57  ;;  %v4146_v57 = vld [vmem:[%s6093_s4 + $0x1cc] sm:$0xf] }
  0x76   : > { %1963 = vmatpush.bf16.msrb.mxu2 %v3661_v0  ;;  %1934 = vmatpush.bf16.msrb.mxu1 %v3533_v14  ;;  %v3373_v0 = vor.u32 %v4092_v56, %v3372_v55  ;;  %v4214_v14 = vld [vmem:[%s6093_s4 + $0x3ec] sm:$0xf] }
  0x78   : > { %1905 = vmatpush.bf16.msrb.mxu0 %v3405_v19  ;;  %v3873_v19 = vor.u32 %v4214_v14, %v3870_v16  ;;  %v4206_v16 = vld [vmem:[%s6093_s4 + $0x3ac] sm:$0xf] }
  0x79   : > { %1993 = vmatpush.bf16.msrb.mxu3 %v3773_v28  ;;  %v3614_v28 = vld [vmem:[%s6093_s4 + $0x1f8] sm:$0xf0] }
  0x7a   : > { %1964 = vmatpush.bf16.msrb.mxu2 %v3645_v27  ;;  %1935 = vmatpush.bf16.msrb.mxu1 %v3517_v37  ;;  %v4150_v27 = vld [vmem:[%s6093_s4 + $0x1ec] sm:$0xf] }
  0x7b   : > { %v3617_v35 = vor.u32 %v4150_v27, %v3614_v28  ;;  %v4178_v37 = vld [vmem:[%s6093_s4 + $0x2cc] sm:$0xf] }
  0x7c   : > { %1906 = vmatpush.bf16.msrb.mxu0 %v3389_v41  ;;  %v3729_v40 = vor.u32 %v4178_v37, %v3726_v38  ;;  %v4210_v41 = vld [vmem:[%s6093_s4 + $0x3cc] sm:$0xf] }
  0x7d   : > { %1994 = vmatpush.bf16.msrb.mxu3 %v3757_v53  ;;  %v4142_v38 = vld [vmem:[%s6093_s4 + $0x1ac] sm:$0xf] }
  0x7e   : > { %1965 = vmatpush.bf16.msrb.mxu2 %v3629_v43  ;;  %1936 = vmatpush.bf16.msrb.mxu1 %v3501_v3  ;;  %v3854_v43 = vld [vmem:[%s6093_s4 + $0x3d8] sm:$0xf0]  ;;  %v4114_v3 = vld [vmem:[%s6093_s4 + $0xcc] sm:$0xf] }
  0x7f   : > { %1686 = vmatmul.bf16.gmra.mxu0 %v4964_v18  ;;  %1715 = vmatmul.bf16.gmra.mxu1 %v4975_v22  ;;  %v3857_v44 = vor.u32 %v4210_v41, %v3854_v43  ;;  %v3473_v14 = vor.u32 %v4114_v3, %v3470_v8  ;;  %v3454_v43 = vld [vmem:[%s6093_s4 + $0xb8] sm:$0xf0]  ;;  %v4202_v3 = vld [vmem:[%s6093_s4 + $0x38c] sm:$0xf] }
  0x80   : > { %1773 = vmatmul.bf16.gmra.mxu3 %v4982_v26  ;;  %1907 = vmatpush.bf16.msrb.mxu0 %v3373_v0  ;;  %v3598_v0 = vld [vmem:[%s6093_s4 + $0x1d8] sm:$0xf0] }
  0x81   : > { %1744 = vmatmul.bf16.gmra.mxu2 %v4977_v23  ;;  %v3601_v1 = vor.u32 %v4146_v57, %v3598_v0  ;;  %v3694_v57 = vld [vmem:[%s6093_s4 + $0x298] sm:$0xf0] }
  0x82   : > { %v3822_v8 = vld [vmem:[%s6093_s4 + $0x398] sm:$0xf0] }
  0x8f   : > { %1691 = vmatmul.bf16.gmra.mxu0 %v5032_v58  ;;  %1720 = vmatmul.bf16.gmra.mxu1 %v5034_v59 }
  0x90   : > { %1778 = vmatmul.bf16.gmra.mxu3 %v5038_v61 }
  0x91   : > { %1749 = vmatmul.bf16.gmra.mxu2 %v5036_v60 }
  0x9b   : > { %v5092_v30 = vpop.f32.mrf.mxu0 }
  0x9c   : > { %v5094_v31 = vpop.f32.mrf.mxu1 }
  0x9f   : > { %1792 = vmatmul.bf16.vlgmr.msra.gmra.mxu0 %v4834_v9  ;;  %1821 = vmatmul.bf16.vlgmr.msra.gmra.mxu1 %v4836_v10 }
  0xa0   : > { %1879 = vmatmul.bf16.vlgmr.msra.gmra.mxu3 %v4840_v12  ;;  %2045 = vmatpush.bf16.msra.mxu1 %v3617_v35 }
  0xa1   : > { %1850 = vmatmul.bf16.vlgmr.msra.gmra.mxu2 %v4838_v11  ;;  %2103 = vmatpush.bf16.msra.mxu3 %v3873_v19  ;;  %v3838_v19 = vld [vmem:[%s6093_s4 + $0x3b8] sm:$0xf0] }
  0xa2   : > { %v5124_v42 = vpop.f32.mrf.mxu2  ;;  %2074 = vmatpush.bf16.msra.mxu2 %v3745_v15  ;;  %2016 = vmatpush.bf16.msra.mxu0 %v3489_v39  ;;  %v3710_v15 = vld [vmem:[%s6093_s4 + $0x2b8] sm:$0xf0]  ;;  %v3841_v34 = vor.u32 %v4206_v16, %v3838_v19 }
  0xa3   : > { %v5126_v49 = vpop.f32.mrf.mxu3  ;;  %v5128_v50 = vpop.f32.mrf.mxu0  ;;  %v3713_v28 = vor.u32 %v4174_v13, %v3710_v15  ;;  %v3582_v39 = vld [vmem:[%s6093_s4 + $0x1b8] sm:$0xf0]  ;;  %v3825_v13 = vor.u32 %v4202_v3, %v3822_v8 }
  0xa4   : > { %v5130_v51 = vpop.f32.mrf.mxu1  ;;  %2046 = vmatpush.bf16.msra.mxu1 %v3601_v1  ;;  %v3585_v41 = vor.u32 %v4142_v38, %v3582_v39  ;;  %v4138_v38 = vld [vmem:[%s6093_s4 + $0x18c] sm:$0xf]  ;;  %v3566_v39 = vld [vmem:[%s6093_s4 + $0x198] sm:$0xf0] }
  0xa5   : > { %2104 = vmatpush.bf16.msra.mxu3 %v3857_v44  ;;  %v4170_v44 = vld [vmem:[%s6093_s4 + $0x28c] sm:$0xf] }
  0xa6   : > { %2075 = vmatpush.bf16.msra.mxu2 %v3729_v40  ;;  %2017 = vmatpush.bf16.msra.mxu0 %v3473_v14  ;;  %v4110_v40 = vld [vmem:[%s6093_s4 + $0xac] sm:$0xf]  ;;  %v3697_v1 = vor.u32 %v4170_v44, %v3694_v57  ;;  %v3678_v57 = vld [vmem:[%s6093_s4 + $0x278] sm:$0xf0] }
  0xa7   : > { %v3457_v0 = vor.u32 %v4110_v40, %v3454_v43  ;;  %v3569_v40 = vor.u32 %v4138_v38, %v3566_v39  ;;  %v4166_v43 = vld [vmem:[%s6093_s4 + $0x26c] sm:$0xf] }
  0xa8   : > { %2047 = vmatpush.bf16.msra.mxu1 %v3585_v41  ;;  %v3438_v41 = vld [vmem:[%s6093_s4 + $0x98] sm:$0xf0]  ;;  %v3681_v8 = vor.u32 %v4166_v43, %v3678_v57  ;;  %v4162_v57 = vld [vmem:[%s6093_s4 + $0x24c] sm:$0xf] }
  0xa9   : > { %2105 = vmatpush.bf16.msra.mxu3 %v3841_v34  ;;  %v3550_v43 = vld [vmem:[%s6093_s4 + $0x178] sm:$0xf0] }
  0xaa   : > { %v5156_v4 = vpop.f32.mrf.mxu2  ;;  %2076 = vmatpush.bf16.msra.mxu2 %v3713_v28  ;;  %2018 = vmatpush.bf16.msra.mxu0 %v3457_v0  ;;  %v4198_v0 = vld [vmem:[%s6093_s4 + $0x36c] sm:$0xf] }
  0xab   : > { %v5158_v5 = vpop.f32.mrf.mxu3 }
  0xac   : > { %v5160_v6 = vpop.f32.mrf.mxu0  ;;  %v5162_v7 = vpop.f32.mrf.mxu1  ;;  %2048 = vmatpush.bf16.msra.mxu1 %v3569_v40 }
  0xad   : > { %2106 = vmatpush.bf16.msra.mxu3 %v3825_v13 }
  0xae   : > { %2077 = vmatpush.bf16.msra.mxu2 %v3697_v1  ;;  %v3806_v1 = vld [vmem:[%s6093_s4 + $0x378] sm:$0xf0] }
  0xaf   : > { %1797 = vmatmul.bf16.gmra.mxu0 %v4902_v45  ;;  %1826 = vmatmul.bf16.gmra.mxu1 %v4904_v46  ;;  %v3809_v13 = vor.u32 %v4198_v0, %v3806_v1  ;;  %v3662_v0 = vld [vmem:[%s6093_s4 + $0x258] sm:$0xf0] }
  0xb0   : > { %1884 = vmatmul.bf16.gmra.mxu3 %v4908_v48 }
  0xb1   : > { %1855 = vmatmul.bf16.gmra.mxu2 %v4906_v47  ;;  %2107 = vmatpush.bf16.msra.mxu3 %v3809_v13  ;;  %v3790_v13 = vld [vmem:[%s6093_s4 + $0x358] sm:$0xf0] }
  0xb2   : > { %2078 = vmatpush.bf16.msra.mxu2 %v3681_v8  ;;  %v4194_v8 = vld [vmem:[%s6093_s4 + $0x34c] sm:$0xf] }
  0xb3   : > { %v5194_v29 = vpop.f32.mrf.mxu3 }
  0xb4   : > { %v5192_v25 = vpop.f32.mrf.mxu2  ;;  %v5196_v32 = vpop.f32.mrf.mxu0 }
  0xb5   : > { %v5198_v33 = vpop.f32.mrf.mxu1 }
  0xbb   : > { %v5235_v62 = vpop.f32.mrf.mxu3 }
  0xbc   : > { %v5224_v54 = vpop.f32.mrf.mxu2  ;;  %v5237_v63 = vpop.f32.mrf.mxu0 }
  0xbd   : > { %v5242_v2 = vpop.f32.mrf.mxu1 }
  0xbf   : > { %1802 = vmatmul.bf16.gmra.mxu0 %v4964_v18  ;;  %1831 = vmatmul.bf16.gmra.mxu1 %v4975_v22 }
  0xc0   : > { %1889 = vmatmul.bf16.gmra.mxu3 %v4982_v26 }
  0xc1   : > { %1860 = vmatmul.bf16.gmra.mxu2 %v4977_v23 }
  0xc3   : > { %v5262_v20 = vpop.f32.mrf.mxu3 }
  0xc4   : > { %v5260_v17 = vpop.f32.mrf.mxu2  ;;  %v5264_v21 = vpop.f32.mrf.mxu0 }
  0xc5   : > { %v5266_v24 = vpop.f32.mrf.mxu1 }
  0xcb   : > { %v5294_v53 = vpop.f32.mrf.mxu3 }
  0xcc   : > { %v5292_v52 = vpop.f32.mrf.mxu2  ;;  %v5296_v55 = vpop.f32.mrf.mxu0 }
  0xcd   : > { %v5298_v56 = vpop.f32.mrf.mxu1 }
  0xcf   : > { %1807 = vmatmul.bf16.gmra.mxu0 %v5032_v58  ;;  %1836 = vmatmul.bf16.gmra.mxu1 %v5034_v59 }
  0xd0   : > { %1894 = vmatmul.bf16.gmra.mxu3 %v5038_v61 }
  0xd1   : > { %1865 = vmatmul.bf16.gmra.mxu2 %v5036_v60 }
  0xd3   : > { %v5330_v35 = vpop.f32.mrf.mxu3 }
  0xd4   : > { %v5328_v27 = vpop.f32.mrf.mxu2  ;;  %v5332_v36 = vpop.f32.mrf.mxu0 }
  0xd5   : > { %v5334_v37 = vpop.f32.mrf.mxu1 }
  0xdb   : > { %v5362_v15 = vpop.f32.mrf.mxu3 }
  0xdc   : > { %v5360_v14 = vpop.f32.mrf.mxu2  ;;  %v1677_v16 = vpop.f32.mrf.mxu0 }
  0xdd   : > { %v1678_v19 = vadd.f32 %v1677_v16, %v5092_v30  ;;  %v1706_v28 = vpop.f32.mrf.mxu1  ;;  %v4106_v30 = vld [vmem:[%s6093_s4 + $0x8c] sm:$0xf] }
  0xde   : > { %v3441_v44 = vor.u32 %v4106_v30, %v3438_v41  ;;  %v4134_v41 = vld [vmem:[%s6093_s4 + $0x16c] sm:$0xf] }
  0xdf   : > { %v1707_v34 = vadd.f32 %v1706_v28, %v1678_v19  ;;  %1908 = vmatmul.bf16.vlgmr.msrb.gmra.mxu0 %v4834_v9  ;;  %1937 = vmatmul.bf16.vlgmr.msrb.gmra.mxu1 %v4836_v10 }
  0xe0   : > { %1995 = vmatmul.bf16.vlgmr.msrb.gmra.mxu3 %v4840_v12  ;;  %2019 = vmatpush.bf16.msra.mxu0 %v3441_v44  ;;  %v3553_v44 = vor.u32 %v4134_v41, %v3550_v43 }
  0xe1   : > { %1966 = vmatmul.bf16.vlgmr.msrb.gmra.mxu2 %v4838_v11 }
  0xe2   : > { %2049 = vmatpush.bf16.msra.mxu1 %v3553_v44  ;;  %v4130_v44 = vld [vmem:[%s6093_s4 + $0x14c] sm:$0xf] }
  0xe3   : > { %v1764_v19 = vpop.f32.mrf.mxu3 }
  0xe4   : > { %v1735_v3 = vpop.f32.mrf.mxu2  ;;  %v1679_v28 = vpop.f32.mrf.mxu0 }
  0xe5   : > { %v1736_v16 = vadd.f32 %v1735_v3, %v1707_v34  ;;  %v1680_v38 = vadd.f32 %v1679_v28, %v5128_v50  ;;  %v1708_v39 = vpop.f32.mrf.mxu1  ;;  %v4102_v34 = vld [vmem:[%s6093_s4 + $0x6c] sm:$0xf]  ;;  %v3422_v50 = vld [vmem:[%s6093_s4 + $0x78] sm:$0xf0]  ;;  %v3665_v3 = vor.u32 %v4162_v57, %v3662_v0 }
  0xe6   : > { %v3425_v1 = vor.u32 %v4102_v34, %v3422_v50  ;;  %v3534_v57 = vld [vmem:[%s6093_s4 + $0x158] sm:$0xf0] }
  0xe7   : > { %v5394_v40 = vadd.f32 %v1764_v19, %v1736_v16  ;;  %v1709_v30 = vadd.f32 %v1708_v39, %v1680_v38  ;;  %v3793_v16 = vor.u32 %v4194_v8, %v3790_v13  ;;  %2079 = vmatpush.bf16.msra.mxu2 %v3665_v3  ;;  %v3406_v0 = vld [vmem:[%s6093_s4 + $0x58] sm:$0xf0]  ;;  %v4190_v13 = vld [vmem:[%s6093_s4 + $0x32c] sm:$0xf] }
  0xe8   : > { %2020 = vmatpush.bf16.msra.mxu0 %v3425_v1  ;;  %v4158_v1 = vld [vmem:[%s6093_s4 + $0x22c] sm:$0xf]  ;;  %v3646_v8 = vld [vmem:[%s6093_s4 + $0x238] sm:$0xf0] }
  0xe9   : > { %2108 = vmatpush.bf16.msra.mxu3 %v3793_v16  ;;  %v3774_v16 = vld [vmem:[%s6093_s4 + $0x338] sm:$0xf0] }
  0xeb   : > { %v1766_v38 = vpop.f32.mrf.mxu3 }
  0xec   : > { %v1737_v19 = vpop.f32.mrf.mxu2  ;;  %v1682_v39 = vpop.f32.mrf.mxu0 }
  0xed   : > { %v1738_v28 = vadd.f32 %v1737_v19, %v1709_v30  ;;  %v1683_v41 = vadd.f32 %v1682_v39, %v5160_v6  ;;  %v1711_v43 = vpop.f32.mrf.mxu1  ;;  %v3537_v30 = vor.u32 %v4130_v44, %v3534_v57  ;;  %v4098_v6 = vld [vmem:[%s6093_s4 + $0x4c] sm:$0xf] }
  0xee   : > { %v3409_v3 = vor.u32 %v4098_v6, %v3406_v0  ;;  %v4126_v0 = vld [vmem:[%s6093_s4 + $0x12c] sm:$0xf] }
  0xef   : > { %v5421_v34 = vadd.f32 %v1766_v38, %v1738_v28  ;;  %v1712_v50 = vadd.f32 %v1711_v43, %v1683_v41  ;;  %1913 = vmatmul.bf16.gmra.mxu0 %v4902_v45  ;;  %1942 = vmatmul.bf16.gmra.mxu1 %v4904_v46  ;;  %v3649_v28 = vor.u32 %v4158_v1, %v3646_v8  ;;  %v3518_v1 = vld [vmem:[%s6093_s4 + $0x138] sm:$0xf0]  ;;  %v4154_v8 = vld [vmem:[%s6093_s4 + $0x20c] sm:$0xf] }
  0xf0   : > { %2000 = vmatmul.bf16.gmra.mxu3 %v4908_v48  ;;  %2050 = vmatpush.bf16.msra.mxu1 %v3537_v30  ;;  %v3777_v38 = vor.u32 %v4190_v13, %v3774_v16  ;;  %v3630_v13 = vld [vmem:[%s6093_s4 + $0x218] sm:$0xf0] }
  0xf1   : > { %1971 = vmatmul.bf16.gmra.mxu2 %v4906_v47  ;;  %2021 = vmatpush.bf16.msra.mxu0 %v3409_v3  ;;  %v3521_v3 = vor.u32 %v4126_v0, %v3518_v1 }
  0xf2   : > { %2080 = vmatpush.bf16.msra.mxu2 %v3649_v28  ;;  %2109 = vmatpush.bf16.msra.mxu3 %v3777_v38  ;;  %v4186_v28 = vld [vmem:[%s6093_s4 + $0x30c] sm:$0xf]  ;;  %v3758_v38 = vld [vmem:[%s6093_s4 + $0x318] sm:$0xf0] }
  0xf3   : > { %v1769_v41 = vpop.f32.mrf.mxu3 }
  0xf4   : > { %v1740_v19 = vpop.f32.mrf.mxu2  ;;  %v1684_v43 = vpop.f32.mrf.mxu0  ;;  %2051 = vmatpush.bf16.msra.mxu1 %v3521_v3  ;;  %v3502_v3 = vld [vmem:[%s6093_s4 + $0x118] sm:$0xf0] }
  0xf5   : > { %v1741_v39 = vadd.f32 %v1740_v19, %v1712_v50  ;;  %v1685_v44 = vadd.f32 %v1684_v43, %v5196_v32  ;;  %v1713_v57 = vpop.f32.mrf.mxu1  ;;  %v4094_v50 = vld [vmem:[%s6093_s4 + $0x2c] sm:$0xf]  ;;  %v3390_v32 = vld [vmem:[%s6093_s4 + $0x38] sm:$0xf0]  ;;  %v3633_v19 = vor.u32 %v4154_v8, %v3630_v13 }
  0xf6   : > { %v3393_v16 = vor.u32 %v4094_v50, %v3390_v32  ;;  %v4090_v43 = vld [vmem:[%s6093_s4 + $0xc] sm:$0xf] }
  0xf7   : > { %v5452_v30 = vadd.f32 %v1769_v41, %v1741_v39  ;;  %v1714_v6 = vadd.f32 %v1713_v57, %v1685_v44  ;;  %v3761_v39 = vor.u32 %v4186_v28, %v3758_v38  ;;  %2081 = vmatpush.bf16.msra.mxu2 %v3633_v19  ;;  %v3374_v44 = vld [vmem:[%s6093_s4 + $0x18] sm:$0xf0]  ;;  %v4122_v57 = vld [vmem:[%s6093_s4 + $0x10c] sm:$0xf] }
  0xf8   : > { %2022 = vmatpush.bf16.msra.mxu0 %v3393_v16  ;;  %v3377_v13 = vor.u32 %v4090_v43, %v3374_v44  ;;  %v3505_v16 = vor.u32 %v4122_v57, %v3502_v3  ;;  %v4254_v38 = vld [vmem:[%s6095_s6 + $0x6c] sm:$0xf] }
  0xf9   : > { %2110 = vmatpush.bf16.msra.mxu3 %v3761_v39 }
  0xfa   : > { %2052 = vmatpush.bf16.msra.mxu1 %v3505_v16  ;;  %v3942_v16 = vld [vmem:[%s6095_s6 + $0x70] sm:$0xf0] }
  0xfb   : > { %v1771_v1 = vpop.f32.mrf.mxu3 }
  0xfc   : > { %v1742_v41 = vpop.f32.mrf.mxu2  ;;  %v1687_v50 = vpop.f32.mrf.mxu0  ;;  %2023 = vmatpush.bf16.msra.mxu0 %v3377_v13  ;;  %v4253_v13 = vld [vmem:[%s6095_s6 + $0x64] sm:$0xf] }
  0xfd   : > { %v1743_v0 = vadd.f32 %v1742_v41, %v1714_v6  ;;  %v1688_v32 = vadd.f32 %v1687_v50, %v5237_v63  ;;  %v1716_v8 = vpop.f32.mrf.mxu1  ;;  %v3948_v63 = vld [vmem:[%s6095_s6 + $0x68] sm:$0xf]  ;;  %v4256_v6 = vld [vmem:[%s6095_s6 + $0x74] sm:$0xf0]  ;;  %v3950_v41 = vld [vmem:[%s6095_s6 + $0x78] sm:$0xf0] }
  0xfe   : > { %v3949_v39 = vor.u32 %v4256_v6, %v3948_v63  ;;  %v3953_v44 = vor.u32 %v4254_v38, %v3950_v41  ;;  %v3945_v63 = vor.u32 %v4253_v13, %v3942_v16  ;;  %v3934_v13 = vld [vmem:[%s6095_s6 + $0x58] sm:$0xf0] }
  0xff   : > { %v5491_v19 = vadd.f32 %v1771_v1, %v1743_v0  ;;  %v1717_v28 = vadd.f32 %v1716_v8, %v1688_v32  ;;  %1918 = vmatmul.bf16.gmra.mxu0 %v4964_v18  ;;  %1947 = vmatmul.bf16.gmra.mxu1 %v4975_v22 }
 0x100   : > { %2005 = vmatmul.bf16.gmra.mxu3 %v4982_v26  ;;  %2330 = vmatpush.bf16.msrb.mxu2 %v3949_v39 }
 0x101   : > { %1976 = vmatmul.bf16.gmra.mxu2 %v4977_v23  ;;  %2359 = vmatpush.bf16.msrb.mxu3 %v3953_v44 }
 0x102   : > { %2301 = vmatpush.bf16.msrb.mxu1 %v3945_v63 }
 0x103   : > { %v1774_v0 = vpop.f32.mrf.mxu3 }
 0x104   : > { %v1745_v43 = vpop.f32.mrf.mxu2  ;;  %v1689_v1 = vpop.f32.mrf.mxu0 }
 0x105   : > { %v1746_v57 = vadd.f32 %v1745_v43, %v1717_v28  ;;  %v1690_v50 = vadd.f32 %v1689_v1, %v5264_v21  ;;  %v1718_v3 = vpop.f32.mrf.mxu1  ;;  %v3940_v28 = vld [vmem:[%s6095_s6 + $0x60] sm:$0xf]  ;;  %v4255_v21 = vld [vmem:[%s6095_s6 + $0x6c] sm:$0xf0] }
 0x106   : > { %v3941_v6 = vor.u32 %v4255_v21, %v3940_v28 }
 0x107   : > { %v5510_v32 = vadd.f32 %v1774_v0, %v1746_v57  ;;  %v1719_v8 = vadd.f32 %v1718_v3, %v1690_v50  ;;  %v3932_v50 = vld [vmem:[%s6095_s6 + $0x48] sm:$0xf]  ;;  %v4250_v3 = vld [vmem:[%s6095_s6 + $0x4c] sm:$0xf] }
 0x108   : > { %2272 = vmatpush.bf16.msrb.mxu0 %v3941_v6  ;;  %v3937_v28 = vor.u32 %v4250_v3, %v3934_v13 }
 0x10a   : > { %2360 = vmatpush.bf16.msrb.mxu3 %v3937_v28 }
 0x10b   : > { %v1776_v41 = vpop.f32.mrf.mxu3 }
 0x10c   : > { %v1747_v38 = vpop.f32.mrf.mxu2  ;;  %v1692_v43 = vpop.f32.mrf.mxu0 }
 0x10d   : > { %v1748_v39 = vadd.f32 %v1747_v38, %v1719_v8  ;;  %v1693_v44 = vadd.f32 %v1692_v43, %v5296_v55  ;;  %v1721_v57 = vpop.f32.mrf.mxu1  ;;  %v4252_v55 = vld [vmem:[%s6095_s6 + $0x54] sm:$0xf0] }
 0x10e   : > { %v3933_v8 = vor.u32 %v4252_v55, %v3932_v50 }
 0x10f   : > { %v5525_v0 = vadd.f32 %v1776_v41, %v1748_v39  ;;  %v1722_v1 = vadd.f32 %v1721_v57, %v1693_v44  ;;  %1923 = vmatmul.bf16.gmra.mxu0 %v5032_v58  ;;  %1952 = vmatmul.bf16.gmra.mxu1 %v5034_v59  ;;  %v4249_v44 = vld [vmem:[%s6095_s6 + $0x44] sm:$0xf]  ;;  %v3926_v57 = vld [vmem:[%s6095_s6 + $0x50] sm:$0xf0] }
 0x110   : > { %2010 = vmatmul.bf16.gmra.mxu3 %v5038_v61  ;;  %2331 = vmatpush.bf16.msrb.mxu2 %v3933_v8  ;;  %v3929_v50 = vor.u32 %v4249_v44, %v3926_v57 }
 0x111   : > { %1981 = vmatmul.bf16.gmra.mxu2 %v5036_v60 }
 0x112   : > { %2302 = vmatpush.bf16.msrb.mxu1 %v3929_v50 }
 0x113   : > { %v1779_v21 = vpop.f32.mrf.mxu3 }
 0x114   : > { %v1750_v16 = vpop.f32.mrf.mxu2  ;;  %v1694_v6 = vpop.f32.mrf.mxu0 }
 0x115   : > { %v1751_v63 = vadd.f32 %v1750_v16, %v1722_v1  ;;  %v1695_v38 = vadd.f32 %v1694_v6, %v5332_v36  ;;  %v1723_v39 = vpop.f32.mrf.mxu1  ;;  %v3924_v1 = vld [vmem:[%s6095_s6 + $0x40] sm:$0xf]  ;;  %v4251_v36 = vld [vmem:[%s6095_s6 + $0x4c] sm:$0xf0] }
 0x116   : > { %v3925_v55 = vor.u32 %v4251_v36, %v3924_v1 }
 0x117   : > { %v5544_v41 = vadd.f32 %v1779_v21, %v1751_v63  ;;  %v1724_v43 = vadd.f32 %v1723_v39, %v1695_v38  ;;  %v3916_v38 = vld [vmem:[%s6095_s6 + $0x28] sm:$0xf]  ;;  %v4246_v39 = vld [vmem:[%s6095_s6 + $0x2c] sm:$0xf] }
 0x118   : > { %2273 = vmatpush.bf16.msrb.mxu0 %v3925_v55 }
 0x119   : > { %6101 = vst [vmem:[#allocation2_spill] sm:$0xff] %v5544_v41 }
 0x11b   : > { %v1781_v13 = vpop.f32.mrf.mxu3 }
 0x11c   : > { %v1752_v3 = vpop.f32.mrf.mxu2  ;;  %v1793_v16 = vpop.f32.mrf.mxu0 }
 0x11d   : > { %v1753_v8 = vadd.f32 %v1752_v3, %v1724_v43  ;;  %v1794_v28 = vadd.f32 %v1793_v16, %v5094_v31  ;;  %v1822_v63 = vpop.f32.mrf.mxu1  ;;  %v4248_v31 = vld [vmem:[%s6095_s6 + $0x34] sm:$0xf0]  ;;  %v4245_v3 = vld [vmem:[%s6095_s6 + $0x24] sm:$0xf] }
 0x11e   : > { %v3917_v43 = vor.u32 %v4248_v31, %v3916_v38 }
 0x11f   : > { %v5559_v21 = vadd.f32 %v1781_v13, %v1753_v8  ;;  %v1823_v6 = vadd.f32 %v1822_v63, %v1794_v28  ;;  %2024 = vmatmul.bf16.vlgmr.msra.gmra.mxu0 %v4834_v9  ;;  %2053 = vmatmul.bf16.vlgmr.msra.gmra.mxu1 %v4836_v10  ;;  %v3918_v9 = vld [vmem:[%s6095_s6 + $0x38] sm:$0xf0]  ;;  %v3910_v8 = vld [vmem:[%s6095_s6 + $0x30] sm:$0xf0]  ;;  %v3908_v13 = vld [vmem:[%s6095_s6 + $0x20] sm:$0xf] }
 0x120   : > { %2111 = vmatmul.bf16.vlgmr.msra.gmra.mxu3 %v4840_v12  ;;  %2332 = vmatpush.bf16.msrb.mxu2 %v3917_v43  ;;  %v3913_v16 = vor.u32 %v4245_v3, %v3910_v8 }
 0x121   : > { %2082 = vmatmul.bf16.vlgmr.msra.gmra.mxu2 %v4838_v11  ;;  %v3921_v11 = vor.u32 %v4246_v39, %v3918_v9 }
 0x122   : > { %2303 = vmatpush.bf16.msrb.mxu1 %v3913_v16  ;;  %v3894_v16 = vld [vmem:[%s6095_s6 + $0x10] sm:$0xf0] }
 0x123   : > { %v1880_v44 = vpop.f32.mrf.mxu3  ;;  %2361 = vmatpush.bf16.msrb.mxu3 %v3921_v11  ;;  %v3900_v11 = vld [vmem:[%s6095_s6 + $0x8] sm:$0xf] }
 0x124   : > { %v1851_v10 = vpop.f32.mrf.mxu2  ;;  %v1795_v57 = vpop.f32.mrf.mxu0 }
 0x125   : > { %v1852_v12 = vadd.f32 %v1851_v10, %v1823_v6  ;;  %v1796_v1 = vadd.f32 %v1795_v57, %v5130_v51  ;;  %v1824_v50 = vpop.f32.mrf.mxu1  ;;  %v4247_v51 = vld [vmem:[%s6095_s6 + $0x2c] sm:$0xf0] }
 0x126   : > { %v3909_v28 = vor.u32 %v4247_v51, %v3908_v13  ;;  %v4241_v13 = vld [vmem:[%s6095_s6 + $0x4] sm:$0xf]  ;;  %v3892_v51 = vld [vmem:[%s6095_s6] sm:$0xf] }
 0x127   : > { %v5578_v36 = vadd.f32 %v1880_v44, %v1852_v12  ;;  %v1825_v55 = vadd.f32 %v1824_v50, %v1796_v1  ;;  %v4242_v12 = vld [vmem:[%s6095_s6 + $0xc] sm:$0xf] }
 0x128   : > { %2274 = vmatpush.bf16.msrb.mxu0 %v3909_v28  ;;  %v3897_v28 = vor.u32 %v4241_v13, %v3894_v16  ;;  %v4036_v13 = vld [vmem:[%s6096_s7 + $0x60] sm:$0xf] }
 0x12a   : > { %2304 = vmatpush.bf16.msrb.mxu1 %v3897_v28 }
 0x12b   : > { %v1882_v38 = vpop.f32.mrf.mxu3 }
 0x12c   : > { %v1853_v63 = vpop.f32.mrf.mxu2  ;;  %v1798_v31 = vpop.f32.mrf.mxu0 }
 0x12d   : > { %v1854_v6 = vadd.f32 %v1853_v63, %v1825_v55  ;;  %v1799_v39 = vadd.f32 %v1798_v31, %v5162_v7  ;;  %v1827_v43 = vpop.f32.mrf.mxu1  ;;  %v4244_v7 = vld [vmem:[%s6095_s6 + $0x14] sm:$0xf0] }
 0x12e   : > { %v3901_v44 = vor.u32 %v4244_v7, %v3900_v11 }
 0x12f   : > { %v5593_v9 = vadd.f32 %v1882_v38, %v1854_v6  ;;  %v1828_v10 = vadd.f32 %v1827_v43, %v1799_v39  ;;  %2029 = vmatmul.bf16.gmra.mxu0 %v4902_v45  ;;  %2058 = vmatmul.bf16.gmra.mxu1 %v4904_v46  ;;  %v3902_v45 = vld [vmem:[%s6095_s6 + $0x18] sm:$0xf0] }
 0x130   : > { %2116 = vmatmul.bf16.gmra.mxu3 %v4908_v48  ;;  %2333 = vmatpush.bf16.msrb.mxu2 %v3901_v44  ;;  %v4274_v44 = vld [vmem:[%s6096_s7 + $0x6c] sm:$0xf] }
 0x131   : > { %2087 = vmatmul.bf16.gmra.mxu2 %v4906_v47  ;;  %v3905_v47 = vor.u32 %v4242_v12, %v3902_v45  ;;  %v4044_v12 = vld [vmem:[%s6096_s7 + $0x68] sm:$0xf] }
 0x133   : > { %v1885_v57 = vpop.f32.mrf.mxu3  ;;  %2362 = vmatpush.bf16.msrb.mxu3 %v3905_v47 }
 0x134   : > { %v1856_v46 = vpop.f32.mrf.mxu2  ;;  %v1800_v1 = vpop.f32.mrf.mxu0 }
 0x135   : > { %v1857_v48 = vadd.f32 %v1856_v46, %v1828_v10  ;;  %v1801_v50 = vadd.f32 %v1800_v1, %v5198_v33  ;;  %v1829_v55 = vpop.f32.mrf.mxu1  ;;  %v4243_v33 = vld [vmem:[%s6095_s6 + $0xc] sm:$0xf0] }
 0x136   : > { %v3893_v63 = vor.u32 %v4243_v33, %v3892_v51 }
 0x137   : > { %v5612_v3 = vadd.f32 %v1885_v57, %v1857_v48  ;;  %v1830_v8 = vadd.f32 %v1829_v55, %v1801_v50  ;;  %v4273_v55 = vld [vmem:[%s6096_s7 + $0x64] sm:$0xf] }
 0x138   : > { %2275 = vmatpush.bf16.msrb.mxu0 %v3893_v63 }
 0x13b   : > { %v1887_v31 = vpop.f32.mrf.mxu3 }
 0x13c   : > { %v1858_v6 = vpop.f32.mrf.mxu2  ;;  %v1803_v39 = vpop.f32.mrf.mxu0 }
 0x13d   : > { %v1859_v38 = vadd.f32 %v1858_v6, %v1830_v8  ;;  %v1804_v43 = vadd.f32 %v1803_v39, %v5242_v2  ;;  %v1832_v10 = vpop.f32.mrf.mxu1  ;;  %v4276_v2 = vld [vmem:[%s6096_s7 + $0x74] sm:$0xf0]  ;;  %v4038_v8 = vld [vmem:[%s6096_s7 + $0x70] sm:$0xf0] }
 0x13e   : > { %v4045_v45 = vor.u32 %v4276_v2, %v4044_v12  ;;  %v4041_v16 = vor.u32 %v4273_v55, %v4038_v8  ;;  %v4237_v55 = vld [vmem:[%s5695_s16] sm:$0xff] }
 0x13f   : > { %v5627_v11 = vadd.f32 %v1887_v31, %v1859_v38  ;;  %v1833_v7 = vadd.f32 %v1832_v10, %v1804_v43  ;;  %2034 = vmatmul.bf16.gmra.mxu0 %v4964_v18  ;;  %2063 = vmatmul.bf16.gmra.mxu1 %v4975_v22  ;;  %v4046_v18 = vld [vmem:[%s6096_s7 + $0x78] sm:$0xf0]  ;;  %v4028_v10 = vld [vmem:[%s6096_s7 + $0x48] sm:$0xf] }
 0x140   : > { %2121 = vmatmul.bf16.gmra.mxu3 %v4982_v26  ;;  %2614 = vmatpush.bf16.msra.mxu2 %v4045_v45 }
 0x141   : > { %2092 = vmatmul.bf16.gmra.mxu2 %v4977_v23  ;;  %v4049_v23 = vor.u32 %v4274_v44, %v4046_v18  ;;  %2585 = vmatpush.bf16.msra.mxu1 %v4041_v16 }
 0x143   : > { %v1890_v46 = vpop.f32.mrf.mxu3  ;;  %2643 = vmatpush.bf16.msra.mxu3 %v4049_v23 }
 0x144   : > { %v1861_v22 = vpop.f32.mrf.mxu2  ;;  %v1805_v47 = vpop.f32.mrf.mxu0 }
 0x145   : > { %v1862_v26 = vadd.f32 %v1861_v22, %v1833_v7  ;;  %v1806_v48 = vadd.f32 %v1805_v47, %v5266_v24  ;;  %v1834_v57 = vpop.f32.mrf.mxu1  ;;  %v4275_v24 = vld [vmem:[%s6096_s7 + $0x6c] sm:$0xf0]  ;;  %v4270_v7 = vld [vmem:[%s6096_s7 + $0x4c] sm:$0xf]  ;;  %v4020_v47 = vld [vmem:[%s6096_s7 + $0x40] sm:$0xf] }
 0x146   : > { %v4037_v51 = vor.u32 %v4275_v24, %v4036_v13 }
 0x147   : > { %v5646_v1 = vadd.f32 %v1890_v46, %v1862_v26  ;;  %v1835_v50 = vadd.f32 %v1834_v57, %v1806_v48  ;;  %v4269_v26 = vld [vmem:[%s6096_s7 + $0x44] sm:$0xf]  ;;  %v4022_v46 = vld [vmem:[%s6096_s7 + $0x50] sm:$0xf0]  ;;  %v4271_v48 = vld [vmem:[%s6096_s7 + $0x4c] sm:$0xf0] }
 0x148   : > { %2556 = vmatpush.bf16.msra.mxu0 %v4037_v51  ;;  %v4021_v57 = vor.u32 %v4271_v48, %v4020_v47 }
 0x14b   : > { %v1892_v63 = vpop.f32.mrf.mxu3 }
 0x14c   : > { %v1863_v28 = vpop.f32.mrf.mxu2  ;;  %v1808_v6 = vpop.f32.mrf.mxu0  ;;  %2557 = vmatpush.bf16.msra.mxu0 %v4021_v57 }
 0x14d   : > { %v1864_v33 = vadd.f32 %v1863_v28, %v1835_v50  ;;  %v1809_v38 = vadd.f32 %v1808_v6, %v5298_v56  ;;  %v1837_v31 = vpop.f32.mrf.mxu1  ;;  %v4272_v56 = vld [vmem:[%s6096_s7 + $0x54] sm:$0xf0]  ;;  %v4266_v6 = vld [vmem:[%s6096_s7 + $0x2c] sm:$0xf] }
 0x14e   : > { %v4029_v12 = vor.u32 %v4272_v56, %v4028_v10 }
 0x14f   : > { %v5661_v39 = vadd.f32 %v1892_v63, %v1864_v33  ;;  %v1838_v43 = vadd.f32 %v1837_v31, %v1809_v38  ;;  %2039 = vmatmul.bf16.gmra.mxu0 %v5032_v58  ;;  %2068 = vmatmul.bf16.gmra.mxu1 %v5034_v59  ;;  %v4030_v58 = vld [vmem:[%s6096_s7 + $0x58] sm:$0xf0]  ;;  %v4012_v63 = vld [vmem:[%s6096_s7 + $0x28] sm:$0xf] }
 0x150   : > { %2126 = vmatmul.bf16.gmra.mxu3 %v5038_v61  ;;  %2615 = vmatpush.bf16.msra.mxu2 %v4029_v12  ;;  %v4014_v31 = vld [vmem:[%s6096_s7 + $0x38] sm:$0xf0] }
 0x151   : > { %2097 = vmatmul.bf16.gmra.mxu2 %v5036_v60  ;;  %v4033_v60 = vor.u32 %v4270_v7, %v4030_v58  ;;  %v4017_v10 = vor.u32 %v4266_v6, %v4014_v31 }
 0x153   : > { %v1895_v2 = vpop.f32.mrf.mxu3  ;;  %2644 = vmatpush.bf16.msra.mxu3 %v4033_v60 }
 0x154   : > { %v1866_v59 = vpop.f32.mrf.mxu2  ;;  %v1810_v44 = vpop.f32.mrf.mxu0 }
 0x155   : > { %v1867_v61 = vadd.f32 %v1866_v59, %v1838_v43  ;;  %v1811_v45 = vadd.f32 %v1810_v44, %v5334_v37  ;;  %v1839_v18 = vpop.f32.mrf.mxu1  ;;  %v4025_v37 = vor.u32 %v4269_v26, %v4022_v46  ;;  %v4006_v44 = vld [vmem:[%s6096_s7 + $0x30] sm:$0xf0]  ;;  %v4238_v46 = vld [vmem:[%s5695_s16 + $0x8] sm:$0xff] }
 0x157   : > { %v5680_v22 = vadd.f32 %v1895_v2, %v1867_v61  ;;  %v1840_v23 = vadd.f32 %v1839_v18, %v1811_v45  ;;  %2586 = vmatpush.bf16.msra.mxu1 %v4025_v37  ;;  %2645 = vmatpush.bf16.msra.mxu3 %v4017_v10  ;;  %v4265_v2 = vld [vmem:[%s6096_s7 + $0x24] sm:$0xf]  ;;  %v4004_v45 = vld [vmem:[%s6096_s7 + $0x20] sm:$0xf] }
 0x158   : > { %v4009_v18 = vor.u32 %v4265_v2, %v4006_v44  ;;  %v4239_v44 = vld [vmem:[%s5695_s16 + $0x10] sm:$0xff] }
 0x159   : > { %6102 = vst [vmem:[#allocation3_spill] sm:$0xff] %v5680_v22 }
 0x15b   : > { %v1897_v13 = vpop.f32.mrf.mxu3  ;;  %2587 = vmatpush.bf16.msra.mxu1 %v4009_v18 }
 0x15c   : > { %v1868_v50 = vpop.f32.mrf.mxu2  ;;  %v1909_v16 = vpop.f32.mrf.mxu0 }
 0x15d   : > { %v1869_v8 = vadd.f32 %v1868_v50, %v1840_v23  ;;  %v1910_v24 = vadd.f32 %v1909_v16, %v5124_v42  ;;  %v1938_v51 = vpop.f32.mrf.mxu1  ;;  %v4268_v42 = vld [vmem:[%s6096_s7 + $0x34] sm:$0xf0]  ;;  %v4262_v16 = vld [vmem:[%s6096_s7 + $0xc] sm:$0xf] }
 0x15e   : > { %v4013_v38 = vor.u32 %v4268_v42, %v4012_v63 }
 0x15f   : > { %v5702_v28 = vadd.f32 %v1897_v13, %v1869_v8  ;;  %v1939_v33 = vadd.f32 %v1938_v51, %v1910_v24  ;;  %3954 = vmatmul.msk.bf16.vlgmr.msrb.gmra.mxu0 %vm819_vm0, %v4237_v55  ;;  %3958 = vmatmul.msk.bf16.vlgmr.msrb.gmra.mxu1 %vm819_vm0, %v4237_v55  ;;  %v3996_v13 = vld [vmem:[%s6096_s7 + $0x8] sm:$0xf]  ;;  %v3998_v51 = vld [vmem:[%s6096_s7 + $0x18] sm:$0xf0] }
 0x160   : > { %3966 = vmatmul.msk.bf16.vlgmr.msrb.gmra.mxu3 %vm819_vm0, %v4237_v55  ;;  %2616 = vmatpush.bf16.msra.mxu2 %v4013_v38  ;;  %v4001_v63 = vor.u32 %v4262_v16, %v3998_v51 }
 0x161   : > { %3962 = vmatmul.msk.bf16.vlgmr.msrb.gmra.mxu2 %vm819_vm0, %v4237_v55 }
 0x162   : > { %2646 = vmatpush.bf16.msra.mxu3 %v4001_v63 }
 0x163   : > { %v1996_v7 = vpop.f32.mrf.mxu3 }
 0x164   : > { %v1967_v43 = vpop.f32.mrf.mxu2  ;;  %v1911_v12 = vpop.f32.mrf.mxu0 }
 0x165   : > { %v1968_v56 = vadd.f32 %v1967_v43, %v1939_v33  ;;  %v1912_v58 = vadd.f32 %v1911_v12, %v5156_v4  ;;  %v1940_v59 = vpop.f32.mrf.mxu1  ;;  %v4267_v4 = vld [vmem:[%s6096_s7 + $0x2c] sm:$0xf0]  ;;  %v3990_v12 = vld [vmem:[%s6096_s7 + $0x10] sm:$0xf0] }
 0x166   : > { %v4005_v23 = vor.u32 %v4267_v4, %v4004_v45 }
 0x167   : > { %v5721_v60 = vadd.f32 %v1996_v7, %v1968_v56  ;;  %v1941_v61 = vadd.f32 %v1940_v59, %v1912_v58  ;;  %v4261_v7 = vld [vmem:[%s6096_s7 + $0x4] sm:$0xf]  ;;  %v3988_v58 = vld [vmem:[%s6096_s7] sm:$0xf] }
 0x168   : > { %2558 = vmatpush.bf16.msra.mxu0 %v4005_v23  ;;  %v3993_v59 = vor.u32 %v4261_v7, %v3990_v12 }
 0x16a   : > { %2588 = vmatpush.bf16.msra.mxu1 %v3993_v59 }
 0x16b   : > { %v1998_v37 = vpop.f32.mrf.mxu3 }
 0x16c   : > { %v1969_v26 = vpop.f32.mrf.mxu2  ;;  %v1914_v48 = vpop.f32.mrf.mxu0 }
 0x16d   : > { %v1970_v47 = vadd.f32 %v1969_v26, %v1941_v61  ;;  %v1915_v57 = vadd.f32 %v1914_v48, %v5192_v25  ;;  %v1943_v50 = vpop.f32.mrf.mxu1  ;;  %v4264_v25 = vld [vmem:[%s6096_s7 + $0x14] sm:$0xf0] }
 0x16e   : > { %v3997_v24 = vor.u32 %v4264_v25, %v3996_v13 }
 0x16f   : > { %v5737_v55 = vadd.f32 %v1998_v37, %v1970_v47  ;;  %v1944_v8 = vadd.f32 %v1943_v50, %v1915_v57  ;;  %3955 = vmatmul.msk.bf16.gmra.mxu0 %vm819_vm0, %v4238_v46  ;;  %3959 = vmatmul.msk.bf16.gmra.mxu1 %vm819_vm0, %v4238_v46 }
 0x170   : > { %3967 = vmatmul.msk.bf16.gmra.mxu3 %vm819_vm0, %v4238_v46  ;;  %2617 = vmatpush.bf16.msra.mxu2 %v3997_v24  ;;  %v4240_v24 = vld [vmem:[%s5695_s16 + $0x18] sm:$0xff] }
 0x171   : > { %3963 = vmatmul.msk.bf16.gmra.mxu2 %vm819_vm0, %v4238_v46 }
 0x173   : > { %v2001_v6 = vpop.f32.mrf.mxu3 }
 0x174   : > { %v1972_v33 = vpop.f32.mrf.mxu2  ;;  %v1916_v38 = vpop.f32.mrf.mxu0 }
 0x175   : > { %v1973_v42 = vadd.f32 %v1972_v33, %v1944_v8  ;;  %v1917_v31 = vadd.f32 %v1916_v38, %v5224_v54  ;;  %v1945_v43 = vpop.f32.mrf.mxu1  ;;  %v4263_v54 = vld [vmem:[%s6096_s7 + $0xc] sm:$0xf0] }
 0x176   : > { %v3989_v61 = vor.u32 %v4263_v54, %v3988_v58 }
 0x177   : > { %v5756_v10 = vadd.f32 %v2001_v6, %v1973_v42  ;;  %v1946_v56 = vadd.f32 %v1945_v43, %v1917_v31 }
 0x178   : > { %2559 = vmatpush.bf16.msra.mxu0 %v3989_v61  ;;  %v4257_v61 = vld [vmem:[%s5796_s15] sm:$0xff] }
 0x17b   : > { %v2003_v18 = vpop.f32.mrf.mxu3 }
 0x17c   : > { %v1974_v2 = vpop.f32.mrf.mxu2  ;;  %v1919_v4 = vpop.f32.mrf.mxu0 }
 0x17d   : > { %v1975_v45 = vadd.f32 %v1974_v2, %v1946_v56  ;;  %v1920_v23 = vadd.f32 %v1919_v4, %v5260_v17  ;;  %v1948_v26 = vpop.f32.mrf.mxu1 }
 0x17f   : > { %v5772_v46 = vadd.f32 %v2003_v18, %v1975_v45  ;;  %v1949_v47 = vadd.f32 %v1948_v26, %v1920_v23  ;;  %3956 = vmatmul.msk.bf16.gmra.mxu0 %vm819_vm0, %v4239_v44  ;;  %3960 = vmatmul.msk.bf16.gmra.mxu1 %vm819_vm0, %v4239_v44 }
 0x180   : > { %3968 = vmatmul.msk.bf16.gmra.mxu3 %vm819_vm0, %v4239_v44 }
 0x181   : > { %3964 = vmatmul.msk.bf16.gmra.mxu2 %vm819_vm0, %v4239_v44 }
 0x183   : > { %v2006_v57 = vpop.f32.mrf.mxu3 }
 0x184   : > { %v1977_v37 = vpop.f32.mrf.mxu2  ;;  %v1921_v50 = vpop.f32.mrf.mxu0 }
 0x185   : > { %v1978_v48 = vadd.f32 %v1977_v37, %v1949_v47  ;;  %v1922_v8 = vadd.f32 %v1921_v50, %v5292_v52  ;;  %v1950_v17 = vpop.f32.mrf.mxu1 }
 0x187   : > { %v5779_v13 = vadd.f32 %v2006_v57, %v1978_v48  ;;  %v1951_v25 = vadd.f32 %v1950_v17, %v1922_v8 }
 0x18b   : > { %v2008_v33 = vpop.f32.mrf.mxu3 }
 0x18c   : > { %v1979_v16 = vpop.f32.mrf.mxu2  ;;  %v1924_v63 = vpop.f32.mrf.mxu0 }
 0x18d   : > { %v1980_v51 = vadd.f32 %v1979_v16, %v1951_v25  ;;  %v1925_v42 = vadd.f32 %v1924_v63, %v5328_v27  ;;  %v1953_v6 = vpop.f32.mrf.mxu1  ;;  %v4258_v25 = vld [vmem:[%s5796_s15 + $0x8] sm:$0xff] }
 0x18f   : > { %v5783_v38 = vadd.f32 %v2008_v33, %v1980_v51  ;;  %v1954_v31 = vadd.f32 %v1953_v6, %v1925_v42  ;;  %3957 = vmatmul.msk.bf16.gmra.mxu0 %vm819_vm0, %v4240_v24  ;;  %3961 = vmatmul.msk.bf16.gmra.mxu1 %vm819_vm0, %v4240_v24 }
 0x190   : > { %3969 = vmatmul.msk.bf16.gmra.mxu3 %vm819_vm0, %v4240_v24 }
 0x191   : > { %3965 = vmatmul.msk.bf16.gmra.mxu2 %vm819_vm0, %v4240_v24 }
 0x193   : > { %v2011_v56 = vpop.f32.mrf.mxu3 }
 0x194   : > { %v1982_v52 = vpop.f32.mrf.mxu2  ;;  %v1926_v7 = vpop.f32.mrf.mxu0 }
 0x195   : > { %v1983_v43 = vadd.f32 %v1982_v52, %v1954_v31  ;;  %v1927_v12 = vadd.f32 %v1926_v7, %v5360_v14  ;;  %v1955_v27 = vpop.f32.mrf.mxu1 }
 0x197   : > { %v5790_v58 = vadd.f32 %v2011_v56, %v1983_v43  ;;  %v1956_v59 = vadd.f32 %v1955_v27, %v1927_v12 }
 0x199   : > { %6103 = vst [vmem:[#allocation4_spill] sm:$0xff] %v5790_v58 }
 0x19b   : > { %v2013_v44 = vpop.f32.mrf.mxu3 }
 0x19c   : > { %v1984_v54 = vpop.f32.mrf.mxu2  ;;  %v2025_v45 = vpop.f32.mrf.mxu0 }
 0x19d   : > { %v1985_v2 = vadd.f32 %v1984_v54, %v1956_v59  ;;  %v2026_v18 = vadd.f32 %v2025_v45, %v5126_v49  ;;  %v2054_v4 = vpop.f32.mrf.mxu1  ;;  %v4259_v59 = vld [vmem:[%s5796_s15 + $0x10] sm:$0xff] }
 0x19f   : > { %v5800_v14 = vadd.f32 %v2013_v44, %v1985_v2  ;;  %v2055_v23 = vadd.f32 %v2054_v4, %v2026_v18  ;;  %4050 = vmatmul.msk.bf16.vlgmr.msra.gmra.mxu0 %vm819_vm0, %v4257_v61  ;;  %4054 = vmatmul.msk.bf16.vlgmr.msra.gmra.mxu1 %vm819_vm0, %v4257_v61 }
 0x1a0   : > { %4062 = vmatmul.msk.bf16.vlgmr.msra.gmra.mxu3 %vm819_vm0, %v4257_v61 }
 0x1a1   : > { %6104 = vst [vmem:[#allocation5_spill] sm:$0xff] %v5800_v14  ;;  %4058 = vmatmul.msk.bf16.vlgmr.msra.gmra.mxu2 %vm819_vm0, %v4257_v61  ;;  %v2742_v14 = vld [vmem:[%s6098_s9] sm:$0xf] }
 0x1a2   : > { %v5912_v22 = vperm.slane %v2742_v14, 1 }
 0x1a3   : > { %v2112_v37 = vpop.f32.mrf.mxu3 }
 0x1a4   : > { %v2083_v26 = vpop.f32.mrf.mxu2  ;;  %v2027_v48 = vpop.f32.mrf.mxu0 }
 0x1a5   : > { %v2084_v47 = vadd.f32 %v2083_v26, %v2055_v23  ;;  %v2028_v57 = vadd.f32 %v2027_v48, %v5158_v5  ;;  %v2056_v49 = vpop.f32.mrf.mxu1 }
 0x1a7   : > { %v5807_v50 = vadd.f32 %v2112_v37, %v2084_v47  ;;  %v2057_v8 = vadd.f32 %v2056_v49, %v2028_v57 }
 0x1ab   : > { %v2114_v24 = vpop.f32.mrf.mxu3 }
 0x1ac   : > { %v2085_v17 = vpop.f32.mrf.mxu2  ;;  %v2030_v51 = vpop.f32.mrf.mxu0 }
 0x1ad   : > { %v2086_v16 = vadd.f32 %v2085_v17, %v2057_v8  ;;  %v2031_v33 = vadd.f32 %v2030_v51, %v5194_v29  ;;  %v2059_v63 = vpop.f32.mrf.mxu1  ;;  %v4260_v8 = vld [vmem:[%s5796_s15 + $0x18] sm:$0xff] }
 0x1af   : > { %v5811_v42 = vadd.f32 %v2114_v24, %v2086_v16  ;;  %v2060_v6 = vadd.f32 %v2059_v63, %v2031_v33  ;;  %4051 = vmatmul.msk.bf16.gmra.mxu0 %vm819_vm0, %v4258_v25  ;;  %4055 = vmatmul.msk.bf16.gmra.mxu1 %vm819_vm0, %v4258_v25 }
 0x1b0   : > { %4063 = vmatmul.msk.bf16.gmra.mxu3 %vm819_vm0, %v4258_v25 }
 0x1b1   : > { %4059 = vmatmul.msk.bf16.gmra.mxu2 %vm819_vm0, %v4258_v25 }
 0x1b3   : > { %v2117_v52 = vpop.f32.mrf.mxu3 }
 0x1b4   : > { %v2088_v5 = vpop.f32.mrf.mxu2  ;;  %v2032_v43 = vpop.f32.mrf.mxu0 }
 0x1b5   : > { %v2089_v31 = vadd.f32 %v2088_v5, %v2060_v6  ;;  %v2033_v56 = vadd.f32 %v2032_v43, %v5235_v62  ;;  %v2061_v29 = vpop.f32.mrf.mxu1 }
 0x1b7   : > { %v5818_v7 = vadd.f32 %v2117_v52, %v2089_v31  ;;  %v2062_v12 = vadd.f32 %v2061_v29, %v2033_v56 }
 0x1bb   : > { %v2119_v61 = vpop.f32.mrf.mxu3 }
 0x1bc   : > { %v2090_v27 = vpop.f32.mrf.mxu2  ;;  %v2035_v2 = vpop.f32.mrf.mxu0 }
 0x1bd   : > { %v2091_v54 = vadd.f32 %v2090_v27, %v2062_v12  ;;  %v2036_v44 = vadd.f32 %v2035_v2, %v5262_v20  ;;  %v2064_v45 = vpop.f32.mrf.mxu1 }
 0x1bf   : > { %v5822_v18 = vadd.f32 %v2119_v61, %v2091_v54  ;;  %v2065_v4 = vadd.f32 %v2064_v45, %v2036_v44  ;;  %4052 = vmatmul.msk.bf16.gmra.mxu0 %vm819_vm0, %v4259_v59  ;;  %4056 = vmatmul.msk.bf16.gmra.mxu1 %vm819_vm0, %v4259_v59 }
 0x1c0   : > { %4064 = vmatmul.msk.bf16.gmra.mxu3 %vm819_vm0, %v4259_v59 }
 0x1c1   : > { %4060 = vmatmul.msk.bf16.gmra.mxu2 %vm819_vm0, %v4259_v59 }
 0x1c3   : > { %v2122_v26 = vpop.f32.mrf.mxu3 }
 0x1c4   : > { %v2093_v62 = vpop.f32.mrf.mxu2  ;;  %v2037_v47 = vpop.f32.mrf.mxu0 }
 0x1c5   : > { %v2094_v23 = vadd.f32 %v2093_v62, %v2065_v4  ;;  %v2038_v37 = vadd.f32 %v2037_v47, %v5294_v53  ;;  %v2066_v20 = vpop.f32.mrf.mxu1 }
 0x1c7   : > { %v5829_v48 = vadd.f32 %v2122_v26, %v2094_v23  ;;  %v2067_v57 = vadd.f32 %v2066_v20, %v2038_v37 }
 0x1cb   : > { %v2124_v25 = vpop.f32.mrf.mxu3 }
 0x1cc   : > { %v2095_v49 = vpop.f32.mrf.mxu2  ;;  %v2040_v16 = vpop.f32.mrf.mxu0 }
 0x1cd   : > { %v2096_v17 = vadd.f32 %v2095_v49, %v2067_v57  ;;  %v2041_v24 = vadd.f32 %v2040_v16, %v5330_v35  ;;  %v2069_v51 = vpop.f32.mrf.mxu1 }
 0x1cf   : > { %v5833_v33 = vadd.f32 %v2124_v25, %v2096_v17  ;;  %v2070_v63 = vadd.f32 %v2069_v51, %v2041_v24  ;;  %4053 = vmatmul.msk.bf16.gmra.mxu0 %vm819_vm0, %v4260_v8  ;;  %4057 = vmatmul.msk.bf16.gmra.mxu1 %vm819_vm0, %v4260_v8 }
 0x1d0   : > { %4065 = vmatmul.msk.bf16.gmra.mxu3 %vm819_vm0, %v4260_v8 }
 0x1d1   : > { %4061 = vmatmul.msk.bf16.gmra.mxu2 %vm819_vm0, %v4260_v8 }
 0x1d3   : > { %v2127_v5 = vpop.f32.mrf.mxu3 }
 0x1d4   : > { %v2098_v53 = vpop.f32.mrf.mxu2  ;;  %v2042_v31 = vpop.f32.mrf.mxu0 }
 0x1d5   : > { %v2099_v6 = vadd.f32 %v2098_v53, %v2070_v63  ;;  %v2043_v52 = vadd.f32 %v2042_v31, %v5362_v15  ;;  %v2071_v43 = vpop.f32.mrf.mxu1 }
 0x1d7   : > { %v5840_v35 = vadd.f32 %v2127_v5, %v2099_v6  ;;  %v2072_v56 = vadd.f32 %v2071_v43, %v2043_v52 }
 0x1d9   : > { %6105 = vst [vmem:[#allocation6_spill] sm:$0xff] %v5840_v35 }
 0x1db   : > { %v2129_v27 = vpop.f32.mrf.mxu3 }
 0x1dc   : > { %v2100_v29 = vpop.f32.mrf.mxu2  ;;  %v2277_v59 = vpop.f32.mrf.mxu0 }
 0x1dd   : > { %v2101_v12 = vadd.f32 %v2100_v29, %v2072_v56  ;;  %v2306_v54 = vpop.f32.mrf.mxu1  ;;  %v2384_v35 = vadd.f32 %v2277_v59, %v5394_v40 }
 0x1df   : > { %v5842_v61 = vadd.f32 %v2129_v27, %v2101_v12 }
 0x1e1   : > { %6106 = vst [vmem:[#allocation7_spill] sm:$0xff] %v5842_v61  ;;  %v2700_v61 = vld [vmem:[%s6097_s8] sm:$0xf] }
 0x1e3   : > { %v2364_v44 = vpop.f32.mrf.mxu3 }
 0x1e4   : > { %v2335_v2 = vpop.f32.mrf.mxu2  ;;  %v2279_v45 = vpop.f32.mrf.mxu0 }
 0x1e5   : > { %v2308_v4 = vpop.f32.mrf.mxu1 }
 0x1eb   : > { %v5846_v23 = vpop.f32.mrf.mxu3 }
 0x1ec   : > { %v5844_v62 = vpop.f32.mrf.mxu2  ;;  %v5848_v15 = vpop.f32.mrf.mxu0 }
 0x1ed   : > { %v5850_v26 = vpop.f32.mrf.mxu1 }
 0x1f3   : > { %v5854_v37 = vpop.f32.mrf.mxu3 }
 0x1f4   : > { %v5852_v47 = vpop.f32.mrf.mxu2  ;;  %v5856_v20 = vpop.f32.mrf.mxu0 }
 0x1f5   : > { %v5858_v57 = vpop.f32.mrf.mxu1 }
 0x1fb   : > { %v5862_v8 = vpop.f32.mrf.mxu3 }
 0x1fc   : > { %v5860_v49 = vpop.f32.mrf.mxu2  ;;  %v5864_v17 = vpop.f32.mrf.mxu0 }
 0x1fd   : > { %v5866_v25 = vpop.f32.mrf.mxu1 }
 0x203   : > { %v5870_v24 = vpop.f32.mrf.mxu3 }
 0x204   : > { %v5868_v16 = vpop.f32.mrf.mxu2  ;;  %v5872_v51 = vpop.f32.mrf.mxu0 }
 0x205   : > { %v5874_v63 = vpop.f32.mrf.mxu1 }
 0x20b   : > { %v5878_v6 = vpop.f32.mrf.mxu3 }
 0x20c   : > { %v5876_v53 = vpop.f32.mrf.mxu2  ;;  %6107 = vst [vmem:[#allocation8_spill] sm:$0xff] %v5878_v6  ;;  %v5880_v5 = vpop.f32.mrf.mxu0  ;;  %v5926_v6 = vperm.slane %v2742_v14, 2 }
 0x20d   : > { %6108 = vst [vmem:[#allocation9_spill] sm:$0xff] %v5880_v5  ;;  %v5882_v31 = vpop.f32.mrf.mxu1  ;;  %v5923_v5 = vperm.slane %v2700_v61, 3 }
 0x20e   : > { %6109 = vst [vmem:[#allocation10_spill] sm:$0xff] %v5882_v31 }
 0x213   : > { %v5886_v43 = vpop.f32.mrf.mxu3 }
 0x214   : > { %v5884_v52 = vpop.f32.mrf.mxu2  ;;  %6111 = vst [vmem:[#allocation12_spill] sm:$0xff] %v5886_v43  ;;  %v2294_v56 = vpop.f32.mrf.mxu0  ;;  %v5903_v43 = vperm.slane %v2700_v61, 0 }
 0x215   : > { %6110 = vst [vmem:[#allocation11_spill] sm:$0xff] %v5884_v52  ;;  %v5889_v29 = vadd.f32 %v2294_v56, %v5559_v21  ;;  %v2323_v12 = vpop.f32.mrf.mxu1  ;;  %v2385_v21 = vadd.f32 %v2306_v54, %v5578_v36  ;;  %v2386_v36 = vadd.f32 %v2335_v2, %v5721_v60 }
 0x216   : > { %v5892_v27 = vadd.f32 %v2323_v12, %v5702_v28  ;;  %v5908_v12 = vperm.slane %v2700_v61, 1 }
 0x217   : > { %6112 = vst [vmem:[#allocation13_spill] sm:$0xff] %v5889_v29  ;;  %v5910_v29 = vperm.slane %v2742_v14, 0 }
 0x218   : > { %6113 = vst [vmem:[#allocation14_spill] sm:$0xff] %v5892_v27 }
 0x21b   : > { %v5906_v56 = vpop.f32.mrf.mxu3 }
 0x21c   : > { %v5901_v52 = vpop.f32.mrf.mxu2  ;;  %6115 = vst [vmem:[#allocation16_spill] sm:$0xff] %v5906_v56  ;;  %v2561_v28 = vpop.f32.mrf.mxu0  ;;  %v5919_v56 = vperm.slane %v2700_v61, 2 }
 0x21d   : > { %6114 = vst [vmem:[#allocation15_spill] sm:$0xff] %v5901_v52  ;;  %v2668_v27 = vadd.f32 %v2561_v28, %v2384_v35  ;;  %v2590_v58 = vpop.f32.mrf.mxu1  ;;  %v2387_v35 = vadd.f32 %v2364_v44, %v5807_v50  ;;  %v2388_v28 = vadd.f32 %v2279_v45, %v5421_v34  ;;  %v5935_v50 = vperm.slane %v2742_v14, 3 }
 0x21e   : > { %v2669_v31 = vadd.f32 %v2590_v58, %v2385_v21 }
 0x21f   : > { %v2710_v40 = vmul.f32 %v5903_v43, %v2668_v27  ;;  %v2389_v27 = vadd.f32 %v2308_v4, %v5593_v9 }
 0x220   : > { %v2711_v59 = vmul.f32 %v5908_v12, %v2669_v31 }
 0x221   : > { %v2752_v52 = vadd.f32 %v5910_v29, %v2710_v40 }
 0x222   : > { %v2753_v54 = vadd.f32 %v5912_v22, %v2711_v59 }
 0x223   : > { %v2784_v58 = vmax.f32 %v2752_v52, 0.0  ;;  %v2648_v40 = vpop.f32.mrf.mxu3 }
 0x224   : > { %v2619_v21 = vpop.f32.mrf.mxu2  ;;  %v2785_v31 = vmax.f32 %v2753_v54, 0.0  ;;  %v2563_v60 = vpop.f32.mrf.mxu0  ;;  %v2671_v34 = vadd.f32 %v2648_v40, %v2387_v35  ;;  %v2390_v35 = vadd.f32 %v5844_v62, %v5737_v55 }
 0x225   : > { %v2670_v41 = vadd.f32 %v2619_v21, %v2386_v36  ;;  %v2672_v61 = vadd.f32 %v2563_v60, %v2388_v28  ;;  %v2592_v2 = vpop.f32.mrf.mxu1  ;;  %v2391_v21 = vadd.f32 %v5846_v23, %v5811_v42 }
 0x226   : > { %v2816_v44 = vpack.c.bf16 %v2785_v31, %v2784_v58  ;;  %v2673_v45 = vadd.f32 %v2592_v2, %v2389_v27  ;;  %v2713_v4 = vmul.f32 %v5923_v5, %v2671_v34  ;;  %v2392_v27 = vadd.f32 %v5848_v15, %v5452_v30 }
 0x227   : > { %v2712_v9 = vmul.f32 %v5919_v56, %v2670_v41  ;;  %v2714_v52 = vmul.f32 %v5903_v43, %v2672_v61  ;;  %v2393_v61 = vadd.f32 %v5850_v26, %v5612_v3 }
 0x228   : > { %2832 = vst [vmem:[%s5933_s28] sm:$0xff] %v2816_v44  ;;  %v2715_v36 = vmul.f32 %v5908_v12, %v2673_v45  ;;  %v2755_v54 = vadd.f32 %v5935_v50, %v2713_v4 }
 0x229   : > { %v2754_v59 = vadd.f32 %v5926_v6, %v2712_v9  ;;  %v2756_v14 = vadd.f32 %v5910_v29, %v2714_v52 }
 0x22a   : > { %v2757_v41 = vadd.f32 %v5912_v22, %v2715_v36  ;;  %v2787_v40 = vmax.f32 %v2755_v54, 0.0 }
 0x22b   : > { %v2786_v28 = vmax.f32 %v2754_v59, 0.0  ;;  %v2788_v60 = vmax.f32 %v2756_v14, 0.0  ;;  %v2650_v55 = vpop.f32.mrf.mxu3 }
 0x22c   : > { %v2621_v34 = vpop.f32.mrf.mxu2  ;;  %v2789_v2 = vmax.f32 %v2757_v41, 0.0  ;;  %v2566_v62 = vpop.f32.mrf.mxu0  ;;  %v2675_v4 = vadd.f32 %v2650_v55, %v2391_v21  ;;  %v2395_v21 = vadd.f32 %v5854_v37, %v5818_v7 }
 0x22d   : > { %v2674_v44 = vadd.f32 %v2621_v34, %v2390_v35  ;;  %v2817_v9 = vpack.c.bf16 %v2787_v40, %v2786_v28  ;;  %v2923_v45 = vadd.f32 %v2788_v60, %v2784_v58  ;;  %v2676_v52 = vadd.f32 %v2566_v62, %v2392_v27  ;;  %v2595_v42 = vpop.f32.mrf.mxu1 }
 0x22e   : > { %v2818_v23 = vpack.c.bf16 %v2789_v2, %v2788_v60  ;;  %v2936_v59 = vadd.f32 %v2789_v2, %v2785_v31  ;;  %v2677_v15 = vadd.f32 %v2595_v42, %v2393_v61  ;;  %v2717_v36 = vmul.f32 %v5923_v5, %v2675_v4 }
 0x22f   : > { %v2716_v30 = vmul.f32 %v5919_v56, %v2674_v44  ;;  %2833 = vst [vmem:[%s5933_s28 + $0x8] sm:$0xff] %v2817_v9  ;;  %v2718_v3 = vmul.f32 %v5903_v43, %v2676_v52  ;;  %v2394_v31 = vadd.f32 %v5852_v47, %v5756_v10  ;;  %v2396_v27 = vadd.f32 %v5856_v20, %v5491_v19 }
 0x230   : > { %2834 = vst [vmem:[%s5933_s28 + $0x10] sm:$0xff] %v2818_v23  ;;  %v2719_v54 = vmul.f32 %v5908_v12, %v2677_v15  ;;  %v2759_v58 = vadd.f32 %v5935_v50, %v2717_v36  ;;  %v2397_v2 = vadd.f32 %v5858_v57, %v5627_v11 }
 0x231   : > { %v2758_v26 = vadd.f32 %v5926_v6, %v2716_v30  ;;  %v2760_v14 = vadd.f32 %v5910_v29, %v2718_v3  ;;  %v2399_v3 = vadd.f32 %v5862_v8, %v5822_v18 }
 0x232   : > { %v2761_v41 = vadd.f32 %v5912_v22, %v2719_v54  ;;  %v2791_v60 = vmax.f32 %v2759_v58, 0.0 }
 0x233   : > { %v2790_v35 = vmax.f32 %v2758_v26, 0.0  ;;  %v2792_v34 = vmax.f32 %v2760_v14, 0.0  ;;  %v2653_v47 = vpop.f32.mrf.mxu3  ;;  %v2400_v26 = vadd.f32 %v5864_v17, %v5510_v32 }
 0x234   : > { %v2624_v61 = vpop.f32.mrf.mxu2  ;;  %v2793_v55 = vmax.f32 %v2761_v41, 0.0  ;;  %v2568_v62 = vpop.f32.mrf.mxu0  ;;  %v2962_v4 = vadd.f32 %v2791_v60, %v2787_v40  ;;  %v2679_v7 = vadd.f32 %v2653_v47, %v2395_v21 }
 0x235   : > { %v2949_v44 = vadd.f32 %v2790_v35, %v2786_v28  ;;  %v2678_v10 = vadd.f32 %v2624_v61, %v2394_v31  ;;  %v2819_v9 = vpack.c.bf16 %v2791_v60, %v2790_v35  ;;  %v2924_v52 = vadd.f32 %v2923_v45, %v2792_v34  ;;  %v2597_v37 = vpop.f32.mrf.mxu1 }
 0x236   : > { %v2820_v42 = vpack.c.bf16 %v2793_v55, %v2792_v34  ;;  %v2937_v19 = vadd.f32 %v2936_v59, %v2793_v55  ;;  %v2680_v23 = vadd.f32 %v2568_v62, %v2396_v27  ;;  %v2721_v30 = vmul.f32 %v5923_v5, %v2679_v7 }
 0x237   : > { %v2720_v20 = vmul.f32 %v5919_v56, %v2678_v10  ;;  %2835 = vst [vmem:[%s5933_s28 + $0x18] sm:$0xff] %v2819_v9  ;;  %v2681_v11 = vadd.f32 %v2597_v37, %v2397_v2  ;;  %v2398_v45 = vadd.f32 %v5860_v49, %v5772_v46  ;;  %v2401_v31 = vadd.f32 %v5866_v25, %v5646_v1 }
 0x238   : > { %2836 = vst [vmem:[%s5933_s28 + $0x20] sm:$0xff] %v2820_v42  ;;  %v2722_v28 = vmul.f32 %v5903_v43, %v2680_v23  ;;  %v2763_v15 = vadd.f32 %v5935_v50, %v2721_v30  ;;  %v2402_v9 = vadd.f32 %v5868_v16, %v5779_v13  ;;  %v2403_v37 = vadd.f32 %v5870_v24, %v5829_v48 }
 0x239   : > { %v2762_v57 = vadd.f32 %v5926_v6, %v2720_v20  ;;  %v2723_v40 = vmul.f32 %v5908_v12, %v2681_v11  ;;  %v2404_v42 = vadd.f32 %v5872_v51, %v5525_v0 }
 0x23a   : > { %v2764_v36 = vadd.f32 %v5910_v29, %v2722_v28  ;;  %v2795_v54 = vmax.f32 %v2763_v15, 0.0 }
 0x23b   : > { %v2794_v59 = vmax.f32 %v2762_v57, 0.0  ;;  %v2765_v58 = vadd.f32 %v5912_v22, %v2723_v40  ;;  %v2655_v49 = vpop.f32.mrf.mxu3 }
 0x23c   : > { %v2626_v14 = vpop.f32.mrf.mxu2  ;;  %v2796_v41 = vmax.f32 %v2764_v36, 0.0  ;;  %v2571_v21 = vpop.f32.mrf.mxu0  ;;  %v2963_v60 = vadd.f32 %v2962_v4, %v2795_v54  ;;  %v2683_v8 = vadd.f32 %v2655_v49, %v2399_v3 }
 0x23d   : > { %v2950_v35 = vadd.f32 %v2949_v44, %v2794_v59  ;;  %v2682_v46 = vadd.f32 %v2626_v14, %v2398_v45  ;;  %v2821_v27 = vpack.c.bf16 %v2795_v54, %v2794_v59  ;;  %v2797_v18 = vmax.f32 %v2765_v58, 0.0  ;;  %v2600_v34 = vpop.f32.mrf.mxu1 }
 0x23e   : > { %v2925_v32 = vadd.f32 %v2924_v52, %v2796_v41  ;;  %v2684_v61 = vadd.f32 %v2571_v21, %v2400_v26  ;;  %v2685_v2 = vadd.f32 %v2600_v34, %v2401_v31  ;;  %v2725_v1 = vmul.f32 %v5923_v5, %v2683_v8  ;;  %v6118_v8 = vld [vmem:[#allocation9_spill] sm:$0xff] }
 0x23f   : > { %v2724_v17 = vmul.f32 %v5919_v56, %v2682_v46  ;;  %2837 = vst [vmem:[%s5933_s28 + $0x28] sm:$0xff] %v2821_v27  ;;  %v2822_v55 = vpack.c.bf16 %v2797_v18, %v2796_v41  ;;  %v2938_v10 = vadd.f32 %v2937_v19, %v2797_v18  ;;  %v2405_v19 = vadd.f32 %v5874_v63, %v5661_v39  ;;  %v6116_v41 = vld [vmem:[#allocation8_spill] sm:$0xff]  ;;  %v6117_v18 = vld [vmem:[#allocation2_spill] sm:$0xff] }
 0x240   : > { %v2726_v44 = vmul.f32 %v5903_v43, %v2684_v61  ;;  %v2727_v47 = vmul.f32 %v5908_v12, %v2685_v2  ;;  %v2767_v62 = vadd.f32 %v5935_v50, %v2725_v1  ;;  %v2406_v31 = vadd.f32 %v5876_v53, %v5783_v38 }
 0x241   : > { %v2766_v25 = vadd.f32 %v5926_v6, %v2724_v17  ;;  %2838 = vst [vmem:[%s5933_s28 + $0x30] sm:$0xff] %v2822_v55  ;;  %v2407_v46 = vadd.f32 %v6116_v41, %v5833_v33  ;;  %v2408_v34 = vadd.f32 %v6118_v8, %v6117_v18  ;;  %v6120_v17 = vld [vmem:[#allocation10_spill] sm:$0xff] }
 0x242   : > { %v2768_v52 = vadd.f32 %v5910_v29, %v2726_v44  ;;  %v2769_v7 = vadd.f32 %v5912_v22, %v2727_v47  ;;  %v2799_v20 = vmax.f32 %v2767_v62, 0.0 }
 0x243   : > { %v2798_v4 = vmax.f32 %v2766_v25, 0.0  ;;  %v2658_v57 = vpop.f32.mrf.mxu3 }
 0x244   : > { %v2629_v23 = vpop.f32.mrf.mxu2  ;;  %v2800_v11 = vmax.f32 %v2768_v52, 0.0  ;;  %v2801_v13 = vmax.f32 %v2769_v7, 0.0  ;;  %v2573_v28 = vpop.f32.mrf.mxu0  ;;  %v2964_v40 = vadd.f32 %v2963_v60, %v2799_v20  ;;  %v2687_v45 = vadd.f32 %v2658_v57, %v2403_v37 }
 0x245   : > { %v2951_v30 = vadd.f32 %v2950_v35, %v2798_v4  ;;  %v2686_v16 = vadd.f32 %v2629_v23, %v2402_v9  ;;  %v2823_v15 = vpack.c.bf16 %v2799_v20, %v2798_v4  ;;  %v2688_v48 = vadd.f32 %v2573_v28, %v2404_v42  ;;  %v2602_v24 = vpop.f32.mrf.mxu1 }
 0x246   : > { %v2926_v59 = vadd.f32 %v2925_v32, %v2800_v11  ;;  %v2824_v0 = vpack.c.bf16 %v2801_v13, %v2800_v11  ;;  %v2939_v51 = vadd.f32 %v2938_v10, %v2801_v13  ;;  %v2729_v63 = vmul.f32 %v5923_v5, %v2687_v45  ;;  %v6119_v32 = vld [vmem:[#allocation3_spill] sm:$0xff] }
 0x247   : > { %v2728_v39 = vmul.f32 %v5919_v56, %v2686_v16  ;;  %2839 = vst [vmem:[%s5933_s28 + $0x38] sm:$0xff] %v2823_v15  ;;  %v2730_v36 = vmul.f32 %v5903_v43, %v2688_v48  ;;  %v2689_v3 = vadd.f32 %v2602_v24, %v2405_v19  ;;  %v2409_v61 = vadd.f32 %v6120_v17, %v6119_v32  ;;  %v6123_v15 = vld [vmem:[#allocation4_spill] sm:$0xff]  ;;  %v6125_v48 = vld [vmem:[#allocation6_spill] sm:$0xff] }
 0x248   : > { %2840 = vst [vmem:[%s5933_s28 + $0x40] sm:$0xff] %v2824_v0  ;;  %v2771_v54 = vadd.f32 %v5935_v50, %v2729_v63  ;;  %v2979_v37 = vlaneseq  ;;  %v4326_v28 = vmov 0.0   ;;  %v6126_v24 = vld [vmem:[#allocation12_spill] sm:$0xff] }
 0x249   : > { %v2770_v26 = vadd.f32 %v5926_v6, %v2728_v39  ;;  %v2772_v58 = vadd.f32 %v5910_v29, %v2730_v36  ;;  %v2731_v14 = vmul.f32 %v5908_v12, %v2689_v3 }
 0x24a   : > { %v2803_v49 = vmax.f32 %v2771_v54, 0.0  ;;  %vm6039_vm1 = vcmp.lt.s32.totalorder %v2979_v37, 512 }
 0x24b   : > { %v2802_v35 = vmax.f32 %v2770_v26, 0.0  ;;  %v2804_v21 = vmax.f32 %v2772_v58, 0.0  ;;  %v2773_v27 = vadd.f32 %v5912_v22, %v2731_v14  ;;  %v2660_v10 = vpop.f32.mrf.mxu3  ;;  %2983 = vst.msk [vmem:[%s6032_s12] sm:$0xf] %vm6039_vm1, %v4326_v28  ;;  %v6127_v14 = vld [vmem:[#allocation13_spill] sm:$0xff] }
 0x24c   : > { %v2631_v60 = vpop.f32.mrf.mxu2  ;;  %v2576_v38 = vpop.f32.mrf.mxu0  ;;  %v2965_v1 = vadd.f32 %v2964_v40, %v2803_v49  ;;  %v2691_v62 = vadd.f32 %v2660_v10, %v2407_v46  ;;  %v6124_v40 = vld [vmem:[#allocation11_spill] sm:$0xff] }
 0x24d   : > { %v2952_v2 = vadd.f32 %v2951_v30, %v2802_v35  ;;  %v2690_v55 = vadd.f32 %v2631_v60, %v2406_v31  ;;  %v2825_v53 = vpack.c.bf16 %v2803_v49, %v2802_v35  ;;  %v2927_v33 = vadd.f32 %v2926_v59, %v2804_v21  ;;  %v2605_v44 = vpop.f32.mrf.mxu1  ;;  %v6130_v10 = vld [vmem:[#allocation15_spill] sm:$0xff] }
 0x24e   : > { %v2805_v25 = vmax.f32 %v2773_v27, 0.0  ;;  %v2692_v9 = vadd.f32 %v2576_v38, %v2408_v34  ;;  %v2693_v4 = vadd.f32 %v2605_v44, %v2409_v61  ;;  %v2733_v19 = vmul.f32 %v5923_v5, %v2691_v62  ;;  %v6128_v34 = vld [vmem:[#allocation14_spill] sm:$0xff]  ;;  %v6131_v44 = vld [vmem:[#allocation7_spill] sm:$0xff] }
 0x24f   : > { %v2732_v47 = vmul.f32 %v5919_v56, %v2690_v55  ;;  %2841 = vst [vmem:[%s5933_s28 + $0x48] sm:$0xff] %v2825_v53  ;;  %v2410_v45 = vadd.f32 %v6124_v40, %v6123_v15  ;;  %v2411_v59 = vadd.f32 %v6126_v24, %v6125_v48  ;;  %v6129_v55 = vld [vmem:[#allocation5_spill] sm:$0xff] }
 0x250   : > { %v2826_v52 = vpack.c.bf16 %v2805_v25, %v2804_v21  ;;  %v2940_v7 = vadd.f32 %v2939_v51, %v2805_v25  ;;  %v2734_v20 = vmul.f32 %v5903_v43, %v2692_v9  ;;  %v2735_v23 = vmul.f32 %v5908_v12, %v2693_v4 }
 0x251   : > { %v2774_v42 = vadd.f32 %v5926_v6, %v2732_v47  ;;  %v2775_v13 = vadd.f32 %v5935_v50, %v2733_v19  ;;  %v2414_v38 = vadd.f32 %v6130_v10, %v6129_v55  ;;  %v6132_v47 = vld [vmem:[#allocation16_spill] sm:$0xff] }
 0x252   : > { %2842 = vst [vmem:[%s5933_s28 + $0x50] sm:$0xff] %v2826_v52  ;;  %v2776_v16 = vadd.f32 %v5910_v29, %v2734_v20  ;;  %v2777_v57 = vadd.f32 %v5912_v22, %v2735_v23  ;;  %v2415_v62 = vadd.f32 %v6132_v47, %v6131_v44 }
 0x253   : > { %v2806_v11 = vmax.f32 %v2774_v42, 0.0  ;;  %v2807_v39 = vmax.f32 %v2775_v13, 0.0  ;;  %v2663_v3 = vpop.f32.mrf.mxu3 }
 0x254   : > { %v2634_v0 = vpop.f32.mrf.mxu2  ;;  %v2808_v63 = vmax.f32 %v2776_v16, 0.0  ;;  %v2809_v36 = vmax.f32 %v2777_v57, 0.0  ;;  %v2578_v26 = vpop.f32.mrf.mxu0  ;;  %v2695_v58 = vadd.f32 %v2663_v3, %v2411_v59 }
 0x255   : > { %v2953_v51 = vadd.f32 %v2952_v2, %v2806_v11  ;;  %v2694_v54 = vadd.f32 %v2634_v0, %v2410_v45  ;;  %v2696_v31 = vadd.f32 %v2578_v26, %v6127_v14  ;;  %v2607_v35 = vpop.f32.mrf.mxu1  ;;  %v2827_v41 = vpack.c.bf16 %v2807_v39, %v2806_v11 }
 0x256   : > { %v2966_v46 = vadd.f32 %v2965_v1, %v2807_v39  ;;  %v2928_v49 = vadd.f32 %v2927_v33, %v2808_v63  ;;  %v2828_v21 = vpack.c.bf16 %v2809_v36, %v2808_v63  ;;  %v2941_v27 = vadd.f32 %v2940_v7, %v2809_v36 }
 0x257   : > { %v2736_v60 = vmul.f32 %v5919_v56, %v2694_v54  ;;  %v2737_v18 = vmul.f32 %v5923_v5, %v2695_v58  ;;  %v2738_v8 = vmul.f32 %v5903_v43, %v2696_v31  ;;  %2843 = vst [vmem:[%s5933_s28 + $0x58] sm:$0xff] %v2827_v41  ;;  %v2697_v32 = vadd.f32 %v2607_v35, %v6128_v34 }
 0x258   : > { %2844 = vst [vmem:[%s5933_s28 + $0x60] sm:$0xff] %v2828_v21 }
 0x259   : > { %v2778_v17 = vadd.f32 %v5926_v6, %v2736_v60  ;;  %v2779_v61 = vadd.f32 %v5935_v50, %v2737_v18  ;;  %v2780_v2 = vadd.f32 %v5910_v29, %v2738_v8  ;;  %v2739_v53 = vmul.f32 %v5908_v12, %v2697_v32  ;;  %v2984_v32 = vld [vmem:[%s6032_s12] sm:$0xf] }
 0x25b   : > { %v2810_v1 = vmax.f32 %v2778_v17, 0.0  ;;  %v2811_v33 = vmax.f32 %v2779_v61, 0.0  ;;  %v2812_v25 = vmax.f32 %v2780_v2, 0.0  ;;  %v2781_v9 = vadd.f32 %v5912_v22, %v2739_v53  ;;  %v2665_v52 = vpop.f32.mrf.mxu3 }
 0x25c   : > { %v2636_v43 = vpop.f32.mrf.mxu2  ;;  %v2699_v20 = vadd.f32 %v2665_v52, %v2415_v62 }
 0x25d   : > { %v2698_v4 = vadd.f32 %v2636_v43, %v2414_v38  ;;  %v2954_v7 = vadd.f32 %v2953_v51, %v2810_v1  ;;  %v2829_v29 = vpack.c.bf16 %v2811_v33, %v2810_v1  ;;  %v2967_v37 = vadd.f32 %v2966_v46, %v2811_v33 }
 0x25e   : > { %v2929_v42 = vadd.f32 %v2928_v49, %v2812_v25  ;;  %v2813_v19 = vmax.f32 %v2781_v9, 0.0  ;;  %v2741_v57 = vmul.f32 %v5923_v5, %v2699_v20 }
 0x25f   : > { %v2740_v12 = vmul.f32 %v5919_v56, %v2698_v4  ;;  %2845 = vst [vmem:[%s5933_s28 + $0x68] sm:$0xff] %v2829_v29 }
 0x260   : > { %v2930_v23 = vrot.slane %v2929_v42, 4  ;;  %v2830_v11 = vpack.c.bf16 %v2813_v19, %v2812_v25  ;;  %v2942_v13 = vadd.f32 %v2941_v27, %v2813_v19  ;;  %v2783_v40 = vadd.f32 %v5935_v50, %v2741_v57 }
 0x261   : > { %v2782_v16 = vadd.f32 %v5926_v6, %v2740_v12 }
 0x262   : > { %v2931_v22 = vadd.f32 %v2930_v23, %v2929_v42  ;;  %2846 = vst [vmem:[%s5933_s28 + $0x70] sm:$0xff] %v2830_v11  ;;  %v2943_v28 = vrot.slane %v2942_v13, 4  ;;  %v2815_v56 = vmax.f32 %v2783_v40, 0.0 }
 0x263   : > { %v2814_v15 = vmax.f32 %v2782_v16, 0.0 }
 0x264   : > { %v2932_v45 = vrot.slane %v2931_v22, 2  ;;  %v2944_v48 = vadd.f32 %v2943_v28, %v2942_v13  ;;  %v2968_v63 = vadd.f32 %v2967_v37, %v2815_v56 }
 0x265   : > { %v2955_v24 = vadd.f32 %v2954_v7, %v2814_v15  ;;  %v2831_v39 = vpack.c.bf16 %v2815_v56, %v2814_v15 }
 0x266   : > { %v2933_v59 = vadd.f32 %v2932_v45, %v2931_v22  ;;  %v2945_v0 = vrot.slane %v2944_v48, 2  ;;  %v2969_v5 = vrot.slane %v2968_v63, 4 }
 0x267   : > { %v2956_v51 = vrot.slane %v2955_v24, 4  ;;  %2847 = vst [vmem:[%s5933_s28 + $0x78] sm:$0xff] %v2831_v39 }
 0x268   : > { %v2946_v36 = vadd.f32 %v2945_v0, %v2944_v48  ;;  %v2934_v3 = vrot.slane %v2933_v59, 1  ;;  %v2970_v58 = vadd.f32 %v2969_v5, %v2968_v63 }
 0x269   : > { %v2957_v6 = vadd.f32 %v2956_v51, %v2955_v24 }
 0x26a   : > { %v2947_v26 = vrot.slane %v2946_v36, 1  ;;  %v2971_v31 = vrot.slane %v2970_v58, 2  ;;  %v2935_v35 = vadd.f32 %v2934_v3, %v2933_v59 }
 0x26b   : > { %v2958_v54 = vrot.slane %v2957_v6, 2 }
 0x26c   : > { %v2948_v14 = vadd.f32 %v2947_v26, %v2946_v36  ;;  %v2972_v49 = vadd.f32 %v2971_v31, %v2970_v58 }
 0x26d   : > { %v2959_v50 = vadd.f32 %v2958_v54, %v2957_v6 }
 0x26e   : > { %v2989_v41 = vrot.slane %v2948_v14, 7  ;;  %v2973_v60 = vrot.slane %v2972_v49, 1 }
 0x26f   : > { %v2960_v46 = vrot.slane %v2959_v50, 1 }
 0x270   : > { %v2993_v21 = vsel %vm2992_vm2, %v2935_v35, %v2989_v41  ;;  %v2974_v8 = vadd.f32 %v2973_v60, %v2972_v49 }
 0x271   : > { %v2961_v27 = vadd.f32 %v2960_v46, %v2959_v50 }
 0x272   : > { %v2991_v34 = vrot.slane %v2974_v8, 5 }
 0x273   : > { %v2990_v18 = vrot.slane %v2961_v27, 6 }
 0x275   : > { %v2995_v17 = vsel %vm2994_vm3, %v2990_v18, %v2991_v34 }
 0x276   : > { %v2997_v61 = vsel %vm2996_vm4, %v2993_v21, %v2995_v17 }
 0x277   : > { %v2999_v2 = vadd.f32 %v2997_v61, %v2984_v32 }
 0x279   : > { %3004 = vst.msk [vmem:[%s6032_s12] sm:$0xf] %vm6039_vm1, %v2999_v2 }
 0x27a PF: > { %s22_s19 = sadd.s32 1, %s4324_s19   ;;  %s6133_s17 = smov %s4320_s18 }
 0x27b   : > { %p19_p5 = scmp.ge.s32.totalorder %s22_s19, 4   ;;  %s6134_s18 = smov %s6136_s20 }
 0x27d   :  { %21 = sbr.rel (!%p19_p5) target bundleno = 2 (0x2), region = 115 }

</bundles_post_ra>
